<compile_context>
chip_gen: v5e
topology: v5e:2x2
jax: 0.10.0
libtpu: 0.0.40
codegen_flags: <defaults>
</compile_context>

<pallas_src>
import functools

import jax
import jax.numpy as jnp
from jax.experimental import pallas as pl
from jax.experimental.pallas import tpu as pltpu


# ----------------------------------------------------------------------------
# Device-aware budgets
# ----------------------------------------------------------------------------

def _tpu_vmem_capacity():
    try:
        return int(pltpu.get_tpu_info().vmem_capacity_bytes)
    except Exception:
        return 128 * 1024 * 1024


_VMEM_CAP = _tpu_vmem_capacity()
# Scoped limit: half of physical, capped at 64 MiB (=> 64 MiB v5e/v6e, 32 MiB v7x).
_VMEM_LIMIT = min(_VMEM_CAP // 2, 64 * 1024 * 1024)
# Row-tile target: 512 on 128-MiB-VMEM chips (v5e/v6e), 256 on 64-MiB v7x.
_TM_TARGET = 512 if _VMEM_CAP >= 96 * 1024 * 1024 else 256
# Per-kernel working-set budget that decides when to K-tile the matmul.
_TILE_BUDGET = int(0.45 * _VMEM_LIMIT)


def _round_up(x, m):
    return (x + m - 1) // m * m


def _pad_m(m):
    """Pad the matmul M axis and pick a row-tile (multiple of 8)."""
    tm = _TM_TARGET if m >= _TM_TARGET else _round_up(m, 8)
    return _round_up(m, tm), tm


def _tile_bytes(tm, tk, tn, with_res):
    # bf16 A/B/out(/residual) double-buffered + f32 accumulator scratch.
    byt = 2 * 2 * (tm * tk + tk * tn)      # A, B
    byt += 2 * 2 * tm * tn                 # out
    if with_res:
        byt += 2 * 2 * tm * tn             # residual
    byt += 4 * tm * tn                     # f32 accumulator (K-tiled case)
    return byt


def _pick_tk(kdim, tm, tn, with_res):
    """Largest K-tile (a 128-multiple divisor of kdim) fitting the VMEM budget."""
    if _tile_bytes(tm, kdim, tn, with_res) <= _TILE_BUDGET:
        return kdim
    units = kdim // 128                    # kdim is always a multiple of 128
    for d in range(units - 1, 0, -1):
        if units % d == 0 and _tile_bytes(tm, d * 128, tn, with_res) <= _TILE_BUDGET:
            return d * 128
    return 128


# ----------------------------------------------------------------------------
# Pallas kernels
# ----------------------------------------------------------------------------

def _epilogue(acc, s, c, r, relu, out_dtype):
    """f32 folded-BN (+residual) (+ReLU) epilogue, cast to bf16 on the store."""
    acc = acc * s + c
    if r is not None:
        acc = acc + r.astype(jnp.float32)
    if relu:
        acc = jnp.maximum(acc, 0.0)
    return acc.astype(out_dtype)


def _mm_kernel(a_ref, b_ref, s_ref, c_ref, o_ref, *, relu):
    acc = jnp.dot(a_ref[...], b_ref[...], preferred_element_type=jnp.float32)
    o_ref[...] = _epilogue(acc, s_ref[...], c_ref[...], None, relu, o_ref.dtype)


def _mm_res_kernel(a_ref, b_ref, s_ref, c_ref, r_ref, o_ref, *, relu):
    acc = jnp.dot(a_ref[...], b_ref[...], preferred_element_type=jnp.float32)
    o_ref[...] = _epilogue(acc, s_ref[...], c_ref[...], r_ref[...], relu, o_ref.dtype)


def _mm_kernel_kt(a_ref, b_ref, s_ref, c_ref, o_ref, acc_ref, *, relu):
    @pl.when(pl.program_id(2) == 0)
    def _():
        acc_ref[...] = jnp.zeros_like(acc_ref)

    acc_ref[...] += jnp.dot(a_ref[...], b_ref[...],
                            preferred_element_type=jnp.float32)

    @pl.when(pl.program_id(2) == pl.num_programs(2) - 1)
    def _():
        o_ref[...] = _epilogue(acc_ref[...], s_ref[...], c_ref[...],
                               None, relu, o_ref.dtype)


def _mm_res_kernel_kt(a_ref, b_ref, s_ref, c_ref, r_ref, o_ref, acc_ref, *, relu):
    @pl.when(pl.program_id(2) == 0)
    def _():
        acc_ref[...] = jnp.zeros_like(acc_ref)

    acc_ref[...] += jnp.dot(a_ref[...], b_ref[...],
                            preferred_element_type=jnp.float32)

    @pl.when(pl.program_id(2) == pl.num_programs(2) - 1)
    def _():
        o_ref[...] = _epilogue(acc_ref[...], s_ref[...], c_ref[...],
                               r_ref[...], relu, o_ref.dtype)


def _maxpool_kernel(p_ref, o_ref):
    """p_ref: (KK, tm, C) bf16 patches with the window axis leading."""
    o_ref[...] = jnp.max(p_ref[...], axis=0)


def _head_kernel(f_ref, w_ref, b_ref, o_ref):
    """Global average pool + Linear + Sigmoid, fused.  f_ref: (tb, S, Cp) bf16."""
    pooled = jnp.mean(f_ref[...].astype(jnp.float32), axis=1)   # (tb, Cp) f32
    logits = jnp.dot(pooled, w_ref[...], preferred_element_type=jnp.float32)
    logits = logits + b_ref[...]
    o_ref[...] = 1.0 / (1.0 + jnp.exp(-logits))


# ----------------------------------------------------------------------------
# Cached pallas_call builders (one build per unique shape signature)
# ----------------------------------------------------------------------------

@functools.lru_cache(maxsize=None)
def _get_mm(mp, kdim, coutp, tm, tn, tk, relu, with_res, m_major):
    """Fused conv-as-matmul: out = relu?((A@B)*scale + bias [+res]), bf16 store."""
    grid_mn = (mp // tm, coutp // tn) if m_major else (coutp // tn, mp // tm)

    def mi(idx):
        return idx[0] if m_major else idx[1]

    def nj(idx):
        return idx[1] if m_major else idx[0]

    if tk == kdim:
        grid = grid_mn
        a_map = lambda *idx: (mi(idx), 0)
        b_map = lambda *idx: (0, nj(idx))
        v_map = lambda *idx: (0, nj(idx))
        o_map = lambda *idx: (mi(idx), nj(idx))
        kern = functools.partial(_mm_res_kernel if with_res else _mm_kernel,
                                 relu=relu)
        scratch = []
        semantics = ("parallel", "parallel")
        a_block, b_block = (tm, kdim), (kdim, tn)
    else:
        grid = grid_mn + (kdim // tk,)
        a_map = lambda *idx: (mi(idx), idx[2])
        b_map = lambda *idx: (idx[2], nj(idx))
        v_map = lambda *idx: (0, nj(idx))
        o_map = lambda *idx: (mi(idx), nj(idx))
        kern = functools.partial(_mm_res_kernel_kt if with_res else _mm_kernel_kt,
                                 relu=relu)
        scratch = [pltpu.VMEM((tm, tn), jnp.float32)]
        semantics = ("parallel", "parallel", "arbitrary")
        a_block, b_block = (tm, tk), (tk, tn)

    in_specs = [
        pl.BlockSpec(a_block, a_map),        # A tile (bf16)
        pl.BlockSpec(b_block, b_map),        # B tile (bf16 weights)
        pl.BlockSpec((1, tn), v_map),        # BN scale (f32)
        pl.BlockSpec((1, tn), v_map),        # BN bias  (f32)
    ]
    if with_res:
        in_specs.append(pl.BlockSpec((tm, tn), o_map))   # residual (bf16)

    return pl.pallas_call(
        kern,
        out_shape=jax.ShapeDtypeStruct((mp, coutp), jnp.bfloat16),
        grid=grid,
        in_specs=in_specs,
        out_specs=pl.BlockSpec((tm, tn), o_map),
        scratch_shapes=scratch,
        compiler_params=pltpu.CompilerParams(
            dimension_semantics=semantics,
            vmem_limit_bytes=_VMEM_LIMIT),
    )


@functools.lru_cache(maxsize=None)
def _get_maxpool(mp, kk, c, tm):
    return pl.pallas_call(
        _maxpool_kernel,
        out_shape=jax.ShapeDtypeStruct((mp, c), jnp.bfloat16),
        grid=(mp // tm,),
        in_specs=[pl.BlockSpec((kk, tm, c), lambda i: (0, i, 0))],
        out_specs=pl.BlockSpec((tm, c), lambda i: (i, 0)),
        compiler_params=pltpu.CompilerParams(
            dimension_semantics=("parallel",),
            vmem_limit_bytes=_VMEM_LIMIT),
    )


@functools.lru_cache(maxsize=None)
def _get_head(npad, tb, s, cp, lp):
    return pl.pallas_call(
        _head_kernel,
        out_shape=jax.ShapeDtypeStruct((npad, lp), jnp.float32),
        grid=(npad // tb,),
        in_specs=[
            pl.BlockSpec((tb, s, cp), lambda i: (i, 0, 0)),
            pl.BlockSpec((cp, lp), lambda i: (0, 0)),
            pl.BlockSpec((1, lp), lambda i: (0, 0)),
        ],
        out_specs=pl.BlockSpec((tb, lp), lambda i: (i, 0)),
        compiler_params=pltpu.CompilerParams(
            dimension_semantics=("parallel",),
            vmem_limit_bytes=_VMEM_LIMIT),
    )


# ----------------------------------------------------------------------------
# Glue: im2col patch extraction (layout plumbing only; fused under one jit)
# ----------------------------------------------------------------------------

def _extract_patches(x, kh, kw, stride, pad, pad_value=0.0, tap_axis=3):
    """x: NHWC -> patches stacked along `tap_axis` over the kh*kw window."""
    n, h, w, c = x.shape
    if pad:
        x = jnp.pad(x, ((0, 0), (pad, pad), (pad, pad), (0, 0)),
                    constant_values=pad_value)
    ho = (h + 2 * pad - kh) // stride + 1
    wo = (w + 2 * pad - kw) // stride + 1
    cols = []
    for i in range(kh):
        for j in range(kw):
            cols.append(x[:, i:i + stride * ho:stride,
                          j:j + stride * wo:stride, :])
    return jnp.stack(cols, axis=tap_axis), ho, wo


# ----------------------------------------------------------------------------
# Layer wrappers (traced inside the single jit)
# ----------------------------------------------------------------------------

def conv_bn(x, arrs, k, stride, pad, relu, residual=None):
    """Conv2d (no bias) + folded BatchNorm + optional ReLU/residual.  x: NHWC bf16."""
    n, h, w, cin = x.shape
    w2d, scale, bias = arrs["w2d"], arrs["scale"], arrs["bias"]
    kdim, coutp = w2d.shape

    if k == 1:
        xs = x[:, ::stride, ::stride, :] if stride > 1 else x
        ho, wo = xs.shape[1], xs.shape[2]
        a = xs.reshape(n * ho * wo, cin)
    else:
        # TODO(synk): an in-kernel shifted-window tap reduction would avoid
        # materializing the KxK-expanded patches in HBM; kept as bf16 XLA-side
        # im2col (fused under the single jit) for now.
        patches, ho, wo = _extract_patches(x, k, k, stride, pad, 0.0, tap_axis=3)
        a = patches.reshape(n * ho * wo, k * k * cin)

    m = n * ho * wo
    mp, tm = _pad_m(m)
    tn = 256 if coutp % 256 == 0 else 128
    # Pad rows to the M tile and columns up to the (lane-padded) contraction dim
    # (only the 7x7 stem needs K padding: 147 -> 256).
    a = jnp.pad(a, ((0, mp - m), (0, kdim - a.shape[1])))

    m_tiles, n_tiles = mp // tm, coutp // tn
    m_major = m_tiles >= n_tiles          # larger axis leads -> both TCs busy
    tk = _pick_tk(kdim, tm, tn, residual is not None)
    call = _get_mm(mp, kdim, coutp, tm, tn, tk, bool(relu),
                   residual is not None, m_major)

    if residual is None:
        out = call(a, w2d, scale, bias)
    else:
        r = residual.reshape(m, coutp)
        if mp != m:
            r = jnp.pad(r, ((0, mp - m), (0, 0)))
        out = call(a, w2d, scale, bias, r)
    return out[:m].reshape(n, ho, wo, coutp)


def maxpool_3x3_s2(x):
    # TODO(synk): could be expressed as a shifted-window grid reduction to skip
    # the 9x patch materialization; minor at these spatial sizes.
    n, h, w, c = x.shape
    patches, ho, wo = _extract_patches(x, 3, 3, 2, 1, float("-inf"), tap_axis=0)
    kk = 9
    m = n * ho * wo
    p = patches.reshape(kk, m, c)
    tm = 256 if m >= 256 else _round_up(m, 8)
    mp = _round_up(m, tm)
    if mp != m:
        p = jnp.pad(p, ((0, 0), (0, mp - m), (0, 0)),
                    constant_values=float("-inf"))
    out = _get_maxpool(mp, kk, c, tm)(p)
    return out[:m].reshape(n, ho, wo, c)


def bottleneck(x, blk_arrs, blk_meta):
    s = blk_meta["stride"]
    out = conv_bn(x, blk_arrs["conv1"], k=1, stride=1, pad=0, relu=True)
    # TODO(synk): pysaresnet50's PSA attention replaces this 3x3 conv; spec unavailable.
    out = conv_bn(out, blk_arrs["conv2"], k=3, stride=s, pad=1, relu=True)
    if blk_meta["has_down"]:
        identity = conv_bn(x, blk_arrs["down"], k=1, stride=s, pad=0, relu=False)
    else:
        identity = x
    # conv3 + BN + residual add + ReLU fused into one kernel epilogue.
    return conv_bn(out, blk_arrs["conv3"], k=1, stride=1, pad=0, relu=True,
                   residual=identity)


def head(x, fc_w, fc_b, n_labels):
    n, hh, ww, cp = x.shape
    s = hh * ww
    f = x.reshape(n, s, cp)
    tb = 8 if n >= 8 else n
    npad = _round_up(n, tb)
    if npad != n:
        f = jnp.pad(f, ((0, npad - n), (0, 0), (0, 0)))
    lp = fc_w.shape[1]
    out = _get_head(npad, tb, s, cp, lp)(f, fc_w, fc_b)
    return out[:n, :n_labels]


def make_forward(meta):
    """Build a single-jit forward over the prepared (array-only) params."""

    @jax.jit
    def forward(arrs, x_nchw):
        # Accept NCHW (PyTorch convention); run NHWC + bf16 internally.
        x = jnp.transpose(x_nchw, (0, 2, 3, 1)).astype(jnp.bfloat16)
        x = conv_bn(x, arrs["stem"], k=7, stride=2, pad=3, relu=True)
        x = maxpool_3x3_s2(x)
        for layer_arrs, layer_meta in zip(arrs["layers"], meta["layers"]):
            for blk_arrs, blk_meta in zip(layer_arrs, layer_meta):
                x = bottleneck(x, blk_arrs, blk_meta)
        return head(x, arrs["fc_w"], arrs["fc_b"], meta["n_labels"])

    return forward


# ----------------------------------------------------------------------------
# Deterministic synthetic parameter initialization (raw, PyTorch-like layout)
# ----------------------------------------------------------------------------

def _make_conv_bn(key, cin, cout, k):
    k1, k2, k3, k4, k5 = jax.random.split(key, 5)
    fan_in = cin * k * k
    w = jax.random.normal(k1, (cout, cin, k, k), jnp.float32) * (2.0 / fan_in) ** 0.5
    gamma = 1.0 + 0.1 * jax.random.normal(k2, (cout,), jnp.float32)
    beta = 0.1 * jax.random.normal(k3, (cout,), jnp.float32)
    mean = 0.1 * jax.random.normal(k4, (cout,), jnp.float32)
    var = jnp.abs(1.0 + 0.1 * jax.random.normal(k5, (cout,), jnp.float32))
    scale = gamma / jnp.sqrt(var + 1e-5)          # inference-folded BatchNorm
    bias = beta - mean * scale
    return {"w": w, "scale": scale, "bias": bias}


def init_params(key, n_labels=14, base=8):
    """ResNet-50 topology ([3,4,6,3] bottlenecks, expansion 4) at reduced width."""
    keys = iter(jax.random.split(key, 256))
    params = {"stem": _make_conv_bn(next(keys), 3, base, 7)}
    layers = []
    in_c = base
    cfg = [(base, 3, 1), (2 * base, 4, 2), (4 * base, 6, 2), (8 * base, 3, 2)]
    for width, nblocks, stride in cfg:
        blocks = []
        for bi in range(nblocks):
            s = stride if bi == 0 else 1
            out_c = width * 4
            blk = {
                "conv1": _make_conv_bn(next(keys), in_c, width, 1),
                "conv2": _make_conv_bn(next(keys), width, width, 3),
                "conv3": _make_conv_bn(next(keys), width, out_c, 1),
                "stride": s,
            }
            if s != 1 or in_c != out_c:
                blk["down"] = _make_conv_bn(next(keys), in_c, out_c, 1)
            blocks.append(blk)
            in_c = out_c
        layers.append(blocks)
    params["layers"] = layers

    num_ftrs = in_c  # fc.in_features of the backbone
    kw_, kb_ = jax.random.split(next(keys))
    bound = 1.0 / (num_ftrs ** 0.5)
    params["fc_w"] = jax.random.uniform(
        kw_, (num_ftrs, n_labels), jnp.float32, minval=-bound, maxval=bound)
    params["fc_b"] = jax.random.uniform(
        kb_, (n_labels,), jnp.float32, minval=-bound, maxval=bound)
    return params


# ----------------------------------------------------------------------------
# Kernel-ready parameter prep: lane-pad channels to x128, flatten, cast to bf16.
# Padded output lanes carry zero scale/bias, so padded channels stay exactly 0
# through the residual path and the head pooling.
# ----------------------------------------------------------------------------

def _prep_conv(p, pad_cin=True):
    cout, cin, kh, kw = p["w"].shape
    cinp = _round_up(cin, 128) if pad_cin else cin
    coutp = _round_up(cout, 128)
    w = jnp.transpose(p["w"], (2, 3, 1, 0))                 # (kh, kw, cin, cout)
    w = jnp.pad(w, ((0, 0), (0, 0), (0, cinp - cin), (0, coutp - cout)))
    w2d = w.reshape(kh * kw * cinp, coutp)
    kdim = w2d.shape[0]
    kdimp = _round_up(kdim, 128)                            # stem: 147 -> 256
    if kdimp != kdim:
        w2d = jnp.pad(w2d, ((0, kdimp - kdim), (0, 0)))
    w2d = w2d.astype(jnp.bfloat16)
    scale = jnp.pad(p["scale"], (0, coutp - cout)).reshape(1, coutp)
    bias = jnp.pad(p["bias"], (0, coutp - cout)).reshape(1, coutp)
    return {"w2d": w2d, "scale": scale, "bias": bias}


def prepare_params(raw):
    arrs = {"stem": _prep_conv(raw["stem"], pad_cin=False)}
    meta = {"layers": [], "n_labels": int(raw["fc_w"].shape[1])}
    arr_layers = []
    for blocks in raw["layers"]:
        a_blocks, m_blocks = [], []
        for blk in blocks:
            a = {"conv1": _prep_conv(blk["conv1"]),
                 "conv2": _prep_conv(blk["conv2"]),
                 "conv3": _prep_conv(blk["conv3"])}
            if "down" in blk:
                a["down"] = _prep_conv(blk["down"])
            a_blocks.append(a)
            m_blocks.append({"stride": int(blk["stride"]),
                             "has_down": "down" in blk})
        arr_layers.append(a_blocks)
        meta["layers"].append(m_blocks)
    arrs["layers"] = arr_layers

    num_ftrs, n_labels = raw["fc_w"].shape
    cp = _round_up(num_ftrs, 128)
    lp = _round_up(n_labels, 128)
    arrs["fc_w"] = jnp.pad(raw["fc_w"], ((0, cp - num_ftrs), (0, lp - n_labels)))
    arrs["fc_b"] = jnp.pad(raw["fc_b"], (0, lp - n_labels)).reshape(1, lp)
    return arrs, meta


# ----------------------------------------------------------------------------
# Main
# ----------------------------------------------------------------------------

if __name__ == "__main__":
    N_LABELS = 14
    key = jax.random.PRNGKey(0)
    pkey, xkey = jax.random.split(key)

    raw_params = init_params(pkey, n_labels=N_LABELS, base=8)
    arrs, meta = prepare_params(raw_params)
    forward = make_forward(meta)

    # Small input consistent with the module: NCHW image batch.
    x = jax.random.normal(xkey, (2, 3, 32, 32), jnp.float32)

    out = jax.block_until_ready(forward(arrs, x))

    assert out.shape == (2, N_LABELS), out.shape
    assert bool(jnp.all((out >= 0.0) & (out <= 1.0)))  # sigmoid range
    print("KERNEL_OK")
</pallas_src>

<mosaic_0001>
module attributes {stable_mosaic.version = 11 : i64} {
  func.func @_mm_kernel(%arg0: i32, %arg1: i32, %arg2: memref<512x256xbf16, #tpu.memory_space<vmem>>, %arg3: memref<256x128xbf16, #tpu.memory_space<vmem>>, %arg4: memref<1x128xf32, #tpu.memory_space<vmem>>, %arg5: memref<1x128xf32, #tpu.memory_space<vmem>>, %arg6: memref<512x128xbf16, #tpu.memory_space<vmem>>) attributes {dimension_semantics = [#tpu.dimension_semantics<parallel>, #tpu.dimension_semantics<parallel>], iteration_bounds = array<i64: 1, 1>, scalar_prefetch = 0 : i64, scratch_operands = 0 : i64, tpu.core_type = #tpu.core_type<tc>, window_params = [{transform_indices = @transform_0, window_bounds = array<i64: 512, 256>}, {transform_indices = @transform_1, window_bounds = array<i64: 256, 128>}, {transform_indices = @transform_2, window_bounds = array<i64: 1, 128>}, {transform_indices = @transform_3, window_bounds = array<i64: 1, 128>}, {transform_indices = @transform_4, window_bounds = array<i64: 512, 128>}]} {
    %c0 = arith.constant 0 : index
    %c0_0 = arith.constant 0 : index
    %0 = vector.load %arg2[%c0, %c0_0] : memref<512x256xbf16, #tpu.memory_space<vmem>>, vector<512x256xbf16>
    %c0_1 = arith.constant 0 : index
    %c0_2 = arith.constant 0 : index
    %1 = vector.load %arg3[%c0_1, %c0_2] : memref<256x128xbf16, #tpu.memory_space<vmem>>, vector<256x128xbf16>
    %cst = arith.constant dense<0.000000e+00> : vector<512x128xf32>
    %2 = tpu.matmul %0, %1, %cst {dimension_numbers = #tpu.dot_dimension_numbers<[1], [0], [0], [1], [0, 0, 1, 1], [], []>} : vector<512x256xbf16>, vector<256x128xbf16>, vector<512x128xf32> -> vector<512x128xf32>
    %c0_3 = arith.constant 0 : index
    %c0_4 = arith.constant 0 : index
    %3 = vector.load %arg4[%c0_3, %c0_4] : memref<1x128xf32, #tpu.memory_space<vmem>>, vector<1x128xf32>
    %c0_5 = arith.constant 0 : index
    %c0_6 = arith.constant 0 : index
    %4 = vector.load %arg5[%c0_5, %c0_6] : memref<1x128xf32, #tpu.memory_space<vmem>>, vector<1x128xf32>
    %5 = vector.broadcast %3 : vector<1x128xf32> to vector<512x128xf32>
    %6 = arith.mulf %2, %5 : vector<512x128xf32>
    %7 = vector.broadcast %4 : vector<1x128xf32> to vector<512x128xf32>
    %8 = arith.addf %6, %7 : vector<512x128xf32>
    %cst_7 = arith.constant 0.000000e+00 : f32
    %9 = vector.broadcast %cst_7 : f32 to vector<512x128xf32>
    %10 = arith.maximumf %8, %9 : vector<512x128xf32>
    %11 = arith.truncf %10 : vector<512x128xf32> to vector<512x128xbf16>
    %c0_8 = arith.constant 0 : index
    %c0_9 = arith.constant 0 : index
    %12 = vector.load %arg6[%c0_8, %c0_9] : memref<512x128xbf16, #tpu.memory_space<vmem>>, vector<512x128xbf16>
    tpu.vector_store %arg6[%c0_8, %c0_9], %11 {strides = array<i32>} : memref<512x128xbf16, #tpu.memory_space<vmem>>, vector<512x128xbf16>,
    return
  }
  func.func @transform_0(%arg0: i32, %arg1: i32) -> (i32, i32) {
    %c0_i32 = arith.constant 0 : i32
    %c0_i32_0 = arith.constant 0 : i32
    return %arg0, %c0_i32 : i32, i32
  }
  func.func @transform_1(%arg0: i32, %arg1: i32) -> (i32, i32) {
    %c0_i32 = arith.constant 0 : i32
    %c0_i32_0 = arith.constant 0 : i32
    return %c0_i32, %arg1 : i32, i32
  }
  func.func @transform_2(%arg0: i32, %arg1: i32) -> (i32, i32) {
    %c0_i32 = arith.constant 0 : i32
    %c0_i32_0 = arith.constant 0 : i32
    return %c0_i32, %arg1 : i32, i32
  }
  func.func @transform_3(%arg0: i32, %arg1: i32) -> (i32, i32) {
    %c0_i32 = arith.constant 0 : i32
    %c0_i32_0 = arith.constant 0 : i32
    return %c0_i32, %arg1 : i32, i32
  }
  func.func @transform_4(%arg0: i32, %arg1: i32) -> (i32, i32) {
    %c0_i32 = arith.constant 0 : i32
    return %arg0, %arg1 : i32, i32
  }
}

module attributes {stable_mosaic.version = 11 : i64} {
  func.func @_maxpool_kernel(%arg0: i32, %arg1: memref<9x128x128xbf16, #tpu.memory_space<vmem>>, %arg2: memref<128x128xbf16, #tpu.memory_space<vmem>>) attributes {dimension_semantics = [#tpu.dimension_semantics<parallel>], iteration_bounds = array<i64: 1>, scalar_prefetch = 0 : i64, scratch_operands = 0 : i64, tpu.core_type = #tpu.core_type<tc>, window_params = [{transform_indices = @transform_0, window_bounds = array<i64: 9, 128, 128>}, {transform_indices = @transform_1, window_bounds = array<i64: 128, 128>}]} {
    %c0 = arith.constant 0 : index
    %c0_0 = arith.constant 0 : index
    %c0_1 = arith.constant 0 : index
    %0 = vector.load %arg1[%c0, %c0_0, %c0_1] : memref<9x128x128xbf16, #tpu.memory_space<vmem>>, vector<9x128x128xbf16>
    %cst = arith.constant dense<0xFF80> : vector<128x128xbf16>
    %1 = vector.multi_reduction <maximumf>, %0, %cst [0] : vector<9x128x128xbf16> to vector<128x128xbf16>
    %c0_2 = arith.constant 0 : index
    %c0_3 = arith.constant 0 : index
    %2 = vector.load %arg2[%c0_2, %c0_3] : memref<128x128xbf16, #tpu.memory_space<vmem>>, vector<128x128xbf16>
    tpu.vector_store %arg2[%c0_2, %c0_3], %1 {strides = array<i32>} : memref<128x128xbf16, #tpu.memory_space<vmem>>, vector<128x128xbf16>,
    return
  }
  func.func @transform_0(%arg0: i32) -> (i32, i32, i32) {
    %c0_i32 = arith.constant 0 : i32
    %c0_i32_0 = arith.constant 0 : i32
    %c0_i32_1 = arith.constant 0 : i32
    return %c0_i32, %arg0, %c0_i32_0 : i32, i32, i32
  }
  func.func @transform_1(%arg0: i32) -> (i32, i32) {
    %c0_i32 = arith.constant 0 : i32
    %c0_i32_0 = arith.constant 0 : i32
    return %arg0, %c0_i32 : i32, i32
  }
}

module attributes {stable_mosaic.version = 11 : i64} {
  func.func @_mm_kernel(%arg0: i32, %arg1: i32, %arg2: memref<128x128xbf16, #tpu.memory_space<vmem>>, %arg3: memref<128x128xbf16, #tpu.memory_space<vmem>>, %arg4: memref<1x128xf32, #tpu.memory_space<vmem>>, %arg5: memref<1x128xf32, #tpu.memory_space<vmem>>, %arg6: memref<128x128xbf16, #tpu.memory_space<vmem>>) attributes {dimension_semantics = [#tpu.dimension_semantics<parallel>, #tpu.dimension_semantics<parallel>], iteration_bounds = array<i64: 1, 1>, scalar_prefetch = 0 : i64, scratch_operands = 0 : i64, tpu.core_type = #tpu.core_type<tc>, window_params = [{transform_indices = @transform_0, window_bounds = array<i64: 128, 128>}, {transform_indices = @transform_1, window_bounds = array<i64: 128, 128>}, {transform_indices = @transform_2, window_bounds = array<i64: 1, 128>}, {transform_indices = @transform_3, window_bounds = array<i64: 1, 128>}, {transform_indices = @transform_4, window_bounds = array<i64: 128, 128>}]} {
    %c0 = arith.constant 0 : index
    %c0_0 = arith.constant 0 : index
    %0 = vector.load %arg2[%c0, %c0_0] : memref<128x128xbf16, #tpu.memory_space<vmem>>, vector<128x128xbf16>
    %c0_1 = arith.constant 0 : index
    %c0_2 = arith.constant 0 : index
    %1 = vector.load %arg3[%c0_1, %c0_2] : memref<128x128xbf16, #tpu.memory_space<vmem>>, vector<128x128xbf16>
    %cst = arith.constant dense<0.000000e+00> : vector<128x128xf32>
    %2 = tpu.matmul %0, %1, %cst {dimension_numbers = #tpu.dot_dimension_numbers<[1], [0], [0], [1], [0, 0, 1, 1], [], []>} : vector<128x128xbf16>, vector<128x128xbf16>, vector<128x128xf32> -> vector<128x128xf32>
    %c0_3 = arith.constant 0 : index
    %c0_4 = arith.constant 0 : index
    %3 = vector.load %arg4[%c0_3, %c0_4] : memref<1x128xf32, #tpu.memory_space<vmem>>, vector<1x128xf32>
    %c0_5 = arith.constant 0 : index
    %c0_6 = arith.constant 0 : index
    %4 = vector.load %arg5[%c0_5, %c0_6] : memref<1x128xf32, #tpu.memory_space<vmem>>, vector<1x128xf32>
    %5 = vector.broadcast %3 : vector<1x128xf32> to vector<128x128xf32>
    %6 = arith.mulf %2, %5 : vector<128x128xf32>
    %7 = vector.broadcast %4 : vector<1x128xf32> to vector<128x128xf32>
    %8 = arith.addf %6, %7 : vector<128x128xf32>
    %cst_7 = arith.constant 0.000000e+00 : f32
    %9 = vector.broadcast %cst_7 : f32 to vector<128x128xf32>
    %10 = arith.maximumf %8, %9 : vector<128x128xf32>
    %11 = arith.truncf %10 : vector<128x128xf32> to vector<128x128xbf16>
    %c0_8 = arith.constant 0 : index
    %c0_9 = arith.constant 0 : index
    %12 = vector.load %arg6[%c0_8, %c0_9] : memref<128x128xbf16, #tpu.memory_space<vmem>>, vector<128x128xbf16>
    tpu.vector_store %arg6[%c0_8, %c0_9], %11 {strides = array<i32>} : memref<128x128xbf16, #tpu.memory_space<vmem>>, vector<128x128xbf16>,
    return
  }
  func.func @transform_0(%arg0: i32, %arg1: i32) -> (i32, i32) {
    %c0_i32 = arith.constant 0 : i32
    %c0_i32_0 = arith.constant 0 : i32
    return %arg0, %c0_i32 : i32, i32
  }
  func.func @transform_1(%arg0: i32, %arg1: i32) -> (i32, i32) {
    %c0_i32 = arith.constant 0 : i32
    %c0_i32_0 = arith.constant 0 : i32
    return %c0_i32, %arg1 : i32, i32
  }
  func.func @transform_2(%arg0: i32, %arg1: i32) -> (i32, i32) {
    %c0_i32 = arith.constant 0 : i32
    %c0_i32_0 = arith.constant 0 : i32
    return %c0_i32, %arg1 : i32, i32
  }
  func.func @transform_3(%arg0: i32, %arg1: i32) -> (i32, i32) {
    %c0_i32 = arith.constant 0 : i32
    %c0_i32_0 = arith.constant 0 : i32
    return %c0_i32, %arg1 : i32, i32
  }
  func.func @transform_4(%arg0: i32, %arg1: i32) -> (i32, i32) {
    %c0_i32 = arith.constant 0 : i32
    return %arg0, %arg1 : i32, i32
  }
}

module attributes {stable_mosaic.version = 11 : i64} {
  func.func @_mm_kernel(%arg0: i32, %arg1: i32, %arg2: memref<128x1152xbf16, #tpu.memory_space<vmem>>, %arg3: memref<1152x128xbf16, #tpu.memory_space<vmem>>, %arg4: memref<1x128xf32, #tpu.memory_space<vmem>>, %arg5: memref<1x128xf32, #tpu.memory_space<vmem>>, %arg6: memref<128x128xbf16, #tpu.memory_space<vmem>>) attributes {dimension_semantics = [#tpu.dimension_semantics<parallel>, #tpu.dimension_semantics<parallel>], iteration_bounds = array<i64: 1, 1>, scalar_prefetch = 0 : i64, scratch_operands = 0 : i64, tpu.core_type = #tpu.core_type<tc>, window_params = [{transform_indices = @transform_0, window_bounds = array<i64: 128, 1152>}, {transform_indices = @transform_1, window_bounds = array<i64: 1152, 128>}, {transform_indices = @transform_2, window_bounds = array<i64: 1, 128>}, {transform_indices = @transform_3, window_bounds = array<i64: 1, 128>}, {transform_indices = @transform_4, window_bounds = array<i64: 128, 128>}]} {
    %c0 = arith.constant 0 : index
    %c0_0 = arith.constant 0 : index
    %0 = vector.load %arg2[%c0, %c0_0] : memref<128x1152xbf16, #tpu.memory_space<vmem>>, vector<128x1152xbf16>
    %c0_1 = arith.constant 0 : index
    %c0_2 = arith.constant 0 : index
    %1 = vector.load %arg3[%c0_1, %c0_2] : memref<1152x128xbf16, #tpu.memory_space<vmem>>, vector<1152x128xbf16>
    %cst = arith.constant dense<0.000000e+00> : vector<128x128xf32>
    %2 = tpu.matmul %0, %1, %cst {dimension_numbers = #tpu.dot_dimension_numbers<[1], [0], [0], [1], [0, 0, 1, 1], [], []>} : vector<128x1152xbf16>, vector<1152x128xbf16>, vector<128x128xf32> -> vector<128x128xf32>
    %c0_3 = arith.constant 0 : index
    %c0_4 = arith.constant 0 : index
    %3 = vector.load %arg4[%c0_3, %c0_4] : memref<1x128xf32, #tpu.memory_space<vmem>>, vector<1x128xf32>
    %c0_5 = arith.constant 0 : index
    %c0_6 = arith.constant 0 : index
    %4 = vector.load %arg5[%c0_5, %c0_6] : memref<1x128xf32, #tpu.memory_space<vmem>>, vector<1x128xf32>
    %5 = vector.broadcast %3 : vector<1x128xf32> to vector<128x128xf32>
    %6 = arith.mulf %2, %5 : vector<128x128xf32>
    %7 = vector.broadcast %4 : vector<1x128xf32> to vector<128x128xf32>
    %8 = arith.addf %6, %7 : vector<128x128xf32>
    %cst_7 = arith.constant 0.000000e+00 : f32
    %9 = vector.broadcast %cst_7 : f32 to vector<128x128xf32>
    %10 = arith.maximumf %8, %9 : vector<128x128xf32>
    %11 = arith.truncf %10 : vector<128x128xf32> to vector<128x128xbf16>
    %c0_8 = arith.constant 0 : index
    %c0_9 = arith.constant 0 : index
    %12 = vector.load %arg6[%c0_8, %c0_9] : memref<128x128xbf16, #tpu.memory_space<vmem>>, vector<128x128xbf16>
    tpu.vector_store %arg6[%c0_8, %c0_9], %11 {strides = array<i32>} : memref<128x128xbf16, #tpu.memory_space<vmem>>, vector<128x128xbf16>,
    return
  }
  func.func @transform_0(%arg0: i32, %arg1: i32) -> (i32, i32) {
    %c0_i32 = arith.constant 0 : i32
    %c0_i32_0 = arith.constant 0 : i32
    return %arg0, %c0_i32 : i32, i32
  }
  func.func @transform_1(%arg0: i32, %arg1: i32) -> (i32, i32) {
    %c0_i32 = arith.constant 0 : i32
    %c0_i32_0 = arith.constant 0 : i32
    return %c0_i32, %arg1 : i32, i32
  }
  func.func @transform_2(%arg0: i32, %arg1: i32) -> (i32, i32) {
    %c0_i32 = arith.constant 0 : i32
    %c0_i32_0 = arith.constant 0 : i32
    return %c0_i32, %arg1 : i32, i32
  }
  func.func @transform_3(%arg0: i32, %arg1: i32) -> (i32, i32) {
    %c0_i32 = arith.constant 0 : i32
    %c0_i32_0 = arith.constant 0 : i32
    return %c0_i32, %arg1 : i32, i32
  }
  func.func @transform_4(%arg0: i32, %arg1: i32) -> (i32, i32) {
    %c0_i32 = arith.constant 0 : i32
    return %arg0, %arg1 : i32, i32
  }
}

module attributes {stable_mosaic.version = 11 : i64} {
  func.func @_mm_kernel(%arg0: i32, %arg1: i32, %arg2: memref<128x128xbf16, #tpu.memory_space<vmem>>, %arg3: memref<128x128xbf16, #tpu.memory_space<vmem>>, %arg4: memref<1x128xf32, #tpu.memory_space<vmem>>, %arg5: memref<1x128xf32, #tpu.memory_space<vmem>>, %arg6: memref<128x128xbf16, #tpu.memory_space<vmem>>) attributes {dimension_semantics = [#tpu.dimension_semantics<parallel>, #tpu.dimension_semantics<parallel>], iteration_bounds = array<i64: 1, 1>, scalar_prefetch = 0 : i64, scratch_operands = 0 : i64, tpu.core_type = #tpu.core_type<tc>, window_params = [{transform_indices = @transform_0, window_bounds = array<i64: 128, 128>}, {transform_indices = @transform_1, window_bounds = array<i64: 128, 128>}, {transform_indices = @transform_2, window_bounds = array<i64: 1, 128>}, {transform_indices = @transform_3, window_bounds = array<i64: 1, 128>}, {transform_indices = @transform_4, window_bounds = array<i64: 128, 128>}]} {
    %c0 = arith.constant 0 : index
    %c0_0 = arith.constant 0 : index
    %0 = vector.load %arg2[%c0, %c0_0] : memref<128x128xbf16, #tpu.memory_space<vmem>>, vector<128x128xbf16>
    %c0_1 = arith.constant 0 : index
    %c0_2 = arith.constant 0 : index
    %1 = vector.load %arg3[%c0_1, %c0_2] : memref<128x128xbf16, #tpu.memory_space<vmem>>, vector<128x128xbf16>
    %cst = arith.constant dense<0.000000e+00> : vector<128x128xf32>
    %2 = tpu.matmul %0, %1, %cst {dimension_numbers = #tpu.dot_dimension_numbers<[1], [0], [0], [1], [0, 0, 1, 1], [], []>} : vector<128x128xbf16>, vector<128x128xbf16>, vector<128x128xf32> -> vector<128x128xf32>
    %c0_3 = arith.constant 0 : index
    %c0_4 = arith.constant 0 : index
    %3 = vector.load %arg4[%c0_3, %c0_4] : memref<1x128xf32, #tpu.memory_space<vmem>>, vector<1x128xf32>
    %c0_5 = arith.constant 0 : index
    %c0_6 = arith.constant 0 : index
    %4 = vector.load %arg5[%c0_5, %c0_6] : memref<1x128xf32, #tpu.memory_space<vmem>>, vector<1x128xf32>
    %5 = vector.broadcast %3 : vector<1x128xf32> to vector<128x128xf32>
    %6 = arith.mulf %2, %5 : vector<128x128xf32>
    %7 = vector.broadcast %4 : vector<1x128xf32> to vector<128x128xf32>
    %8 = arith.addf %6, %7 : vector<128x128xf32>
    %9 = arith.truncf %8 : vector<128x128xf32> to vector<128x128xbf16>
    %c0_7 = arith.constant 0 : index
    %c0_8 = arith.constant 0 : index
    %10 = vector.load %arg6[%c0_7, %c0_8] : memref<128x128xbf16, #tpu.memory_space<vmem>>, vector<128x128xbf16>
    tpu.vector_store %arg6[%c0_7, %c0_8], %9 {strides = array<i32>} : memref<128x128xbf16, #tpu.memory_space<vmem>>, vector<128x128xbf16>,
    return
  }
  func.func @transform_0(%arg0: i32, %arg1: i32) -> (i32, i32) {
    %c0_i32 = arith.constant 0 : i32
    %c0_i32_0 = arith.constant 0 : i32
    return %arg0, %c0_i32 : i32, i32
  }
  func.func @transform_1(%arg0: i32, %arg1: i32) -> (i32, i32) {
    %c0_i32 = arith.constant 0 : i32
    %c0_i32_0 = arith.constant 0 : i32
    return %c0_i32, %arg1 : i32, i32
  }
  func.func @transform_2(%arg0: i32, %arg1: i32) -> (i32, i32) {
    %c0_i32 = arith.constant 0 : i32
    %c0_i32_0 = arith.constant 0 : i32
    return %c0_i32, %arg1 : i32, i32
  }
  func.func @transform_3(%arg0: i32, %arg1: i32) -> (i32, i32) {
    %c0_i32 = arith.constant 0 : i32
    %c0_i32_0 = arith.constant 0 : i32
    return %c0_i32, %arg1 : i32, i32
  }
  func.func @transform_4(%arg0: i32, %arg1: i32) -> (i32, i32) {
    %c0_i32 = arith.constant 0 : i32
    return %arg0, %arg1 : i32, i32
  }
}

module attributes {stable_mosaic.version = 11 : i64} {
  func.func @_mm_res_kernel(%arg0: i32, %arg1: i32, %arg2: memref<128x128xbf16, #tpu.memory_space<vmem>>, %arg3: memref<128x128xbf16, #tpu.memory_space<vmem>>, %arg4: memref<1x128xf32, #tpu.memory_space<vmem>>, %arg5: memref<1x128xf32, #tpu.memory_space<vmem>>, %arg6: memref<128x128xbf16, #tpu.memory_space<vmem>>, %arg7: memref<128x128xbf16, #tpu.memory_space<vmem>>) attributes {dimension_semantics = [#tpu.dimension_semantics<parallel>, #tpu.dimension_semantics<parallel>], iteration_bounds = array<i64: 1, 1>, scalar_prefetch = 0 : i64, scratch_operands = 0 : i64, tpu.core_type = #tpu.core_type<tc>, window_params = [{transform_indices = @transform_0, window_bounds = array<i64: 128, 128>}, {transform_indices = @transform_1, window_bounds = array<i64: 128, 128>}, {transform_indices = @transform_2, window_bounds = array<i64: 1, 128>}, {transform_indices = @transform_3, window_bounds = array<i64: 1, 128>}, {transform_indices = @transform_4, window_bounds = array<i64: 128, 128>}, {transform_indices = @transform_5, window_bounds = array<i64: 128, 128>}]} {
    %c0 = arith.constant 0 : index
    %c0_0 = arith.constant 0 : index
    %0 = vector.load %arg2[%c0, %c0_0] : memref<128x128xbf16, #tpu.memory_space<vmem>>, vector<128x128xbf16>
    %c0_1 = arith.constant 0 : index
    %c0_2 = arith.constant 0 : index
    %1 = vector.load %arg3[%c0_1, %c0_2] : memref<128x128xbf16, #tpu.memory_space<vmem>>, vector<128x128xbf16>
    %cst = arith.constant dense<0.000000e+00> : vector<128x128xf32>
    %2 = tpu.matmul %0, %1, %cst {dimension_numbers = #tpu.dot_dimension_numbers<[1], [0], [0], [1], [0, 0, 1, 1], [], []>} : vector<128x128xbf16>, vector<128x128xbf16>, vector<128x128xf32> -> vector<128x128xf32>
    %c0_3 = arith.constant 0 : index
    %c0_4 = arith.constant 0 : index
    %3 = vector.load %arg4[%c0_3, %c0_4] : memref<1x128xf32, #tpu.memory_space<vmem>>, vector<1x128xf32>
    %c0_5 = arith.constant 0 : index
    %c0_6 = arith.constant 0 : index
    %4 = vector.load %arg5[%c0_5, %c0_6] : memref<1x128xf32, #tpu.memory_space<vmem>>, vector<1x128xf32>
    %c0_7 = arith.constant 0 : index
    %c0_8 = arith.constant 0 : index
    %5 = vector.load %arg6[%c0_7, %c0_8] : memref<128x128xbf16, #tpu.memory_space<vmem>>, vector<128x128xbf16>
    %6 = vector.broadcast %3 : vector<1x128xf32> to vector<128x128xf32>
    %7 = arith.mulf %2, %6 : vector<128x128xf32>
    %8 = vector.broadcast %4 : vector<1x128xf32> to vector<128x128xf32>
    %9 = arith.addf %7, %8 : vector<128x128xf32>
    %10 = arith.extf %5 : vector<128x128xbf16> to vector<128x128xf32>
    %11 = arith.addf %9, %10 : vector<128x128xf32>
    %cst_9 = arith.constant 0.000000e+00 : f32
    %12 = vector.broadcast %cst_9 : f32 to vector<128x128xf32>
    %13 = arith.maximumf %11, %12 : vector<128x128xf32>
    %14 = arith.truncf %13 : vector<128x128xf32> to vector<128x128xbf16>
    %c0_10 = arith.constant 0 : index
    %c0_11 = arith.constant 0 : index
    %15 = vector.load %arg7[%c0_10, %c0_11] : memref<128x128xbf16, #tpu.memory_space<vmem>>, vector<128x128xbf16>
    tpu.vector_store %arg7[%c0_10, %c0_11], %14 {strides = array<i32>} : memref<128x128xbf16, #tpu.memory_space<vmem>>, vector<128x128xbf16>,
    return
  }
  func.func @transform_0(%arg0: i32, %arg1: i32) -> (i32, i32) {
    %c0_i32 = arith.constant 0 : i32
    %c0_i32_0 = arith.constant 0 : i32
    return %arg0, %c0_i32 : i32, i32
  }
  func.func @transform_1(%arg0: i32, %arg1: i32) -> (i32, i32) {
    %c0_i32 = arith.constant 0 : i32
    %c0_i32_0 = arith.constant 0 : i32
    return %c0_i32, %arg1 : i32, i32
  }
  func.func @transform_2(%arg0: i32, %arg1: i32) -> (i32, i32) {
    %c0_i32 = arith.constant 0 : i32
    %c0_i32_0 = arith.constant 0 : i32
    return %c0_i32, %arg1 : i32, i32
  }
  func.func @transform_3(%arg0: i32, %arg1: i32) -> (i32, i32) {
    %c0_i32 = arith.constant 0 : i32
    %c0_i32_0 = arith.constant 0 : i32
    return %c0_i32, %arg1 : i32, i32
  }
  func.func @transform_4(%arg0: i32, %arg1: i32) -> (i32, i32) {
    %c0_i32 = arith.constant 0 : i32
    return %arg0, %arg1 : i32, i32
  }
  func.func @transform_5(%arg0: i32, %arg1: i32) -> (i32, i32) {
    %c0_i32 = arith.constant 0 : i32
    return %arg0, %arg1 : i32, i32
  }
}

module attributes {stable_mosaic.version = 11 : i64} {
  func.func @_mm_kernel(%arg0: i32, %arg1: i32, %arg2: memref<128x128xbf16, #tpu.memory_space<vmem>>, %arg3: memref<128x128xbf16, #tpu.memory_space<vmem>>, %arg4: memref<1x128xf32, #tpu.memory_space<vmem>>, %arg5: memref<1x128xf32, #tpu.memory_space<vmem>>, %arg6: memref<128x128xbf16, #tpu.memory_space<vmem>>) attributes {dimension_semantics = [#tpu.dimension_semantics<parallel>, #tpu.dimension_semantics<parallel>], iteration_bounds = array<i64: 1, 1>, scalar_prefetch = 0 : i64, scratch_operands = 0 : i64, tpu.core_type = #tpu.core_type<tc>, window_params = [{transform_indices = @transform_0, window_bounds = array<i64: 128, 128>}, {transform_indices = @transform_1, window_bounds = array<i64: 128, 128>}, {transform_indices = @transform_2, window_bounds = array<i64: 1, 128>}, {transform_indices = @transform_3, window_bounds = array<i64: 1, 128>}, {transform_indices = @transform_4, window_bounds = array<i64: 128, 128>}]} {
    %c0 = arith.constant 0 : index
    %c0_0 = arith.constant 0 : index
    %0 = vector.load %arg2[%c0, %c0_0] : memref<128x128xbf16, #tpu.memory_space<vmem>>, vector<128x128xbf16>
    %c0_1 = arith.constant 0 : index
    %c0_2 = arith.constant 0 : index
    %1 = vector.load %arg3[%c0_1, %c0_2] : memref<128x128xbf16, #tpu.memory_space<vmem>>, vector<128x128xbf16>
    %cst = arith.constant dense<0.000000e+00> : vector<128x128xf32>
    %2 = tpu.matmul %0, %1, %cst {dimension_numbers = #tpu.dot_dimension_numbers<[1], [0], [0], [1], [0, 0, 1, 1], [], []>} : vector<128x128xbf16>, vector<128x128xbf16>, vector<128x128xf32> -> vector<128x128xf32>
    %c0_3 = arith.constant 0 : index
    %c0_4 = arith.constant 0 : index
    %3 = vector.load %arg4[%c0_3, %c0_4] : memref<1x128xf32, #tpu.memory_space<vmem>>, vector<1x128xf32>
    %c0_5 = arith.constant 0 : index
    %c0_6 = arith.constant 0 : index
    %4 = vector.load %arg5[%c0_5, %c0_6] : memref<1x128xf32, #tpu.memory_space<vmem>>, vector<1x128xf32>
    %5 = vector.broadcast %3 : vector<1x128xf32> to vector<128x128xf32>
    %6 = arith.mulf %2, %5 : vector<128x128xf32>
    %7 = vector.broadcast %4 : vector<1x128xf32> to vector<128x128xf32>
    %8 = arith.addf %6, %7 : vector<128x128xf32>
    %cst_7 = arith.constant 0.000000e+00 : f32
    %9 = vector.broadcast %cst_7 : f32 to vector<128x128xf32>
    %10 = arith.maximumf %8, %9 : vector<128x128xf32>
    %11 = arith.truncf %10 : vector<128x128xf32> to vector<128x128xbf16>
    %c0_8 = arith.constant 0 : index
    %c0_9 = arith.constant 0 : index
    %12 = vector.load %arg6[%c0_8, %c0_9] : memref<128x128xbf16, #tpu.memory_space<vmem>>, vector<128x128xbf16>
    tpu.vector_store %arg6[%c0_8, %c0_9], %11 {strides = array<i32>} : memref<128x128xbf16, #tpu.memory_space<vmem>>, vector<128x128xbf16>,
    return
  }
  func.func @transform_0(%arg0: i32, %arg1: i32) -> (i32, i32) {
    %c0_i32 = arith.constant 0 : i32
    %c0_i32_0 = arith.constant 0 : i32
    return %arg0, %c0_i32 : i32, i32
  }
  func.func @transform_1(%arg0: i32, %arg1: i32) -> (i32, i32) {
    %c0_i32 = arith.constant 0 : i32
    %c0_i32_0 = arith.constant 0 : i32
    return %c0_i32, %arg1 : i32, i32
  }
  func.func @transform_2(%arg0: i32, %arg1: i32) -> (i32, i32) {
    %c0_i32 = arith.constant 0 : i32
    %c0_i32_0 = arith.constant 0 : i32
    return %c0_i32, %arg1 : i32, i32
  }
  func.func @transform_3(%arg0: i32, %arg1: i32) -> (i32, i32) {
    %c0_i32 = arith.constant 0 : i32
    %c0_i32_0 = arith.constant 0 : i32
    return %c0_i32, %arg1 : i32, i32
  }
  func.func @transform_4(%arg0: i32, %arg1: i32) -> (i32, i32) {
    %c0_i32 = arith.constant 0 : i32
    return %arg0, %arg1 : i32, i32
  }
}

module attributes {stable_mosaic.version = 11 : i64} {
  func.func @_mm_kernel(%arg0: i32, %arg1: i32, %arg2: memref<128x1152xbf16, #tpu.memory_space<vmem>>, %arg3: memref<1152x128xbf16, #tpu.memory_space<vmem>>, %arg4: memref<1x128xf32, #tpu.memory_space<vmem>>, %arg5: memref<1x128xf32, #tpu.memory_space<vmem>>, %arg6: memref<128x128xbf16, #tpu.memory_space<vmem>>) attributes {dimension_semantics = [#tpu.dimension_semantics<parallel>, #tpu.dimension_semantics<parallel>], iteration_bounds = array<i64: 1, 1>, scalar_prefetch = 0 : i64, scratch_operands = 0 : i64, tpu.core_type = #tpu.core_type<tc>, window_params = [{transform_indices = @transform_0, window_bounds = array<i64: 128, 1152>}, {transform_indices = @transform_1, window_bounds = array<i64: 1152, 128>}, {transform_indices = @transform_2, window_bounds = array<i64: 1, 128>}, {transform_indices = @transform_3, window_bounds = array<i64: 1, 128>}, {transform_indices = @transform_4, window_bounds = array<i64: 128, 128>}]} {
    %c0 = arith.constant 0 : index
    %c0_0 = arith.constant 0 : index
    %0 = vector.load %arg2[%c0, %c0_0] : memref<128x1152xbf16, #tpu.memory_space<vmem>>, vector<128x1152xbf16>
    %c0_1 = arith.constant 0 : index
    %c0_2 = arith.constant 0 : index
    %1 = vector.load %arg3[%c0_1, %c0_2] : memref<1152x128xbf16, #tpu.memory_space<vmem>>, vector<1152x128xbf16>
    %cst = arith.constant dense<0.000000e+00> : vector<128x128xf32>
    %2 = tpu.matmul %0, %1, %cst {dimension_numbers = #tpu.dot_dimension_numbers<[1], [0], [0], [1], [0, 0, 1, 1], [], []>} : vector<128x1152xbf16>, vector<1152x128xbf16>, vector<128x128xf32> -> vector<128x128xf32>
    %c0_3 = arith.constant 0 : index
    %c0_4 = arith.constant 0 : index
    %3 = vector.load %arg4[%c0_3, %c0_4] : memref<1x128xf32, #tpu.memory_space<vmem>>, vector<1x128xf32>
    %c0_5 = arith.constant 0 : index
    %c0_6 = arith.constant 0 : index
    %4 = vector.load %arg5[%c0_5, %c0_6] : memref<1x128xf32, #tpu.memory_space<vmem>>, vector<1x128xf32>
    %5 = vector.broadcast %3 : vector<1x128xf32> to vector<128x128xf32>
    %6 = arith.mulf %2, %5 : vector<128x128xf32>
    %7 = vector.broadcast %4 : vector<1x128xf32> to vector<128x128xf32>
    %8 = arith.addf %6, %7 : vector<128x128xf32>
    %cst_7 = arith.constant 0.000000e+00 : f32
    %9 = vector.broadcast %cst_7 : f32 to vector<128x128xf32>
    %10 = arith.maximumf %8, %9 : vector<128x128xf32>
    %11 = arith.truncf %10 : vector<128x128xf32> to vector<128x128xbf16>
    %c0_8 = arith.constant 0 : index
    %c0_9 = arith.constant 0 : index
    %12 = vector.load %arg6[%c0_8, %c0_9] : memref<128x128xbf16, #tpu.memory_space<vmem>>, vector<128x128xbf16>
    tpu.vector_store %arg6[%c0_8, %c0_9], %11 {strides = array<i32>} : memref<128x128xbf16, #tpu.memory_space<vmem>>, vector<128x128xbf16>,
    return
  }
  func.func @transform_0(%arg0: i32, %arg1: i32) -> (i32, i32) {
    %c0_i32 = arith.constant 0 : i32
    %c0_i32_0 = arith.constant 0 : i32
    return %arg0, %c0_i32 : i32, i32
  }
  func.func @transform_1(%arg0: i32, %arg1: i32) -> (i32, i32) {
    %c0_i32 = arith.constant 0 : i32
    %c0_i32_0 = arith.constant 0 : i32
    return %c0_i32, %arg1 : i32, i32
  }
  func.func @transform_2(%arg0: i32, %arg1: i32) -> (i32, i32) {
    %c0_i32 = arith.constant 0 : i32
    %c0_i32_0 = arith.constant 0 : i32
    return %c0_i32, %arg1 : i32, i32
  }
  func.func @transform_3(%arg0: i32, %arg1: i32) -> (i32, i32) {
    %c0_i32 = arith.constant 0 : i32
    %c0_i32_0 = arith.constant 0 : i32
    return %c0_i32, %arg1 : i32, i32
  }
  func.func @transform_4(%arg0: i32, %arg1: i32) -> (i32, i32) {
    %c0_i32 = arith.constant 0 : i32
    return %arg0, %arg1 : i32, i32
  }
}

module attributes {stable_mosaic.version = 11 : i64} {
  func.func @_mm_res_kernel(%arg0: i32, %arg1: i32, %arg2: memref<128x128xbf16, #tpu.memory_space<vmem>>, %arg3: memref<128x128xbf16, #tpu.memory_space<vmem>>, %arg4: memref<1x128xf32, #tpu.memory_space<vmem>>, %arg5: memref<1x128xf32, #tpu.memory_space<vmem>>, %arg6: memref<128x128xbf16, #tpu.memory_space<vmem>>, %arg7: memref<128x128xbf16, #tpu.memory_space<vmem>>) attributes {dimension_semantics = [#tpu.dimension_semantics<parallel>, #tpu.dimension_semantics<parallel>], iteration_bounds = array<i64: 1, 1>, scalar_prefetch = 0 : i64, scratch_operands = 0 : i64, tpu.core_type = #tpu.core_type<tc>, window_params = [{transform_indices = @transform_0, window_bounds = array<i64: 128, 128>}, {transform_indices = @transform_1, window_bounds = array<i64: 128, 128>}, {transform_indices = @transform_2, window_bounds = array<i64: 1, 128>}, {transform_indices = @transform_3, window_bounds = array<i64: 1, 128>}, {transform_indices = @transform_4, window_bounds = array<i64: 128, 128>}, {transform_indices = @transform_5, window_bounds = array<i64: 128, 128>}]} {
    %c0 = arith.constant 0 : index
    %c0_0 = arith.constant 0 : index
    %0 = vector.load %arg2[%c0, %c0_0] : memref<128x128xbf16, #tpu.memory_space<vmem>>, vector<128x128xbf16>
    %c0_1 = arith.constant 0 : index
    %c0_2 = arith.constant 0 : index
    %1 = vector.load %arg3[%c0_1, %c0_2] : memref<128x128xbf16, #tpu.memory_space<vmem>>, vector<128x128xbf16>
    %cst = arith.constant dense<0.000000e+00> : vector<128x128xf32>
    %2 = tpu.matmul %0, %1, %cst {dimension_numbers = #tpu.dot_dimension_numbers<[1], [0], [0], [1], [0, 0, 1, 1], [], []>} : vector<128x128xbf16>, vector<128x128xbf16>, vector<128x128xf32> -> vector<128x128xf32>
    %c0_3 = arith.constant 0 : index
    %c0_4 = arith.constant 0 : index
    %3 = vector.load %arg4[%c0_3, %c0_4] : memref<1x128xf32, #tpu.memory_space<vmem>>, vector<1x128xf32>
    %c0_5 = arith.constant 0 : index
    %c0_6 = arith.constant 0 : index
    %4 = vector.load %arg5[%c0_5, %c0_6] : memref<1x128xf32, #tpu.memory_space<vmem>>, vector<1x128xf32>
    %c0_7 = arith.constant 0 : index
    %c0_8 = arith.constant 0 : index
    %5 = vector.load %arg6[%c0_7, %c0_8] : memref<128x128xbf16, #tpu.memory_space<vmem>>, vector<128x128xbf16>
    %6 = vector.broadcast %3 : vector<1x128xf32> to vector<128x128xf32>
    %7 = arith.mulf %2, %6 : vector<128x128xf32>
    %8 = vector.broadcast %4 : vector<1x128xf32> to vector<128x128xf32>
    %9 = arith.addf %7, %8 : vector<128x128xf32>
    %10 = arith.extf %5 : vector<128x128xbf16> to vector<128x128xf32>
    %11 = arith.addf %9, %10 : vector<128x128xf32>
    %cst_9 = arith.constant 0.000000e+00 : f32
    %12 = vector.broadcast %cst_9 : f32 to vector<128x128xf32>
    %13 = arith.maximumf %11, %12 : vector<128x128xf32>
    %14 = arith.truncf %13 : vector<128x128xf32> to vector<128x128xbf16>
    %c0_10 = arith.constant 0 : index
    %c0_11 = arith.constant 0 : index
    %15 = vector.load %arg7[%c0_10, %c0_11] : memref<128x128xbf16, #tpu.memory_space<vmem>>, vector<128x128xbf16>
    tpu.vector_store %arg7[%c0_10, %c0_11], %14 {strides = array<i32>} : memref<128x128xbf16, #tpu.memory_space<vmem>>, vector<128x128xbf16>,
    return
  }
  func.func @transform_0(%arg0: i32, %arg1: i32) -> (i32, i32) {
    %c0_i32 = arith.constant 0 : i32
    %c0_i32_0 = arith.constant 0 : i32
    return %arg0, %c0_i32 : i32, i32
  }
  func.func @transform_1(%arg0: i32, %arg1: i32) -> (i32, i32) {
    %c0_i32 = arith.constant 0 : i32
    %c0_i32_0 = arith.constant 0 : i32
    return %c0_i32, %arg1 : i32, i32
  }
  func.func @transform_2(%arg0: i32, %arg1: i32) -> (i32, i32) {
    %c0_i32 = arith.constant 0 : i32
    %c0_i32_0 = arith.constant 0 : i32
    return %c0_i32, %arg1 : i32, i32
  }
  func.func @transform_3(%arg0: i32, %arg1: i32) -> (i32, i32) {
    %c0_i32 = arith.constant 0 : i32
    %c0_i32_0 = arith.constant 0 : i32
    return %c0_i32, %arg1 : i32, i32
  }
  func.func @transform_4(%arg0: i32, %arg1: i32) -> (i32, i32) {
    %c0_i32 = arith.constant 0 : i32
    return %arg0, %arg1 : i32, i32
  }
  func.func @transform_5(%arg0: i32, %arg1: i32) -> (i32, i32) {
    %c0_i32 = arith.constant 0 : i32
    return %arg0, %arg1 : i32, i32
  }
}

module attributes {stable_mosaic.version = 11 : i64} {
  func.func @_mm_kernel(%arg0: i32, %arg1: i32, %arg2: memref<32x1152xbf16, #tpu.memory_space<vmem>>, %arg3: memref<1152x128xbf16, #tpu.memory_space<vmem>>, %arg4: memref<1x128xf32, #tpu.memory_space<vmem>>, %arg5: memref<1x128xf32, #tpu.memory_space<vmem>>, %arg6: memref<32x128xbf16, #tpu.memory_space<vmem>>) attributes {dimension_semantics = [#tpu.dimension_semantics<parallel>, #tpu.dimension_semantics<parallel>], iteration_bounds = array<i64: 1, 1>, scalar_prefetch = 0 : i64, scratch_operands = 0 : i64, tpu.core_type = #tpu.core_type<tc>, window_params = [{transform_indices = @transform_0, window_bounds = array<i64: 32, 1152>}, {transform_indices = @transform_1, window_bounds = array<i64: 1152, 128>}, {transform_indices = @transform_2, window_bounds = array<i64: 1, 128>}, {transform_indices = @transform_3, window_bounds = array<i64: 1, 128>}, {transform_indices = @transform_4, window_bounds = array<i64: 32, 128>}]} {
    %c0 = arith.constant 0 : index
    %c0_0 = arith.constant 0 : index
    %0 = vector.load %arg2[%c0, %c0_0] : memref<32x1152xbf16, #tpu.memory_space<vmem>>, vector<32x1152xbf16>
    %c0_1 = arith.constant 0 : index
    %c0_2 = arith.constant 0 : index
    %1 = vector.load %arg3[%c0_1, %c0_2] : memref<1152x128xbf16, #tpu.memory_space<vmem>>, vector<1152x128xbf16>
    %cst = arith.constant dense<0.000000e+00> : vector<32x128xf32>
    %2 = tpu.matmul %0, %1, %cst {dimension_numbers = #tpu.dot_dimension_numbers<[1], [0], [0], [1], [0, 0, 1, 1], [], []>} : vector<32x1152xbf16>, vector<1152x128xbf16>, vector<32x128xf32> -> vector<32x128xf32>
    %c0_3 = arith.constant 0 : index
    %c0_4 = arith.constant 0 : index
    %3 = vector.load %arg4[%c0_3, %c0_4] : memref<1x128xf32, #tpu.memory_space<vmem>>, vector<1x128xf32>
    %c0_5 = arith.constant 0 : index
    %c0_6 = arith.constant 0 : index
    %4 = vector.load %arg5[%c0_5, %c0_6] : memref<1x128xf32, #tpu.memory_space<vmem>>, vector<1x128xf32>
    %5 = vector.broadcast %3 : vector<1x128xf32> to vector<32x128xf32>
    %6 = arith.mulf %2, %5 : vector<32x128xf32>
    %7 = vector.broadcast %4 : vector<1x128xf32> to vector<32x128xf32>
    %8 = arith.addf %6, %7 : vector<32x128xf32>
    %cst_7 = arith.constant 0.000000e+00 : f32
    %9 = vector.broadcast %cst_7 : f32 to vector<32x128xf32>
    %10 = arith.maximumf %8, %9 : vector<32x128xf32>
    %11 = arith.truncf %10 : vector<32x128xf32> to vector<32x128xbf16>
    %c0_8 = arith.constant 0 : index
    %c0_9 = arith.constant 0 : index
    %12 = vector.load %arg6[%c0_8, %c0_9] : memref<32x128xbf16, #tpu.memory_space<vmem>>, vector<32x128xbf16>
    tpu.vector_store %arg6[%c0_8, %c0_9], %11 {strides = array<i32>} : memref<32x128xbf16, #tpu.memory_space<vmem>>, vector<32x128xbf16>,
    return
  }
  func.func @transform_0(%arg0: i32, %arg1: i32) -> (i32, i32) {
    %c0_i32 = arith.constant 0 : i32
    %c0_i32_0 = arith.constant 0 : i32
    return %arg0, %c0_i32 : i32, i32
  }
  func.func @transform_1(%arg0: i32, %arg1: i32) -> (i32, i32) {
    %c0_i32 = arith.constant 0 : i32
    %c0_i32_0 = arith.constant 0 : i32
    return %c0_i32, %arg1 : i32, i32
  }
  func.func @transform_2(%arg0: i32, %arg1: i32) -> (i32, i32) {
    %c0_i32 = arith.constant 0 : i32
    %c0_i32_0 = arith.constant 0 : i32
    return %c0_i32, %arg1 : i32, i32
  }
  func.func @transform_3(%arg0: i32, %arg1: i32) -> (i32, i32) {
    %c0_i32 = arith.constant 0 : i32
    %c0_i32_0 = arith.constant 0 : i32
    return %c0_i32, %arg1 : i32, i32
  }
  func.func @transform_4(%arg0: i32, %arg1: i32) -> (i32, i32) {
    %c0_i32 = arith.constant 0 : i32
    return %arg0, %arg1 : i32, i32
  }
}

module attributes {stable_mosaic.version = 11 : i64} {
  func.func @_mm_kernel(%arg0: i32, %arg1: i32, %arg2: memref<32x128xbf16, #tpu.memory_space<vmem>>, %arg3: memref<128x128xbf16, #tpu.memory_space<vmem>>, %arg4: memref<1x128xf32, #tpu.memory_space<vmem>>, %arg5: memref<1x128xf32, #tpu.memory_space<vmem>>, %arg6: memref<32x128xbf16, #tpu.memory_space<vmem>>) attributes {dimension_semantics = [#tpu.dimension_semantics<parallel>, #tpu.dimension_semantics<parallel>], iteration_bounds = array<i64: 1, 1>, scalar_prefetch = 0 : i64, scratch_operands = 0 : i64, tpu.core_type = #tpu.core_type<tc>, window_params = [{transform_indices = @transform_0, window_bounds = array<i64: 32, 128>}, {transform_indices = @transform_1, window_bounds = array<i64: 128, 128>}, {transform_indices = @transform_2, window_bounds = array<i64: 1, 128>}, {transform_indices = @transform_3, window_bounds = array<i64: 1, 128>}, {transform_indices = @transform_4, window_bounds = array<i64: 32, 128>}]} {
    %c0 = arith.constant 0 : index
    %c0_0 = arith.constant 0 : index
    %0 = vector.load %arg2[%c0, %c0_0] : memref<32x128xbf16, #tpu.memory_space<vmem>>, vector<32x128xbf16>
    %c0_1 = arith.constant 0 : index
    %c0_2 = arith.constant 0 : index
    %1 = vector.load %arg3[%c0_1, %c0_2] : memref<128x128xbf16, #tpu.memory_space<vmem>>, vector<128x128xbf16>
    %cst = arith.constant dense<0.000000e+00> : vector<32x128xf32>
    %2 = tpu.matmul %0, %1, %cst {dimension_numbers = #tpu.dot_dimension_numbers<[1], [0], [0], [1], [0, 0, 1, 1], [], []>} : vector<32x128xbf16>, vector<128x128xbf16>, vector<32x128xf32> -> vector<32x128xf32>
    %c0_3 = arith.constant 0 : index
    %c0_4 = arith.constant 0 : index
    %3 = vector.load %arg4[%c0_3, %c0_4] : memref<1x128xf32, #tpu.memory_space<vmem>>, vector<1x128xf32>
    %c0_5 = arith.constant 0 : index
    %c0_6 = arith.constant 0 : index
    %4 = vector.load %arg5[%c0_5, %c0_6] : memref<1x128xf32, #tpu.memory_space<vmem>>, vector<1x128xf32>
    %5 = vector.broadcast %3 : vector<1x128xf32> to vector<32x128xf32>
    %6 = arith.mulf %2, %5 : vector<32x128xf32>
    %7 = vector.broadcast %4 : vector<1x128xf32> to vector<32x128xf32>
    %8 = arith.addf %6, %7 : vector<32x128xf32>
    %9 = arith.truncf %8 : vector<32x128xf32> to vector<32x128xbf16>
    %c0_7 = arith.constant 0 : index
    %c0_8 = arith.constant 0 : index
    %10 = vector.load %arg6[%c0_7, %c0_8] : memref<32x128xbf16, #tpu.memory_space<vmem>>, vector<32x128xbf16>
    tpu.vector_store %arg6[%c0_7, %c0_8], %9 {strides = array<i32>} : memref<32x128xbf16, #tpu.memory_space<vmem>>, vector<32x128xbf16>,
    return
  }
  func.func @transform_0(%arg0: i32, %arg1: i32) -> (i32, i32) {
    %c0_i32 = arith.constant 0 : i32
    %c0_i32_0 = arith.constant 0 : i32
    return %arg0, %c0_i32 : i32, i32
  }
  func.func @transform_1(%arg0: i32, %arg1: i32) -> (i32, i32) {
    %c0_i32 = arith.constant 0 : i32
    %c0_i32_0 = arith.constant 0 : i32
    return %c0_i32, %arg1 : i32, i32
  }
  func.func @transform_2(%arg0: i32, %arg1: i32) -> (i32, i32) {
    %c0_i32 = arith.constant 0 : i32
    %c0_i32_0 = arith.constant 0 : i32
    return %c0_i32, %arg1 : i32, i32
  }
  func.func @transform_3(%arg0: i32, %arg1: i32) -> (i32, i32) {
    %c0_i32 = arith.constant 0 : i32
    %c0_i32_0 = arith.constant 0 : i32
    return %c0_i32, %arg1 : i32, i32
  }
  func.func @transform_4(%arg0: i32, %arg1: i32) -> (i32, i32) {
    %c0_i32 = arith.constant 0 : i32
    return %arg0, %arg1 : i32, i32
  }
}

module attributes {stable_mosaic.version = 11 : i64} {
  func.func @_mm_res_kernel(%arg0: i32, %arg1: i32, %arg2: memref<32x128xbf16, #tpu.memory_space<vmem>>, %arg3: memref<128x128xbf16, #tpu.memory_space<vmem>>, %arg4: memref<1x128xf32, #tpu.memory_space<vmem>>, %arg5: memref<1x128xf32, #tpu.memory_space<vmem>>, %arg6: memref<32x128xbf16, #tpu.memory_space<vmem>>, %arg7: memref<32x128xbf16, #tpu.memory_space<vmem>>) attributes {dimension_semantics = [#tpu.dimension_semantics<parallel>, #tpu.dimension_semantics<parallel>], iteration_bounds = array<i64: 1, 1>, scalar_prefetch = 0 : i64, scratch_operands = 0 : i64, tpu.core_type = #tpu.core_type<tc>, window_params = [{transform_indices = @transform_0, window_bounds = array<i64: 32, 128>}, {transform_indices = @transform_1, window_bounds = array<i64: 128, 128>}, {transform_indices = @transform_2, window_bounds = array<i64: 1, 128>}, {transform_indices = @transform_3, window_bounds = array<i64: 1, 128>}, {transform_indices = @transform_4, window_bounds = array<i64: 32, 128>}, {transform_indices = @transform_5, window_bounds = array<i64: 32, 128>}]} {
    %c0 = arith.constant 0 : index
    %c0_0 = arith.constant 0 : index
    %0 = vector.load %arg2[%c0, %c0_0] : memref<32x128xbf16, #tpu.memory_space<vmem>>, vector<32x128xbf16>
    %c0_1 = arith.constant 0 : index
    %c0_2 = arith.constant 0 : index
    %1 = vector.load %arg3[%c0_1, %c0_2] : memref<128x128xbf16, #tpu.memory_space<vmem>>, vector<128x128xbf16>
    %cst = arith.constant dense<0.000000e+00> : vector<32x128xf32>
    %2 = tpu.matmul %0, %1, %cst {dimension_numbers = #tpu.dot_dimension_numbers<[1], [0], [0], [1], [0, 0, 1, 1], [], []>} : vector<32x128xbf16>, vector<128x128xbf16>, vector<32x128xf32> -> vector<32x128xf32>
    %c0_3 = arith.constant 0 : index
    %c0_4 = arith.constant 0 : index
    %3 = vector.load %arg4[%c0_3, %c0_4] : memref<1x128xf32, #tpu.memory_space<vmem>>, vector<1x128xf32>
    %c0_5 = arith.constant 0 : index
    %c0_6 = arith.constant 0 : index
    %4 = vector.load %arg5[%c0_5, %c0_6] : memref<1x128xf32, #tpu.memory_space<vmem>>, vector<1x128xf32>
    %c0_7 = arith.constant 0 : index
    %c0_8 = arith.constant 0 : index
    %5 = vector.load %arg6[%c0_7, %c0_8] : memref<32x128xbf16, #tpu.memory_space<vmem>>, vector<32x128xbf16>
    %6 = vector.broadcast %3 : vector<1x128xf32> to vector<32x128xf32>
    %7 = arith.mulf %2, %6 : vector<32x128xf32>
    %8 = vector.broadcast %4 : vector<1x128xf32> to vector<32x128xf32>
    %9 = arith.addf %7, %8 : vector<32x128xf32>
    %10 = arith.extf %5 : vector<32x128xbf16> to vector<32x128xf32>
    %11 = arith.addf %9, %10 : vector<32x128xf32>
    %cst_9 = arith.constant 0.000000e+00 : f32
    %12 = vector.broadcast %cst_9 : f32 to vector<32x128xf32>
    %13 = arith.maximumf %11, %12 : vector<32x128xf32>
    %14 = arith.truncf %13 : vector<32x128xf32> to vector<32x128xbf16>
    %c0_10 = arith.constant 0 : index
    %c0_11 = arith.constant 0 : index
    %15 = vector.load %arg7[%c0_10, %c0_11] : memref<32x128xbf16, #tpu.memory_space<vmem>>, vector<32x128xbf16>
    tpu.vector_store %arg7[%c0_10, %c0_11], %14 {strides = array<i32>} : memref<32x128xbf16, #tpu.memory_space<vmem>>, vector<32x128xbf16>,
    return
  }
  func.func @transform_0(%arg0: i32, %arg1: i32) -> (i32, i32) {
    %c0_i32 = arith.constant 0 : i32
    %c0_i32_0 = arith.constant 0 : i32
    return %arg0, %c0_i32 : i32, i32
  }
  func.func @transform_1(%arg0: i32, %arg1: i32) -> (i32, i32) {
    %c0_i32 = arith.constant 0 : i32
    %c0_i32_0 = arith.constant 0 : i32
    return %c0_i32, %arg1 : i32, i32
  }
  func.func @transform_2(%arg0: i32, %arg1: i32) -> (i32, i32) {
    %c0_i32 = arith.constant 0 : i32
    %c0_i32_0 = arith.constant 0 : i32
    return %c0_i32, %arg1 : i32, i32
  }
  func.func @transform_3(%arg0: i32, %arg1: i32) -> (i32, i32) {
    %c0_i32 = arith.constant 0 : i32
    %c0_i32_0 = arith.constant 0 : i32
    return %c0_i32, %arg1 : i32, i32
  }
  func.func @transform_4(%arg0: i32, %arg1: i32) -> (i32, i32) {
    %c0_i32 = arith.constant 0 : i32
    return %arg0, %arg1 : i32, i32
  }
  func.func @transform_5(%arg0: i32, %arg1: i32) -> (i32, i32) {
    %c0_i32 = arith.constant 0 : i32
    return %arg0, %arg1 : i32, i32
  }
}

module attributes {stable_mosaic.version = 11 : i64} {
  func.func @_mm_kernel(%arg0: i32, %arg1: i32, %arg2: memref<32x128xbf16, #tpu.memory_space<vmem>>, %arg3: memref<128x128xbf16, #tpu.memory_space<vmem>>, %arg4: memref<1x128xf32, #tpu.memory_space<vmem>>, %arg5: memref<1x128xf32, #tpu.memory_space<vmem>>, %arg6: memref<32x128xbf16, #tpu.memory_space<vmem>>) attributes {dimension_semantics = [#tpu.dimension_semantics<parallel>, #tpu.dimension_semantics<parallel>], iteration_bounds = array<i64: 1, 1>, scalar_prefetch = 0 : i64, scratch_operands = 0 : i64, tpu.core_type = #tpu.core_type<tc>, window_params = [{transform_indices = @transform_0, window_bounds = array<i64: 32, 128>}, {transform_indices = @transform_1, window_bounds = array<i64: 128, 128>}, {transform_indices = @transform_2, window_bounds = array<i64: 1, 128>}, {transform_indices = @transform_3, window_bounds = array<i64: 1, 128>}, {transform_indices = @transform_4, window_bounds = array<i64: 32, 128>}]} {
    %c0 = arith.constant 0 : index
    %c0_0 = arith.constant 0 : index
    %0 = vector.load %arg2[%c0, %c0_0] : memref<32x128xbf16, #tpu.memory_space<vmem>>, vector<32x128xbf16>
    %c0_1 = arith.constant 0 : index
    %c0_2 = arith.constant 0 : index
    %1 = vector.load %arg3[%c0_1, %c0_2] : memref<128x128xbf16, #tpu.memory_space<vmem>>, vector<128x128xbf16>
    %cst = arith.constant dense<0.000000e+00> : vector<32x128xf32>
    %2 = tpu.matmul %0, %1, %cst {dimension_numbers = #tpu.dot_dimension_numbers<[1], [0], [0], [1], [0, 0, 1, 1], [], []>} : vector<32x128xbf16>, vector<128x128xbf16>, vector<32x128xf32> -> vector<32x128xf32>
    %c0_3 = arith.constant 0 : index
    %c0_4 = arith.constant 0 : index
    %3 = vector.load %arg4[%c0_3, %c0_4] : memref<1x128xf32, #tpu.memory_space<vmem>>, vector<1x128xf32>
    %c0_5 = arith.constant 0 : index
    %c0_6 = arith.constant 0 : index
    %4 = vector.load %arg5[%c0_5, %c0_6] : memref<1x128xf32, #tpu.memory_space<vmem>>, vector<1x128xf32>
    %5 = vector.broadcast %3 : vector<1x128xf32> to vector<32x128xf32>
    %6 = arith.mulf %2, %5 : vector<32x128xf32>
    %7 = vector.broadcast %4 : vector<1x128xf32> to vector<32x128xf32>
    %8 = arith.addf %6, %7 : vector<32x128xf32>
    %cst_7 = arith.constant 0.000000e+00 : f32
    %9 = vector.broadcast %cst_7 : f32 to vector<32x128xf32>
    %10 = arith.maximumf %8, %9 : vector<32x128xf32>
    %11 = arith.truncf %10 : vector<32x128xf32> to vector<32x128xbf16>
    %c0_8 = arith.constant 0 : index
    %c0_9 = arith.constant 0 : index
    %12 = vector.load %arg6[%c0_8, %c0_9] : memref<32x128xbf16, #tpu.memory_space<vmem>>, vector<32x128xbf16>
    tpu.vector_store %arg6[%c0_8, %c0_9], %11 {strides = array<i32>} : memref<32x128xbf16, #tpu.memory_space<vmem>>, vector<32x128xbf16>,
    return
  }
  func.func @transform_0(%arg0: i32, %arg1: i32) -> (i32, i32) {
    %c0_i32 = arith.constant 0 : i32
    %c0_i32_0 = arith.constant 0 : i32
    return %arg0, %c0_i32 : i32, i32
  }
  func.func @transform_1(%arg0: i32, %arg1: i32) -> (i32, i32) {
    %c0_i32 = arith.constant 0 : i32
    %c0_i32_0 = arith.constant 0 : i32
    return %c0_i32, %arg1 : i32, i32
  }
  func.func @transform_2(%arg0: i32, %arg1: i32) -> (i32, i32) {
    %c0_i32 = arith.constant 0 : i32
    %c0_i32_0 = arith.constant 0 : i32
    return %c0_i32, %arg1 : i32, i32
  }
  func.func @transform_3(%arg0: i32, %arg1: i32) -> (i32, i32) {
    %c0_i32 = arith.constant 0 : i32
    %c0_i32_0 = arith.constant 0 : i32
    return %c0_i32, %arg1 : i32, i32
  }
  func.func @transform_4(%arg0: i32, %arg1: i32) -> (i32, i32) {
    %c0_i32 = arith.constant 0 : i32
    return %arg0, %arg1 : i32, i32
  }
}

module attributes {stable_mosaic.version = 11 : i64} {
  func.func @_mm_kernel(%arg0: i32, %arg1: i32, %arg2: memref<32x128xbf16, #tpu.memory_space<vmem>>, %arg3: memref<128x128xbf16, #tpu.memory_space<vmem>>, %arg4: memref<1x128xf32, #tpu.memory_space<vmem>>, %arg5: memref<1x128xf32, #tpu.memory_space<vmem>>, %arg6: memref<32x128xbf16, #tpu.memory_space<vmem>>) attributes {dimension_semantics = [#tpu.dimension_semantics<parallel>, #tpu.dimension_semantics<parallel>], iteration_bounds = array<i64: 1, 1>, scalar_prefetch = 0 : i64, scratch_operands = 0 : i64, tpu.core_type = #tpu.core_type<tc>, window_params = [{transform_indices = @transform_0, window_bounds = array<i64: 32, 128>}, {transform_indices = @transform_1, window_bounds = array<i64: 128, 128>}, {transform_indices = @transform_2, window_bounds = array<i64: 1, 128>}, {transform_indices = @transform_3, window_bounds = array<i64: 1, 128>}, {transform_indices = @transform_4, window_bounds = array<i64: 32, 128>}]} {
    %c0 = arith.constant 0 : index
    %c0_0 = arith.constant 0 : index
    %0 = vector.load %arg2[%c0, %c0_0] : memref<32x128xbf16, #tpu.memory_space<vmem>>, vector<32x128xbf16>
    %c0_1 = arith.constant 0 : index
    %c0_2 = arith.constant 0 : index
    %1 = vector.load %arg3[%c0_1, %c0_2] : memref<128x128xbf16, #tpu.memory_space<vmem>>, vector<128x128xbf16>
    %cst = arith.constant dense<0.000000e+00> : vector<32x128xf32>
    %2 = tpu.matmul %0, %1, %cst {dimension_numbers = #tpu.dot_dimension_numbers<[1], [0], [0], [1], [0, 0, 1, 1], [], []>} : vector<32x128xbf16>, vector<128x128xbf16>, vector<32x128xf32> -> vector<32x128xf32>
    %c0_3 = arith.constant 0 : index
    %c0_4 = arith.constant 0 : index
    %3 = vector.load %arg4[%c0_3, %c0_4] : memref<1x128xf32, #tpu.memory_space<vmem>>, vector<1x128xf32>
    %c0_5 = arith.constant 0 : index
    %c0_6 = arith.constant 0 : index
    %4 = vector.load %arg5[%c0_5, %c0_6] : memref<1x128xf32, #tpu.memory_space<vmem>>, vector<1x128xf32>
    %5 = vector.broadcast %3 : vector<1x128xf32> to vector<32x128xf32>
    %6 = arith.mulf %2, %5 : vector<32x128xf32>
    %7 = vector.broadcast %4 : vector<1x128xf32> to vector<32x128xf32>
    %8 = arith.addf %6, %7 : vector<32x128xf32>
    %cst_7 = arith.constant 0.000000e+00 : f32
    %9 = vector.broadcast %cst_7 : f32 to vector<32x128xf32>
    %10 = arith.maximumf %8, %9 : vector<32x128xf32>
    %11 = arith.truncf %10 : vector<32x128xf32> to vector<32x128xbf16>
    %c0_8 = arith.constant 0 : index
    %c0_9 = arith.constant 0 : index
    %12 = vector.load %arg6[%c0_8, %c0_9] : memref<32x128xbf16, #tpu.memory_space<vmem>>, vector<32x128xbf16>
    tpu.vector_store %arg6[%c0_8, %c0_9], %11 {strides = array<i32>} : memref<32x128xbf16, #tpu.memory_space<vmem>>, vector<32x128xbf16>,
    return
  }
  func.func @transform_0(%arg0: i32, %arg1: i32) -> (i32, i32) {
    %c0_i32 = arith.constant 0 : i32
    %c0_i32_0 = arith.constant 0 : i32
    return %arg0, %c0_i32 : i32, i32
  }
  func.func @transform_1(%arg0: i32, %arg1: i32) -> (i32, i32) {
    %c0_i32 = arith.constant 0 : i32
    %c0_i32_0 = arith.constant 0 : i32
    return %c0_i32, %arg1 : i32, i32
  }
  func.func @transform_2(%arg0: i32, %arg1: i32) -> (i32, i32) {
    %c0_i32 = arith.constant 0 : i32
    %c0_i32_0 = arith.constant 0 : i32
    return %c0_i32, %arg1 : i32, i32
  }
  func.func @transform_3(%arg0: i32, %arg1: i32) -> (i32, i32) {
    %c0_i32 = arith.constant 0 : i32
    %c0_i32_0 = arith.constant 0 : i32
    return %c0_i32, %arg1 : i32, i32
  }
  func.func @transform_4(%arg0: i32, %arg1: i32) -> (i32, i32) {
    %c0_i32 = arith.constant 0 : i32
    return %arg0, %arg1 : i32, i32
  }
}

module attributes {stable_mosaic.version = 11 : i64} {
  func.func @_mm_kernel(%arg0: i32, %arg1: i32, %arg2: memref<32x1152xbf16, #tpu.memory_space<vmem>>, %arg3: memref<1152x128xbf16, #tpu.memory_space<vmem>>, %arg4: memref<1x128xf32, #tpu.memory_space<vmem>>, %arg5: memref<1x128xf32, #tpu.memory_space<vmem>>, %arg6: memref<32x128xbf16, #tpu.memory_space<vmem>>) attributes {dimension_semantics = [#tpu.dimension_semantics<parallel>, #tpu.dimension_semantics<parallel>], iteration_bounds = array<i64: 1, 1>, scalar_prefetch = 0 : i64, scratch_operands = 0 : i64, tpu.core_type = #tpu.core_type<tc>, window_params = [{transform_indices = @transform_0, window_bounds = array<i64: 32, 1152>}, {transform_indices = @transform_1, window_bounds = array<i64: 1152, 128>}, {transform_indices = @transform_2, window_bounds = array<i64: 1, 128>}, {transform_indices = @transform_3, window_bounds = array<i64: 1, 128>}, {transform_indices = @transform_4, window_bounds = array<i64: 32, 128>}]} {
    %c0 = arith.constant 0 : index
    %c0_0 = arith.constant 0 : index
    %0 = vector.load %arg2[%c0, %c0_0] : memref<32x1152xbf16, #tpu.memory_space<vmem>>, vector<32x1152xbf16>
    %c0_1 = arith.constant 0 : index
    %c0_2 = arith.constant 0 : index
    %1 = vector.load %arg3[%c0_1, %c0_2] : memref<1152x128xbf16, #tpu.memory_space<vmem>>, vector<1152x128xbf16>
    %cst = arith.constant dense<0.000000e+00> : vector<32x128xf32>
    %2 = tpu.matmul %0, %1, %cst {dimension_numbers = #tpu.dot_dimension_numbers<[1], [0], [0], [1], [0, 0, 1, 1], [], []>} : vector<32x1152xbf16>, vector<1152x128xbf16>, vector<32x128xf32> -> vector<32x128xf32>
    %c0_3 = arith.constant 0 : index
    %c0_4 = arith.constant 0 : index
    %3 = vector.load %arg4[%c0_3, %c0_4] : memref<1x128xf32, #tpu.memory_space<vmem>>, vector<1x128xf32>
    %c0_5 = arith.constant 0 : index
    %c0_6 = arith.constant 0 : index
    %4 = vector.load %arg5[%c0_5, %c0_6] : memref<1x128xf32, #tpu.memory_space<vmem>>, vector<1x128xf32>
    %5 = vector.broadcast %3 : vector<1x128xf32> to vector<32x128xf32>
    %6 = arith.mulf %2, %5 : vector<32x128xf32>
    %7 = vector.broadcast %4 : vector<1x128xf32> to vector<32x128xf32>
    %8 = arith.addf %6, %7 : vector<32x128xf32>
    %cst_7 = arith.constant 0.000000e+00 : f32
    %9 = vector.broadcast %cst_7 : f32 to vector<32x128xf32>
    %10 = arith.maximumf %8, %9 : vector<32x128xf32>
    %11 = arith.truncf %10 : vector<32x128xf32> to vector<32x128xbf16>
    %c0_8 = arith.constant 0 : index
    %c0_9 = arith.constant 0 : index
    %12 = vector.load %arg6[%c0_8, %c0_9] : memref<32x128xbf16, #tpu.memory_space<vmem>>, vector<32x128xbf16>
    tpu.vector_store %arg6[%c0_8, %c0_9], %11 {strides = array<i32>} : memref<32x128xbf16, #tpu.memory_space<vmem>>, vector<32x128xbf16>,
    return
  }
  func.func @transform_0(%arg0: i32, %arg1: i32) -> (i32, i32) {
    %c0_i32 = arith.constant 0 : i32
    %c0_i32_0 = arith.constant 0 : i32
    return %arg0, %c0_i32 : i32, i32
  }
  func.func @transform_1(%arg0: i32, %arg1: i32) -> (i32, i32) {
    %c0_i32 = arith.constant 0 : i32
    %c0_i32_0 = arith.constant 0 : i32
    return %c0_i32, %arg1 : i32, i32
  }
  func.func @transform_2(%arg0: i32, %arg1: i32) -> (i32, i32) {
    %c0_i32 = arith.constant 0 : i32
    %c0_i32_0 = arith.constant 0 : i32
    return %c0_i32, %arg1 : i32, i32
  }
  func.func @transform_3(%arg0: i32, %arg1: i32) -> (i32, i32) {
    %c0_i32 = arith.constant 0 : i32
    %c0_i32_0 = arith.constant 0 : i32
    return %c0_i32, %arg1 : i32, i32
  }
  func.func @transform_4(%arg0: i32, %arg1: i32) -> (i32, i32) {
    %c0_i32 = arith.constant 0 : i32
    return %arg0, %arg1 : i32, i32
  }
}

module attributes {stable_mosaic.version = 11 : i64} {
  func.func @_mm_kernel(%arg0: i32, %arg1: i32, %arg2: memref<8x1152xbf16, #tpu.memory_space<vmem>>, %arg3: memref<1152x128xbf16, #tpu.memory_space<vmem>>, %arg4: memref<1x128xf32, #tpu.memory_space<vmem>>, %arg5: memref<1x128xf32, #tpu.memory_space<vmem>>, %arg6: memref<8x128xbf16, #tpu.memory_space<vmem>>) attributes {dimension_semantics = [#tpu.dimension_semantics<parallel>, #tpu.dimension_semantics<parallel>], iteration_bounds = array<i64: 1, 1>, scalar_prefetch = 0 : i64, scratch_operands = 0 : i64, tpu.core_type = #tpu.core_type<tc>, window_params = [{transform_indices = @transform_0, window_bounds = array<i64: 8, 1152>}, {transform_indices = @transform_1, window_bounds = array<i64: 1152, 128>}, {transform_indices = @transform_2, window_bounds = array<i64: 1, 128>}, {transform_indices = @transform_3, window_bounds = array<i64: 1, 128>}, {transform_indices = @transform_4, window_bounds = array<i64: 8, 128>}]} {
    %c0 = arith.constant 0 : index
    %c0_0 = arith.constant 0 : index
    %0 = vector.load %arg2[%c0, %c0_0] : memref<8x1152xbf16, #tpu.memory_space<vmem>>, vector<8x1152xbf16>
    %c0_1 = arith.constant 0 : index
    %c0_2 = arith.constant 0 : index
    %1 = vector.load %arg3[%c0_1, %c0_2] : memref<1152x128xbf16, #tpu.memory_space<vmem>>, vector<1152x128xbf16>
    %cst = arith.constant dense<0.000000e+00> : vector<8x128xf32>
    %2 = tpu.matmul %0, %1, %cst {dimension_numbers = #tpu.dot_dimension_numbers<[1], [0], [0], [1], [0, 0, 1, 1], [], []>} : vector<8x1152xbf16>, vector<1152x128xbf16>, vector<8x128xf32> -> vector<8x128xf32>
    %c0_3 = arith.constant 0 : index
    %c0_4 = arith.constant 0 : index
    %3 = vector.load %arg4[%c0_3, %c0_4] : memref<1x128xf32, #tpu.memory_space<vmem>>, vector<1x128xf32>
    %c0_5 = arith.constant 0 : index
    %c0_6 = arith.constant 0 : index
    %4 = vector.load %arg5[%c0_5, %c0_6] : memref<1x128xf32, #tpu.memory_space<vmem>>, vector<1x128xf32>
    %5 = vector.broadcast %3 : vector<1x128xf32> to vector<8x128xf32>
    %6 = arith.mulf %2, %5 : vector<8x128xf32>
    %7 = vector.broadcast %4 : vector<1x128xf32> to vector<8x128xf32>
    %8 = arith.addf %6, %7 : vector<8x128xf32>
    %cst_7 = arith.constant 0.000000e+00 : f32
    %9 = vector.broadcast %cst_7 : f32 to vector<8x128xf32>
    %10 = arith.maximumf %8, %9 : vector<8x128xf32>
    %11 = arith.truncf %10 : vector<8x128xf32> to vector<8x128xbf16>
    %c0_8 = arith.constant 0 : index
    %c0_9 = arith.constant 0 : index
    %12 = vector.load %arg6[%c0_8, %c0_9] : memref<8x128xbf16, #tpu.memory_space<vmem>>, vector<8x128xbf16>
    tpu.vector_store %arg6[%c0_8, %c0_9], %11 {strides = array<i32>} : memref<8x128xbf16, #tpu.memory_space<vmem>>, vector<8x128xbf16>,
    return
  }
  func.func @transform_0(%arg0: i32, %arg1: i32) -> (i32, i32) {
    %c0_i32 = arith.constant 0 : i32
    %c0_i32_0 = arith.constant 0 : i32
    return %arg0, %c0_i32 : i32, i32
  }
  func.func @transform_1(%arg0: i32, %arg1: i32) -> (i32, i32) {
    %c0_i32 = arith.constant 0 : i32
    %c0_i32_0 = arith.constant 0 : i32
    return %c0_i32, %arg1 : i32, i32
  }
  func.func @transform_2(%arg0: i32, %arg1: i32) -> (i32, i32) {
    %c0_i32 = arith.constant 0 : i32
    %c0_i32_0 = arith.constant 0 : i32
    return %c0_i32, %arg1 : i32, i32
  }
  func.func @transform_3(%arg0: i32, %arg1: i32) -> (i32, i32) {
    %c0_i32 = arith.constant 0 : i32
    %c0_i32_0 = arith.constant 0 : i32
    return %c0_i32, %arg1 : i32, i32
  }
  func.func @transform_4(%arg0: i32, %arg1: i32) -> (i32, i32) {
    %c0_i32 = arith.constant 0 : i32
    return %arg0, %arg1 : i32, i32
  }
}

module attributes {stable_mosaic.version = 11 : i64} {
  func.func @_mm_res_kernel(%arg0: i32, %arg1: i32, %arg2: memref<8x128xbf16, #tpu.memory_space<vmem>>, %arg3: memref<128x128xbf16, #tpu.memory_space<vmem>>, %arg4: memref<1x128xf32, #tpu.memory_space<vmem>>, %arg5: memref<1x128xf32, #tpu.memory_space<vmem>>, %arg6: memref<8x128xbf16, #tpu.memory_space<vmem>>, %arg7: memref<8x128xbf16, #tpu.memory_space<vmem>>) attributes {dimension_semantics = [#tpu.dimension_semantics<parallel>, #tpu.dimension_semantics<parallel>], iteration_bounds = array<i64: 1, 1>, scalar_prefetch = 0 : i64, scratch_operands = 0 : i64, tpu.core_type = #tpu.core_type<tc>, window_params = [{transform_indices = @transform_0, window_bounds = array<i64: 8, 128>}, {transform_indices = @transform_1, window_bounds = array<i64: 128, 128>}, {transform_indices = @transform_2, window_bounds = array<i64: 1, 128>}, {transform_indices = @transform_3, window_bounds = array<i64: 1, 128>}, {transform_indices = @transform_4, window_bounds = array<i64: 8, 128>}, {transform_indices = @transform_5, window_bounds = array<i64: 8, 128>}]} {
    %c0 = arith.constant 0 : index
    %c0_0 = arith.constant 0 : index
    %0 = vector.load %arg2[%c0, %c0_0] : memref<8x128xbf16, #tpu.memory_space<vmem>>, vector<8x128xbf16>
    %c0_1 = arith.constant 0 : index
    %c0_2 = arith.constant 0 : index
    %1 = vector.load %arg3[%c0_1, %c0_2] : memref<128x128xbf16, #tpu.memory_space<vmem>>, vector<128x128xbf16>
    %cst = arith.constant dense<0.000000e+00> : vector<8x128xf32>
    %2 = tpu.matmul %0, %1, %cst {dimension_numbers = #tpu.dot_dimension_numbers<[1], [0], [0], [1], [0, 0, 1, 1], [], []>} : vector<8x128xbf16>, vector<128x128xbf16>, vector<8x128xf32> -> vector<8x128xf32>
    %c0_3 = arith.constant 0 : index
    %c0_4 = arith.constant 0 : index
    %3 = vector.load %arg4[%c0_3, %c0_4] : memref<1x128xf32, #tpu.memory_space<vmem>>, vector<1x128xf32>
    %c0_5 = arith.constant 0 : index
    %c0_6 = arith.constant 0 : index
    %4 = vector.load %arg5[%c0_5, %c0_6] : memref<1x128xf32, #tpu.memory_space<vmem>>, vector<1x128xf32>
    %c0_7 = arith.constant 0 : index
    %c0_8 = arith.constant 0 : index
    %5 = vector.load %arg6[%c0_7, %c0_8] : memref<8x128xbf16, #tpu.memory_space<vmem>>, vector<8x128xbf16>
    %6 = vector.broadcast %3 : vector<1x128xf32> to vector<8x128xf32>
    %7 = arith.mulf %2, %6 : vector<8x128xf32>
    %8 = vector.broadcast %4 : vector<1x128xf32> to vector<8x128xf32>
    %9 = arith.addf %7, %8 : vector<8x128xf32>
    %10 = arith.extf %5 : vector<8x128xbf16> to vector<8x128xf32>
    %11 = arith.addf %9, %10 : vector<8x128xf32>
    %cst_9 = arith.constant 0.000000e+00 : f32
    %12 = vector.broadcast %cst_9 : f32 to vector<8x128xf32>
    %13 = arith.maximumf %11, %12 : vector<8x128xf32>
    %14 = arith.truncf %13 : vector<8x128xf32> to vector<8x128xbf16>
    %c0_10 = arith.constant 0 : index
    %c0_11 = arith.constant 0 : index
    %15 = vector.load %arg7[%c0_10, %c0_11] : memref<8x128xbf16, #tpu.memory_space<vmem>>, vector<8x128xbf16>
    tpu.vector_store %arg7[%c0_10, %c0_11], %14 {strides = array<i32>} : memref<8x128xbf16, #tpu.memory_space<vmem>>, vector<8x128xbf16>,
    return
  }
  func.func @transform_0(%arg0: i32, %arg1: i32) -> (i32, i32) {
    %c0_i32 = arith.constant 0 : i32
    %c0_i32_0 = arith.constant 0 : i32
    return %arg0, %c0_i32 : i32, i32
  }
  func.func @transform_1(%arg0: i32, %arg1: i32) -> (i32, i32) {
    %c0_i32 = arith.constant 0 : i32
    %c0_i32_0 = arith.constant 0 : i32
    return %c0_i32, %arg1 : i32, i32
  }
  func.func @transform_2(%arg0: i32, %arg1: i32) -> (i32, i32) {
    %c0_i32 = arith.constant 0 : i32
    %c0_i32_0 = arith.constant 0 : i32
    return %c0_i32, %arg1 : i32, i32
  }
  func.func @transform_3(%arg0: i32, %arg1: i32) -> (i32, i32) {
    %c0_i32 = arith.constant 0 : i32
    %c0_i32_0 = arith.constant 0 : i32
    return %c0_i32, %arg1 : i32, i32
  }
  func.func @transform_4(%arg0: i32, %arg1: i32) -> (i32, i32) {
    %c0_i32 = arith.constant 0 : i32
    return %arg0, %arg1 : i32, i32
  }
  func.func @transform_5(%arg0: i32, %arg1: i32) -> (i32, i32) {
    %c0_i32 = arith.constant 0 : i32
    return %arg0, %arg1 : i32, i32
  }
}

module attributes {stable_mosaic.version = 11 : i64} {
  func.func @_mm_kernel(%arg0: i32, %arg1: i32, %arg2: memref<8x128xbf16, #tpu.memory_space<vmem>>, %arg3: memref<128x128xbf16, #tpu.memory_space<vmem>>, %arg4: memref<1x128xf32, #tpu.memory_space<vmem>>, %arg5: memref<1x128xf32, #tpu.memory_space<vmem>>, %arg6: memref<8x128xbf16, #tpu.memory_space<vmem>>) attributes {dimension_semantics = [#tpu.dimension_semantics<parallel>, #tpu.dimension_semantics<parallel>], iteration_bounds = array<i64: 1, 1>, scalar_prefetch = 0 : i64, scratch_operands = 0 : i64, tpu.core_type = #tpu.core_type<tc>, window_params = [{transform_indices = @transform_0, window_bounds = array<i64: 8, 128>}, {transform_indices = @transform_1, window_bounds = array<i64: 128, 128>}, {transform_indices = @transform_2, window_bounds = array<i64: 1, 128>}, {transform_indices = @transform_3, window_bounds = array<i64: 1, 128>}, {transform_indices = @transform_4, window_bounds = array<i64: 8, 128>}]} {
    %c0 = arith.constant 0 : index
    %c0_0 = arith.constant 0 : index
    %0 = vector.load %arg2[%c0, %c0_0] : memref<8x128xbf16, #tpu.memory_space<vmem>>, vector<8x128xbf16>
    %c0_1 = arith.constant 0 : index
    %c0_2 = arith.constant 0 : index
    %1 = vector.load %arg3[%c0_1, %c0_2] : memref<128x128xbf16, #tpu.memory_space<vmem>>, vector<128x128xbf16>
    %cst = arith.constant dense<0.000000e+00> : vector<8x128xf32>
    %2 = tpu.matmul %0, %1, %cst {dimension_numbers = #tpu.dot_dimension_numbers<[1], [0], [0], [1], [0, 0, 1, 1], [], []>} : vector<8x128xbf16>, vector<128x128xbf16>, vector<8x128xf32> -> vector<8x128xf32>
    %c0_3 = arith.constant 0 : index
    %c0_4 = arith.constant 0 : index
    %3 = vector.load %arg4[%c0_3, %c0_4] : memref<1x128xf32, #tpu.memory_space<vmem>>, vector<1x128xf32>
    %c0_5 = arith.constant 0 : index
    %c0_6 = arith.constant 0 : index
    %4 = vector.load %arg5[%c0_5, %c0_6] : memref<1x128xf32, #tpu.memory_space<vmem>>, vector<1x128xf32>
    %5 = vector.broadcast %3 : vector<1x128xf32> to vector<8x128xf32>
    %6 = arith.mulf %2, %5 : vector<8x128xf32>
    %7 = vector.broadcast %4 : vector<1x128xf32> to vector<8x128xf32>
    %8 = arith.addf %6, %7 : vector<8x128xf32>
    %9 = arith.truncf %8 : vector<8x128xf32> to vector<8x128xbf16>
    %c0_7 = arith.constant 0 : index
    %c0_8 = arith.constant 0 : index
    %10 = vector.load %arg6[%c0_7, %c0_8] : memref<8x128xbf16, #tpu.memory_space<vmem>>, vector<8x128xbf16>
    tpu.vector_store %arg6[%c0_7, %c0_8], %9 {strides = array<i32>} : memref<8x128xbf16, #tpu.memory_space<vmem>>, vector<8x128xbf16>,
    return
  }
  func.func @transform_0(%arg0: i32, %arg1: i32) -> (i32, i32) {
    %c0_i32 = arith.constant 0 : i32
    %c0_i32_0 = arith.constant 0 : i32
    return %arg0, %c0_i32 : i32, i32
  }
  func.func @transform_1(%arg0: i32, %arg1: i32) -> (i32, i32) {
    %c0_i32 = arith.constant 0 : i32
    %c0_i32_0 = arith.constant 0 : i32
    return %c0_i32, %arg1 : i32, i32
  }
  func.func @transform_2(%arg0: i32, %arg1: i32) -> (i32, i32) {
    %c0_i32 = arith.constant 0 : i32
    %c0_i32_0 = arith.constant 0 : i32
    return %c0_i32, %arg1 : i32, i32
  }
  func.func @transform_3(%arg0: i32, %arg1: i32) -> (i32, i32) {
    %c0_i32 = arith.constant 0 : i32
    %c0_i32_0 = arith.constant 0 : i32
    return %c0_i32, %arg1 : i32, i32
  }
  func.func @transform_4(%arg0: i32, %arg1: i32) -> (i32, i32) {
    %c0_i32 = arith.constant 0 : i32
    return %arg0, %arg1 : i32, i32
  }
}

module attributes {stable_mosaic.version = 11 : i64} {
  func.func @_mm_kernel(%arg0: i32, %arg1: i32, %arg2: memref<8x128xbf16, #tpu.memory_space<vmem>>, %arg3: memref<128x128xbf16, #tpu.memory_space<vmem>>, %arg4: memref<1x128xf32, #tpu.memory_space<vmem>>, %arg5: memref<1x128xf32, #tpu.memory_space<vmem>>, %arg6: memref<8x128xbf16, #tpu.memory_space<vmem>>) attributes {dimension_semantics = [#tpu.dimension_semantics<parallel>, #tpu.dimension_semantics<parallel>], iteration_bounds = array<i64: 1, 1>, scalar_prefetch = 0 : i64, scratch_operands = 0 : i64, tpu.core_type = #tpu.core_type<tc>, window_params = [{transform_indices = @transform_0, window_bounds = array<i64: 8, 128>}, {transform_indices = @transform_1, window_bounds = array<i64: 128, 128>}, {transform_indices = @transform_2, window_bounds = array<i64: 1, 128>}, {transform_indices = @transform_3, window_bounds = array<i64: 1, 128>}, {transform_indices = @transform_4, window_bounds = array<i64: 8, 128>}]} {
    %c0 = arith.constant 0 : index
    %c0_0 = arith.constant 0 : index
    %0 = vector.load %arg2[%c0, %c0_0] : memref<8x128xbf16, #tpu.memory_space<vmem>>, vector<8x128xbf16>
    %c0_1 = arith.constant 0 : index
    %c0_2 = arith.constant 0 : index
    %1 = vector.load %arg3[%c0_1, %c0_2] : memref<128x128xbf16, #tpu.memory_space<vmem>>, vector<128x128xbf16>
    %cst = arith.constant dense<0.000000e+00> : vector<8x128xf32>
    %2 = tpu.matmul %0, %1, %cst {dimension_numbers = #tpu.dot_dimension_numbers<[1], [0], [0], [1], [0, 0, 1, 1], [], []>} : vector<8x128xbf16>, vector<128x128xbf16>, vector<8x128xf32> -> vector<8x128xf32>
    %c0_3 = arith.constant 0 : index
    %c0_4 = arith.constant 0 : index
    %3 = vector.load %arg4[%c0_3, %c0_4] : memref<1x128xf32, #tpu.memory_space<vmem>>, vector<1x128xf32>
    %c0_5 = arith.constant 0 : index
    %c0_6 = arith.constant 0 : index
    %4 = vector.load %arg5[%c0_5, %c0_6] : memref<1x128xf32, #tpu.memory_space<vmem>>, vector<1x128xf32>
    %5 = vector.broadcast %3 : vector<1x128xf32> to vector<8x128xf32>
    %6 = arith.mulf %2, %5 : vector<8x128xf32>
    %7 = vector.broadcast %4 : vector<1x128xf32> to vector<8x128xf32>
    %8 = arith.addf %6, %7 : vector<8x128xf32>
    %cst_7 = arith.constant 0.000000e+00 : f32
    %9 = vector.broadcast %cst_7 : f32 to vector<8x128xf32>
    %10 = arith.maximumf %8, %9 : vector<8x128xf32>
    %11 = arith.truncf %10 : vector<8x128xf32> to vector<8x128xbf16>
    %c0_8 = arith.constant 0 : index
    %c0_9 = arith.constant 0 : index
    %12 = vector.load %arg6[%c0_8, %c0_9] : memref<8x128xbf16, #tpu.memory_space<vmem>>, vector<8x128xbf16>
    tpu.vector_store %arg6[%c0_8, %c0_9], %11 {strides = array<i32>} : memref<8x128xbf16, #tpu.memory_space<vmem>>, vector<8x128xbf16>,
    return
  }
  func.func @transform_0(%arg0: i32, %arg1: i32) -> (i32, i32) {
    %c0_i32 = arith.constant 0 : i32
    %c0_i32_0 = arith.constant 0 : i32
    return %arg0, %c0_i32 : i32, i32
  }
  func.func @transform_1(%arg0: i32, %arg1: i32) -> (i32, i32) {
    %c0_i32 = arith.constant 0 : i32
    %c0_i32_0 = arith.constant 0 : i32
    return %c0_i32, %arg1 : i32, i32
  }
  func.func @transform_2(%arg0: i32, %arg1: i32) -> (i32, i32) {
    %c0_i32 = arith.constant 0 : i32
    %c0_i32_0 = arith.constant 0 : i32
    return %c0_i32, %arg1 : i32, i32
  }
  func.func @transform_3(%arg0: i32, %arg1: i32) -> (i32, i32) {
    %c0_i32 = arith.constant 0 : i32
    %c0_i32_0 = arith.constant 0 : i32
    return %c0_i32, %arg1 : i32, i32
  }
  func.func @transform_4(%arg0: i32, %arg1: i32) -> (i32, i32) {
    %c0_i32 = arith.constant 0 : i32
    return %arg0, %arg1 : i32, i32
  }
}

module attributes {stable_mosaic.version = 11 : i64} {
  func.func @_mm_kernel(%arg0: i32, %arg1: i32, %arg2: memref<8x128xbf16, #tpu.memory_space<vmem>>, %arg3: memref<128x256xbf16, #tpu.memory_space<vmem>>, %arg4: memref<1x256xf32, #tpu.memory_space<vmem>>, %arg5: memref<1x256xf32, #tpu.memory_space<vmem>>, %arg6: memref<8x256xbf16, #tpu.memory_space<vmem>>) attributes {dimension_semantics = [#tpu.dimension_semantics<parallel>, #tpu.dimension_semantics<parallel>], iteration_bounds = array<i64: 1, 1>, scalar_prefetch = 0 : i64, scratch_operands = 0 : i64, tpu.core_type = #tpu.core_type<tc>, window_params = [{transform_indices = @transform_0, window_bounds = array<i64: 8, 128>}, {transform_indices = @transform_1, window_bounds = array<i64: 128, 256>}, {transform_indices = @transform_2, window_bounds = array<i64: 1, 256>}, {transform_indices = @transform_3, window_bounds = array<i64: 1, 256>}, {transform_indices = @transform_4, window_bounds = array<i64: 8, 256>}]} {
    %c0 = arith.constant 0 : index
    %c0_0 = arith.constant 0 : index
    %0 = vector.load %arg2[%c0, %c0_0] : memref<8x128xbf16, #tpu.memory_space<vmem>>, vector<8x128xbf16>
    %c0_1 = arith.constant 0 : index
    %c0_2 = arith.constant 0 : index
    %1 = vector.load %arg3[%c0_1, %c0_2] : memref<128x256xbf16, #tpu.memory_space<vmem>>, vector<128x256xbf16>
    %cst = arith.constant dense<0.000000e+00> : vector<8x256xf32>
    %2 = tpu.matmul %0, %1, %cst {dimension_numbers = #tpu.dot_dimension_numbers<[1], [0], [0], [1], [0, 0, 1, 1], [], []>} : vector<8x128xbf16>, vector<128x256xbf16>, vector<8x256xf32> -> vector<8x256xf32>
    %c0_3 = arith.constant 0 : index
    %c0_4 = arith.constant 0 : index
    %3 = vector.load %arg4[%c0_3, %c0_4] : memref<1x256xf32, #tpu.memory_space<vmem>>, vector<1x256xf32>
    %c0_5 = arith.constant 0 : index
    %c0_6 = arith.constant 0 : index
    %4 = vector.load %arg5[%c0_5, %c0_6] : memref<1x256xf32, #tpu.memory_space<vmem>>, vector<1x256xf32>
    %5 = vector.broadcast %3 : vector<1x256xf32> to vector<8x256xf32>
    %6 = arith.mulf %2, %5 : vector<8x256xf32>
    %7 = vector.broadcast %4 : vector<1x256xf32> to vector<8x256xf32>
    %8 = arith.addf %6, %7 : vector<8x256xf32>
    %9 = arith.truncf %8 : vector<8x256xf32> to vector<8x256xbf16>
    %c0_7 = arith.constant 0 : index
    %c0_8 = arith.constant 0 : index
    %10 = vector.load %arg6[%c0_7, %c0_8] : memref<8x256xbf16, #tpu.memory_space<vmem>>, vector<8x256xbf16>
    tpu.vector_store %arg6[%c0_7, %c0_8], %9 {strides = array<i32>} : memref<8x256xbf16, #tpu.memory_space<vmem>>, vector<8x256xbf16>,
    return
  }
  func.func @transform_0(%arg0: i32, %arg1: i32) -> (i32, i32) {
    %c0_i32 = arith.constant 0 : i32
    %c0_i32_0 = arith.constant 0 : i32
    return %arg0, %c0_i32 : i32, i32
  }
  func.func @transform_1(%arg0: i32, %arg1: i32) -> (i32, i32) {
    %c0_i32 = arith.constant 0 : i32
    %c0_i32_0 = arith.constant 0 : i32
    return %c0_i32, %arg1 : i32, i32
  }
  func.func @transform_2(%arg0: i32, %arg1: i32) -> (i32, i32) {
    %c0_i32 = arith.constant 0 : i32
    %c0_i32_0 = arith.constant 0 : i32
    return %c0_i32, %arg1 : i32, i32
  }
  func.func @transform_3(%arg0: i32, %arg1: i32) -> (i32, i32) {
    %c0_i32 = arith.constant 0 : i32
    %c0_i32_0 = arith.constant 0 : i32
    return %c0_i32, %arg1 : i32, i32
  }
  func.func @transform_4(%arg0: i32, %arg1: i32) -> (i32, i32) {
    %c0_i32 = arith.constant 0 : i32
    return %arg0, %arg1 : i32, i32
  }
}

module attributes {stable_mosaic.version = 11 : i64} {
  func.func @_mm_kernel(%arg0: i32, %arg1: i32, %arg2: memref<8x256xbf16, #tpu.memory_space<vmem>>, %arg3: memref<256x128xbf16, #tpu.memory_space<vmem>>, %arg4: memref<1x128xf32, #tpu.memory_space<vmem>>, %arg5: memref<1x128xf32, #tpu.memory_space<vmem>>, %arg6: memref<8x128xbf16, #tpu.memory_space<vmem>>) attributes {dimension_semantics = [#tpu.dimension_semantics<parallel>, #tpu.dimension_semantics<parallel>], iteration_bounds = array<i64: 1, 1>, scalar_prefetch = 0 : i64, scratch_operands = 0 : i64, tpu.core_type = #tpu.core_type<tc>, window_params = [{transform_indices = @transform_0, window_bounds = array<i64: 8, 256>}, {transform_indices = @transform_1, window_bounds = array<i64: 256, 128>}, {transform_indices = @transform_2, window_bounds = array<i64: 1, 128>}, {transform_indices = @transform_3, window_bounds = array<i64: 1, 128>}, {transform_indices = @transform_4, window_bounds = array<i64: 8, 128>}]} {
    %c0 = arith.constant 0 : index
    %c0_0 = arith.constant 0 : index
    %0 = vector.load %arg2[%c0, %c0_0] : memref<8x256xbf16, #tpu.memory_space<vmem>>, vector<8x256xbf16>
    %c0_1 = arith.constant 0 : index
    %c0_2 = arith.constant 0 : index
    %1 = vector.load %arg3[%c0_1, %c0_2] : memref<256x128xbf16, #tpu.memory_space<vmem>>, vector<256x128xbf16>
    %cst = arith.constant dense<0.000000e+00> : vector<8x128xf32>
    %2 = tpu.matmul %0, %1, %cst {dimension_numbers = #tpu.dot_dimension_numbers<[1], [0], [0], [1], [0, 0, 1, 1], [], []>} : vector<8x256xbf16>, vector<256x128xbf16>, vector<8x128xf32> -> vector<8x128xf32>
    %c0_3 = arith.constant 0 : index
    %c0_4 = arith.constant 0 : index
    %3 = vector.load %arg4[%c0_3, %c0_4] : memref<1x128xf32, #tpu.memory_space<vmem>>, vector<1x128xf32>
    %c0_5 = arith.constant 0 : index
    %c0_6 = arith.constant 0 : index
    %4 = vector.load %arg5[%c0_5, %c0_6] : memref<1x128xf32, #tpu.memory_space<vmem>>, vector<1x128xf32>
    %5 = vector.broadcast %3 : vector<1x128xf32> to vector<8x128xf32>
    %6 = arith.mulf %2, %5 : vector<8x128xf32>
    %7 = vector.broadcast %4 : vector<1x128xf32> to vector<8x128xf32>
    %8 = arith.addf %6, %7 : vector<8x128xf32>
    %cst_7 = arith.constant 0.000000e+00 : f32
    %9 = vector.broadcast %cst_7 : f32 to vector<8x128xf32>
    %10 = arith.maximumf %8, %9 : vector<8x128xf32>
    %11 = arith.truncf %10 : vector<8x128xf32> to vector<8x128xbf16>
    %c0_8 = arith.constant 0 : index
    %c0_9 = arith.constant 0 : index
    %12 = vector.load %arg6[%c0_8, %c0_9] : memref<8x128xbf16, #tpu.memory_space<vmem>>, vector<8x128xbf16>
    tpu.vector_store %arg6[%c0_8, %c0_9], %11 {strides = array<i32>} : memref<8x128xbf16, #tpu.memory_space<vmem>>, vector<8x128xbf16>,
    return
  }
  func.func @transform_0(%arg0: i32, %arg1: i32) -> (i32, i32) {
    %c0_i32 = arith.constant 0 : i32
    %c0_i32_0 = arith.constant 0 : i32
    return %arg0, %c0_i32 : i32, i32
  }
  func.func @transform_1(%arg0: i32, %arg1: i32) -> (i32, i32) {
    %c0_i32 = arith.constant 0 : i32
    %c0_i32_0 = arith.constant 0 : i32
    return %c0_i32, %arg1 : i32, i32
  }
  func.func @transform_2(%arg0: i32, %arg1: i32) -> (i32, i32) {
    %c0_i32 = arith.constant 0 : i32
    %c0_i32_0 = arith.constant 0 : i32
    return %c0_i32, %arg1 : i32, i32
  }
  func.func @transform_3(%arg0: i32, %arg1: i32) -> (i32, i32) {
    %c0_i32 = arith.constant 0 : i32
    %c0_i32_0 = arith.constant 0 : i32
    return %c0_i32, %arg1 : i32, i32
  }
  func.func @transform_4(%arg0: i32, %arg1: i32) -> (i32, i32) {
    %c0_i32 = arith.constant 0 : i32
    return %arg0, %arg1 : i32, i32
  }
}

module attributes {stable_mosaic.version = 11 : i64} {
  func.func @_mm_res_kernel(%arg0: i32, %arg1: i32, %arg2: memref<8x128xbf16, #tpu.memory_space<vmem>>, %arg3: memref<128x256xbf16, #tpu.memory_space<vmem>>, %arg4: memref<1x256xf32, #tpu.memory_space<vmem>>, %arg5: memref<1x256xf32, #tpu.memory_space<vmem>>, %arg6: memref<8x256xbf16, #tpu.memory_space<vmem>>, %arg7: memref<8x256xbf16, #tpu.memory_space<vmem>>) attributes {dimension_semantics = [#tpu.dimension_semantics<parallel>, #tpu.dimension_semantics<parallel>], iteration_bounds = array<i64: 1, 1>, scalar_prefetch = 0 : i64, scratch_operands = 0 : i64, tpu.core_type = #tpu.core_type<tc>, window_params = [{transform_indices = @transform_0, window_bounds = array<i64: 8, 128>}, {transform_indices = @transform_1, window_bounds = array<i64: 128, 256>}, {transform_indices = @transform_2, window_bounds = array<i64: 1, 256>}, {transform_indices = @transform_3, window_bounds = array<i64: 1, 256>}, {transform_indices = @transform_4, window_bounds = array<i64: 8, 256>}, {transform_indices = @transform_5, window_bounds = array<i64: 8, 256>}]} {
    %c0 = arith.constant 0 : index
    %c0_0 = arith.constant 0 : index
    %0 = vector.load %arg2[%c0, %c0_0] : memref<8x128xbf16, #tpu.memory_space<vmem>>, vector<8x128xbf16>
    %c0_1 = arith.constant 0 : index
    %c0_2 = arith.constant 0 : index
    %1 = vector.load %arg3[%c0_1, %c0_2] : memref<128x256xbf16, #tpu.memory_space<vmem>>, vector<128x256xbf16>
    %cst = arith.constant dense<0.000000e+00> : vector<8x256xf32>
    %2 = tpu.matmul %0, %1, %cst {dimension_numbers = #tpu.dot_dimension_numbers<[1], [0], [0], [1], [0, 0, 1, 1], [], []>} : vector<8x128xbf16>, vector<128x256xbf16>, vector<8x256xf32> -> vector<8x256xf32>
    %c0_3 = arith.constant 0 : index
    %c0_4 = arith.constant 0 : index
    %3 = vector.load %arg4[%c0_3, %c0_4] : memref<1x256xf32, #tpu.memory_space<vmem>>, vector<1x256xf32>
    %c0_5 = arith.constant 0 : index
    %c0_6 = arith.constant 0 : index
    %4 = vector.load %arg5[%c0_5, %c0_6] : memref<1x256xf32, #tpu.memory_space<vmem>>, vector<1x256xf32>
    %c0_7 = arith.constant 0 : index
    %c0_8 = arith.constant 0 : index
    %5 = vector.load %arg6[%c0_7, %c0_8] : memref<8x256xbf16, #tpu.memory_space<vmem>>, vector<8x256xbf16>
    %6 = vector.broadcast %3 : vector<1x256xf32> to vector<8x256xf32>
    %7 = arith.mulf %2, %6 : vector<8x256xf32>
    %8 = vector.broadcast %4 : vector<1x256xf32> to vector<8x256xf32>
    %9 = arith.addf %7, %8 : vector<8x256xf32>
    %10 = arith.extf %5 : vector<8x256xbf16> to vector<8x256xf32>
    %11 = arith.addf %9, %10 : vector<8x256xf32>
    %cst_9 = arith.constant 0.000000e+00 : f32
    %12 = vector.broadcast %cst_9 : f32 to vector<8x256xf32>
    %13 = arith.maximumf %11, %12 : vector<8x256xf32>
    %14 = arith.truncf %13 : vector<8x256xf32> to vector<8x256xbf16>
    %c0_10 = arith.constant 0 : index
    %c0_11 = arith.constant 0 : index
    %15 = vector.load %arg7[%c0_10, %c0_11] : memref<8x256xbf16, #tpu.memory_space<vmem>>, vector<8x256xbf16>
    tpu.vector_store %arg7[%c0_10, %c0_11], %14 {strides = array<i32>} : memref<8x256xbf16, #tpu.memory_space<vmem>>, vector<8x256xbf16>,
    return
  }
  func.func @transform_0(%arg0: i32, %arg1: i32) -> (i32, i32) {
    %c0_i32 = arith.constant 0 : i32
    %c0_i32_0 = arith.constant 0 : i32
    return %arg0, %c0_i32 : i32, i32
  }
  func.func @transform_1(%arg0: i32, %arg1: i32) -> (i32, i32) {
    %c0_i32 = arith.constant 0 : i32
    %c0_i32_0 = arith.constant 0 : i32
    return %c0_i32, %arg1 : i32, i32
  }
  func.func @transform_2(%arg0: i32, %arg1: i32) -> (i32, i32) {
    %c0_i32 = arith.constant 0 : i32
    %c0_i32_0 = arith.constant 0 : i32
    return %c0_i32, %arg1 : i32, i32
  }
  func.func @transform_3(%arg0: i32, %arg1: i32) -> (i32, i32) {
    %c0_i32 = arith.constant 0 : i32
    %c0_i32_0 = arith.constant 0 : i32
    return %c0_i32, %arg1 : i32, i32
  }
  func.func @transform_4(%arg0: i32, %arg1: i32) -> (i32, i32) {
    %c0_i32 = arith.constant 0 : i32
    return %arg0, %arg1 : i32, i32
  }
  func.func @transform_5(%arg0: i32, %arg1: i32) -> (i32, i32) {
    %c0_i32 = arith.constant 0 : i32
    return %arg0, %arg1 : i32, i32
  }
}

module attributes {stable_mosaic.version = 11 : i64} {
  func.func @_mm_kernel(%arg0: i32, %arg1: i32, %arg2: memref<8x1152xbf16, #tpu.memory_space<vmem>>, %arg3: memref<1152x128xbf16, #tpu.memory_space<vmem>>, %arg4: memref<1x128xf32, #tpu.memory_space<vmem>>, %arg5: memref<1x128xf32, #tpu.memory_space<vmem>>, %arg6: memref<8x128xbf16, #tpu.memory_space<vmem>>) attributes {dimension_semantics = [#tpu.dimension_semantics<parallel>, #tpu.dimension_semantics<parallel>], iteration_bounds = array<i64: 1, 1>, scalar_prefetch = 0 : i64, scratch_operands = 0 : i64, tpu.core_type = #tpu.core_type<tc>, window_params = [{transform_indices = @transform_0, window_bounds = array<i64: 8, 1152>}, {transform_indices = @transform_1, window_bounds = array<i64: 1152, 128>}, {transform_indices = @transform_2, window_bounds = array<i64: 1, 128>}, {transform_indices = @transform_3, window_bounds = array<i64: 1, 128>}, {transform_indices = @transform_4, window_bounds = array<i64: 8, 128>}]} {
    %c0 = arith.constant 0 : index
    %c0_0 = arith.constant 0 : index
    %0 = vector.load %arg2[%c0, %c0_0] : memref<8x1152xbf16, #tpu.memory_space<vmem>>, vector<8x1152xbf16>
    %c0_1 = arith.constant 0 : index
    %c0_2 = arith.constant 0 : index
    %1 = vector.load %arg3[%c0_1, %c0_2] : memref<1152x128xbf16, #tpu.memory_space<vmem>>, vector<1152x128xbf16>
    %cst = arith.constant dense<0.000000e+00> : vector<8x128xf32>
    %2 = tpu.matmul %0, %1, %cst {dimension_numbers = #tpu.dot_dimension_numbers<[1], [0], [0], [1], [0, 0, 1, 1], [], []>} : vector<8x1152xbf16>, vector<1152x128xbf16>, vector<8x128xf32> -> vector<8x128xf32>
    %c0_3 = arith.constant 0 : index
    %c0_4 = arith.constant 0 : index
    %3 = vector.load %arg4[%c0_3, %c0_4] : memref<1x128xf32, #tpu.memory_space<vmem>>, vector<1x128xf32>
    %c0_5 = arith.constant 0 : index
    %c0_6 = arith.constant 0 : index
    %4 = vector.load %arg5[%c0_5, %c0_6] : memref<1x128xf32, #tpu.memory_space<vmem>>, vector<1x128xf32>
    %5 = vector.broadcast %3 : vector<1x128xf32> to vector<8x128xf32>
    %6 = arith.mulf %2, %5 : vector<8x128xf32>
    %7 = vector.broadcast %4 : vector<1x128xf32> to vector<8x128xf32>
    %8 = arith.addf %6, %7 : vector<8x128xf32>
    %cst_7 = arith.constant 0.000000e+00 : f32
    %9 = vector.broadcast %cst_7 : f32 to vector<8x128xf32>
    %10 = arith.maximumf %8, %9 : vector<8x128xf32>
    %11 = arith.truncf %10 : vector<8x128xf32> to vector<8x128xbf16>
    %c0_8 = arith.constant 0 : index
    %c0_9 = arith.constant 0 : index
    %12 = vector.load %arg6[%c0_8, %c0_9] : memref<8x128xbf16, #tpu.memory_space<vmem>>, vector<8x128xbf16>
    tpu.vector_store %arg6[%c0_8, %c0_9], %11 {strides = array<i32>} : memref<8x128xbf16, #tpu.memory_space<vmem>>, vector<8x128xbf16>,
    return
  }
  func.func @transform_0(%arg0: i32, %arg1: i32) -> (i32, i32) {
    %c0_i32 = arith.constant 0 : i32
    %c0_i32_0 = arith.constant 0 : i32
    return %arg0, %c0_i32 : i32, i32
  }
  func.func @transform_1(%arg0: i32, %arg1: i32) -> (i32, i32) {
    %c0_i32 = arith.constant 0 : i32
    %c0_i32_0 = arith.constant 0 : i32
    return %c0_i32, %arg1 : i32, i32
  }
  func.func @transform_2(%arg0: i32, %arg1: i32) -> (i32, i32) {
    %c0_i32 = arith.constant 0 : i32
    %c0_i32_0 = arith.constant 0 : i32
    return %c0_i32, %arg1 : i32, i32
  }
  func.func @transform_3(%arg0: i32, %arg1: i32) -> (i32, i32) {
    %c0_i32 = arith.constant 0 : i32
    %c0_i32_0 = arith.constant 0 : i32
    return %c0_i32, %arg1 : i32, i32
  }
  func.func @transform_4(%arg0: i32, %arg1: i32) -> (i32, i32) {
    %c0_i32 = arith.constant 0 : i32
    return %arg0, %arg1 : i32, i32
  }
}

module attributes {stable_mosaic.version = 11 : i64} {
  func.func @_mm_kernel(%arg0: i32, %arg1: i32, %arg2: memref<8x256xbf16, #tpu.memory_space<vmem>>, %arg3: memref<256x128xbf16, #tpu.memory_space<vmem>>, %arg4: memref<1x128xf32, #tpu.memory_space<vmem>>, %arg5: memref<1x128xf32, #tpu.memory_space<vmem>>, %arg6: memref<8x128xbf16, #tpu.memory_space<vmem>>) attributes {dimension_semantics = [#tpu.dimension_semantics<parallel>, #tpu.dimension_semantics<parallel>], iteration_bounds = array<i64: 1, 1>, scalar_prefetch = 0 : i64, scratch_operands = 0 : i64, tpu.core_type = #tpu.core_type<tc>, window_params = [{transform_indices = @transform_0, window_bounds = array<i64: 8, 256>}, {transform_indices = @transform_1, window_bounds = array<i64: 256, 128>}, {transform_indices = @transform_2, window_bounds = array<i64: 1, 128>}, {transform_indices = @transform_3, window_bounds = array<i64: 1, 128>}, {transform_indices = @transform_4, window_bounds = array<i64: 8, 128>}]} {
    %c0 = arith.constant 0 : index
    %c0_0 = arith.constant 0 : index
    %0 = vector.load %arg2[%c0, %c0_0] : memref<8x256xbf16, #tpu.memory_space<vmem>>, vector<8x256xbf16>
    %c0_1 = arith.constant 0 : index
    %c0_2 = arith.constant 0 : index
    %1 = vector.load %arg3[%c0_1, %c0_2] : memref<256x128xbf16, #tpu.memory_space<vmem>>, vector<256x128xbf16>
    %cst = arith.constant dense<0.000000e+00> : vector<8x128xf32>
    %2 = tpu.matmul %0, %1, %cst {dimension_numbers = #tpu.dot_dimension_numbers<[1], [0], [0], [1], [0, 0, 1, 1], [], []>} : vector<8x256xbf16>, vector<256x128xbf16>, vector<8x128xf32> -> vector<8x128xf32>
    %c0_3 = arith.constant 0 : index
    %c0_4 = arith.constant 0 : index
    %3 = vector.load %arg4[%c0_3, %c0_4] : memref<1x128xf32, #tpu.memory_space<vmem>>, vector<1x128xf32>
    %c0_5 = arith.constant 0 : index
    %c0_6 = arith.constant 0 : index
    %4 = vector.load %arg5[%c0_5, %c0_6] : memref<1x128xf32, #tpu.memory_space<vmem>>, vector<1x128xf32>
    %5 = vector.broadcast %3 : vector<1x128xf32> to vector<8x128xf32>
    %6 = arith.mulf %2, %5 : vector<8x128xf32>
    %7 = vector.broadcast %4 : vector<1x128xf32> to vector<8x128xf32>
    %8 = arith.addf %6, %7 : vector<8x128xf32>
    %cst_7 = arith.constant 0.000000e+00 : f32
    %9 = vector.broadcast %cst_7 : f32 to vector<8x128xf32>
    %10 = arith.maximumf %8, %9 : vector<8x128xf32>
    %11 = arith.truncf %10 : vector<8x128xf32> to vector<8x128xbf16>
    %c0_8 = arith.constant 0 : index
    %c0_9 = arith.constant 0 : index
    %12 = vector.load %arg6[%c0_8, %c0_9] : memref<8x128xbf16, #tpu.memory_space<vmem>>, vector<8x128xbf16>
    tpu.vector_store %arg6[%c0_8, %c0_9], %11 {strides = array<i32>} : memref<8x128xbf16, #tpu.memory_space<vmem>>, vector<8x128xbf16>,
    return
  }
  func.func @transform_0(%arg0: i32, %arg1: i32) -> (i32, i32) {
    %c0_i32 = arith.constant 0 : i32
    %c0_i32_0 = arith.constant 0 : i32
    return %arg0, %c0_i32 : i32, i32
  }
  func.func @transform_1(%arg0: i32, %arg1: i32) -> (i32, i32) {
    %c0_i32 = arith.constant 0 : i32
    %c0_i32_0 = arith.constant 0 : i32
    return %c0_i32, %arg1 : i32, i32
  }
  func.func @transform_2(%arg0: i32, %arg1: i32) -> (i32, i32) {
    %c0_i32 = arith.constant 0 : i32
    %c0_i32_0 = arith.constant 0 : i32
    return %c0_i32, %arg1 : i32, i32
  }
  func.func @transform_3(%arg0: i32, %arg1: i32) -> (i32, i32) {
    %c0_i32 = arith.constant 0 : i32
    %c0_i32_0 = arith.constant 0 : i32
    return %c0_i32, %arg1 : i32, i32
  }
  func.func @transform_4(%arg0: i32, %arg1: i32) -> (i32, i32) {
    %c0_i32 = arith.constant 0 : i32
    return %arg0, %arg1 : i32, i32
  }
}

module attributes {stable_mosaic.version = 11 : i64} {
  func.func @_head_kernel(%arg0: i32, %arg1: memref<2x1x256xbf16, #tpu.memory_space<vmem>>, %arg2: memref<256x128xf32, #tpu.memory_space<vmem>>, %arg3: memref<1x128xf32, #tpu.memory_space<vmem>>, %arg4: memref<2x128xf32, #tpu.memory_space<vmem>>) attributes {dimension_semantics = [#tpu.dimension_semantics<parallel>], iteration_bounds = array<i64: 1>, scalar_prefetch = 0 : i64, scratch_operands = 0 : i64, tpu.core_type = #tpu.core_type<tc>, window_params = [{transform_indices = @transform_0, window_bounds = array<i64: 2, 1, 256>}, {pipeline_mode = #tpu.pipeline_mode<synchronous>, transform_indices = @transform_1, window_bounds = array<i64: 256, 128>}, {pipeline_mode = #tpu.pipeline_mode<synchronous>, transform_indices = @transform_2, window_bounds = array<i64: 1, 128>}, {transform_indices = @transform_3, window_bounds = array<i64: 2, 128>}]} {
    %c0 = arith.constant 0 : index
    %c0_0 = arith.constant 0 : index
    %c0_1 = arith.constant 0 : index
    %0 = vector.load %arg1[%c0, %c0_0, %c0_1] : memref<2x1x256xbf16, #tpu.memory_space<vmem>>, vector<2x1x256xbf16>
    %1 = arith.extf %0 : vector<2x1x256xbf16> to vector<2x1x256xf32>
    %cst = arith.constant dense<0.000000e+00> : vector<2x256xf32>
    %2 = vector.multi_reduction <add>, %1, %cst [1] : vector<2x1x256xf32> to vector<2x256xf32>
    %cst_2 = arith.constant 1.000000e+00 : f32
    %3 = vector.broadcast %cst_2 : f32 to vector<2x256xf32>
    %4 = arith.divf %2, %3 : vector<2x256xf32>
    %c0_3 = arith.constant 0 : index
    %c0_4 = arith.constant 0 : index
    %5 = vector.load %arg2[%c0_3, %c0_4] : memref<256x128xf32, #tpu.memory_space<vmem>>, vector<256x128xf32>
    %cst_5 = arith.constant dense<0.000000e+00> : vector<2x128xf32>
    %6 = tpu.matmul %4, %5, %cst_5 {dimension_numbers = #tpu.dot_dimension_numbers<[1], [0], [0], [1], [0, 0, 1, 1], [], []>} : vector<2x256xf32>, vector<256x128xf32>, vector<2x128xf32> -> vector<2x128xf32>
    %c0_6 = arith.constant 0 : index
    %c0_7 = arith.constant 0 : index
    %7 = vector.load %arg3[%c0_6, %c0_7] : memref<1x128xf32, #tpu.memory_space<vmem>>, vector<1x128xf32>
    %8 = vector.broadcast %7 : vector<1x128xf32> to vector<2x128xf32>
    %9 = arith.addf %6, %8 : vector<2x128xf32>
    %cst_8 = arith.constant 0.000000e+00 : f32
    %10 = vector.broadcast %cst_8 : f32 to vector<2x128xf32>
    %11 = arith.subf %10, %9 : vector<2x128xf32>
    %12 = math.exp %11 : vector<2x128xf32>
    %cst_9 = arith.constant 1.000000e+00 : f32
    %13 = vector.broadcast %cst_9 : f32 to vector<2x128xf32>
    %14 = arith.addf %13, %12 : vector<2x128xf32>
    %cst_10 = arith.constant 1.000000e+00 : f32
    %15 = vector.broadcast %cst_10 : f32 to vector<2x128xf32>
    %16 = arith.divf %15, %14 : vector<2x128xf32>
    %c0_11 = arith.constant 0 : index
    %c0_12 = arith.constant 0 : index
    %17 = vector.load %arg4[%c0_11, %c0_12] : memref<2x128xf32, #tpu.memory_space<vmem>>, vector<2x128xf32>
    tpu.vector_store %arg4[%c0_11, %c0_12], %16 {strides = array<i32>} : memref<2x128xf32, #tpu.memory_space<vmem>>, vector<2x128xf32>,
    return
  }
  func.func @transform_0(%arg0: i32) -> (i32, i32, i32) {
    %c0_i32 = arith.constant 0 : i32
    %c0_i32_0 = arith.constant 0 : i32
    %c0_i32_1 = arith.constant 0 : i32
    return %arg0, %c0_i32, %c0_i32_0 : i32, i32, i32
  }
  func.func @transform_1(%arg0: i32) -> (i32, i32) {
    %c0_i32 = arith.constant 0 : i32
    %c0_i32_0 = arith.constant 0 : i32
    %c0_i32_1 = arith.constant 0 : i32
    return %c0_i32, %c0_i32_0 : i32, i32
  }
  func.func @transform_2(%arg0: i32) -> (i32, i32) {
    %c0_i32 = arith.constant 0 : i32
    %c0_i32_0 = arith.constant 0 : i32
    %c0_i32_1 = arith.constant 0 : i32
    return %c0_i32, %c0_i32_0 : i32, i32
  }
  func.func @transform_3(%arg0: i32) -> (i32, i32) {
    %c0_i32 = arith.constant 0 : i32
    %c0_i32_0 = arith.constant 0 : i32
    return %arg0, %c0_i32 : i32, i32
  }
}

</mosaic_0001>

<bundles_post_ra>
// kernel: forward.55
= control target key start
LH: loop header
LB: loop body
LE: loop exit
PB: predicated region body
PF: predicated region fallthrough
CT: control target
= control target key end

     0   :  { %s2493_s1 = inlined_call_operand.vmem [shape: bf16[256,128], index: 1, kind: input, shape index: {}]   ;;  %s2494_s0 = inlined_call_operand.vmem [shape: bf16[512,256], index: 0, kind: input, shape index: {}]   ;;  %s2495_s2 = inlined_call_operand.vmem [shape: f32[1,128], index: 2, kind: input, shape index: {}]   ;;  %s2496_s3 = inlined_call_operand.vmem [shape: f32[1,128], index: 3, kind: input, shape index: {}]   ;;  %s2497_s4 = inlined_call_operand.vmem [shape: bf16[512,128], index: 4, kind: output, shape index: {}]  }
   0x1   :  { %v1590_v0 = vld [vmem:[%s2493_s1 + $0x38] sm:$0xff]  ;;  %v1589_v2 = vld [vmem:[%s2493_s1 + $0x30] sm:$0xff]  ;;  %v1588_v4 = vld [vmem:[%s2493_s1 + $0x28] sm:$0xff] }
   0x2   :  { %v1598_v1 = vld [vmem:[%s2493_s1 + $0x78] sm:$0xff]  ;;  %529 = vmatpush.bf16.msra.mxu0 %v1590_v0  ;;  %1790 = vmatpush.bf16.msra.mxu2 %v1590_v0  ;;  %v1597_v3 = vld [vmem:[%s2493_s1 + $0x70] sm:$0xff]  ;;  %v1596_v5 = vld [vmem:[%s2493_s1 + $0x68] sm:$0xff] }
   0x3   :  { %698 = vmatpush.bf16.msra.mxu1 %v1598_v1  ;;  %1798 = vmatpush.bf16.msra.mxu3 %v1598_v1  ;;  %v1587_v6 = vld [vmem:[%s2493_s1 + $0x20] sm:$0xff]  ;;  %v1586_v8 = vld [vmem:[%s2493_s1 + $0x18] sm:$0xff]  ;;  %v1585_v10 = vld [vmem:[%s2493_s1 + $0x10] sm:$0xff] }
   0x4   :  { %v1595_v7 = vld [vmem:[%s2493_s1 + $0x60] sm:$0xff]  ;;  %v1594_v9 = vld [vmem:[%s2493_s1 + $0x58] sm:$0xff]  ;;  %v1593_v11 = vld [vmem:[%s2493_s1 + $0x50] sm:$0xff] }
   0x5   :  { %v1584_v12 = vld [vmem:[%s2493_s1 + $0x8] sm:$0xff]  ;;  %v1583_v14 = vld [vmem:[%s2493_s1] sm:$0xff]  ;;  %v1209_v28 = vld [vmem:[%s2494_s0 + $0x10] sm:$0xf] }
   0x6   :  { %530 = vmatpush.bf16.msra.mxu0 %v1589_v2  ;;  %1791 = vmatpush.bf16.msra.mxu2 %v1589_v2  ;;  %v1592_v13 = vld [vmem:[%s2493_s1 + $0x48] sm:$0xff]  ;;  %v1591_v15 = vld [vmem:[%s2493_s1 + $0x40] sm:$0xff]  ;;  %v1522_v29 = vld [vmem:[%s2494_s0 + $0x14] sm:$0xf0] }
   0x7   :  { %699 = vmatpush.bf16.msra.mxu1 %v1597_v3  ;;  %1799 = vmatpush.bf16.msra.mxu3 %v1597_v3  ;;  %v1201_v16 = vld [vmem:[%s2494_s0] sm:$0xf]  ;;  %v1520_v17 = vld [vmem:[%s2494_s0 + $0x4] sm:$0xf0]  ;;  %v1519_v20 = vld [vmem:[%s2494_s0 + $0x4] sm:$0xf]  ;;  %v1210_v36 = vor.u32 %v1522_v29, %v1209_v28 }
   0x8   :  { %v1329_v18 = vld [vmem:[%s2494_s0 + $0x100] sm:$0xf]  ;;  %v1552_v19 = vld [vmem:[%s2494_s0 + $0x104] sm:$0xf0]  ;;  %v1203_v21 = vld [vmem:[%s2494_s0 + $0x8] sm:$0xf0]  ;;  %v1202_v24 = vor.u32 %v1520_v17, %v1201_v16 }
   0x9   :  { %v1551_v22 = vld [vmem:[%s2494_s0 + $0x104] sm:$0xf]  ;;  %v1331_v23 = vld [vmem:[%s2494_s0 + $0x108] sm:$0xf0]  ;;  %v1330_v25 = vor.u32 %v1552_v19, %v1329_v18  ;;  %v1206_v26 = vor.u32 %v1519_v20, %v1203_v21  ;;  %v1337_v30 = vld [vmem:[%s2494_s0 + $0x110] sm:$0xf] }
   0xa   :  { %531 = vmatpush.bf16.msra.mxu0 %v1588_v4  ;;  %1792 = vmatpush.bf16.msra.mxu2 %v1588_v4  ;;  %v1334_v27 = vor.u32 %v1551_v22, %v1331_v23  ;;  %v1554_v31 = vld [vmem:[%s2494_s0 + $0x114] sm:$0xf0]  ;;  %v1521_v32 = vld [vmem:[%s2494_s0 + $0x14] sm:$0xf]  ;;  %v1211_v33 = vld [vmem:[%s2494_s0 + $0x18] sm:$0xf0] }
   0xb   :  { %700 = vmatpush.bf16.msra.mxu1 %v1596_v5  ;;  %1800 = vmatpush.bf16.msra.mxu3 %v1596_v5  ;;  %v1553_v34 = vld [vmem:[%s2494_s0 + $0x114] sm:$0xf]  ;;  %v1339_v35 = vld [vmem:[%s2494_s0 + $0x118] sm:$0xf0]  ;;  %v1338_v37 = vor.u32 %v1554_v31, %v1337_v30  ;;  %v1214_v38 = vor.u32 %v1521_v32, %v1211_v33  ;;  %v1217_v40 = vld [vmem:[%s2494_s0 + $0x20] sm:$0xf] }
   0xc   :  { %v1342_v39 = vor.u32 %v1553_v34, %v1339_v35  ;;  %v1524_v41 = vld [vmem:[%s2494_s0 + $0x24] sm:$0xf0]  ;;  %v1345_v42 = vld [vmem:[%s2494_s0 + $0x120] sm:$0xf]  ;;  %v1523_v44 = vld [vmem:[%s2494_s0 + $0x24] sm:$0xf] }
   0xd   :  { %v1556_v43 = vld [vmem:[%s2494_s0 + $0x124] sm:$0xf0]  ;;  %v1219_v45 = vld [vmem:[%s2494_s0 + $0x28] sm:$0xf0]  ;;  %v1555_v46 = vld [vmem:[%s2494_s0 + $0x124] sm:$0xf]  ;;  %v1218_v48 = vor.u32 %v1524_v41, %v1217_v40 }
   0xe   :  { %532 = vmatpush.bf16.msra.mxu0 %v1587_v6  ;;  %1793 = vmatpush.bf16.msra.mxu2 %v1587_v6  ;;  %v1347_v47 = vld [vmem:[%s2494_s0 + $0x128] sm:$0xf0]  ;;  %v1346_v49 = vor.u32 %v1556_v43, %v1345_v42  ;;  %v1222_v50 = vor.u32 %v1523_v44, %v1219_v45  ;;  %v1225_v52 = vld [vmem:[%s2494_s0 + $0x30] sm:$0xf]  ;;  %v1526_v53 = vld [vmem:[%s2494_s0 + $0x34] sm:$0xf0] }
   0xf   :  { %701 = vmatpush.bf16.msra.mxu1 %v1595_v7  ;;  %1801 = vmatpush.bf16.msra.mxu3 %v1595_v7  ;;  %v1350_v51 = vor.u32 %v1555_v46, %v1347_v47  ;;  %v1353_v54 = vld [vmem:[%s2494_s0 + $0x130] sm:$0xf]  ;;  %v1558_v55 = vld [vmem:[%s2494_s0 + $0x134] sm:$0xf0]  ;;  %v1525_v56 = vld [vmem:[%s2494_s0 + $0x34] sm:$0xf]  ;;  %v1226_v60 = vor.u32 %v1526_v53, %v1225_v52 }
  0x10   :  { %v1227_v57 = vld [vmem:[%s2494_s0 + $0x38] sm:$0xf0]  ;;  %v1557_v58 = vld [vmem:[%s2494_s0 + $0x134] sm:$0xf]  ;;  %v1354_v61 = vor.u32 %v1558_v55, %v1353_v54  ;;  %v1233_v0 = vld [vmem:[%s2494_s0 + $0x40] sm:$0xf] }
  0x11   :  { %v1355_v59 = vld [vmem:[%s2494_s0 + $0x138] sm:$0xf0]  ;;  %v1230_v62 = vor.u32 %v1525_v56, %v1227_v57  ;;  %v1528_v1 = vld [vmem:[%s2494_s0 + $0x44] sm:$0xf0]  ;;  %v1361_v2 = vld [vmem:[%s2494_s0 + $0x140] sm:$0xf] }
  0x12   :  { %533 = vmatpush.bf16.msra.mxu0 %v1586_v8  ;;  %1794 = vmatpush.bf16.msra.mxu2 %v1586_v8  ;;  %v1358_v63 = vor.u32 %v1557_v58, %v1355_v59  ;;  %v1560_v3 = vld [vmem:[%s2494_s0 + $0x144] sm:$0xf0]  ;;  %v1527_v4 = vld [vmem:[%s2494_s0 + $0x44] sm:$0xf]  ;;  %v1235_v5 = vld [vmem:[%s2494_s0 + $0x48] sm:$0xf0]  ;;  %v1234_v8 = vor.u32 %v1528_v1, %v1233_v0 }
  0x13   :  { %702 = vmatpush.bf16.msra.mxu1 %v1594_v9  ;;  %1802 = vmatpush.bf16.msra.mxu3 %v1594_v9  ;;  %v1559_v6 = vld [vmem:[%s2494_s0 + $0x144] sm:$0xf]  ;;  %v1363_v7 = vld [vmem:[%s2494_s0 + $0x148] sm:$0xf0]  ;;  %v1362_v9 = vor.u32 %v1560_v3, %v1361_v2  ;;  %v1529_v16 = vld [vmem:[%s2494_s0 + $0x54] sm:$0xf] }
  0x14   :  { %v1243_v17 = vld [vmem:[%s2494_s0 + $0x58] sm:$0xf0]  ;;  %v1561_v18 = vld [vmem:[%s2494_s0 + $0x154] sm:$0xf]  ;;  %v1531_v28 = vld [vmem:[%s2494_s0 + $0x64] sm:$0xf] }
  0x15   :  { %v1371_v19 = vld [vmem:[%s2494_s0 + $0x158] sm:$0xf0]  ;;  %v1246_v22 = vor.u32 %v1529_v16, %v1243_v17  ;;  %v1251_v29 = vld [vmem:[%s2494_s0 + $0x68] sm:$0xf0]  ;;  %v1563_v30 = vld [vmem:[%s2494_s0 + $0x164] sm:$0xf] }
  0x16   :  { %534 = vmatpush.bf16.msra.mxu0 %v1585_v10  ;;  %1795 = vmatpush.bf16.msra.mxu2 %v1585_v10  ;;  %v1238_v10 = vor.u32 %v1527_v4, %v1235_v5  ;;  %v1374_v23 = vor.u32 %v1561_v18, %v1371_v19  ;;  %v1379_v31 = vld [vmem:[%s2494_s0 + $0x168] sm:$0xf0]  ;;  %v1254_v34 = vor.u32 %v1531_v28, %v1251_v29  ;;  %v1533_v40 = vld [vmem:[%s2494_s0 + $0x74] sm:$0xf]  ;;  %v1259_v41 = vld [vmem:[%s2494_s0 + $0x78] sm:$0xf0] }
  0x17   :  { %703 = vmatpush.bf16.msra.mxu1 %v1593_v11  ;;  %1803 = vmatpush.bf16.msra.mxu3 %v1593_v11  ;;  %v1366_v11 = vor.u32 %v1559_v6, %v1363_v7  ;;  %v1382_v35 = vor.u32 %v1563_v30, %v1379_v31  ;;  %v1565_v42 = vld [vmem:[%s2494_s0 + $0x174] sm:$0xf]  ;;  %v1387_v43 = vld [vmem:[%s2494_s0 + $0x178] sm:$0xf0]  ;;  %v1262_v46 = vor.u32 %v1533_v40, %v1259_v41  ;;  %v1535_v52 = vld [vmem:[%s2494_s0 + $0x84] sm:$0xf] }
  0x18   :  { %v1390_v47 = vor.u32 %v1565_v42, %v1387_v43  ;;  %v1267_v53 = vld [vmem:[%s2494_s0 + $0x88] sm:$0xf0]  ;;  %v1567_v54 = vld [vmem:[%s2494_s0 + $0x184] sm:$0xf]  ;;  %v2108_v3 = vld [vmem:[%s2496_s3] ss:$0 sm:$0xff] }
  0x19   :  { %v1395_v55 = vld [vmem:[%s2494_s0 + $0x188] sm:$0xf0]  ;;  %v1270_v59 = vor.u32 %v1535_v52, %v1267_v53  ;;  %v1569_v16 = vld [vmem:[%s2494_s0 + $0x194] sm:$0xf]  ;;  %v1403_v17 = vld [vmem:[%s2494_s0 + $0x198] sm:$0xf0] }
  0x1a   :  { %535 = vmatpush.bf16.msra.mxu0 %v1584_v12  ;;  %1796 = vmatpush.bf16.msra.mxu2 %v1584_v12  ;;  %v1241_v12 = vld [vmem:[%s2494_s0 + $0x50] sm:$0xf]  ;;  %v1406_v29 = vor.u32 %v1569_v16, %v1403_v17  ;;  %v1539_v52 = vld [vmem:[%s2494_s0 + $0xa4] sm:$0xf]  ;;  %v1283_v53 = vld [vmem:[%s2494_s0 + $0xa8] sm:$0xf0] }
  0x1b   :  { %704 = vmatpush.bf16.msra.mxu1 %v1592_v13  ;;  %1804 = vmatpush.bf16.msra.mxu3 %v1592_v13  ;;  %v1530_v13 = vld [vmem:[%s2494_s0 + $0x54] sm:$0xf0] }
  0x1c   :  { %v1242_v20 = vor.u32 %v1530_v13, %v1241_v12  ;;  %v1570_v13 = vld [vmem:[%s2494_s0 + $0x194] sm:$0xf0] }
  0x1e   :  { %536 = vmatpush.bf16.msra.mxu0 %v1583_v14  ;;  %1797 = vmatpush.bf16.msra.mxu2 %v1583_v14  ;;  %v1369_v14 = vld [vmem:[%s2494_s0 + $0x150] sm:$0xf] }
  0x1f   :  { %705 = vmatpush.bf16.msra.mxu1 %v1591_v15  ;;  %1805 = vmatpush.bf16.msra.mxu3 %v1591_v15  ;;  %v1562_v15 = vld [vmem:[%s2494_s0 + $0x154] sm:$0xf0] }
  0x20   :  { %v1370_v21 = vor.u32 %v1562_v15, %v1369_v14  ;;  %v1537_v14 = vld [vmem:[%s2494_s0 + $0x94] sm:$0xf]  ;;  %v1275_v15 = vld [vmem:[%s2494_s0 + $0x98] sm:$0xf0] }
  0x21   :  { %537 = vmatmul.bf16.vlgmr.msra.gmra.mxu0 %v1202_v24  ;;  %617 = vmatmul.bf16.vlgmr.msra.gmra.mxu2 %v1330_v25  ;;  %v1249_v24 = vld [vmem:[%s2494_s0 + $0x60] sm:$0xf]  ;;  %v1532_v25 = vld [vmem:[%s2494_s0 + $0x64] sm:$0xf0] }
  0x22   :  { %706 = vmatmul.bf16.vlgmr.msra.gmra.mxu1 %v1206_v26  ;;  %786 = vmatmul.bf16.vlgmr.msra.gmra.mxu3 %v1334_v27  ;;  %v1377_v26 = vld [vmem:[%s2494_s0 + $0x160] sm:$0xf]  ;;  %v1564_v27 = vld [vmem:[%s2494_s0 + $0x164] sm:$0xf0]  ;;  %v1250_v32 = vor.u32 %v1532_v25, %v1249_v24  ;;  %v1278_v24 = vor.u32 %v1537_v14, %v1275_v15 }
  0x23   :  { %v1378_v33 = vor.u32 %v1564_v27, %v1377_v26 }
  0x31   :  { %542 = vmatmul.bf16.gmra.mxu0 %v1210_v36  ;;  %622 = vmatmul.bf16.gmra.mxu2 %v1338_v37  ;;  %v1257_v36 = vld [vmem:[%s2494_s0 + $0x70] sm:$0xf]  ;;  %v1534_v37 = vld [vmem:[%s2494_s0 + $0x74] sm:$0xf0] }
  0x32   :  { %711 = vmatmul.bf16.gmra.mxu1 %v1214_v38  ;;  %791 = vmatmul.bf16.gmra.mxu3 %v1342_v39  ;;  %v1385_v38 = vld [vmem:[%s2494_s0 + $0x170] sm:$0xf]  ;;  %v1566_v39 = vld [vmem:[%s2494_s0 + $0x174] sm:$0xf0]  ;;  %v1258_v44 = vor.u32 %v1534_v37, %v1257_v36 }
  0x33   :  { %v1386_v45 = vor.u32 %v1566_v39, %v1385_v38 }
  0x41   :  { %547 = vmatmul.bf16.gmra.mxu0 %v1218_v48  ;;  %627 = vmatmul.bf16.gmra.mxu2 %v1346_v49  ;;  %v1265_v48 = vld [vmem:[%s2494_s0 + $0x80] sm:$0xf]  ;;  %v1536_v49 = vld [vmem:[%s2494_s0 + $0x84] sm:$0xf0] }
  0x42   :  { %716 = vmatmul.bf16.gmra.mxu1 %v1222_v50  ;;  %796 = vmatmul.bf16.gmra.mxu3 %v1350_v51  ;;  %v1393_v50 = vld [vmem:[%s2494_s0 + $0x180] sm:$0xf]  ;;  %v1568_v51 = vld [vmem:[%s2494_s0 + $0x184] sm:$0xf0]  ;;  %v1266_v56 = vor.u32 %v1536_v49, %v1265_v48 }
  0x43   :  { %v1394_v57 = vor.u32 %v1568_v51, %v1393_v50  ;;  %v1409_v48 = vld [vmem:[%s2494_s0 + $0x1a0] sm:$0xf]  ;;  %v1572_v51 = vld [vmem:[%s2494_s0 + $0x1a4] sm:$0xf0] }
  0x51   :  { %552 = vmatmul.bf16.gmra.mxu0 %v1226_v60  ;;  %632 = vmatmul.bf16.gmra.mxu2 %v1354_v61  ;;  %v1398_v60 = vor.u32 %v1567_v54, %v1395_v55  ;;  %v1571_v54 = vld [vmem:[%s2494_s0 + $0x1a4] sm:$0xf]  ;;  %v1411_v55 = vld [vmem:[%s2494_s0 + $0x1a8] sm:$0xf0] }
  0x52   :  { %721 = vmatmul.bf16.gmra.mxu1 %v1230_v62  ;;  %801 = vmatmul.bf16.gmra.mxu3 %v1358_v63  ;;  %v2102_v63 = vld [vmem:[%s2495_s2] ss:$0 sm:$0xff] }
  0x61   :  { %557 = vmatmul.bf16.gmra.mxu0 %v1234_v8  ;;  %637 = vmatmul.bf16.gmra.mxu2 %v1362_v9  ;;  %v1273_v8 = vld [vmem:[%s2494_s0 + $0x90] sm:$0xf]  ;;  %v1538_v9 = vld [vmem:[%s2494_s0 + $0x94] sm:$0xf0] }
  0x62   :  { %726 = vmatmul.bf16.gmra.mxu1 %v1238_v10  ;;  %806 = vmatmul.bf16.gmra.mxu3 %v1366_v11  ;;  %v1401_v10 = vld [vmem:[%s2494_s0 + $0x190] sm:$0xf] }
  0x71   :  { %562 = vmatmul.bf16.gmra.mxu0 %v1242_v20  ;;  %642 = vmatmul.bf16.gmra.mxu2 %v1370_v21 }
  0x72   :  { %731 = vmatmul.bf16.gmra.mxu1 %v1246_v22  ;;  %811 = vmatmul.bf16.gmra.mxu3 %v1374_v23  ;;  %v1274_v22 = vor.u32 %v1538_v9, %v1273_v8  ;;  %v1402_v23 = vor.u32 %v1570_v13, %v1401_v10 }
  0x81   :  { %567 = vmatmul.bf16.gmra.mxu0 %v1250_v32  ;;  %647 = vmatmul.bf16.gmra.mxu2 %v1378_v33 }
  0x82   :  { %736 = vmatmul.bf16.gmra.mxu1 %v1254_v34  ;;  %816 = vmatmul.bf16.gmra.mxu3 %v1382_v35 }
  0x91   :  { %572 = vmatmul.bf16.gmra.mxu0 %v1258_v44  ;;  %652 = vmatmul.bf16.gmra.mxu2 %v1386_v45 }
  0x92   :  { %741 = vmatmul.bf16.gmra.mxu1 %v1262_v46  ;;  %821 = vmatmul.bf16.gmra.mxu3 %v1390_v47  ;;  %v1281_v46 = vld [vmem:[%s2494_s0 + $0xa0] sm:$0xf]  ;;  %v1540_v47 = vld [vmem:[%s2494_s0 + $0xa4] sm:$0xf0] }
  0x9e   :  { %v538_v58 = vpop.f32.mrf.mxu0 }
  0x9f   :  { %v707_v61 = vpop.f32.mrf.mxu1 }
  0xa0   :  { %v708_v62 = vadd.f32 %v707_v61, %v538_v58  ;;  %v1410_v61 = vor.u32 %v1572_v51, %v1409_v48 }
  0xa1   :  { %577 = vmatmul.bf16.gmra.mxu0 %v1266_v56  ;;  %657 = vmatmul.bf16.gmra.mxu2 %v1394_v57 }
  0xa2   :  { %746 = vmatmul.bf16.gmra.mxu1 %v1270_v59  ;;  %826 = vmatmul.bf16.gmra.mxu3 %v1398_v60  ;;  %v872_v2 = vmul.f32 %v2102_v63, %v708_v62  ;;  %v1282_v60 = vor.u32 %v1540_v47, %v1281_v46  ;;  %v1286_v62 = vor.u32 %v1539_v52, %v1283_v53 }
  0xa4   :  { %v618_v0 = vpop.f32.mrf.mxu2  ;;  %v939_v11 = vadd.f32 %v2108_v3, %v872_v2 }
  0xa5   :  { %v787_v1 = vpop.f32.mrf.mxu3 }
  0xa6   :  { %v540_v4 = vpop.f32.mrf.mxu0  ;;  %v788_v6 = vadd.f32 %v787_v1, %v618_v0  ;;  %v1003_v25 = vmax.f32 %v939_v11, 0.0 }
  0xa7   :  { %v709_v5 = vpop.f32.mrf.mxu1 }
  0xa8   :  { %v710_v7 = vadd.f32 %v709_v5, %v540_v4  ;;  %v904_v18 = vmul.f32 %v2102_v63, %v788_v6  ;;  %v1414_v5 = vor.u32 %v1571_v54, %v1411_v55 }
  0xaa   :  { %v873_v12 = vmul.f32 %v2102_v63, %v710_v7  ;;  %v971_v31 = vadd.f32 %v2108_v3, %v904_v18 }
  0xac   :  { %v940_v19 = vadd.f32 %v2108_v3, %v873_v12  ;;  %v620_v20 = vpop.f32.mrf.mxu2  ;;  %v1035_v36 = vmax.f32 %v971_v31, 0.0  ;;  %v1419_v31 = vld [vmem:[%s2494_s0 + $0x1b8] sm:$0xf0] }
  0xad   :  { %v789_v21 = vpop.f32.mrf.mxu3 }
  0xae   :  { %v1004_v26 = vmax.f32 %v940_v19, 0.0  ;;  %v790_v27 = vadd.f32 %v789_v21, %v620_v20  ;;  %v543_v28 = vpop.f32.mrf.mxu0 }
  0xaf   :  { %v712_v30 = vpop.f32.mrf.mxu1 }
  0xb0   :  { %v1602_v32 = vpack.c.bf16 %v1004_v26, %v1003_v25  ;;  %v905_v33 = vmul.f32 %v2102_v63, %v790_v27  ;;  %v713_v35 = vadd.f32 %v712_v30, %v543_v28  ;;  %v1574_v27 = vld [vmem:[%s2494_s0 + $0x1b4] sm:$0xf0]  ;;  %v1541_v28 = vld [vmem:[%s2494_s0 + $0xb4] sm:$0xf] }
  0xb1   :  { %582 = vmatmul.bf16.gmra.mxu0 %v1274_v22  ;;  %662 = vmatmul.bf16.gmra.mxu2 %v1402_v23  ;;  %v1289_v22 = vld [vmem:[%s2494_s0 + $0xb0] sm:$0xf]  ;;  %v1542_v23 = vld [vmem:[%s2494_s0 + $0xb4] sm:$0xf0]  ;;  %v1573_v30 = vld [vmem:[%s2494_s0 + $0x1b4] sm:$0xf] }
  0xb2   :  { %1603 = vst [vmem:[%s2497_s4] sm:$0xff] %v1602_v32   ;;  %v972_v34 = vadd.f32 %v2108_v3, %v905_v33  ;;  %751 = vmatmul.bf16.gmra.mxu1 %v1278_v24  ;;  %831 = vmatmul.bf16.gmra.mxu3 %v1406_v29  ;;  %v874_v41 = vmul.f32 %v2102_v63, %v713_v35  ;;  %v1417_v24 = vld [vmem:[%s2494_s0 + $0x1b0] sm:$0xf]  ;;  %v1291_v29 = vld [vmem:[%s2494_s0 + $0xb8] sm:$0xf0] }
  0xb4   :  { %v1036_v37 = vmax.f32 %v972_v34, 0.0  ;;  %v623_v38 = vpop.f32.mrf.mxu2  ;;  %v941_v49 = vadd.f32 %v2108_v3, %v874_v41 }
  0xb5   :  { %v792_v39 = vpop.f32.mrf.mxu3 }
  0xb6   :  { %v1682_v40 = vpack.c.bf16 %v1036_v37, %v1035_v36  ;;  %v545_v42 = vpop.f32.mrf.mxu0  ;;  %v793_v44 = vadd.f32 %v792_v39, %v623_v38  ;;  %v1005_v0 = vmax.f32 %v941_v49, 0.0  ;;  %v1290_v36 = vor.u32 %v1542_v23, %v1289_v22 }
  0xb7   :  { %v714_v43 = vpop.f32.mrf.mxu1  ;;  %v1418_v37 = vor.u32 %v1574_v27, %v1417_v24  ;;  %v1294_v38 = vor.u32 %v1541_v28, %v1291_v29 }
  0xb8   :  { %1774 = vst [vmem:[%s2497_s4 + $0x80] sm:$0xff] %v1682_v40   ;;  %v715_v45 = vadd.f32 %v714_v43, %v545_v42  ;;  %v906_v56 = vmul.f32 %v2102_v63, %v793_v44  ;;  %v1422_v43 = vor.u32 %v1573_v30, %v1419_v31 }
  0xba   :  { %v875_v50 = vmul.f32 %v2102_v63, %v715_v45  ;;  %v973_v7 = vadd.f32 %v2108_v3, %v906_v56 }
  0xbc   :  { %v942_v57 = vadd.f32 %v2108_v3, %v875_v50  ;;  %v625_v58 = vpop.f32.mrf.mxu2  ;;  %v1037_v12 = vmax.f32 %v973_v7, 0.0  ;;  %v1427_v7 = vld [vmem:[%s2494_s0 + $0x1c8] sm:$0xf0] }
  0xbd   :  { %v794_v59 = vpop.f32.mrf.mxu3 }
  0xbe   :  { %v1006_v1 = vmax.f32 %v942_v57, 0.0  ;;  %v795_v2 = vadd.f32 %v794_v59, %v625_v58  ;;  %v548_v4 = vpop.f32.mrf.mxu0 }
  0xbf   :  { %v717_v6 = vpop.f32.mrf.mxu1 }
  0xc0   :  { %v1607_v8 = vpack.c.bf16 %v1006_v1, %v1005_v0  ;;  %v907_v9 = vmul.f32 %v2102_v63, %v795_v2  ;;  %v718_v11 = vadd.f32 %v717_v6, %v548_v4  ;;  %v1576_v2 = vld [vmem:[%s2494_s0 + $0x1c4] sm:$0xf0]  ;;  %v1543_v4 = vld [vmem:[%s2494_s0 + $0xc4] sm:$0xf] }
  0xc1   :  { %587 = vmatmul.bf16.gmra.mxu0 %v1282_v60  ;;  %667 = vmatmul.bf16.gmra.mxu2 %v1410_v61  ;;  %v1297_v60 = vld [vmem:[%s2494_s0 + $0xc0] sm:$0xf]  ;;  %v1544_v61 = vld [vmem:[%s2494_s0 + $0xc4] sm:$0xf0]  ;;  %v1575_v6 = vld [vmem:[%s2494_s0 + $0x1c4] sm:$0xf] }
  0xc2   :  { %1759 = vst [vmem:[%s2497_s4 + $0x8] sm:$0xff] %v1607_v8   ;;  %v974_v10 = vadd.f32 %v2108_v3, %v907_v9  ;;  %756 = vmatmul.bf16.gmra.mxu1 %v1286_v62  ;;  %836 = vmatmul.bf16.gmra.mxu3 %v1414_v5  ;;  %v876_v17 = vmul.f32 %v2102_v63, %v718_v11  ;;  %v1425_v62 = vld [vmem:[%s2494_s0 + $0x1c0] sm:$0xf]  ;;  %v1299_v5 = vld [vmem:[%s2494_s0 + $0xc8] sm:$0xf0] }
  0xc4   :  { %v1038_v13 = vmax.f32 %v974_v10, 0.0  ;;  %v628_v14 = vpop.f32.mrf.mxu2  ;;  %v943_v25 = vadd.f32 %v2108_v3, %v876_v17 }
  0xc5   :  { %v797_v15 = vpop.f32.mrf.mxu3 }
  0xc6   :  { %v1687_v16 = vpack.c.bf16 %v1038_v13, %v1037_v12  ;;  %v550_v18 = vpop.f32.mrf.mxu0  ;;  %v798_v20 = vadd.f32 %v797_v15, %v628_v14  ;;  %v1007_v39 = vmax.f32 %v943_v25, 0.0  ;;  %v1298_v12 = vor.u32 %v1544_v61, %v1297_v60 }
  0xc7   :  { %v719_v19 = vpop.f32.mrf.mxu1  ;;  %v1426_v13 = vor.u32 %v1576_v2, %v1425_v62  ;;  %v1302_v14 = vor.u32 %v1543_v4, %v1299_v5 }
  0xc8   :  { %1775 = vst [vmem:[%s2497_s4 + $0x88] sm:$0xff] %v1687_v16   ;;  %v720_v21 = vadd.f32 %v719_v19, %v550_v18  ;;  %v908_v32 = vmul.f32 %v2102_v63, %v798_v20  ;;  %v1430_v19 = vor.u32 %v1575_v6, %v1427_v7 }
  0xca   :  { %v877_v26 = vmul.f32 %v2102_v63, %v720_v21  ;;  %v975_v45 = vadd.f32 %v2108_v3, %v908_v32 }
  0xcc   :  { %v944_v33 = vadd.f32 %v2108_v3, %v877_v26  ;;  %v630_v34 = vpop.f32.mrf.mxu2  ;;  %v1039_v50 = vmax.f32 %v975_v45, 0.0  ;;  %v1435_v45 = vld [vmem:[%s2494_s0 + $0x1d8] sm:$0xf0] }
  0xcd   :  { %v799_v35 = vpop.f32.mrf.mxu3 }
  0xce   :  { %v1008_v40 = vmax.f32 %v944_v33, 0.0  ;;  %v800_v41 = vadd.f32 %v799_v35, %v630_v34  ;;  %v553_v42 = vpop.f32.mrf.mxu0 }
  0xcf   :  { %v722_v44 = vpop.f32.mrf.mxu1 }
  0xd0   :  { %v1612_v46 = vpack.c.bf16 %v1008_v40, %v1007_v39  ;;  %v909_v47 = vmul.f32 %v2102_v63, %v800_v41  ;;  %v723_v49 = vadd.f32 %v722_v44, %v553_v42  ;;  %v1578_v41 = vld [vmem:[%s2494_s0 + $0x1d4] sm:$0xf0]  ;;  %v1545_v42 = vld [vmem:[%s2494_s0 + $0xd4] sm:$0xf] }
  0xd1   :  { %592 = vmatmul.bf16.gmra.mxu0 %v1290_v36  ;;  %672 = vmatmul.bf16.gmra.mxu2 %v1418_v37  ;;  %v1305_v36 = vld [vmem:[%s2494_s0 + $0xd0] sm:$0xf]  ;;  %v1546_v37 = vld [vmem:[%s2494_s0 + $0xd4] sm:$0xf0]  ;;  %v1577_v44 = vld [vmem:[%s2494_s0 + $0x1d4] sm:$0xf] }
  0xd2   :  { %1760 = vst [vmem:[%s2497_s4 + $0x10] sm:$0xff] %v1612_v46   ;;  %v976_v48 = vadd.f32 %v2108_v3, %v909_v47  ;;  %761 = vmatmul.bf16.gmra.mxu1 %v1294_v38  ;;  %841 = vmatmul.bf16.gmra.mxu3 %v1422_v43  ;;  %v878_v55 = vmul.f32 %v2102_v63, %v723_v49  ;;  %v1433_v38 = vld [vmem:[%s2494_s0 + $0x1d0] sm:$0xf]  ;;  %v1307_v43 = vld [vmem:[%s2494_s0 + $0xd8] sm:$0xf0] }
  0xd4   :  { %v1040_v51 = vmax.f32 %v976_v48, 0.0  ;;  %v633_v52 = vpop.f32.mrf.mxu2  ;;  %v945_v0 = vadd.f32 %v2108_v3, %v878_v55 }
  0xd5   :  { %v802_v53 = vpop.f32.mrf.mxu3 }
  0xd6   :  { %v1692_v54 = vpack.c.bf16 %v1040_v51, %v1039_v50  ;;  %v555_v56 = vpop.f32.mrf.mxu0  ;;  %v803_v58 = vadd.f32 %v802_v53, %v633_v52  ;;  %v1009_v15 = vmax.f32 %v945_v0, 0.0  ;;  %v1306_v50 = vor.u32 %v1546_v37, %v1305_v36 }
  0xd7   :  { %v724_v57 = vpop.f32.mrf.mxu1  ;;  %v1434_v51 = vor.u32 %v1578_v41, %v1433_v38  ;;  %v1310_v52 = vor.u32 %v1545_v42, %v1307_v43 }
  0xd8   :  { %1776 = vst [vmem:[%s2497_s4 + $0x90] sm:$0xff] %v1692_v54   ;;  %v725_v59 = vadd.f32 %v724_v57, %v555_v56  ;;  %v910_v8 = vmul.f32 %v2102_v63, %v803_v58  ;;  %v1438_v57 = vor.u32 %v1577_v44, %v1435_v45 }
  0xda   :  { %v879_v1 = vmul.f32 %v2102_v63, %v725_v59  ;;  %v977_v21 = vadd.f32 %v2108_v3, %v910_v8 }
  0xdc   :  { %v946_v9 = vadd.f32 %v2108_v3, %v879_v1  ;;  %v635_v10 = vpop.f32.mrf.mxu2  ;;  %v1041_v26 = vmax.f32 %v977_v21, 0.0  ;;  %v1443_v21 = vld [vmem:[%s2494_s0 + $0x1e8] sm:$0xf0] }
  0xdd   :  { %v804_v11 = vpop.f32.mrf.mxu3 }
  0xde   :  { %v1010_v16 = vmax.f32 %v946_v9, 0.0  ;;  %v805_v17 = vadd.f32 %v804_v11, %v635_v10  ;;  %v558_v18 = vpop.f32.mrf.mxu0 }
  0xdf   :  { %v727_v20 = vpop.f32.mrf.mxu1 }
  0xe0   :  { %v1617_v22 = vpack.c.bf16 %v1010_v16, %v1009_v15  ;;  %v911_v23 = vmul.f32 %v2102_v63, %v805_v17  ;;  %v728_v25 = vadd.f32 %v727_v20, %v558_v18  ;;  %v1580_v17 = vld [vmem:[%s2494_s0 + $0x1e4] sm:$0xf0]  ;;  %v1547_v18 = vld [vmem:[%s2494_s0 + $0xe4] sm:$0xf] }
  0xe1   :  { %597 = vmatmul.bf16.gmra.mxu0 %v1298_v12  ;;  %677 = vmatmul.bf16.gmra.mxu2 %v1426_v13  ;;  %v1313_v12 = vld [vmem:[%s2494_s0 + $0xe0] sm:$0xf]  ;;  %v1548_v13 = vld [vmem:[%s2494_s0 + $0xe4] sm:$0xf0]  ;;  %v1579_v20 = vld [vmem:[%s2494_s0 + $0x1e4] sm:$0xf] }
  0xe2   :  { %1761 = vst [vmem:[%s2497_s4 + $0x18] sm:$0xff] %v1617_v22   ;;  %v978_v24 = vadd.f32 %v2108_v3, %v911_v23  ;;  %766 = vmatmul.bf16.gmra.mxu1 %v1302_v14  ;;  %846 = vmatmul.bf16.gmra.mxu3 %v1430_v19  ;;  %v880_v31 = vmul.f32 %v2102_v63, %v728_v25  ;;  %v1441_v14 = vld [vmem:[%s2494_s0 + $0x1e0] sm:$0xf]  ;;  %v1315_v19 = vld [vmem:[%s2494_s0 + $0xe8] sm:$0xf0] }
  0xe4   :  { %v1042_v27 = vmax.f32 %v978_v24, 0.0  ;;  %v638_v28 = vpop.f32.mrf.mxu2  ;;  %v947_v39 = vadd.f32 %v2108_v3, %v880_v31 }
  0xe5   :  { %v807_v29 = vpop.f32.mrf.mxu3 }
  0xe6   :  { %v1697_v30 = vpack.c.bf16 %v1042_v27, %v1041_v26  ;;  %v560_v32 = vpop.f32.mrf.mxu0  ;;  %v808_v34 = vadd.f32 %v807_v29, %v638_v28  ;;  %v1011_v53 = vmax.f32 %v947_v39, 0.0  ;;  %v1314_v26 = vor.u32 %v1548_v13, %v1313_v12 }
  0xe7   :  { %v729_v33 = vpop.f32.mrf.mxu1  ;;  %v1442_v27 = vor.u32 %v1580_v17, %v1441_v14  ;;  %v1318_v28 = vor.u32 %v1547_v18, %v1315_v19 }
  0xe8   :  { %1777 = vst [vmem:[%s2497_s4 + $0x98] sm:$0xff] %v1697_v30   ;;  %v730_v35 = vadd.f32 %v729_v33, %v560_v32  ;;  %v912_v46 = vmul.f32 %v2102_v63, %v808_v34  ;;  %v1446_v33 = vor.u32 %v1579_v20, %v1443_v21 }
  0xea   :  { %v881_v40 = vmul.f32 %v2102_v63, %v730_v35  ;;  %v979_v59 = vadd.f32 %v2108_v3, %v912_v46 }
  0xec   :  { %v948_v47 = vadd.f32 %v2108_v3, %v881_v40  ;;  %v640_v48 = vpop.f32.mrf.mxu2  ;;  %v1043_v1 = vmax.f32 %v979_v59, 0.0  ;;  %v1451_v59 = vld [vmem:[%s2494_s0 + $0x1f8] sm:$0xf0] }
  0xed   :  { %v809_v49 = vpop.f32.mrf.mxu3 }
  0xee   :  { %v1012_v54 = vmax.f32 %v948_v47, 0.0  ;;  %v810_v55 = vadd.f32 %v809_v49, %v640_v48  ;;  %v563_v56 = vpop.f32.mrf.mxu0 }
  0xef   :  { %v732_v58 = vpop.f32.mrf.mxu1 }
  0xf0   :  { %v1622_v60 = vpack.c.bf16 %v1012_v54, %v1011_v53  ;;  %v913_v61 = vmul.f32 %v2102_v63, %v810_v55  ;;  %v733_v0 = vadd.f32 %v732_v58, %v563_v56  ;;  %v1582_v55 = vld [vmem:[%s2494_s0 + $0x1f4] sm:$0xf0]  ;;  %v1549_v56 = vld [vmem:[%s2494_s0 + $0xf4] sm:$0xf] }
  0xf1   :  { %602 = vmatmul.bf16.gmra.mxu0 %v1306_v50  ;;  %682 = vmatmul.bf16.gmra.mxu2 %v1434_v51  ;;  %v1321_v50 = vld [vmem:[%s2494_s0 + $0xf0] sm:$0xf]  ;;  %v1550_v51 = vld [vmem:[%s2494_s0 + $0xf4] sm:$0xf0]  ;;  %v1581_v58 = vld [vmem:[%s2494_s0 + $0x1f4] sm:$0xf] }
  0xf2   :  { %1762 = vst [vmem:[%s2497_s4 + $0x20] sm:$0xff] %v1622_v60   ;;  %v980_v62 = vadd.f32 %v2108_v3, %v913_v61  ;;  %771 = vmatmul.bf16.gmra.mxu1 %v1310_v52  ;;  %851 = vmatmul.bf16.gmra.mxu3 %v1438_v57  ;;  %v882_v7 = vmul.f32 %v2102_v63, %v733_v0  ;;  %v1449_v52 = vld [vmem:[%s2494_s0 + $0x1f0] sm:$0xf]  ;;  %v1323_v57 = vld [vmem:[%s2494_s0 + $0xf8] sm:$0xf0] }
  0xf4   :  { %v1044_v2 = vmax.f32 %v980_v62, 0.0  ;;  %v643_v4 = vpop.f32.mrf.mxu2  ;;  %v949_v15 = vadd.f32 %v2108_v3, %v882_v7 }
  0xf5   :  { %v812_v5 = vpop.f32.mrf.mxu3 }
  0xf6   :  { %v1702_v6 = vpack.c.bf16 %v1044_v2, %v1043_v1  ;;  %v565_v8 = vpop.f32.mrf.mxu0  ;;  %v813_v10 = vadd.f32 %v812_v5, %v643_v4  ;;  %v1013_v29 = vmax.f32 %v949_v15, 0.0  ;;  %v1322_v1 = vor.u32 %v1550_v51, %v1321_v50 }
  0xf7   :  { %v734_v9 = vpop.f32.mrf.mxu1  ;;  %v1450_v2 = vor.u32 %v1582_v55, %v1449_v52  ;;  %v1326_v4 = vor.u32 %v1549_v56, %v1323_v57 }
  0xf8   :  { %1778 = vst [vmem:[%s2497_s4 + $0xa0] sm:$0xff] %v1702_v6   ;;  %v735_v11 = vadd.f32 %v734_v9, %v565_v8  ;;  %v914_v22 = vmul.f32 %v2102_v63, %v813_v10  ;;  %v1454_v9 = vor.u32 %v1581_v58, %v1451_v59 }
  0xfa   :  { %v883_v16 = vmul.f32 %v2102_v63, %v735_v11  ;;  %v981_v35 = vadd.f32 %v2108_v3, %v914_v22 }
  0xfc   :  { %v950_v23 = vadd.f32 %v2108_v3, %v883_v16  ;;  %v645_v24 = vpop.f32.mrf.mxu2  ;;  %v1045_v40 = vmax.f32 %v981_v35, 0.0 }
  0xfd   :  { %v814_v25 = vpop.f32.mrf.mxu3 }
  0xfe   :  { %v1014_v30 = vmax.f32 %v950_v23, 0.0  ;;  %v815_v31 = vadd.f32 %v814_v25, %v645_v24  ;;  %v568_v32 = vpop.f32.mrf.mxu0 }
  0xff   :  { %v737_v34 = vpop.f32.mrf.mxu1 }
 0x100   :  { %v1627_v36 = vpack.c.bf16 %v1014_v30, %v1013_v29  ;;  %v915_v37 = vmul.f32 %v2102_v63, %v815_v31  ;;  %v738_v39 = vadd.f32 %v737_v34, %v568_v32 }
 0x101   :  { %607 = vmatmul.bf16.gmra.mxu0 %v1314_v26  ;;  %687 = vmatmul.bf16.gmra.mxu2 %v1442_v27 }
 0x102   :  { %1763 = vst [vmem:[%s2497_s4 + $0x28] sm:$0xff] %v1627_v36   ;;  %v982_v38 = vadd.f32 %v2108_v3, %v915_v37  ;;  %776 = vmatmul.bf16.gmra.mxu1 %v1318_v28  ;;  %856 = vmatmul.bf16.gmra.mxu3 %v1446_v33  ;;  %v884_v45 = vmul.f32 %v2102_v63, %v738_v39 }
 0x104   :  { %v1046_v41 = vmax.f32 %v982_v38, 0.0  ;;  %v648_v42 = vpop.f32.mrf.mxu2  ;;  %v951_v53 = vadd.f32 %v2108_v3, %v884_v45 }
 0x105   :  { %v817_v43 = vpop.f32.mrf.mxu3 }
 0x106   :  { %v1707_v44 = vpack.c.bf16 %v1046_v41, %v1045_v40  ;;  %v570_v46 = vpop.f32.mrf.mxu0  ;;  %v818_v48 = vadd.f32 %v817_v43, %v648_v42  ;;  %v1015_v5 = vmax.f32 %v951_v53, 0.0 }
 0x107   :  { %v739_v47 = vpop.f32.mrf.mxu1 }
 0x108   :  { %1779 = vst [vmem:[%s2497_s4 + $0xa8] sm:$0xff] %v1707_v44   ;;  %v740_v49 = vadd.f32 %v739_v47, %v570_v46  ;;  %v916_v60 = vmul.f32 %v2102_v63, %v818_v48 }
 0x10a   :  { %v885_v54 = vmul.f32 %v2102_v63, %v740_v49  ;;  %v983_v11 = vadd.f32 %v2108_v3, %v916_v60 }
 0x10c   :  { %v952_v61 = vadd.f32 %v2108_v3, %v885_v54  ;;  %v650_v62 = vpop.f32.mrf.mxu2  ;;  %v1047_v16 = vmax.f32 %v983_v11, 0.0 }
 0x10d   :  { %v819_v0 = vpop.f32.mrf.mxu3 }
 0x10e   :  { %v1016_v6 = vmax.f32 %v952_v61, 0.0  ;;  %v820_v7 = vadd.f32 %v819_v0, %v650_v62  ;;  %v573_v8 = vpop.f32.mrf.mxu0 }
 0x10f   :  { %v742_v10 = vpop.f32.mrf.mxu1 }
 0x110   :  { %v1632_v12 = vpack.c.bf16 %v1016_v6, %v1015_v5  ;;  %v917_v13 = vmul.f32 %v2102_v63, %v820_v7  ;;  %v743_v15 = vadd.f32 %v742_v10, %v573_v8 }
 0x111   :  { %612 = vmatmul.bf16.gmra.mxu0 %v1322_v1  ;;  %692 = vmatmul.bf16.gmra.mxu2 %v1450_v2 }
 0x112   :  { %1764 = vst [vmem:[%s2497_s4 + $0x30] sm:$0xff] %v1632_v12   ;;  %v984_v14 = vadd.f32 %v2108_v3, %v917_v13  ;;  %781 = vmatmul.bf16.gmra.mxu1 %v1326_v4  ;;  %861 = vmatmul.bf16.gmra.mxu3 %v1454_v9  ;;  %v886_v21 = vmul.f32 %v2102_v63, %v743_v15 }
 0x114   :  { %v1048_v17 = vmax.f32 %v984_v14, 0.0  ;;  %v653_v18 = vpop.f32.mrf.mxu2  ;;  %v953_v26 = vadd.f32 %v2108_v3, %v886_v21 }
 0x115   :  { %v822_v19 = vpop.f32.mrf.mxu3 }
 0x116   :  { %v1712_v20 = vpack.c.bf16 %v1048_v17, %v1047_v16  ;;  %v575_v22 = vpop.f32.mrf.mxu0  ;;  %v823_v24 = vadd.f32 %v822_v19, %v653_v18  ;;  %v1017_v32 = vmax.f32 %v953_v26, 0.0 }
 0x117   :  { %v744_v23 = vpop.f32.mrf.mxu1 }
 0x118   :  { %1780 = vst [vmem:[%s2497_s4 + $0xb0] sm:$0xff] %v1712_v20   ;;  %v745_v25 = vadd.f32 %v744_v23, %v575_v22  ;;  %v918_v28 = vmul.f32 %v2102_v63, %v823_v24 }
 0x11a   :  { %v887_v27 = vmul.f32 %v2102_v63, %v745_v25  ;;  %v985_v37 = vadd.f32 %v2108_v3, %v918_v28 }
 0x11c   :  { %v954_v29 = vadd.f32 %v2108_v3, %v887_v27  ;;  %v655_v30 = vpop.f32.mrf.mxu2  ;;  %v1049_v42 = vmax.f32 %v985_v37, 0.0 }
 0x11d   :  { %v824_v31 = vpop.f32.mrf.mxu3 }
 0x11e   :  { %v1018_v33 = vmax.f32 %v954_v29, 0.0  ;;  %v825_v34 = vadd.f32 %v824_v31, %v655_v30  ;;  %v578_v35 = vpop.f32.mrf.mxu0 }
 0x11f   :  { %v747_v36 = vpop.f32.mrf.mxu1 }
 0x120   :  { %v1637_v38 = vpack.c.bf16 %v1018_v33, %v1017_v32  ;;  %v919_v39 = vmul.f32 %v2102_v63, %v825_v34  ;;  %v748_v41 = vadd.f32 %v747_v36, %v578_v35 }
 0x122   :  { %1765 = vst [vmem:[%s2497_s4 + $0x38] sm:$0xff] %v1637_v38   ;;  %v986_v40 = vadd.f32 %v2108_v3, %v919_v39  ;;  %v888_v47 = vmul.f32 %v2102_v63, %v748_v41 }
 0x124   :  { %v1050_v43 = vmax.f32 %v986_v40, 0.0  ;;  %v658_v44 = vpop.f32.mrf.mxu2  ;;  %v955_v52 = vadd.f32 %v2108_v3, %v888_v47 }
 0x125   :  { %v827_v45 = vpop.f32.mrf.mxu3 }
 0x126   :  { %v1717_v46 = vpack.c.bf16 %v1050_v43, %v1049_v42  ;;  %v580_v48 = vpop.f32.mrf.mxu0  ;;  %v828_v50 = vadd.f32 %v827_v45, %v658_v44  ;;  %v1019_v58 = vmax.f32 %v955_v52, 0.0 }
 0x127   :  { %v749_v49 = vpop.f32.mrf.mxu1 }
 0x128   :  { %1781 = vst [vmem:[%s2497_s4 + $0xb8] sm:$0xff] %v1717_v46   ;;  %v750_v51 = vadd.f32 %v749_v49, %v580_v48  ;;  %v920_v54 = vmul.f32 %v2102_v63, %v828_v50 }
 0x12a   :  { %v889_v53 = vmul.f32 %v2102_v63, %v750_v51  ;;  %v987_v0 = vadd.f32 %v2108_v3, %v920_v54 }
 0x12c   :  { %v956_v55 = vadd.f32 %v2108_v3, %v889_v53  ;;  %v660_v56 = vpop.f32.mrf.mxu2  ;;  %v1051_v6 = vmax.f32 %v987_v0, 0.0 }
 0x12d   :  { %v829_v57 = vpop.f32.mrf.mxu3 }
 0x12e   :  { %v1020_v59 = vmax.f32 %v956_v55, 0.0  ;;  %v830_v60 = vadd.f32 %v829_v57, %v660_v56  ;;  %v583_v61 = vpop.f32.mrf.mxu0 }
 0x12f   :  { %v752_v62 = vpop.f32.mrf.mxu1 }
 0x130   :  { %v1642_v1 = vpack.c.bf16 %v1020_v59, %v1019_v58  ;;  %v921_v2 = vmul.f32 %v2102_v63, %v830_v60  ;;  %v753_v5 = vadd.f32 %v752_v62, %v583_v61 }
 0x132   :  { %1766 = vst [vmem:[%s2497_s4 + $0x40] sm:$0xff] %v1642_v1   ;;  %v988_v4 = vadd.f32 %v2108_v3, %v921_v2  ;;  %v890_v11 = vmul.f32 %v2102_v63, %v753_v5 }
 0x134   :  { %v1052_v7 = vmax.f32 %v988_v4, 0.0  ;;  %v663_v8 = vpop.f32.mrf.mxu2  ;;  %v957_v16 = vadd.f32 %v2108_v3, %v890_v11 }
 0x135   :  { %v832_v9 = vpop.f32.mrf.mxu3 }
 0x136   :  { %v1722_v10 = vpack.c.bf16 %v1052_v7, %v1051_v6  ;;  %v585_v12 = vpop.f32.mrf.mxu0  ;;  %v833_v14 = vadd.f32 %v832_v9, %v663_v8  ;;  %v1021_v22 = vmax.f32 %v957_v16, 0.0 }
 0x137   :  { %v754_v13 = vpop.f32.mrf.mxu1 }
 0x138   :  { %1782 = vst [vmem:[%s2497_s4 + $0xc0] sm:$0xff] %v1722_v10   ;;  %v755_v15 = vadd.f32 %v754_v13, %v585_v12  ;;  %v922_v18 = vmul.f32 %v2102_v63, %v833_v14 }
 0x13a   :  { %v891_v17 = vmul.f32 %v2102_v63, %v755_v15  ;;  %v989_v27 = vadd.f32 %v2108_v3, %v922_v18 }
 0x13c   :  { %v958_v19 = vadd.f32 %v2108_v3, %v891_v17  ;;  %v665_v20 = vpop.f32.mrf.mxu2  ;;  %v1053_v32 = vmax.f32 %v989_v27, 0.0 }
 0x13d   :  { %v834_v21 = vpop.f32.mrf.mxu3 }
 0x13e   :  { %v1022_v23 = vmax.f32 %v958_v19, 0.0  ;;  %v835_v24 = vadd.f32 %v834_v21, %v665_v20  ;;  %v588_v25 = vpop.f32.mrf.mxu0 }
 0x13f   :  { %v757_v26 = vpop.f32.mrf.mxu1 }
 0x140   :  { %v1647_v28 = vpack.c.bf16 %v1022_v23, %v1021_v22  ;;  %v923_v29 = vmul.f32 %v2102_v63, %v835_v24  ;;  %v758_v31 = vadd.f32 %v757_v26, %v588_v25 }
 0x142   :  { %1767 = vst [vmem:[%s2497_s4 + $0x48] sm:$0xff] %v1647_v28   ;;  %v990_v30 = vadd.f32 %v2108_v3, %v923_v29  ;;  %v892_v37 = vmul.f32 %v2102_v63, %v758_v31 }
 0x144   :  { %v1054_v33 = vmax.f32 %v990_v30, 0.0  ;;  %v668_v34 = vpop.f32.mrf.mxu2  ;;  %v959_v42 = vadd.f32 %v2108_v3, %v892_v37 }
 0x145   :  { %v837_v35 = vpop.f32.mrf.mxu3 }
 0x146   :  { %v1727_v36 = vpack.c.bf16 %v1054_v33, %v1053_v32  ;;  %v590_v38 = vpop.f32.mrf.mxu0  ;;  %v838_v40 = vadd.f32 %v837_v35, %v668_v34  ;;  %v1023_v48 = vmax.f32 %v959_v42, 0.0 }
 0x147   :  { %v759_v39 = vpop.f32.mrf.mxu1 }
 0x148   :  { %1783 = vst [vmem:[%s2497_s4 + $0xc8] sm:$0xff] %v1727_v36   ;;  %v760_v41 = vadd.f32 %v759_v39, %v590_v38  ;;  %v924_v44 = vmul.f32 %v2102_v63, %v838_v40 }
 0x14a   :  { %v893_v43 = vmul.f32 %v2102_v63, %v760_v41  ;;  %v991_v53 = vadd.f32 %v2108_v3, %v924_v44 }
 0x14c   :  { %v960_v45 = vadd.f32 %v2108_v3, %v893_v43  ;;  %v670_v46 = vpop.f32.mrf.mxu2  ;;  %v1055_v58 = vmax.f32 %v991_v53, 0.0 }
 0x14d   :  { %v839_v47 = vpop.f32.mrf.mxu3 }
 0x14e   :  { %v1024_v49 = vmax.f32 %v960_v45, 0.0  ;;  %v840_v50 = vadd.f32 %v839_v47, %v670_v46  ;;  %v593_v51 = vpop.f32.mrf.mxu0 }
 0x14f   :  { %v762_v52 = vpop.f32.mrf.mxu1 }
 0x150   :  { %v1652_v54 = vpack.c.bf16 %v1024_v49, %v1023_v48  ;;  %v925_v55 = vmul.f32 %v2102_v63, %v840_v50  ;;  %v763_v57 = vadd.f32 %v762_v52, %v593_v51 }
 0x152   :  { %1768 = vst [vmem:[%s2497_s4 + $0x50] sm:$0xff] %v1652_v54   ;;  %v992_v56 = vadd.f32 %v2108_v3, %v925_v55  ;;  %v894_v0 = vmul.f32 %v2102_v63, %v763_v57 }
 0x154   :  { %v1056_v59 = vmax.f32 %v992_v56, 0.0  ;;  %v673_v60 = vpop.f32.mrf.mxu2  ;;  %v961_v6 = vadd.f32 %v2108_v3, %v894_v0 }
 0x155   :  { %v842_v61 = vpop.f32.mrf.mxu3 }
 0x156   :  { %v1732_v62 = vpack.c.bf16 %v1056_v59, %v1055_v58  ;;  %v595_v1 = vpop.f32.mrf.mxu0  ;;  %v843_v4 = vadd.f32 %v842_v61, %v673_v60  ;;  %v1025_v12 = vmax.f32 %v961_v6, 0.0 }
 0x157   :  { %v764_v2 = vpop.f32.mrf.mxu1 }
 0x158   :  { %1784 = vst [vmem:[%s2497_s4 + $0xd0] sm:$0xff] %v1732_v62   ;;  %v765_v5 = vadd.f32 %v764_v2, %v595_v1  ;;  %v926_v8 = vmul.f32 %v2102_v63, %v843_v4 }
 0x15a   :  { %v895_v7 = vmul.f32 %v2102_v63, %v765_v5  ;;  %v993_v17 = vadd.f32 %v2108_v3, %v926_v8 }
 0x15c   :  { %v962_v9 = vadd.f32 %v2108_v3, %v895_v7  ;;  %v675_v10 = vpop.f32.mrf.mxu2  ;;  %v1057_v22 = vmax.f32 %v993_v17, 0.0 }
 0x15d   :  { %v844_v11 = vpop.f32.mrf.mxu3 }
 0x15e   :  { %v1026_v13 = vmax.f32 %v962_v9, 0.0  ;;  %v845_v14 = vadd.f32 %v844_v11, %v675_v10  ;;  %v598_v15 = vpop.f32.mrf.mxu0 }
 0x15f   :  { %v767_v16 = vpop.f32.mrf.mxu1 }
 0x160   :  { %v1657_v18 = vpack.c.bf16 %v1026_v13, %v1025_v12  ;;  %v927_v19 = vmul.f32 %v2102_v63, %v845_v14  ;;  %v768_v21 = vadd.f32 %v767_v16, %v598_v15 }
 0x162   :  { %1769 = vst [vmem:[%s2497_s4 + $0x58] sm:$0xff] %v1657_v18   ;;  %v994_v20 = vadd.f32 %v2108_v3, %v927_v19  ;;  %v896_v27 = vmul.f32 %v2102_v63, %v768_v21 }
 0x164   :  { %v1058_v23 = vmax.f32 %v994_v20, 0.0  ;;  %v678_v24 = vpop.f32.mrf.mxu2  ;;  %v963_v32 = vadd.f32 %v2108_v3, %v896_v27 }
 0x165   :  { %v847_v25 = vpop.f32.mrf.mxu3 }
 0x166   :  { %v1737_v26 = vpack.c.bf16 %v1058_v23, %v1057_v22  ;;  %v600_v28 = vpop.f32.mrf.mxu0  ;;  %v848_v30 = vadd.f32 %v847_v25, %v678_v24  ;;  %v1027_v38 = vmax.f32 %v963_v32, 0.0  ;;  %v1808_v23 = vld [vmem:[%s2495_s2] ss:$0 sm:$0xff] }
 0x167   :  { %v769_v29 = vpop.f32.mrf.mxu1 }
 0x168   :  { %1785 = vst [vmem:[%s2497_s4 + $0xd8] sm:$0xff] %v1737_v26   ;;  %v770_v31 = vadd.f32 %v769_v29, %v600_v28  ;;  %v928_v34 = vmul.f32 %v2102_v63, %v848_v30 }
 0x16a   :  { %v897_v33 = vmul.f32 %v2102_v63, %v770_v31  ;;  %v995_v43 = vadd.f32 %v2108_v3, %v928_v34 }
 0x16c   :  { %v964_v35 = vadd.f32 %v2108_v3, %v897_v33  ;;  %v680_v36 = vpop.f32.mrf.mxu2  ;;  %v1059_v48 = vmax.f32 %v995_v43, 0.0 }
 0x16d   :  { %v849_v37 = vpop.f32.mrf.mxu3 }
 0x16e   :  { %v1028_v39 = vmax.f32 %v964_v35, 0.0  ;;  %v850_v40 = vadd.f32 %v849_v37, %v680_v36  ;;  %v603_v41 = vpop.f32.mrf.mxu0 }
 0x16f   :  { %v772_v42 = vpop.f32.mrf.mxu1 }
 0x170   :  { %v1662_v44 = vpack.c.bf16 %v1028_v39, %v1027_v38  ;;  %v929_v45 = vmul.f32 %v2102_v63, %v850_v40  ;;  %v773_v47 = vadd.f32 %v772_v42, %v603_v41 }
 0x172   :  { %1770 = vst [vmem:[%s2497_s4 + $0x60] sm:$0xff] %v1662_v44   ;;  %v996_v46 = vadd.f32 %v2108_v3, %v929_v45  ;;  %v898_v53 = vmul.f32 %v2102_v63, %v773_v47 }
 0x174   :  { %v1060_v49 = vmax.f32 %v996_v46, 0.0  ;;  %v683_v50 = vpop.f32.mrf.mxu2  ;;  %v965_v58 = vadd.f32 %v2108_v3, %v898_v53 }
 0x175   :  { %v852_v51 = vpop.f32.mrf.mxu3 }
 0x176   :  { %v1742_v52 = vpack.c.bf16 %v1060_v49, %v1059_v48  ;;  %v605_v54 = vpop.f32.mrf.mxu0  ;;  %v853_v56 = vadd.f32 %v852_v51, %v683_v50  ;;  %v1029_v1 = vmax.f32 %v965_v58, 0.0 }
 0x177   :  { %v774_v55 = vpop.f32.mrf.mxu1 }
 0x178   :  { %1786 = vst [vmem:[%s2497_s4 + $0xe0] sm:$0xff] %v1742_v52   ;;  %v775_v57 = vadd.f32 %v774_v55, %v605_v54  ;;  %v930_v60 = vmul.f32 %v2102_v63, %v853_v56 }
 0x17a   :  { %v899_v59 = vmul.f32 %v2102_v63, %v775_v57  ;;  %v997_v7 = vadd.f32 %v2108_v3, %v930_v60 }
 0x17c   :  { %v966_v61 = vadd.f32 %v2108_v3, %v899_v59  ;;  %v685_v62 = vpop.f32.mrf.mxu2  ;;  %v1061_v12 = vmax.f32 %v997_v7, 0.0 }
 0x17d   :  { %v854_v0 = vpop.f32.mrf.mxu3 }
 0x17e   :  { %v1030_v2 = vmax.f32 %v966_v61, 0.0  ;;  %v855_v4 = vadd.f32 %v854_v0, %v685_v62  ;;  %v608_v5 = vpop.f32.mrf.mxu0 }
 0x17f   :  { %v777_v6 = vpop.f32.mrf.mxu1 }
 0x180   :  { %v1667_v8 = vpack.c.bf16 %v1030_v2, %v1029_v1  ;;  %v931_v9 = vmul.f32 %v2102_v63, %v855_v4  ;;  %v778_v11 = vadd.f32 %v777_v6, %v608_v5 }
 0x182   :  { %1771 = vst [vmem:[%s2497_s4 + $0x68] sm:$0xff] %v1667_v8   ;;  %v998_v10 = vadd.f32 %v2108_v3, %v931_v9  ;;  %v900_v17 = vmul.f32 %v2102_v63, %v778_v11  ;;  %v1809_v63 = vld [vmem:[%s2496_s3] ss:$0 sm:$0xff] }
 0x184   :  { %v1062_v13 = vmax.f32 %v998_v10, 0.0  ;;  %v688_v14 = vpop.f32.mrf.mxu2  ;;  %v967_v22 = vadd.f32 %v2108_v3, %v900_v17 }
 0x185   :  { %v857_v15 = vpop.f32.mrf.mxu3 }
 0x186   :  { %v1747_v16 = vpack.c.bf16 %v1062_v13, %v1061_v12  ;;  %v610_v18 = vpop.f32.mrf.mxu0  ;;  %v858_v20 = vadd.f32 %v857_v15, %v688_v14  ;;  %v1031_v29 = vmax.f32 %v967_v22, 0.0 }
 0x187   :  { %v779_v19 = vpop.f32.mrf.mxu1 }
 0x188   :  { %1787 = vst [vmem:[%s2497_s4 + $0xe8] sm:$0xff] %v1747_v16   ;;  %v780_v21 = vadd.f32 %v779_v19, %v610_v18  ;;  %v932_v25 = vmul.f32 %v1808_v23, %v858_v20 }
 0x18a   :  { %v901_v24 = vmul.f32 %v1808_v23, %v780_v21  ;;  %v999_v34 = vadd.f32 %v1809_v63, %v932_v25 }
 0x18c   :  { %v968_v26 = vadd.f32 %v1809_v63, %v901_v24  ;;  %v690_v27 = vpop.f32.mrf.mxu2  ;;  %v1063_v38 = vmax.f32 %v999_v34, 0.0 }
 0x18d   :  { %v859_v28 = vpop.f32.mrf.mxu3 }
 0x18e   :  { %v1032_v30 = vmax.f32 %v968_v26, 0.0  ;;  %v860_v31 = vadd.f32 %v859_v28, %v690_v27  ;;  %v613_v32 = vpop.f32.mrf.mxu0 }
 0x18f   :  { %v782_v33 = vpop.f32.mrf.mxu1 }
 0x190   :  { %v1672_v3 = vpack.c.bf16 %v1032_v30, %v1031_v29  ;;  %v933_v35 = vmul.f32 %v1808_v23, %v860_v31  ;;  %v783_v37 = vadd.f32 %v782_v33, %v613_v32 }
 0x192   :  { %1772 = vst [vmem:[%s2497_s4 + $0x70] sm:$0xff] %v1672_v3   ;;  %v1000_v36 = vadd.f32 %v1809_v63, %v933_v35  ;;  %v902_v43 = vmul.f32 %v1808_v23, %v783_v37 }
 0x194   :  { %v1064_v39 = vmax.f32 %v1000_v36, 0.0  ;;  %v693_v40 = vpop.f32.mrf.mxu2  ;;  %v969_v48 = vadd.f32 %v1809_v63, %v902_v43 }
 0x195   :  { %v862_v41 = vpop.f32.mrf.mxu3 }
 0x196   :  { %v1752_v42 = vpack.c.bf16 %v1064_v39, %v1063_v38  ;;  %v615_v44 = vpop.f32.mrf.mxu0  ;;  %v863_v46 = vadd.f32 %v862_v41, %v693_v40  ;;  %v1033_v54 = vmax.f32 %v969_v48, 0.0 }
 0x197   :  { %v784_v45 = vpop.f32.mrf.mxu1 }
 0x198   :  { %1788 = vst [vmem:[%s2497_s4 + $0xf0] sm:$0xff] %v1752_v42   ;;  %v785_v47 = vadd.f32 %v784_v45, %v615_v44  ;;  %v934_v50 = vmul.f32 %v1808_v23, %v863_v46 }
 0x19a   :  { %v903_v49 = vmul.f32 %v1808_v23, %v785_v47  ;;  %v1001_v57 = vadd.f32 %v1809_v63, %v934_v50 }
 0x19c   :  { %v970_v51 = vadd.f32 %v1809_v63, %v903_v49  ;;  %v695_v52 = vpop.f32.mrf.mxu2  ;;  %v1065_v61 = vmax.f32 %v1001_v57, 0.0 }
 0x19d   :  { %v864_v53 = vpop.f32.mrf.mxu3 }
 0x19e   :  { %v1034_v55 = vmax.f32 %v970_v51, 0.0  ;;  %v865_v56 = vadd.f32 %v864_v53, %v695_v52 }
 0x1a0   :  { %v1677_v58 = vpack.c.bf16 %v1034_v55, %v1033_v54  ;;  %v935_v59 = vmul.f32 %v1808_v23, %v865_v56 }
 0x1a2   :  { %1773 = vst [vmem:[%s2497_s4 + $0x78] sm:$0xff] %v1677_v58   ;;  %v1002_v60 = vadd.f32 %v1809_v63, %v935_v59 }
 0x1a4   :  { %v1066_v62 = vmax.f32 %v1002_v60, 0.0 }
 0x1a6   :  { %v1757_v0 = vpack.c.bf16 %v1066_v62, %v1065_v61 }
 0x1a8   :  { %1789 = vst [vmem:[%s2497_s4 + $0xf8] sm:$0xff] %v1757_v0  }

// kernel: forward.57
= control target key start
LH: loop header
LB: loop body
LE: loop exit
PB: predicated region body
PF: predicated region fallthrough
CT: control target
= control target key end

     0   :  { %s578_s1 = inlined_call_operand.vmem [shape: bf16[128,128], index: 1, kind: input, shape index: {}]   ;;  %s579_s2 = inlined_call_operand.vmem [shape: f32[1,128], index: 2, kind: input, shape index: {}]   ;;  %s580_s3 = inlined_call_operand.vmem [shape: f32[1,128], index: 3, kind: input, shape index: {}]   ;;  %s581_s0 = inlined_call_operand.vmem [shape: bf16[128,128], index: 0, kind: input, shape index: {}]   ;;  %s582_s4 = inlined_call_operand.vmem [shape: bf16[128,128], index: 4, kind: output, shape index: {}]  }
   0x1   :  { %v365_v0 = vld [vmem:[%s578_s1 + $0x38] sm:$0xff]  ;;  %v364_v1 = vld [vmem:[%s578_s1 + $0x30] sm:$0xff]  ;;  %v363_v2 = vld [vmem:[%s578_s1 + $0x28] sm:$0xff] }
   0x2   :  { %145 = vmatpush.bf16.msra.mxu0 %v365_v0  ;;  %413 = vmatpush.bf16.msra.mxu1 %v365_v0  ;;  %v362_v3 = vld [vmem:[%s578_s1 + $0x20] sm:$0xff]  ;;  %v361_v4 = vld [vmem:[%s578_s1 + $0x18] sm:$0xff]  ;;  %v360_v5 = vld [vmem:[%s578_s1 + $0x10] sm:$0xff] }
   0x3   :  { %414 = vmatpush.bf16.msra.mxu2 %v365_v0  ;;  %415 = vmatpush.bf16.msra.mxu3 %v365_v0  ;;  %v359_v6 = vld [vmem:[%s578_s1 + $0x8] sm:$0xff]  ;;  %v358_v7 = vld [vmem:[%s578_s1] sm:$0xff]  ;;  %v352_v9 = vld [vmem:[%s581_s0 + $0x10] sm:$0xff] }
   0x4   :  { %v350_v8 = vld [vmem:[%s581_s0] sm:$0xff]  ;;  %v356_v11 = vld [vmem:[%s581_s0 + $0x30] sm:$0xff]  ;;  %v351_v12 = vld [vmem:[%s581_s0 + $0x8] sm:$0xff] }
   0x5   :  { %v354_v10 = vld [vmem:[%s581_s0 + $0x20] sm:$0xff]  ;;  %v353_v13 = vld [vmem:[%s581_s0 + $0x18] sm:$0xff]  ;;  %v355_v14 = vld [vmem:[%s581_s0 + $0x28] sm:$0xff] }
   0x6   :  { %146 = vmatpush.bf16.msra.mxu0 %v364_v1  ;;  %416 = vmatpush.bf16.msra.mxu1 %v364_v1  ;;  %v357_v15 = vld [vmem:[%s581_s0 + $0x38] sm:$0xff]  ;;  %v515_v18 = vld [vmem:[%s579_s2] ss:$0 sm:$0xff] }
   0x7   :  { %417 = vmatpush.bf16.msra.mxu2 %v364_v1  ;;  %418 = vmatpush.bf16.msra.mxu3 %v364_v1  ;;  %v521_v20 = vld [vmem:[%s580_s3] ss:$0 sm:$0xff] }
   0xa   :  { %147 = vmatpush.bf16.msra.mxu0 %v363_v2  ;;  %419 = vmatpush.bf16.msra.mxu1 %v363_v2 }
   0xb   :  { %420 = vmatpush.bf16.msra.mxu2 %v363_v2  ;;  %421 = vmatpush.bf16.msra.mxu3 %v363_v2 }
   0xe   :  { %148 = vmatpush.bf16.msra.mxu0 %v362_v3  ;;  %422 = vmatpush.bf16.msra.mxu1 %v362_v3 }
   0xf   :  { %423 = vmatpush.bf16.msra.mxu2 %v362_v3  ;;  %424 = vmatpush.bf16.msra.mxu3 %v362_v3 }
  0x12   :  { %149 = vmatpush.bf16.msra.mxu0 %v361_v4  ;;  %425 = vmatpush.bf16.msra.mxu1 %v361_v4 }
  0x13   :  { %426 = vmatpush.bf16.msra.mxu2 %v361_v4  ;;  %427 = vmatpush.bf16.msra.mxu3 %v361_v4 }
  0x16   :  { %150 = vmatpush.bf16.msra.mxu0 %v360_v5  ;;  %428 = vmatpush.bf16.msra.mxu1 %v360_v5 }
  0x17   :  { %429 = vmatpush.bf16.msra.mxu2 %v360_v5  ;;  %430 = vmatpush.bf16.msra.mxu3 %v360_v5 }
  0x1a   :  { %151 = vmatpush.bf16.msra.mxu0 %v359_v6  ;;  %431 = vmatpush.bf16.msra.mxu1 %v359_v6 }
  0x1b   :  { %432 = vmatpush.bf16.msra.mxu2 %v359_v6  ;;  %433 = vmatpush.bf16.msra.mxu3 %v359_v6 }
  0x1e   :  { %152 = vmatpush.bf16.msra.mxu0 %v358_v7  ;;  %434 = vmatpush.bf16.msra.mxu1 %v358_v7 }
  0x1f   :  { %435 = vmatpush.bf16.msra.mxu2 %v358_v7  ;;  %436 = vmatpush.bf16.msra.mxu3 %v358_v7 }
  0x21   :  { %153 = vmatmul.bf16.vlgmr.msra.gmra.mxu0 %v350_v8  ;;  %163 = vmatmul.bf16.vlgmr.msra.gmra.mxu1 %v352_v9 }
  0x22   :  { %173 = vmatmul.bf16.vlgmr.msra.gmra.mxu2 %v354_v10  ;;  %183 = vmatmul.bf16.vlgmr.msra.gmra.mxu3 %v356_v11 }
  0x31   :  { %158 = vmatmul.bf16.gmra.mxu0 %v351_v12  ;;  %168 = vmatmul.bf16.gmra.mxu1 %v353_v13 }
  0x32   :  { %178 = vmatmul.bf16.gmra.mxu2 %v355_v14  ;;  %188 = vmatmul.bf16.gmra.mxu3 %v357_v15 }
  0x9e   :  { %v154_v16 = vpop.f32.mrf.mxu0  ;;  %v164_v17 = vpop.f32.mrf.mxu1 }
  0x9f   :  { %v199_v19 = vmul.f32 %v515_v18, %v154_v16  ;;  %v203_v21 = vmul.f32 %v515_v18, %v164_v17 }
  0xa1   :  { %v218_v26 = vadd.f32 %v521_v20, %v199_v19  ;;  %v222_v27 = vadd.f32 %v521_v20, %v203_v21 }
  0xa3   :  { %v234_v34 = vmax.f32 %v218_v26, 0.0  ;;  %v238_v35 = vmax.f32 %v222_v27, 0.0 }
  0xa5   :  { %v174_v22 = vpop.f32.mrf.mxu2  ;;  %v184_v23 = vpop.f32.mrf.mxu3 }
  0xa6   :  { %v156_v24 = vpop.f32.mrf.mxu0  ;;  %v166_v25 = vpop.f32.mrf.mxu1  ;;  %v207_v32 = vmul.f32 %v515_v18, %v174_v22  ;;  %v211_v33 = vmul.f32 %v515_v18, %v184_v23 }
  0xa7   :  { %v200_v28 = vmul.f32 %v515_v18, %v156_v24  ;;  %v204_v29 = vmul.f32 %v515_v18, %v166_v25 }
  0xa8   :  { %v226_v42 = vadd.f32 %v521_v20, %v207_v32  ;;  %v230_v43 = vadd.f32 %v521_v20, %v211_v33 }
  0xa9   :  { %v219_v30 = vadd.f32 %v521_v20, %v200_v28  ;;  %v223_v31 = vadd.f32 %v521_v20, %v204_v29 }
  0xaa   :  { %v242_v50 = vmax.f32 %v226_v42, 0.0  ;;  %v246_v51 = vmax.f32 %v230_v43, 0.0 }
  0xab   :  { %v235_v36 = vmax.f32 %v219_v30, 0.0  ;;  %v239_v37 = vmax.f32 %v223_v31, 0.0 }
  0xad   :  { %v369_v38 = vpack.c.bf16 %v235_v36, %v234_v34  ;;  %v379_v39 = vpack.c.bf16 %v239_v37, %v238_v35  ;;  %v176_v40 = vpop.f32.mrf.mxu2  ;;  %v186_v41 = vpop.f32.mrf.mxu3 }
  0xae   :  { %v208_v44 = vmul.f32 %v515_v18, %v176_v40  ;;  %v212_v45 = vmul.f32 %v515_v18, %v186_v41  ;;  %v159_v46 = vpop.f32.mrf.mxu0  ;;  %v169_v47 = vpop.f32.mrf.mxu1 }
  0xaf   :  { %370 = vst [vmem:[%s582_s4] sm:$0xff] %v369_v38   ;;  %v201_v54 = vmul.f32 %v515_v18, %v159_v46  ;;  %v205_v55 = vmul.f32 %v515_v18, %v169_v47 }
  0xb0   :  { %407 = vst [vmem:[%s582_s4 + $0x10] sm:$0xff] %v379_v39   ;;  %v227_v48 = vadd.f32 %v521_v20, %v208_v44  ;;  %v231_v49 = vadd.f32 %v521_v20, %v212_v45 }
  0xb1   :  { %v220_v62 = vadd.f32 %v521_v20, %v201_v54  ;;  %v224_v63 = vadd.f32 %v521_v20, %v205_v55 }
  0xb2   :  { %v243_v52 = vmax.f32 %v227_v48, 0.0  ;;  %v247_v53 = vmax.f32 %v231_v49, 0.0 }
  0xb3   :  { %v236_v6 = vmax.f32 %v220_v62, 0.0  ;;  %v240_v7 = vmax.f32 %v224_v63, 0.0 }
  0xb4   :  { %v389_v56 = vpack.c.bf16 %v243_v52, %v242_v50  ;;  %v399_v57 = vpack.c.bf16 %v247_v53, %v246_v51 }
  0xb5   :  { %v179_v58 = vpop.f32.mrf.mxu2  ;;  %v189_v59 = vpop.f32.mrf.mxu3 }
  0xb6   :  { %409 = vst [vmem:[%s582_s4 + $0x20] sm:$0xff] %v389_v56   ;;  %v161_v60 = vpop.f32.mrf.mxu0  ;;  %v171_v61 = vpop.f32.mrf.mxu1  ;;  %v209_v4 = vmul.f32 %v515_v18, %v179_v58  ;;  %v213_v5 = vmul.f32 %v515_v18, %v189_v59 }
  0xb7   :  { %411 = vst [vmem:[%s582_s4 + $0x30] sm:$0xff] %v399_v57   ;;  %v202_v0 = vmul.f32 %v515_v18, %v161_v60  ;;  %v206_v1 = vmul.f32 %v515_v18, %v171_v61 }
  0xb8   :  { %v228_v14 = vadd.f32 %v521_v20, %v209_v4  ;;  %v232_v15 = vadd.f32 %v521_v20, %v213_v5 }
  0xb9   :  { %v221_v2 = vadd.f32 %v521_v20, %v202_v0  ;;  %v225_v3 = vadd.f32 %v521_v20, %v206_v1 }
  0xba   :  { %v244_v22 = vmax.f32 %v228_v14, 0.0  ;;  %v248_v23 = vmax.f32 %v232_v15, 0.0 }
  0xbb   :  { %v237_v8 = vmax.f32 %v221_v2, 0.0  ;;  %v241_v9 = vmax.f32 %v225_v3, 0.0 }
  0xbd   :  { %v374_v10 = vpack.c.bf16 %v237_v8, %v236_v6  ;;  %v384_v11 = vpack.c.bf16 %v241_v9, %v240_v7  ;;  %v181_v12 = vpop.f32.mrf.mxu2  ;;  %v191_v13 = vpop.f32.mrf.mxu3 }
  0xbe   :  { %v210_v16 = vmul.f32 %v515_v18, %v181_v12  ;;  %v214_v17 = vmul.f32 %v515_v18, %v191_v13 }
  0xbf   :  { %406 = vst [vmem:[%s582_s4 + $0x8] sm:$0xff] %v374_v10  }
  0xc0   :  { %408 = vst [vmem:[%s582_s4 + $0x18] sm:$0xff] %v384_v11   ;;  %v229_v19 = vadd.f32 %v521_v20, %v210_v16  ;;  %v233_v21 = vadd.f32 %v521_v20, %v214_v17 }
  0xc2   :  { %v245_v24 = vmax.f32 %v229_v19, 0.0  ;;  %v249_v25 = vmax.f32 %v233_v21, 0.0 }
  0xc4   :  { %v394_v26 = vpack.c.bf16 %v245_v24, %v244_v22  ;;  %v404_v27 = vpack.c.bf16 %v249_v25, %v248_v23 }
  0xc6   :  { %410 = vst [vmem:[%s582_s4 + $0x28] sm:$0xff] %v394_v26  }
  0xc7   :  { %412 = vst [vmem:[%s582_s4 + $0x38] sm:$0xff] %v404_v27  }

// kernel: forward.56
= control target key start
LH: loop header
LB: loop body
LE: loop exit
PB: predicated region body
PF: predicated region fallthrough
CT: control target
= control target key end

     0   :  { %s1116_s0 = inlined_call_operand.vmem [shape: bf16[9,128,128], index: 0, kind: input, shape index: {}]   ;;  %s1117_s1 = inlined_call_operand.vmem [shape: bf16[128,128], index: 1, kind: output, shape index: {}]  }
   0x1   :  { %v461_v0 = vld [vmem:[%s1116_s0] sm:$0xff]   ;;  %v788_v16 = vld [vmem:[%s1116_s0 + $0x8] sm:$0xff]   ;;  %v789_v56 = vld [vmem:[%s1116_s0 + $0x10] sm:$0xff]  }
   0x2   :  { %v795_v1 = vld [vmem:[%s1116_s0 + $0x40] sm:$0xff]   ;;  %v462_v3 = vunpack.c.l.bf16 %v461_v0  ;;  %v463_v4 = vunpack.c.h.bf16 %v461_v0  ;;  %v796_v17 = vld [vmem:[%s1116_s0 + $0x48] sm:$0xff]   ;;  %v466_v28 = vunpack.c.l.bf16 %v788_v16  ;;  %v467_v29 = vunpack.c.h.bf16 %v788_v16  ;;  %v797_v61 = vld [vmem:[%s1116_s0 + $0x50] sm:$0xff]  }
   0x3   :  { %v803_v2 = vld [vmem:[%s1116_s0 + $0x80] sm:$0xff]   ;;  %v494_v5 = vunpack.c.l.bf16 %v795_v1  ;;  %v495_v6 = vunpack.c.h.bf16 %v795_v1  ;;  %v804_v26 = vld [vmem:[%s1116_s0 + $0x88] sm:$0xff]   ;;  %v498_v30 = vunpack.c.l.bf16 %v796_v17  ;;  %v499_v31 = vunpack.c.h.bf16 %v796_v17 }
   0x4   :  { %v811_v7 = vld [vmem:[%s1116_s0 + $0xc0] sm:$0xff]   ;;  %v526_v8 = vunpack.c.l.bf16 %v803_v2  ;;  %v527_v9 = vunpack.c.h.bf16 %v803_v2  ;;  %v812_v36 = vld [vmem:[%s1116_s0 + $0xc8] sm:$0xff]   ;;  %v530_v39 = vunpack.c.l.bf16 %v804_v26  ;;  %v531_v40 = vunpack.c.h.bf16 %v804_v26 }
   0x5   :  { %v819_v10 = vld [vmem:[%s1116_s0 + $0x100] sm:$0xff]   ;;  %v558_v12 = vunpack.c.l.bf16 %v811_v7  ;;  %v559_v13 = vunpack.c.h.bf16 %v811_v7  ;;  %v296_v14 = vmax.f32 %v462_v3, %v494_v5  ;;  %v304_v15 = vmax.f32 %v463_v4, %v495_v6  ;;  %v820_v41 = vld [vmem:[%s1116_s0 + $0x108] sm:$0xff]   ;;  %v805_v7 = vld [vmem:[%s1116_s0 + $0x90] sm:$0xff]  }
   0x6   :  { %v827_v11 = vld [vmem:[%s1116_s0 + $0x140] sm:$0xff]   ;;  %v590_v18 = vunpack.c.l.bf16 %v819_v10  ;;  %v591_v19 = vunpack.c.h.bf16 %v819_v10  ;;  %v828_v46 = vld [vmem:[%s1116_s0 + $0x148] sm:$0xff]   ;;  %v562_v47 = vunpack.c.l.bf16 %v812_v36  ;;  %v563_v48 = vunpack.c.h.bf16 %v812_v36 }
   0x7   :  { %v835_v20 = vld [vmem:[%s1116_s0 + $0x180] sm:$0xff]   ;;  %v622_v21 = vunpack.c.l.bf16 %v827_v11  ;;  %v623_v22 = vunpack.c.h.bf16 %v827_v11  ;;  %v297_v24 = vmax.f32 %v296_v14, %v526_v8  ;;  %v305_v25 = vmax.f32 %v304_v15, %v527_v9  ;;  %v836_v49 = vld [vmem:[%s1116_s0 + $0x188] sm:$0xff]  }
   0x8   :  { %v843_v23 = vld [vmem:[%s1116_s0 + $0x1c0] sm:$0xff]   ;;  %v654_v32 = vunpack.c.l.bf16 %v835_v20  ;;  %v655_v33 = vunpack.c.h.bf16 %v835_v20  ;;  %v312_v50 = vmax.f32 %v466_v28, %v498_v30  ;;  %v320_v51 = vmax.f32 %v467_v29, %v499_v31  ;;  %v844_v2 = vld [vmem:[%s1116_s0 + $0x1c8] sm:$0xff]   ;;  %v837_v30 = vld [vmem:[%s1116_s0 + $0x190] sm:$0xff]  }
   0x9   :  { %v851_v27 = vld [vmem:[%s1116_s0 + $0x200] sm:$0xff]   ;;  %v298_v34 = vmax.f32 %v297_v24, %v558_v12  ;;  %v306_v35 = vmax.f32 %v305_v25, %v559_v13  ;;  %v686_v37 = vunpack.c.l.bf16 %v843_v23  ;;  %v687_v38 = vunpack.c.h.bf16 %v843_v23  ;;  %v852_v10 = vld [vmem:[%s1116_s0 + $0x208] sm:$0xff]   ;;  %v813_v13 = vld [vmem:[%s1116_s0 + $0xd0] sm:$0xff]  }
   0xa   :  { %v718_v42 = vunpack.c.l.bf16 %v851_v27  ;;  %v719_v43 = vunpack.c.h.bf16 %v851_v27  ;;  %v594_v54 = vunpack.c.l.bf16 %v820_v41  ;;  %v595_v55 = vunpack.c.h.bf16 %v820_v41  ;;  %v829_v27 = vld [vmem:[%s1116_s0 + $0x150] sm:$0xff]  }
   0xb   :  { %v299_v44 = vmax.f32 %v298_v34, %v590_v18  ;;  %v307_v45 = vmax.f32 %v306_v35, %v591_v19  ;;  %v626_v57 = vunpack.c.l.bf16 %v828_v46  ;;  %v627_v58 = vunpack.c.h.bf16 %v828_v46 }
   0xc   :  { %v313_v59 = vmax.f32 %v312_v50, %v530_v39  ;;  %v321_v60 = vmax.f32 %v320_v51, %v531_v40  ;;  %v658_v0 = vunpack.c.l.bf16 %v836_v49  ;;  %v659_v1 = vunpack.c.h.bf16 %v836_v49 }
   0xd   :  { %v300_v52 = vmax.f32 %v299_v44, %v622_v21  ;;  %v308_v53 = vmax.f32 %v307_v45, %v623_v22  ;;  %v470_v5 = vunpack.c.l.bf16 %v789_v56  ;;  %v471_v6 = vunpack.c.h.bf16 %v789_v56  ;;  %v821_v22 = vld [vmem:[%s1116_s0 + $0x110] sm:$0xff]  }
   0xe   :  { %v314_v3 = vmax.f32 %v313_v59, %v562_v47  ;;  %v322_v4 = vmax.f32 %v321_v60, %v563_v48  ;;  %v502_v11 = vunpack.c.l.bf16 %v797_v61  ;;  %v503_v12 = vunpack.c.h.bf16 %v797_v61  ;;  %v845_v47 = vld [vmem:[%s1116_s0 + $0x1d0] sm:$0xff]  }
   0xf   :  { %v301_v62 = vmax.f32 %v300_v52, %v654_v32  ;;  %v309_v63 = vmax.f32 %v308_v53, %v655_v33  ;;  %v690_v14 = vunpack.c.l.bf16 %v844_v2  ;;  %v691_v15 = vunpack.c.h.bf16 %v844_v2  ;;  %v806_v52 = vld [vmem:[%s1116_s0 + $0x98] sm:$0xff]  }
  0x10   :  { %v315_v16 = vmax.f32 %v314_v3, %v594_v54  ;;  %v323_v17 = vmax.f32 %v322_v4, %v595_v55  ;;  %v534_v20 = vunpack.c.l.bf16 %v805_v7  ;;  %v535_v21 = vunpack.c.h.bf16 %v805_v7  ;;  %v853_v55 = vld [vmem:[%s1116_s0 + $0x210] sm:$0xff]   ;;  %v822_v3 = vld [vmem:[%s1116_s0 + $0x118] sm:$0xff]  }
  0x11   :  { %v302_v8 = vmax.f32 %v301_v62, %v686_v37  ;;  %v310_v9 = vmax.f32 %v309_v63, %v687_v38  ;;  %v722_v23 = vunpack.c.l.bf16 %v852_v10  ;;  %v566_v26 = vunpack.c.l.bf16 %v813_v13  ;;  %v790_v37 = vld [vmem:[%s1116_s0 + $0x18] sm:$0xff]  }
  0x12   :  { %v316_v24 = vmax.f32 %v315_v16, %v626_v57  ;;  %v324_v25 = vmax.f32 %v323_v17, %v627_v58  ;;  %v567_v29 = vunpack.c.h.bf16 %v813_v13  ;;  %v328_v31 = vmax.f32 %v470_v5, %v502_v11  ;;  %v814_v62 = vld [vmem:[%s1116_s0 + $0xd8] sm:$0xff]  }
  0x13   :  { %v303_v18 = vmax.f32 %v302_v8, %v718_v42  ;;  %v311_v19 = vmax.f32 %v310_v9, %v719_v43  ;;  %v336_v32 = vmax.f32 %v471_v6, %v503_v12  ;;  %v723_v33 = vunpack.c.h.bf16 %v852_v10  ;;  %v798_v42 = vld [vmem:[%s1116_s0 + $0x58] sm:$0xff]  }
  0x14   :  { %v317_v34 = vmax.f32 %v316_v24, %v658_v0  ;;  %v325_v35 = vmax.f32 %v324_v25, %v659_v1  ;;  %v598_v36 = vunpack.c.l.bf16 %v821_v22  ;;  %v599_v38 = vunpack.c.h.bf16 %v821_v22  ;;  %v830_v8 = vld [vmem:[%s1116_s0 + $0x158] sm:$0xff]  }
  0x15   :  { %v751_v28 = vpack.c.bf16 %v311_v19, %v303_v18  ;;  %v630_v39 = vunpack.c.l.bf16 %v829_v27  ;;  %v329_v40 = vmax.f32 %v328_v31, %v534_v20  ;;  %v337_v41 = vmax.f32 %v336_v32, %v535_v21  ;;  %v838_v11 = vld [vmem:[%s1116_s0 + $0x198] sm:$0xff]   ;;  %v791_v18 = vld [vmem:[%s1116_s0 + $0x20] sm:$0xff]  }
  0x16   :  { %v318_v43 = vmax.f32 %v317_v34, %v690_v14  ;;  %v326_v44 = vmax.f32 %v325_v35, %v691_v15  ;;  %v631_v45 = vunpack.c.h.bf16 %v829_v27  ;;  %v662_v46 = vunpack.c.l.bf16 %v837_v30  ;;  %v799_v19 = vld [vmem:[%s1116_s0 + $0x60] sm:$0xff]  }
  0x17   :  { %752 = vst [vmem:[%s1117_s1] sm:$0xff] %v751_v28   ;;  %v330_v48 = vmax.f32 %v329_v40, %v566_v26  ;;  %v338_v49 = vmax.f32 %v337_v41, %v567_v29  ;;  %v474_v50 = vunpack.c.l.bf16 %v790_v37  ;;  %v475_v51 = vunpack.c.h.bf16 %v790_v37  ;;  %v846_v28 = vld [vmem:[%s1116_s0 + $0x1d8] sm:$0xff]   ;;  %v807_v29 = vld [vmem:[%s1116_s0 + $0xa0] sm:$0xff]  }
  0x18   :  { %v319_v53 = vmax.f32 %v318_v43, %v722_v23  ;;  %v327_v54 = vmax.f32 %v326_v44, %v723_v33  ;;  %v506_v56 = vunpack.c.l.bf16 %v798_v42  ;;  %v507_v57 = vunpack.c.h.bf16 %v798_v42  ;;  %v823_v44 = vld [vmem:[%s1116_s0 + $0x120] sm:$0xff]  }
  0x19   :  { %v663_v58 = vunpack.c.h.bf16 %v837_v30  ;;  %v694_v59 = vunpack.c.l.bf16 %v845_v47  ;;  %v331_v60 = vmax.f32 %v330_v48, %v598_v36  ;;  %v339_v61 = vmax.f32 %v338_v49, %v599_v38  ;;  %v854_v30 = vld [vmem:[%s1116_s0 + $0x218] sm:$0xff]  }
  0x1a   :  { %v756_v63 = vpack.c.bf16 %v327_v54, %v319_v53  ;;  %v695_v0 = vunpack.c.h.bf16 %v845_v47  ;;  %v538_v1 = vunpack.c.l.bf16 %v806_v52  ;;  %v539_v2 = vunpack.c.h.bf16 %v806_v52  ;;  %v831_v52 = vld [vmem:[%s1116_s0 + $0x160] sm:$0xff]  }
  0x1b   :  { %v726_v4 = vunpack.c.l.bf16 %v853_v55  ;;  %v727_v5 = vunpack.c.h.bf16 %v853_v55  ;;  %v332_v6 = vmax.f32 %v331_v60, %v630_v39  ;;  %v340_v7 = vmax.f32 %v339_v61, %v631_v45  ;;  %v815_v39 = vld [vmem:[%s1116_s0 + $0xe0] sm:$0xff]  }
  0x1c   :  { %859 = vst [vmem:[%s1117_s1 + $0x8] sm:$0xff] %v756_v63   ;;  %v570_v9 = vunpack.c.l.bf16 %v814_v62  ;;  %v571_v10 = vunpack.c.h.bf16 %v814_v62  ;;  %v344_v12 = vmax.f32 %v474_v50, %v506_v56  ;;  %v352_v13 = vmax.f32 %v475_v51, %v507_v57  ;;  %v839_v53 = vld [vmem:[%s1116_s0 + $0x1a0] sm:$0xff]  }
  0x1d   :  { %v333_v14 = vmax.f32 %v332_v6, %v662_v46  ;;  %v341_v15 = vmax.f32 %v340_v7, %v663_v58  ;;  %v602_v16 = vunpack.c.l.bf16 %v822_v3  ;;  %v603_v17 = vunpack.c.h.bf16 %v822_v3  ;;  %v847_v7 = vld [vmem:[%s1116_s0 + $0x1e0] sm:$0xff]  }
  0x1e   :  { %v634_v20 = vunpack.c.l.bf16 %v830_v8  ;;  %v635_v21 = vunpack.c.h.bf16 %v830_v8  ;;  %v345_v22 = vmax.f32 %v344_v12, %v538_v1  ;;  %v353_v23 = vmax.f32 %v352_v13, %v539_v2 }
  0x1f   :  { %v334_v24 = vmax.f32 %v333_v14, %v694_v59  ;;  %v342_v25 = vmax.f32 %v341_v15, %v695_v0  ;;  %v666_v26 = vunpack.c.l.bf16 %v838_v11  ;;  %v667_v27 = vunpack.c.h.bf16 %v838_v11  ;;  %v792_v59 = vld [vmem:[%s1116_s0 + $0x28] sm:$0xff]  }
  0x20   :  { %v346_v31 = vmax.f32 %v345_v22, %v570_v9  ;;  %v354_v32 = vmax.f32 %v353_v23, %v571_v10  ;;  %v478_v33 = vunpack.c.l.bf16 %v791_v18  ;;  %v510_v34 = vunpack.c.l.bf16 %v799_v19  ;;  %v800_v0 = vld [vmem:[%s1116_s0 + $0x68] sm:$0xff]  }
  0x21   :  { %v335_v35 = vmax.f32 %v334_v24, %v726_v4  ;;  %v343_v36 = vmax.f32 %v342_v25, %v727_v5  ;;  %v479_v37 = vunpack.c.h.bf16 %v791_v18  ;;  %v511_v38 = vunpack.c.h.bf16 %v799_v19  ;;  %v808_v10 = vld [vmem:[%s1116_s0 + $0xa8] sm:$0xff]  }
  0x22   :  { %v698_v40 = vunpack.c.l.bf16 %v846_v28  ;;  %v347_v41 = vmax.f32 %v346_v31, %v602_v16  ;;  %v355_v42 = vmax.f32 %v354_v32, %v603_v17  ;;  %v542_v43 = vunpack.c.l.bf16 %v807_v29  ;;  %v816_v15 = vld [vmem:[%s1116_s0 + $0xe8] sm:$0xff]  }
  0x23   :  { %v761_v45 = vpack.c.bf16 %v343_v36, %v335_v35  ;;  %v699_v46 = vunpack.c.h.bf16 %v846_v28  ;;  %v730_v47 = vunpack.c.l.bf16 %v854_v30  ;;  %v543_v48 = vunpack.c.h.bf16 %v807_v29  ;;  %v824_v25 = vld [vmem:[%s1116_s0 + $0x128] sm:$0xff]  }
  0x24   :  { %v348_v49 = vmax.f32 %v347_v41, %v634_v20  ;;  %v356_v50 = vmax.f32 %v355_v42, %v635_v21  ;;  %v574_v51 = vunpack.c.l.bf16 %v815_v39  ;;  %v360_v54 = vmax.f32 %v478_v33, %v510_v34  ;;  %v855_v21 = vld [vmem:[%s1116_s0 + $0x220] sm:$0xff]   ;;  %v832_v32 = vld [vmem:[%s1116_s0 + $0x168] sm:$0xff]  }
  0x25   :  { %860 = vst [vmem:[%s1117_s1 + $0x10] sm:$0xff] %v761_v45   ;;  %v731_v55 = vunpack.c.h.bf16 %v854_v30  ;;  %v575_v56 = vunpack.c.h.bf16 %v815_v39  ;;  %v606_v57 = vunpack.c.l.bf16 %v823_v44  ;;  %v368_v58 = vmax.f32 %v479_v37, %v511_v38  ;;  %v840_v33 = vld [vmem:[%s1116_s0 + $0x1a8] sm:$0xff]   ;;  %v801_v45 = vld [vmem:[%s1116_s0 + $0x70] sm:$0xff]  }
  0x26   :  { %v349_v60 = vmax.f32 %v348_v49, %v666_v26  ;;  %v357_v61 = vmax.f32 %v356_v50, %v667_v27  ;;  %v607_v62 = vunpack.c.h.bf16 %v823_v44  ;;  %v361_v63 = vmax.f32 %v360_v54, %v542_v43 }
  0x27   :  { %v638_v1 = vunpack.c.l.bf16 %v831_v52  ;;  %v639_v2 = vunpack.c.h.bf16 %v831_v52  ;;  %v670_v3 = vunpack.c.l.bf16 %v839_v53  ;;  %v369_v4 = vmax.f32 %v368_v58, %v543_v48 }
  0x28   :  { %v350_v5 = vmax.f32 %v349_v60, %v698_v40  ;;  %v358_v6 = vmax.f32 %v357_v61, %v699_v46  ;;  %v362_v8 = vmax.f32 %v361_v63, %v574_v51  ;;  %v482_v9 = vunpack.c.l.bf16 %v792_v59  ;;  %v793_v40 = vld [vmem:[%s1116_s0 + $0x30] sm:$0xff]   ;;  %v848_v51 = vld [vmem:[%s1116_s0 + $0x1e8] sm:$0xff]  }
  0x29   :  { %v370_v11 = vmax.f32 %v369_v4, %v575_v56  ;;  %v483_v12 = vunpack.c.h.bf16 %v792_v59  ;;  %v514_v13 = vunpack.c.l.bf16 %v800_v0  ;;  %v515_v14 = vunpack.c.h.bf16 %v800_v0  ;;  %v817_v0 = vld [vmem:[%s1116_s0 + $0xf0] sm:$0xff]  }
  0x2a   :  { %v351_v16 = vmax.f32 %v350_v5, %v730_v47  ;;  %v359_v17 = vmax.f32 %v358_v6, %v731_v55  ;;  %v671_v18 = vunpack.c.h.bf16 %v839_v53  ;;  %v363_v19 = vmax.f32 %v362_v8, %v606_v57  ;;  %v809_v55 = vld [vmem:[%s1116_s0 + $0xb0] sm:$0xff]  }
  0x2b   :  { %v702_v20 = vunpack.c.l.bf16 %v847_v7  ;;  %v371_v22 = vmax.f32 %v370_v11, %v607_v62  ;;  %v546_v23 = vunpack.c.l.bf16 %v808_v10  ;;  %v547_v24 = vunpack.c.h.bf16 %v808_v10 }
  0x2c   :  { %v766_v26 = vpack.c.bf16 %v359_v17, %v351_v16  ;;  %v703_v27 = vunpack.c.h.bf16 %v847_v7  ;;  %v364_v28 = vmax.f32 %v363_v19, %v638_v1  ;;  %v578_v29 = vunpack.c.l.bf16 %v816_v15  ;;  %v794_v19 = vld [vmem:[%s1116_s0 + $0x38] sm:$0xff]  }
  0x2d   :  { %v372_v30 = vmax.f32 %v371_v22, %v639_v2  ;;  %v579_v31 = vunpack.c.h.bf16 %v816_v15  ;;  %v376_v34 = vmax.f32 %v482_v9, %v514_v13  ;;  %v384_v35 = vmax.f32 %v483_v12, %v515_v14  ;;  %v856_v2 = vld [vmem:[%s1116_s0 + $0x228] sm:$0xff]   ;;  %v825_v9 = vld [vmem:[%s1116_s0 + $0x130] sm:$0xff]  }
  0x2e   :  { %861 = vst [vmem:[%s1117_s1 + $0x18] sm:$0xff] %v766_v26   ;;  %v734_v36 = vunpack.c.l.bf16 %v855_v21  ;;  %v735_v37 = vunpack.c.h.bf16 %v855_v21  ;;  %v365_v38 = vmax.f32 %v364_v28, %v670_v3  ;;  %v610_v39 = vunpack.c.l.bf16 %v824_v25  ;;  %v833_v12 = vld [vmem:[%s1116_s0 + $0x170] sm:$0xff]  }
  0x2f   :  { %v373_v41 = vmax.f32 %v372_v30, %v671_v18  ;;  %v611_v42 = vunpack.c.h.bf16 %v824_v25  ;;  %v377_v43 = vmax.f32 %v376_v34, %v546_v23  ;;  %v385_v44 = vmax.f32 %v384_v35, %v547_v24  ;;  %v802_v24 = vld [vmem:[%s1116_s0 + $0x78] sm:$0xff]  }
  0x30   :  { %v366_v46 = vmax.f32 %v365_v38, %v702_v20  ;;  %v642_v47 = vunpack.c.l.bf16 %v832_v32  ;;  %v643_v48 = vunpack.c.h.bf16 %v832_v32  ;;  %v674_v49 = vunpack.c.l.bf16 %v840_v33  ;;  %v810_v34 = vld [vmem:[%s1116_s0 + $0xb8] sm:$0xff]  }
  0x31   :  { %v374_v50 = vmax.f32 %v373_v41, %v703_v27  ;;  %v378_v52 = vmax.f32 %v377_v43, %v578_v29  ;;  %v386_v53 = vmax.f32 %v385_v44, %v579_v31  ;;  %v486_v54 = vunpack.c.l.bf16 %v793_v40  ;;  %v841_v29 = vld [vmem:[%s1116_s0 + $0x1b0] sm:$0xff]   ;;  %v818_v44 = vld [vmem:[%s1116_s0 + $0xf8] sm:$0xff]  }
  0x32   :  { %v367_v56 = vmax.f32 %v366_v46, %v734_v36  ;;  %v487_v57 = vunpack.c.h.bf16 %v793_v40  ;;  %v518_v58 = vunpack.c.l.bf16 %v801_v45  ;;  %v519_v59 = vunpack.c.h.bf16 %v801_v45  ;;  %v857_v46 = vld [vmem:[%s1116_s0 + $0x230] sm:$0xff]  }
  0x33   :  { %v375_v60 = vmax.f32 %v374_v50, %v735_v37  ;;  %v675_v61 = vunpack.c.h.bf16 %v840_v33  ;;  %v379_v62 = vmax.f32 %v378_v52, %v610_v39  ;;  %v387_v63 = vmax.f32 %v386_v53, %v611_v42  ;;  %v849_v37 = vld [vmem:[%s1116_s0 + $0x1f0] sm:$0xff]   ;;  %v826_v53 = vld [vmem:[%s1116_s0 + $0x138] sm:$0xff]  }
  0x34   :  { %v706_v1 = vunpack.c.l.bf16 %v848_v51  ;;  %v550_v3 = vunpack.c.l.bf16 %v809_v55  ;;  %v551_v4 = vunpack.c.h.bf16 %v809_v55  ;;  %v707_v6 = vunpack.c.h.bf16 %v848_v51 }
  0x35   :  { %v771_v5 = vpack.c.bf16 %v375_v60, %v367_v56  ;;  %v380_v7 = vmax.f32 %v379_v62, %v642_v47  ;;  %v388_v8 = vmax.f32 %v387_v63, %v643_v48  ;;  %v582_v10 = vunpack.c.l.bf16 %v817_v0  ;;  %v834_v62 = vld [vmem:[%s1116_s0 + $0x178] sm:$0xff]  }
  0x36   :  { %v583_v11 = vunpack.c.h.bf16 %v817_v0  ;;  %v392_v13 = vmax.f32 %v486_v54, %v518_v58  ;;  %v400_v14 = vmax.f32 %v487_v57, %v519_v59  ;;  %v738_v15 = vunpack.c.l.bf16 %v856_v2 }
  0x37   :  { %862 = vst [vmem:[%s1117_s1 + $0x20] sm:$0xff] %v771_v5   ;;  %v739_v16 = vunpack.c.h.bf16 %v856_v2  ;;  %v381_v17 = vmax.f32 %v380_v7, %v674_v49  ;;  %v389_v18 = vmax.f32 %v388_v8, %v675_v61  ;;  %v614_v20 = vunpack.c.l.bf16 %v825_v9  ;;  %v842_v5 = vld [vmem:[%s1116_s0 + $0x1b8] sm:$0xff]  }
  0x38   :  { %v615_v21 = vunpack.c.h.bf16 %v825_v9  ;;  %v393_v22 = vmax.f32 %v392_v13, %v550_v3  ;;  %v401_v23 = vmax.f32 %v400_v14, %v551_v4  ;;  %v646_v27 = vunpack.c.l.bf16 %v833_v12 }
  0x39   :  { %v382_v25 = vmax.f32 %v381_v17, %v706_v1  ;;  %v390_v26 = vmax.f32 %v389_v18, %v707_v6  ;;  %v647_v28 = vunpack.c.h.bf16 %v833_v12  ;;  %v490_v32 = vunpack.c.l.bf16 %v794_v19  ;;  %v850_v12 = vld [vmem:[%s1116_s0 + $0x1f8] sm:$0xff]  }
  0x3a   :  { %v394_v30 = vmax.f32 %v393_v22, %v582_v10  ;;  %v402_v31 = vmax.f32 %v401_v23, %v583_v11  ;;  %v491_v33 = vunpack.c.h.bf16 %v794_v19  ;;  %v522_v38 = vunpack.c.l.bf16 %v802_v24  ;;  %v858_v18 = vld [vmem:[%s1116_s0 + $0x238] sm:$0xff]  }
  0x3b   :  { %v383_v35 = vmax.f32 %v382_v25, %v738_v15  ;;  %v391_v36 = vmax.f32 %v390_v26, %v739_v16  ;;  %v523_v39 = vunpack.c.h.bf16 %v802_v24  ;;  %v678_v40 = vunpack.c.l.bf16 %v841_v29 }
  0x3c   :  { %v679_v41 = vunpack.c.h.bf16 %v841_v29  ;;  %v395_v42 = vmax.f32 %v394_v30, %v614_v20  ;;  %v403_v43 = vmax.f32 %v402_v31, %v615_v21  ;;  %v554_v47 = vunpack.c.l.bf16 %v810_v34 }
  0x3d   :  { %v776_v45 = vpack.c.bf16 %v391_v36, %v383_v35  ;;  %v555_v48 = vunpack.c.h.bf16 %v810_v34  ;;  %v710_v49 = vunpack.c.l.bf16 %v849_v37  ;;  %v711_v50 = vunpack.c.h.bf16 %v849_v37 }
  0x3e   :  { %v396_v51 = vmax.f32 %v395_v42, %v646_v27  ;;  %v404_v52 = vmax.f32 %v403_v43, %v647_v28  ;;  %v586_v54 = vunpack.c.l.bf16 %v818_v44  ;;  %v587_v55 = vunpack.c.h.bf16 %v818_v44 }
  0x3f   :  { %863 = vst [vmem:[%s1117_s1 + $0x28] sm:$0xff] %v776_v45   ;;  %v408_v56 = vmax.f32 %v490_v32, %v522_v38  ;;  %v416_v57 = vmax.f32 %v491_v33, %v523_v39  ;;  %v742_v58 = vunpack.c.l.bf16 %v857_v46  ;;  %v743_v59 = vunpack.c.h.bf16 %v857_v46 }
  0x40   :  { %v397_v60 = vmax.f32 %v396_v51, %v678_v40  ;;  %v405_v61 = vmax.f32 %v404_v52, %v679_v41  ;;  %v618_v63 = vunpack.c.l.bf16 %v826_v53  ;;  %v619_v0 = vunpack.c.h.bf16 %v826_v53 }
  0x41   :  { %v409_v1 = vmax.f32 %v408_v56, %v554_v47  ;;  %v417_v2 = vmax.f32 %v416_v57, %v555_v48  ;;  %v650_v6 = vunpack.c.l.bf16 %v834_v62  ;;  %v651_v7 = vunpack.c.h.bf16 %v834_v62 }
  0x42   :  { %v398_v3 = vmax.f32 %v397_v60, %v710_v49  ;;  %v406_v4 = vmax.f32 %v405_v61, %v711_v50  ;;  %v682_v13 = vunpack.c.l.bf16 %v842_v5  ;;  %v683_v14 = vunpack.c.h.bf16 %v842_v5 }
  0x43   :  { %v410_v8 = vmax.f32 %v409_v1, %v586_v54  ;;  %v418_v9 = vmax.f32 %v417_v2, %v587_v55  ;;  %v714_v19 = vunpack.c.l.bf16 %v850_v12  ;;  %v715_v20 = vunpack.c.h.bf16 %v850_v12 }
  0x44   :  { %v399_v10 = vmax.f32 %v398_v3, %v742_v58  ;;  %v407_v11 = vmax.f32 %v406_v4, %v743_v59  ;;  %v746_v23 = vunpack.c.l.bf16 %v858_v18  ;;  %v747_v24 = vunpack.c.h.bf16 %v858_v18 }
  0x45   :  { %v411_v15 = vmax.f32 %v410_v8, %v618_v63  ;;  %v419_v16 = vmax.f32 %v418_v9, %v619_v0 }
  0x46   :  { %v781_v17 = vpack.c.bf16 %v407_v11, %v399_v10 }
  0x47   :  { %v412_v21 = vmax.f32 %v411_v15, %v650_v6  ;;  %v420_v22 = vmax.f32 %v419_v16, %v651_v7 }
  0x48   :  { %864 = vst [vmem:[%s1117_s1 + $0x30] sm:$0xff] %v781_v17  }
  0x49   :  { %v413_v25 = vmax.f32 %v412_v21, %v682_v13  ;;  %v421_v26 = vmax.f32 %v420_v22, %v683_v14 }
  0x4b   :  { %v414_v27 = vmax.f32 %v413_v25, %v714_v19  ;;  %v422_v28 = vmax.f32 %v421_v26, %v715_v20 }
  0x4d   :  { %v415_v29 = vmax.f32 %v414_v27, %v746_v23  ;;  %v423_v30 = vmax.f32 %v422_v28, %v747_v24 }
  0x4f   :  { %v786_v31 = vpack.c.bf16 %v423_v30, %v415_v29 }
  0x51   :  { %865 = vst [vmem:[%s1117_s1 + $0x38] sm:$0xff] %v786_v31  }

// kernel: forward.60
= control target key start
LH: loop header
LB: loop body
LE: loop exit
PB: predicated region body
PF: predicated region fallthrough
CT: control target
= control target key end

     0   :  { %s697_s1 = inlined_call_operand.vmem [shape: bf16[128,128], index: 1, kind: input, shape index: {}]   ;;  %s698_s2 = inlined_call_operand.vmem [shape: f32[1,128], index: 2, kind: input, shape index: {}]   ;;  %s699_s3 = inlined_call_operand.vmem [shape: f32[1,128], index: 3, kind: input, shape index: {}]   ;;  %s700_s0 = inlined_call_operand.vmem [shape: bf16[128,128], index: 0, kind: input, shape index: {}]   ;;  %s701_s4 = inlined_call_operand.vmem [shape: bf16[128,128], index: 4, kind: input, shape index: {}]   ;;  %s702_s5 = inlined_call_operand.vmem [shape: bf16[128,128], index: 5, kind: output, shape index: {}]  }
   0x1   :  { %v416_v0 = vld [vmem:[%s697_s1 + $0x38] sm:$0xff]  ;;  %v415_v1 = vld [vmem:[%s697_s1 + $0x30] sm:$0xff]  ;;  %v414_v2 = vld [vmem:[%s697_s1 + $0x28] sm:$0xff] }
   0x2   :  { %148 = vmatpush.bf16.msra.mxu0 %v416_v0  ;;  %503 = vmatpush.bf16.msra.mxu1 %v416_v0  ;;  %v413_v3 = vld [vmem:[%s697_s1 + $0x20] sm:$0xff]  ;;  %v412_v4 = vld [vmem:[%s697_s1 + $0x18] sm:$0xff]  ;;  %v411_v5 = vld [vmem:[%s697_s1 + $0x10] sm:$0xff] }
   0x3   :  { %504 = vmatpush.bf16.msra.mxu2 %v416_v0  ;;  %505 = vmatpush.bf16.msra.mxu3 %v416_v0  ;;  %v410_v6 = vld [vmem:[%s697_s1 + $0x8] sm:$0xff]  ;;  %v409_v7 = vld [vmem:[%s697_s1] sm:$0xff]  ;;  %v403_v9 = vld [vmem:[%s700_s0 + $0x10] sm:$0xff] }
   0x4   :  { %v401_v8 = vld [vmem:[%s700_s0] sm:$0xff]  ;;  %v407_v11 = vld [vmem:[%s700_s0 + $0x30] sm:$0xff]  ;;  %v402_v12 = vld [vmem:[%s700_s0 + $0x8] sm:$0xff] }
   0x5   :  { %v405_v10 = vld [vmem:[%s700_s0 + $0x20] sm:$0xff]  ;;  %v404_v13 = vld [vmem:[%s700_s0 + $0x18] sm:$0xff]  ;;  %v406_v14 = vld [vmem:[%s700_s0 + $0x28] sm:$0xff] }
   0x6   :  { %149 = vmatpush.bf16.msra.mxu0 %v415_v1  ;;  %506 = vmatpush.bf16.msra.mxu1 %v415_v1  ;;  %v408_v15 = vld [vmem:[%s700_s0 + $0x38] sm:$0xff]  ;;  %v610_v16 = vld [vmem:[%s698_s2] ss:$0 sm:$0xff]  ;;  %v490_v23 = vld [vmem:[%s701_s4 + $0x10] sm:$0xff]  }
   0x7   :  { %507 = vmatpush.bf16.msra.mxu2 %v415_v1  ;;  %508 = vmatpush.bf16.msra.mxu3 %v415_v1  ;;  %v616_v20 = vld [vmem:[%s699_s3] ss:$0 sm:$0xff]  ;;  %v427_v26 = vunpack.c.l.bf16 %v490_v23  ;;  %v428_v34 = vunpack.c.h.bf16 %v490_v23  ;;  %v494_v41 = vld [vmem:[%s701_s4 + $0x30] sm:$0xff]  }
   0x8   :  { %v418_v22 = vld [vmem:[%s701_s4] sm:$0xff]   ;;  %v443_v48 = vunpack.c.l.bf16 %v494_v41  ;;  %v444_v58 = vunpack.c.h.bf16 %v494_v41 }
   0x9   :  { %v419_v24 = vunpack.c.l.bf16 %v418_v22  ;;  %v420_v32 = vunpack.c.h.bf16 %v418_v22  ;;  %v492_v40 = vld [vmem:[%s701_s4 + $0x20] sm:$0xff]  }
   0xa   :  { %150 = vmatpush.bf16.msra.mxu0 %v414_v2  ;;  %509 = vmatpush.bf16.msra.mxu1 %v414_v2  ;;  %v435_v46 = vunpack.c.l.bf16 %v492_v40  ;;  %v436_v56 = vunpack.c.h.bf16 %v492_v40 }
   0xb   :  { %510 = vmatpush.bf16.msra.mxu2 %v414_v2  ;;  %511 = vmatpush.bf16.msra.mxu3 %v414_v2 }
   0xe   :  { %151 = vmatpush.bf16.msra.mxu0 %v413_v3  ;;  %512 = vmatpush.bf16.msra.mxu1 %v413_v3 }
   0xf   :  { %513 = vmatpush.bf16.msra.mxu2 %v413_v3  ;;  %514 = vmatpush.bf16.msra.mxu3 %v413_v3 }
  0x12   :  { %152 = vmatpush.bf16.msra.mxu0 %v412_v4  ;;  %515 = vmatpush.bf16.msra.mxu1 %v412_v4 }
  0x13   :  { %516 = vmatpush.bf16.msra.mxu2 %v412_v4  ;;  %517 = vmatpush.bf16.msra.mxu3 %v412_v4 }
  0x16   :  { %153 = vmatpush.bf16.msra.mxu0 %v411_v5  ;;  %518 = vmatpush.bf16.msra.mxu1 %v411_v5 }
  0x17   :  { %519 = vmatpush.bf16.msra.mxu2 %v411_v5  ;;  %520 = vmatpush.bf16.msra.mxu3 %v411_v5 }
  0x1a   :  { %154 = vmatpush.bf16.msra.mxu0 %v410_v6  ;;  %521 = vmatpush.bf16.msra.mxu1 %v410_v6 }
  0x1b   :  { %522 = vmatpush.bf16.msra.mxu2 %v410_v6  ;;  %523 = vmatpush.bf16.msra.mxu3 %v410_v6 }
  0x1e   :  { %155 = vmatpush.bf16.msra.mxu0 %v409_v7  ;;  %524 = vmatpush.bf16.msra.mxu1 %v409_v7 }
  0x1f   :  { %525 = vmatpush.bf16.msra.mxu2 %v409_v7  ;;  %526 = vmatpush.bf16.msra.mxu3 %v409_v7 }
  0x21   :  { %156 = vmatmul.bf16.vlgmr.msra.gmra.mxu0 %v401_v8  ;;  %166 = vmatmul.bf16.vlgmr.msra.gmra.mxu1 %v403_v9  ;;  %v489_v8 = vld [vmem:[%s701_s4 + $0x8] sm:$0xff]   ;;  %v491_v9 = vld [vmem:[%s701_s4 + $0x18] sm:$0xff]  }
  0x22   :  { %176 = vmatmul.bf16.vlgmr.msra.gmra.mxu2 %v405_v10  ;;  %186 = vmatmul.bf16.vlgmr.msra.gmra.mxu3 %v407_v11 }
  0x31   :  { %161 = vmatmul.bf16.gmra.mxu0 %v402_v12  ;;  %171 = vmatmul.bf16.gmra.mxu1 %v404_v13 }
  0x32   :  { %181 = vmatmul.bf16.gmra.mxu2 %v406_v14  ;;  %191 = vmatmul.bf16.gmra.mxu3 %v408_v15  ;;  %v423_v14 = vunpack.c.l.bf16 %v489_v8 }
  0x9e   :  { %v157_v17 = vpop.f32.mrf.mxu0  ;;  %v167_v18 = vpop.f32.mrf.mxu1 }
  0x9f   :  { %v218_v19 = vmul.f32 %v610_v16, %v157_v17  ;;  %v222_v21 = vmul.f32 %v610_v16, %v167_v18  ;;  %v431_v17 = vunpack.c.l.bf16 %v491_v9 }
  0xa1   :  { %v237_v25 = vadd.f32 %v616_v20, %v218_v19  ;;  %v241_v27 = vadd.f32 %v616_v20, %v222_v21 }
  0xa3   :  { %v269_v38 = vadd.f32 %v419_v24, %v237_v25  ;;  %v273_v39 = vadd.f32 %v427_v26, %v241_v27  ;;  %v424_v26 = vunpack.c.h.bf16 %v489_v8 }
  0xa5   :  { %v177_v28 = vpop.f32.mrf.mxu2  ;;  %v187_v29 = vpop.f32.mrf.mxu3  ;;  %v285_v50 = vmax.f32 %v269_v38, 0.0  ;;  %v289_v51 = vmax.f32 %v273_v39, 0.0 }
  0xa6   :  { %v159_v30 = vpop.f32.mrf.mxu0  ;;  %v169_v31 = vpop.f32.mrf.mxu1  ;;  %v226_v36 = vmul.f32 %v610_v16, %v177_v28  ;;  %v230_v37 = vmul.f32 %v610_v16, %v187_v29  ;;  %v432_v28 = vunpack.c.h.bf16 %v491_v9 }
  0xa7   :  { %v219_v33 = vmul.f32 %v610_v16, %v159_v30  ;;  %v223_v35 = vmul.f32 %v610_v16, %v169_v31 }
  0xa8   :  { %v245_v47 = vadd.f32 %v616_v20, %v226_v36  ;;  %v249_v49 = vadd.f32 %v616_v20, %v230_v37 }
  0xa9   :  { %v238_v42 = vadd.f32 %v616_v20, %v219_v33  ;;  %v242_v43 = vadd.f32 %v616_v20, %v223_v35  ;;  %v495_v35 = vld [vmem:[%s701_s4 + $0x38] sm:$0xff]  }
  0xaa   :  { %v277_v0 = vadd.f32 %v435_v46, %v245_v47  ;;  %v281_v1 = vadd.f32 %v443_v48, %v249_v49 }
  0xab   :  { %v270_v44 = vadd.f32 %v420_v32, %v238_v42  ;;  %v274_v45 = vadd.f32 %v428_v34, %v242_v43  ;;  %v493_v34 = vld [vmem:[%s701_s4 + $0x28] sm:$0xff]   ;;  %v447_v42 = vunpack.c.l.bf16 %v495_v35 }
  0xac   :  { %v293_v10 = vmax.f32 %v277_v0, 0.0  ;;  %v297_v11 = vmax.f32 %v281_v1, 0.0  ;;  %v439_v40 = vunpack.c.l.bf16 %v493_v34 }
  0xad   :  { %v286_v52 = vmax.f32 %v270_v44, 0.0  ;;  %v290_v53 = vmax.f32 %v274_v45, 0.0  ;;  %v179_v54 = vpop.f32.mrf.mxu2  ;;  %v189_v55 = vpop.f32.mrf.mxu3 }
  0xae   :  { %v227_v57 = vmul.f32 %v610_v16, %v179_v54  ;;  %v231_v59 = vmul.f32 %v610_v16, %v189_v55  ;;  %v162_v60 = vpop.f32.mrf.mxu0  ;;  %v172_v61 = vpop.f32.mrf.mxu1 }
  0xaf   :  { %v452_v62 = vpack.c.bf16 %v286_v52, %v285_v50  ;;  %v462_v63 = vpack.c.bf16 %v290_v53, %v289_v51  ;;  %v220_v4 = vmul.f32 %v610_v16, %v162_v60  ;;  %v224_v5 = vmul.f32 %v610_v16, %v172_v61 }
  0xb0   :  { %v246_v2 = vadd.f32 %v616_v20, %v227_v57  ;;  %v250_v3 = vadd.f32 %v616_v20, %v231_v59  ;;  %v440_v50 = vunpack.c.h.bf16 %v493_v34  ;;  %v448_v52 = vunpack.c.h.bf16 %v495_v35 }
  0xb1   :  { %453 = vst [vmem:[%s702_s5] sm:$0xff] %v452_v62   ;;  %v239_v15 = vadd.f32 %v616_v20, %v220_v4  ;;  %v243_v18 = vadd.f32 %v616_v20, %v224_v5 }
  0xb2   :  { %497 = vst [vmem:[%s702_s5 + $0x10] sm:$0xff] %v462_v63   ;;  %v278_v6 = vadd.f32 %v436_v56, %v246_v2  ;;  %v282_v7 = vadd.f32 %v444_v58, %v250_v3 }
  0xb3   :  { %v271_v32 = vadd.f32 %v423_v14, %v239_v15  ;;  %v275_v33 = vadd.f32 %v431_v17, %v243_v18 }
  0xb4   :  { %v294_v12 = vmax.f32 %v278_v6, 0.0  ;;  %v298_v13 = vmax.f32 %v282_v7, 0.0 }
  0xb5   :  { %v182_v19 = vpop.f32.mrf.mxu2  ;;  %v192_v21 = vpop.f32.mrf.mxu3  ;;  %v287_v44 = vmax.f32 %v271_v32, 0.0  ;;  %v291_v45 = vmax.f32 %v275_v33, 0.0 }
  0xb6   :  { %v472_v22 = vpack.c.bf16 %v294_v12, %v293_v10  ;;  %v482_v23 = vpack.c.bf16 %v298_v13, %v297_v11  ;;  %v164_v24 = vpop.f32.mrf.mxu0  ;;  %v174_v25 = vpop.f32.mrf.mxu1  ;;  %v228_v30 = vmul.f32 %v610_v16, %v182_v19  ;;  %v232_v31 = vmul.f32 %v610_v16, %v192_v21 }
  0xb7   :  { %v221_v27 = vmul.f32 %v610_v16, %v164_v24  ;;  %v225_v29 = vmul.f32 %v610_v16, %v174_v25 }
  0xb8   :  { %499 = vst [vmem:[%s702_s5 + $0x20] sm:$0xff] %v472_v22   ;;  %v247_v41 = vadd.f32 %v616_v20, %v228_v30  ;;  %v251_v43 = vadd.f32 %v616_v20, %v232_v31 }
  0xb9   :  { %501 = vst [vmem:[%s702_s5 + $0x30] sm:$0xff] %v482_v23   ;;  %v240_v36 = vadd.f32 %v616_v20, %v221_v27  ;;  %v244_v37 = vadd.f32 %v616_v20, %v225_v29 }
  0xba   :  { %v279_v56 = vadd.f32 %v439_v40, %v247_v41  ;;  %v283_v57 = vadd.f32 %v447_v42, %v251_v43 }
  0xbb   :  { %v272_v38 = vadd.f32 %v424_v26, %v240_v36  ;;  %v276_v39 = vadd.f32 %v432_v28, %v244_v37 }
  0xbc   :  { %v295_v62 = vmax.f32 %v279_v56, 0.0 }
  0xbd   :  { %v288_v46 = vmax.f32 %v272_v38, 0.0  ;;  %v292_v47 = vmax.f32 %v276_v39, 0.0  ;;  %v184_v48 = vpop.f32.mrf.mxu2  ;;  %v194_v49 = vpop.f32.mrf.mxu3 }
  0xbe   :  { %v229_v51 = vmul.f32 %v610_v16, %v184_v48  ;;  %v233_v53 = vmul.f32 %v610_v16, %v194_v49  ;;  %v299_v16 = vmax.f32 %v283_v57, 0.0 }
  0xbf   :  { %v457_v54 = vpack.c.bf16 %v288_v46, %v287_v44  ;;  %v467_v55 = vpack.c.bf16 %v292_v47, %v291_v45 }
  0xc0   :  { %v248_v58 = vadd.f32 %v616_v20, %v229_v51  ;;  %v252_v59 = vadd.f32 %v616_v20, %v233_v53 }
  0xc1   :  { %496 = vst [vmem:[%s702_s5 + $0x8] sm:$0xff] %v457_v54  }
  0xc2   :  { %498 = vst [vmem:[%s702_s5 + $0x18] sm:$0xff] %v467_v55   ;;  %v280_v60 = vadd.f32 %v440_v50, %v248_v58  ;;  %v284_v61 = vadd.f32 %v448_v52, %v252_v59 }
  0xc4   :  { %v296_v63 = vmax.f32 %v280_v60, 0.0  ;;  %v300_v0 = vmax.f32 %v284_v61, 0.0 }
  0xc6   :  { %v477_v1 = vpack.c.bf16 %v296_v63, %v295_v62  ;;  %v487_v2 = vpack.c.bf16 %v300_v0, %v299_v16 }
  0xc8   :  { %500 = vst [vmem:[%s702_s5 + $0x28] sm:$0xff] %v477_v1  }
  0xc9   :  { %502 = vst [vmem:[%s702_s5 + $0x38] sm:$0xff] %v487_v2  }

// kernel: forward.59
= control target key start
LH: loop header
LB: loop body
LE: loop exit
PB: predicated region body
PF: predicated region fallthrough
CT: control target
= control target key end

     0   :  { %s526_s1 = inlined_call_operand.vmem [shape: bf16[128,128], index: 1, kind: input, shape index: {}]   ;;  %s527_s2 = inlined_call_operand.vmem [shape: f32[1,128], index: 2, kind: input, shape index: {}]   ;;  %s528_s3 = inlined_call_operand.vmem [shape: f32[1,128], index: 3, kind: input, shape index: {}]   ;;  %s529_s0 = inlined_call_operand.vmem [shape: bf16[128,128], index: 0, kind: input, shape index: {}]   ;;  %s530_s4 = inlined_call_operand.vmem [shape: bf16[128,128], index: 4, kind: output, shape index: {}]  }
   0x1   :  { %v349_v0 = vld [vmem:[%s526_s1 + $0x38] sm:$0xff]  ;;  %v348_v1 = vld [vmem:[%s526_s1 + $0x30] sm:$0xff]  ;;  %v347_v2 = vld [vmem:[%s526_s1 + $0x28] sm:$0xff] }
   0x2   :  { %145 = vmatpush.bf16.msra.mxu0 %v349_v0  ;;  %397 = vmatpush.bf16.msra.mxu1 %v349_v0  ;;  %v346_v3 = vld [vmem:[%s526_s1 + $0x20] sm:$0xff]  ;;  %v345_v4 = vld [vmem:[%s526_s1 + $0x18] sm:$0xff]  ;;  %v344_v5 = vld [vmem:[%s526_s1 + $0x10] sm:$0xff] }
   0x3   :  { %398 = vmatpush.bf16.msra.mxu2 %v349_v0  ;;  %399 = vmatpush.bf16.msra.mxu3 %v349_v0  ;;  %v343_v6 = vld [vmem:[%s526_s1 + $0x8] sm:$0xff]  ;;  %v342_v7 = vld [vmem:[%s526_s1] sm:$0xff]  ;;  %v336_v9 = vld [vmem:[%s529_s0 + $0x10] sm:$0xff] }
   0x4   :  { %v334_v8 = vld [vmem:[%s529_s0] sm:$0xff]  ;;  %v340_v11 = vld [vmem:[%s529_s0 + $0x30] sm:$0xff]  ;;  %v335_v12 = vld [vmem:[%s529_s0 + $0x8] sm:$0xff] }
   0x5   :  { %v338_v10 = vld [vmem:[%s529_s0 + $0x20] sm:$0xff]  ;;  %v337_v13 = vld [vmem:[%s529_s0 + $0x18] sm:$0xff]  ;;  %v339_v14 = vld [vmem:[%s529_s0 + $0x28] sm:$0xff] }
   0x6   :  { %146 = vmatpush.bf16.msra.mxu0 %v348_v1  ;;  %400 = vmatpush.bf16.msra.mxu1 %v348_v1  ;;  %v341_v15 = vld [vmem:[%s529_s0 + $0x38] sm:$0xff]  ;;  %v421_v18 = vld [vmem:[%s527_s2] ss:$0 sm:$0xff] }
   0x7   :  { %401 = vmatpush.bf16.msra.mxu2 %v348_v1  ;;  %402 = vmatpush.bf16.msra.mxu3 %v348_v1  ;;  %v422_v20 = vld [vmem:[%s528_s3] ss:$0 sm:$0xff] }
   0xa   :  { %147 = vmatpush.bf16.msra.mxu0 %v347_v2  ;;  %403 = vmatpush.bf16.msra.mxu1 %v347_v2 }
   0xb   :  { %404 = vmatpush.bf16.msra.mxu2 %v347_v2  ;;  %405 = vmatpush.bf16.msra.mxu3 %v347_v2 }
   0xe   :  { %148 = vmatpush.bf16.msra.mxu0 %v346_v3  ;;  %406 = vmatpush.bf16.msra.mxu1 %v346_v3 }
   0xf   :  { %407 = vmatpush.bf16.msra.mxu2 %v346_v3  ;;  %408 = vmatpush.bf16.msra.mxu3 %v346_v3 }
  0x12   :  { %149 = vmatpush.bf16.msra.mxu0 %v345_v4  ;;  %409 = vmatpush.bf16.msra.mxu1 %v345_v4 }
  0x13   :  { %410 = vmatpush.bf16.msra.mxu2 %v345_v4  ;;  %411 = vmatpush.bf16.msra.mxu3 %v345_v4 }
  0x16   :  { %150 = vmatpush.bf16.msra.mxu0 %v344_v5  ;;  %412 = vmatpush.bf16.msra.mxu1 %v344_v5 }
  0x17   :  { %413 = vmatpush.bf16.msra.mxu2 %v344_v5  ;;  %414 = vmatpush.bf16.msra.mxu3 %v344_v5 }
  0x1a   :  { %151 = vmatpush.bf16.msra.mxu0 %v343_v6  ;;  %415 = vmatpush.bf16.msra.mxu1 %v343_v6 }
  0x1b   :  { %416 = vmatpush.bf16.msra.mxu2 %v343_v6  ;;  %417 = vmatpush.bf16.msra.mxu3 %v343_v6 }
  0x1e   :  { %152 = vmatpush.bf16.msra.mxu0 %v342_v7  ;;  %418 = vmatpush.bf16.msra.mxu1 %v342_v7 }
  0x1f   :  { %419 = vmatpush.bf16.msra.mxu2 %v342_v7  ;;  %420 = vmatpush.bf16.msra.mxu3 %v342_v7 }
  0x21   :  { %153 = vmatmul.bf16.vlgmr.msra.gmra.mxu0 %v334_v8  ;;  %163 = vmatmul.bf16.vlgmr.msra.gmra.mxu1 %v336_v9 }
  0x22   :  { %173 = vmatmul.bf16.vlgmr.msra.gmra.mxu2 %v338_v10  ;;  %183 = vmatmul.bf16.vlgmr.msra.gmra.mxu3 %v340_v11 }
  0x31   :  { %158 = vmatmul.bf16.gmra.mxu0 %v335_v12  ;;  %168 = vmatmul.bf16.gmra.mxu1 %v337_v13 }
  0x32   :  { %178 = vmatmul.bf16.gmra.mxu2 %v339_v14  ;;  %188 = vmatmul.bf16.gmra.mxu3 %v341_v15 }
  0x9e   :  { %v154_v16 = vpop.f32.mrf.mxu0  ;;  %v164_v17 = vpop.f32.mrf.mxu1 }
  0x9f   :  { %v199_v19 = vmul.f32 %v421_v18, %v154_v16  ;;  %v203_v21 = vmul.f32 %v421_v18, %v164_v17 }
  0xa1   :  { %v218_v28 = vadd.f32 %v422_v20, %v199_v19  ;;  %v222_v29 = vadd.f32 %v422_v20, %v203_v21 }
  0xa5   :  { %v174_v22 = vpop.f32.mrf.mxu2  ;;  %v184_v23 = vpop.f32.mrf.mxu3 }
  0xa6   :  { %v156_v24 = vpop.f32.mrf.mxu0  ;;  %v166_v25 = vpop.f32.mrf.mxu1  ;;  %v207_v34 = vmul.f32 %v421_v18, %v174_v22  ;;  %v211_v35 = vmul.f32 %v421_v18, %v184_v23 }
  0xa7   :  { %v200_v26 = vmul.f32 %v421_v18, %v156_v24  ;;  %v204_v27 = vmul.f32 %v421_v18, %v166_v25 }
  0xa8   :  { %v226_v42 = vadd.f32 %v422_v20, %v207_v34  ;;  %v230_v43 = vadd.f32 %v422_v20, %v211_v35 }
  0xa9   :  { %v219_v30 = vadd.f32 %v422_v20, %v200_v26  ;;  %v223_v31 = vadd.f32 %v422_v20, %v204_v27 }
  0xab   :  { %v353_v32 = vpack.c.bf16 %v219_v30, %v218_v28  ;;  %v363_v33 = vpack.c.bf16 %v223_v31, %v222_v29 }
  0xad   :  { %354 = vst [vmem:[%s530_s4] sm:$0xff] %v353_v32   ;;  %v176_v36 = vpop.f32.mrf.mxu2  ;;  %v186_v37 = vpop.f32.mrf.mxu3 }
  0xae   :  { %391 = vst [vmem:[%s530_s4 + $0x10] sm:$0xff] %v363_v33   ;;  %v208_v38 = vmul.f32 %v421_v18, %v176_v36  ;;  %v212_v39 = vmul.f32 %v421_v18, %v186_v37  ;;  %v159_v40 = vpop.f32.mrf.mxu0  ;;  %v169_v41 = vpop.f32.mrf.mxu1 }
  0xaf   :  { %v201_v48 = vmul.f32 %v421_v18, %v159_v40  ;;  %v205_v49 = vmul.f32 %v421_v18, %v169_v41 }
  0xb0   :  { %v227_v44 = vadd.f32 %v422_v20, %v208_v38  ;;  %v231_v45 = vadd.f32 %v422_v20, %v212_v39 }
  0xb1   :  { %v220_v56 = vadd.f32 %v422_v20, %v201_v48  ;;  %v224_v57 = vadd.f32 %v422_v20, %v205_v49 }
  0xb2   :  { %v373_v46 = vpack.c.bf16 %v227_v44, %v226_v42  ;;  %v383_v47 = vpack.c.bf16 %v231_v45, %v230_v43 }
  0xb4   :  { %393 = vst [vmem:[%s530_s4 + $0x20] sm:$0xff] %v373_v46  }
  0xb5   :  { %395 = vst [vmem:[%s530_s4 + $0x30] sm:$0xff] %v383_v47   ;;  %v179_v50 = vpop.f32.mrf.mxu2  ;;  %v189_v51 = vpop.f32.mrf.mxu3 }
  0xb6   :  { %v161_v52 = vpop.f32.mrf.mxu0  ;;  %v171_v53 = vpop.f32.mrf.mxu1  ;;  %v209_v62 = vmul.f32 %v421_v18, %v179_v50  ;;  %v213_v63 = vmul.f32 %v421_v18, %v189_v51 }
  0xb7   :  { %v202_v54 = vmul.f32 %v421_v18, %v161_v52  ;;  %v206_v55 = vmul.f32 %v421_v18, %v171_v53 }
  0xb8   :  { %v228_v4 = vadd.f32 %v422_v20, %v209_v62  ;;  %v232_v5 = vadd.f32 %v422_v20, %v213_v63 }
  0xb9   :  { %v221_v58 = vadd.f32 %v422_v20, %v202_v54  ;;  %v225_v59 = vadd.f32 %v422_v20, %v206_v55 }
  0xbb   :  { %v358_v60 = vpack.c.bf16 %v221_v58, %v220_v56  ;;  %v368_v61 = vpack.c.bf16 %v225_v59, %v224_v57 }
  0xbd   :  { %390 = vst [vmem:[%s530_s4 + $0x8] sm:$0xff] %v358_v60   ;;  %v181_v0 = vpop.f32.mrf.mxu2  ;;  %v191_v1 = vpop.f32.mrf.mxu3 }
  0xbe   :  { %392 = vst [vmem:[%s530_s4 + $0x18] sm:$0xff] %v368_v61   ;;  %v210_v2 = vmul.f32 %v421_v18, %v181_v0  ;;  %v214_v3 = vmul.f32 %v421_v18, %v191_v1 }
  0xc0   :  { %v229_v6 = vadd.f32 %v422_v20, %v210_v2  ;;  %v233_v7 = vadd.f32 %v422_v20, %v214_v3 }
  0xc2   :  { %v378_v8 = vpack.c.bf16 %v229_v6, %v228_v4  ;;  %v388_v9 = vpack.c.bf16 %v233_v7, %v232_v5 }
  0xc4   :  { %394 = vst [vmem:[%s530_s4 + $0x28] sm:$0xff] %v378_v8  }
  0xc5   :  { %396 = vst [vmem:[%s530_s4 + $0x38] sm:$0xff] %v388_v9  }

// kernel: forward.58
= control target key start
LH: loop header
LB: loop body
LE: loop exit
PB: predicated region body
PF: predicated region fallthrough
CT: control target
= control target key end

     0   :  { %s3190_s1 = inlined_call_operand.vmem [shape: bf16[1152,128], index: 1, kind: input, shape index: {}]   ;;  %s3191_s0 = inlined_call_operand.vmem [shape: bf16[128,1152], index: 0, kind: input, shape index: {}]   ;;  %s3192_s2 = inlined_call_operand.vmem [shape: f32[1,128], index: 2, kind: input, shape index: {}]   ;;  %s3193_s3 = inlined_call_operand.vmem [shape: f32[1,128], index: 3, kind: input, shape index: {}]   ;;  %s3194_s4 = inlined_call_operand.vmem [shape: bf16[128,128], index: 4, kind: output, shape index: {}]  }
   0x1   :  { %v2229_v0 = vld [vmem:[%s3190_s1 + $0x38] sm:$0xff]  ;;  %v2228_v1 = vld [vmem:[%s3190_s1 + $0x30] sm:$0xff]  ;;  %v2227_v2 = vld [vmem:[%s3190_s1 + $0x28] sm:$0xff] }
   0x2   :  { %2341 = vmatpush.bf16.msra.mxu1 %v2229_v0  ;;  %2342 = vmatpush.bf16.msra.mxu2 %v2229_v0  ;;  %v2226_v3 = vld [vmem:[%s3190_s1 + $0x20] sm:$0xff]  ;;  %v2225_v4 = vld [vmem:[%s3190_s1 + $0x18] sm:$0xff]  ;;  %v2224_v5 = vld [vmem:[%s3190_s1 + $0x10] sm:$0xff] }
   0x3   :  { %2343 = vmatpush.bf16.msra.mxu3 %v2229_v0  ;;  %1041 = vmatpush.bf16.msra.mxu0 %v2229_v0  ;;  %v2223_v6 = vld [vmem:[%s3190_s1 + $0x8] sm:$0xff]  ;;  %v2222_v7 = vld [vmem:[%s3190_s1] sm:$0xff]  ;;  %v1648_v8 = vld [vmem:[%s3191_s0 + $0x90] sm:$0xf] }
   0x4   :  { %v2172_v9 = vld [vmem:[%s3191_s0 + $0xb0] sm:$0xf0]  ;;  %v1720_v10 = vld [vmem:[%s3191_s0 + $0x120] sm:$0xf]  ;;  %v2190_v11 = vld [vmem:[%s3191_s0 + $0x140] sm:$0xf0] }
   0x5   :  { %v1792_v12 = vld [vmem:[%s3191_s0 + $0x1b0] sm:$0xf]  ;;  %v2208_v13 = vld [vmem:[%s3191_s0 + $0x1d0] sm:$0xf0]  ;;  %v1576_v14 = vld [vmem:[%s3191_s0] sm:$0xf]  ;;  %v1649_v18 = vor.u32 %v2172_v9, %v1648_v8  ;;  %v1721_v19 = vor.u32 %v2190_v11, %v1720_v10 }
   0x6   :  { %2344 = vmatpush.bf16.msra.mxu1 %v2228_v1  ;;  %2345 = vmatpush.bf16.msra.mxu2 %v2228_v1  ;;  %v2154_v15 = vld [vmem:[%s3191_s0 + $0x20] sm:$0xf0]  ;;  %v2245_v16 = vld [vmem:[%s3190_s1 + $0xb8] sm:$0xff]  ;;  %v1793_v20 = vor.u32 %v2208_v13, %v1792_v12  ;;  %v2244_v24 = vld [vmem:[%s3190_s1 + $0xb0] sm:$0xff] }
   0x7   :  { %2346 = vmatpush.bf16.msra.mxu3 %v2228_v1  ;;  %1042 = vmatpush.bf16.msra.mxu0 %v2228_v1  ;;  %v2237_v17 = vld [vmem:[%s3190_s1 + $0x78] sm:$0xff]  ;;  %v1577_v21 = vor.u32 %v2154_v15, %v1576_v14  ;;  %v2236_v25 = vld [vmem:[%s3190_s1 + $0x70] sm:$0xff]  ;;  %v2243_v28 = vld [vmem:[%s3190_s1 + $0xa8] sm:$0xff] }
   0x8   :  { %v2253_v22 = vld [vmem:[%s3190_s1 + $0xf8] sm:$0xff]  ;;  %v2252_v26 = vld [vmem:[%s3190_s1 + $0xf0] sm:$0xff]  ;;  %v2235_v29 = vld [vmem:[%s3190_s1 + $0x68] sm:$0xff] }
   0x9   :  { %v2261_v23 = vld [vmem:[%s3190_s1 + $0x138] sm:$0xff]  ;;  %v2260_v27 = vld [vmem:[%s3190_s1 + $0x130] sm:$0xff]  ;;  %v2251_v30 = vld [vmem:[%s3190_s1 + $0xe8] sm:$0xff] }
   0xa   :  { %2347 = vmatpush.bf16.msra.mxu1 %v2227_v2  ;;  %2348 = vmatpush.bf16.msra.mxu2 %v2227_v2  ;;  %v2259_v31 = vld [vmem:[%s3190_s1 + $0x128] sm:$0xff]  ;;  %v2242_v32 = vld [vmem:[%s3190_s1 + $0xa0] sm:$0xff]  ;;  %v1684_v36 = vld [vmem:[%s3191_s0 + $0xd8] sm:$0xf] }
   0xb   :  { %2349 = vmatpush.bf16.msra.mxu3 %v2227_v2  ;;  %1043 = vmatpush.bf16.msra.mxu0 %v2227_v2  ;;  %v2234_v33 = vld [vmem:[%s3190_s1 + $0x60] sm:$0xff]  ;;  %v2181_v37 = vld [vmem:[%s3191_s0 + $0xf8] sm:$0xf0]  ;;  %v1756_v38 = vld [vmem:[%s3191_s0 + $0x168] sm:$0xf] }
   0xc   :  { %v2250_v34 = vld [vmem:[%s3190_s1 + $0xe0] sm:$0xff]  ;;  %v2199_v39 = vld [vmem:[%s3191_s0 + $0x188] sm:$0xf0]  ;;  %v1828_v40 = vld [vmem:[%s3191_s0 + $0x1f8] sm:$0xf]  ;;  %v1685_v46 = vor.u32 %v2181_v37, %v1684_v36 }
   0xd   :  { %v2258_v35 = vld [vmem:[%s3190_s1 + $0x120] sm:$0xff]  ;;  %v2217_v41 = vld [vmem:[%s3191_s0 + $0x218] sm:$0xf0]  ;;  %v1612_v42 = vld [vmem:[%s3191_s0 + $0x48] sm:$0xf]  ;;  %v1757_v47 = vor.u32 %v2199_v39, %v1756_v38 }
   0xe   :  { %2350 = vmatpush.bf16.msra.mxu1 %v2226_v3  ;;  %2351 = vmatpush.bf16.msra.mxu2 %v2226_v3  ;;  %v2163_v43 = vld [vmem:[%s3191_s0 + $0x68] sm:$0xf0]  ;;  %v2241_v44 = vld [vmem:[%s3190_s1 + $0x98] sm:$0xff]  ;;  %v1829_v48 = vor.u32 %v2217_v41, %v1828_v40  ;;  %v2240_v52 = vld [vmem:[%s3190_s1 + $0x90] sm:$0xff] }
   0xf   :  { %2352 = vmatpush.bf16.msra.mxu3 %v2226_v3  ;;  %1044 = vmatpush.bf16.msra.mxu0 %v2226_v3  ;;  %v2233_v45 = vld [vmem:[%s3190_s1 + $0x58] sm:$0xff]  ;;  %v1613_v49 = vor.u32 %v2163_v43, %v1612_v42  ;;  %v2232_v53 = vld [vmem:[%s3190_s1 + $0x50] sm:$0xff]  ;;  %v2239_v56 = vld [vmem:[%s3190_s1 + $0x88] sm:$0xff] }
  0x10   :  { %v2249_v50 = vld [vmem:[%s3190_s1 + $0xd8] sm:$0xff]  ;;  %v2248_v54 = vld [vmem:[%s3190_s1 + $0xd0] sm:$0xff]  ;;  %v2231_v57 = vld [vmem:[%s3190_s1 + $0x48] sm:$0xff] }
  0x11   :  { %v2257_v51 = vld [vmem:[%s3190_s1 + $0x118] sm:$0xff]  ;;  %v2256_v55 = vld [vmem:[%s3190_s1 + $0x110] sm:$0xff]  ;;  %v2247_v58 = vld [vmem:[%s3190_s1 + $0xc8] sm:$0xff] }
  0x12   :  { %2353 = vmatpush.bf16.msra.mxu1 %v2225_v4  ;;  %2354 = vmatpush.bf16.msra.mxu2 %v2225_v4  ;;  %v2255_v59 = vld [vmem:[%s3190_s1 + $0x108] sm:$0xff]  ;;  %v2238_v60 = vld [vmem:[%s3190_s1 + $0x80] sm:$0xff]  ;;  %v2277_v2 = vld [vmem:[%s3190_s1 + $0x1b8] sm:$0xff] }
  0x13   :  { %2355 = vmatpush.bf16.msra.mxu3 %v2225_v4  ;;  %1045 = vmatpush.bf16.msra.mxu0 %v2225_v4  ;;  %v2230_v61 = vld [vmem:[%s3190_s1 + $0x40] sm:$0xff]  ;;  %v1578_v1 = vld [vmem:[%s3191_s0 + $0x24] sm:$0xf0]  ;;  %v2269_v3 = vld [vmem:[%s3190_s1 + $0x178] sm:$0xff] }
  0x14   :  { %v2150_v62 = vld [vmem:[%s3191_s0 + $0x4] sm:$0xf]  ;;  %v1584_v4 = vld [vmem:[%s3191_s0 + $0x8] sm:$0xf]  ;;  %v1592_v8 = vld [vmem:[%s3191_s0 + $0x10] sm:$0xf] }
  0x15   :  { %v2246_v63 = vld [vmem:[%s3190_s1 + $0xc0] sm:$0xff]  ;;  %v2156_v9 = vld [vmem:[%s3191_s0 + $0x30] sm:$0xf0]  ;;  %v2285_v10 = vld [vmem:[%s3190_s1 + $0x1f8] sm:$0xff]  ;;  %v1581_v12 = vor.u32 %v2150_v62, %v1578_v1 }
  0x16   :  { %2356 = vmatpush.bf16.msra.mxu1 %v2224_v5  ;;  %2357 = vmatpush.bf16.msra.mxu2 %v2224_v5  ;;  %v2254_v0 = vld [vmem:[%s3190_s1 + $0x100] sm:$0xff]  ;;  %v2293_v11 = vld [vmem:[%s3190_s1 + $0x238] sm:$0xff]  ;;  %v1593_v15 = vor.u32 %v2156_v9, %v1592_v8  ;;  %v2168_v40 = vld [vmem:[%s3191_s0 + $0x94] sm:$0xf] }
  0x17   :  { %2358 = vmatpush.bf16.msra.mxu3 %v2224_v5  ;;  %1046 = vmatpush.bf16.msra.mxu0 %v2224_v5  ;;  %v2155_v5 = vld [vmem:[%s3191_s0 + $0x28] sm:$0xf0]  ;;  %v2274_v36 = vld [vmem:[%s3190_s1 + $0x1a0] sm:$0xff]  ;;  %v1650_v41 = vld [vmem:[%s3191_s0 + $0xb4] sm:$0xf0] }
  0x18   :  { %v1585_v13 = vor.u32 %v2155_v5, %v1584_v4  ;;  %v2282_v37 = vld [vmem:[%s3190_s1 + $0x1e0] sm:$0xff]  ;;  %v1656_v42 = vld [vmem:[%s3191_s0 + $0x98] sm:$0xf]  ;;  %v2173_v43 = vld [vmem:[%s3191_s0 + $0xb8] sm:$0xf0] }
  0x19   :  { %v2266_v38 = vld [vmem:[%s3190_s1 + $0x160] sm:$0xff]  ;;  %v1700_v62 = vld [vmem:[%s3191_s0 + $0xe8] sm:$0xf]  ;;  %v2272_v4 = vld [vmem:[%s3190_s1 + $0x190] sm:$0xff] }
  0x1a   :  { %2359 = vmatpush.bf16.msra.mxu1 %v2223_v6  ;;  %2360 = vmatpush.bf16.msra.mxu2 %v2223_v6  ;;  %v2290_v39 = vld [vmem:[%s3190_s1 + $0x220] sm:$0xff]  ;;  %v2280_v5 = vld [vmem:[%s3190_s1 + $0x1d0] sm:$0xff]  ;;  %v1722_v9 = vld [vmem:[%s3191_s0 + $0x144] sm:$0xf0] }
  0x1b   :  { %2361 = vmatpush.bf16.msra.mxu3 %v2223_v6  ;;  %1047 = vmatpush.bf16.msra.mxu0 %v2223_v6  ;;  %v2151_v6 = vld [vmem:[%s3191_s0 + $0xc] sm:$0xf]  ;;  %v2186_v8 = vld [vmem:[%s3191_s0 + $0x124] sm:$0xf] }
  0x1e   :  { %2362 = vmatpush.bf16.msra.mxu1 %v2222_v7  ;;  %2363 = vmatpush.bf16.msra.mxu2 %v2222_v7 }
  0x1f   :  { %2364 = vmatpush.bf16.msra.mxu3 %v2222_v7  ;;  %1048 = vmatpush.bf16.msra.mxu0 %v2222_v7  ;;  %v1586_v7 = vld [vmem:[%s3191_s0 + $0x2c] sm:$0xf0] }
  0x20   :  { %v1589_v14 = vor.u32 %v2151_v6, %v1586_v7  ;;  %v2264_v6 = vld [vmem:[%s3190_s1 + $0x150] sm:$0xff] }
  0x21   :  { %1059 = vmatmul.bf16.vlgmr.msra.gmra.mxu1 %v1649_v18  ;;  %1069 = vmatmul.bf16.vlgmr.msra.gmra.mxu2 %v1721_v19  ;;  %v2284_v18 = vld [vmem:[%s3190_s1 + $0x1f0] sm:$0xff] }
  0x22   :  { %1139 = vmatpush.bf16.msrb.mxu2 %v2245_v16  ;;  %1090 = vmatpush.bf16.msrb.mxu1 %v2237_v17  ;;  %v2276_v16 = vld [vmem:[%s3190_s1 + $0x1b0] sm:$0xff] }
  0x23   :  { %1079 = vmatmul.bf16.vlgmr.msra.gmra.mxu3 %v1793_v20  ;;  %1049 = vmatmul.bf16.vlgmr.msra.gmra.mxu0 %v1577_v21  ;;  %v2268_v17 = vld [vmem:[%s3190_s1 + $0x170] sm:$0xff]  ;;  %v2275_v20 = vld [vmem:[%s3190_s1 + $0x1a8] sm:$0xff] }
  0x24   :  { %1188 = vmatpush.bf16.msrb.mxu3 %v2253_v22  ;;  %1237 = vmatpush.bf16.msrb.mxu0 %v2261_v23  ;;  %v2292_v19 = vld [vmem:[%s3190_s1 + $0x230] sm:$0xff]  ;;  %v2267_v21 = vld [vmem:[%s3190_s1 + $0x168] sm:$0xff] }
  0x25   :  { %v2283_v22 = vld [vmem:[%s3190_s1 + $0x1e8] sm:$0xff]  ;;  %v2288_v7 = vld [vmem:[%s3190_s1 + $0x210] sm:$0xff] }
  0x26   :  { %1140 = vmatpush.bf16.msrb.mxu2 %v2244_v24  ;;  %1091 = vmatpush.bf16.msrb.mxu1 %v2236_v25  ;;  %v2291_v23 = vld [vmem:[%s3190_s1 + $0x228] sm:$0xff]  ;;  %v1614_v25 = vld [vmem:[%s3191_s0 + $0x6c] sm:$0xf0] }
  0x27   :  { %v2159_v24 = vld [vmem:[%s3191_s0 + $0x4c] sm:$0xf] }
  0x28   :  { %1189 = vmatpush.bf16.msrb.mxu3 %v2252_v26  ;;  %1238 = vmatpush.bf16.msrb.mxu0 %v2260_v27  ;;  %v1620_v26 = vld [vmem:[%s3191_s0 + $0x50] sm:$0xf]  ;;  %v2164_v27 = vld [vmem:[%s3191_s0 + $0x70] sm:$0xf0] }
  0x2a   :  { %1141 = vmatpush.bf16.msrb.mxu2 %v2243_v28  ;;  %1092 = vmatpush.bf16.msrb.mxu1 %v2235_v29  ;;  %v2160_v28 = vld [vmem:[%s3191_s0 + $0x54] sm:$0xf]  ;;  %v1622_v29 = vld [vmem:[%s3191_s0 + $0x74] sm:$0xf0] }
  0x2c   :  { %1190 = vmatpush.bf16.msrb.mxu3 %v2251_v30  ;;  %1239 = vmatpush.bf16.msrb.mxu0 %v2259_v31  ;;  %v1628_v30 = vld [vmem:[%s3191_s0 + $0x58] sm:$0xf]  ;;  %v2165_v31 = vld [vmem:[%s3191_s0 + $0x78] sm:$0xf0] }
  0x2e   :  { %1142 = vmatpush.bf16.msrb.mxu2 %v2242_v32  ;;  %1093 = vmatpush.bf16.msrb.mxu1 %v2234_v33  ;;  %v1617_v32 = vor.u32 %v2159_v24, %v1614_v25  ;;  %v1621_v33 = vor.u32 %v2164_v27, %v1620_v26  ;;  %v2195_v24 = vld [vmem:[%s3191_s0 + $0x16c] sm:$0xf]  ;;  %v1758_v25 = vld [vmem:[%s3191_s0 + $0x18c] sm:$0xf0]  ;;  %v2200_v27 = vld [vmem:[%s3191_s0 + $0x190] sm:$0xf0] }
  0x2f   :  { %v1764_v26 = vld [vmem:[%s3191_s0 + $0x170] sm:$0xf] }
  0x30   :  { %1191 = vmatpush.bf16.msrb.mxu3 %v2250_v34  ;;  %1240 = vmatpush.bf16.msrb.mxu0 %v2258_v35  ;;  %v1625_v34 = vor.u32 %v2160_v28, %v1622_v29  ;;  %v1629_v35 = vor.u32 %v2165_v31, %v1628_v30  ;;  %v2196_v28 = vld [vmem:[%s3191_s0 + $0x174] sm:$0xf]  ;;  %v1766_v29 = vld [vmem:[%s3191_s0 + $0x194] sm:$0xf0]  ;;  %v2201_v31 = vld [vmem:[%s3191_s0 + $0x198] sm:$0xf0] }
  0x31   :  { %1064 = vmatmul.bf16.gmra.mxu1 %v1685_v46  ;;  %1074 = vmatmul.bf16.gmra.mxu2 %v1757_v47  ;;  %v1664_v46 = vld [vmem:[%s3191_s0 + $0xa0] sm:$0xf]  ;;  %v2174_v47 = vld [vmem:[%s3191_s0 + $0xc0] sm:$0xf0]  ;;  %v1772_v30 = vld [vmem:[%s3191_s0 + $0x178] sm:$0xf] }
  0x32   :  { %1143 = vmatpush.bf16.msrb.mxu2 %v2241_v44  ;;  %1094 = vmatpush.bf16.msrb.mxu1 %v2233_v45  ;;  %v2169_v44 = vld [vmem:[%s3191_s0 + $0x9c] sm:$0xf]  ;;  %v1658_v45 = vld [vmem:[%s3191_s0 + $0xbc] sm:$0xf0] }
  0x33   :  { %1084 = vmatmul.bf16.gmra.mxu3 %v1829_v48  ;;  %1054 = vmatmul.bf16.gmra.mxu0 %v1613_v49  ;;  %v1653_v48 = vor.u32 %v2168_v40, %v1650_v41  ;;  %v1657_v49 = vor.u32 %v2173_v43, %v1656_v42  ;;  %v2204_v40 = vld [vmem:[%s3191_s0 + $0x1b4] sm:$0xf]  ;;  %v1794_v41 = vld [vmem:[%s3191_s0 + $0x1d4] sm:$0xf0]  ;;  %v2209_v43 = vld [vmem:[%s3191_s0 + $0x1d8] sm:$0xf0] }
  0x34   :  { %1192 = vmatpush.bf16.msrb.mxu3 %v2249_v50  ;;  %1241 = vmatpush.bf16.msrb.mxu0 %v2257_v51  ;;  %v1661_v50 = vor.u32 %v2169_v44, %v1658_v45  ;;  %v1665_v51 = vor.u32 %v2174_v47, %v1664_v46  ;;  %v1800_v42 = vld [vmem:[%s3191_s0 + $0x1b8] sm:$0xf]  ;;  %v2205_v44 = vld [vmem:[%s3191_s0 + $0x1bc] sm:$0xf]  ;;  %v1802_v45 = vld [vmem:[%s3191_s0 + $0x1dc] sm:$0xf0] }
  0x35   :  { %v1808_v46 = vld [vmem:[%s3191_s0 + $0x1c0] sm:$0xf]  ;;  %v2210_v47 = vld [vmem:[%s3191_s0 + $0x1e0] sm:$0xf0] }
  0x36   :  { %1144 = vmatpush.bf16.msrb.mxu2 %v2240_v52  ;;  %1095 = vmatpush.bf16.msrb.mxu1 %v2232_v53  ;;  %v2273_v52 = vld [vmem:[%s3190_s1 + $0x198] sm:$0xff] }
  0x37   :  { %v2281_v53 = vld [vmem:[%s3190_s1 + $0x1d8] sm:$0xff] }
  0x38   :  { %1193 = vmatpush.bf16.msrb.mxu3 %v2248_v54  ;;  %1242 = vmatpush.bf16.msrb.mxu0 %v2256_v55  ;;  %v2265_v54 = vld [vmem:[%s3190_s1 + $0x158] sm:$0xff] }
  0x39   :  { %v2289_v55 = vld [vmem:[%s3190_s1 + $0x218] sm:$0xff] }
  0x3a   :  { %1145 = vmatpush.bf16.msrb.mxu2 %v2239_v56  ;;  %1096 = vmatpush.bf16.msrb.mxu1 %v2231_v57  ;;  %v2177_v56 = vld [vmem:[%s3191_s0 + $0xdc] sm:$0xf]  ;;  %v1686_v57 = vld [vmem:[%s3191_s0 + $0xfc] sm:$0xf0] }
  0x3c   :  { %1194 = vmatpush.bf16.msrb.mxu3 %v2247_v58  ;;  %1243 = vmatpush.bf16.msrb.mxu0 %v2255_v59  ;;  %v1692_v58 = vld [vmem:[%s3191_s0 + $0xe0] sm:$0xf]  ;;  %v2182_v59 = vld [vmem:[%s3191_s0 + $0x100] sm:$0xf0] }
  0x3d   :  { %v1693_v1 = vor.u32 %v2182_v59, %v1692_v58  ;;  %v2213_v58 = vld [vmem:[%s3191_s0 + $0x1fc] sm:$0xf]  ;;  %v1830_v59 = vld [vmem:[%s3191_s0 + $0x21c] sm:$0xf0] }
  0x3e   :  { %1146 = vmatpush.bf16.msrb.mxu2 %v2238_v60  ;;  %1097 = vmatpush.bf16.msrb.mxu1 %v2230_v61  ;;  %v2178_v60 = vld [vmem:[%s3191_s0 + $0xe4] sm:$0xf]  ;;  %v1694_v61 = vld [vmem:[%s3191_s0 + $0x104] sm:$0xf0] }
  0x40   :  { %1195 = vmatpush.bf16.msrb.mxu3 %v2246_v63  ;;  %1244 = vmatpush.bf16.msrb.mxu0 %v2254_v0  ;;  %v2183_v63 = vld [vmem:[%s3191_s0 + $0x108] sm:$0xf0]  ;;  %v1689_v0 = vor.u32 %v2177_v56, %v1686_v57 }
  0x41   :  { %1098 = vmatmul.bf16.vlgmr.msrb.gmra.mxu1 %v1581_v12  ;;  %1147 = vmatmul.bf16.vlgmr.msrb.gmra.mxu2 %v1585_v13  ;;  %v2187_v12 = vld [vmem:[%s3191_s0 + $0x12c] sm:$0xf]  ;;  %v1730_v13 = vld [vmem:[%s3191_s0 + $0x14c] sm:$0xf0] }
  0x42   :  { %1335 = vmatpush.bf16.msra.mxu2 %v2277_v2  ;;  %1286 = vmatpush.bf16.msra.mxu1 %v2269_v3  ;;  %v1697_v2 = vor.u32 %v2178_v60, %v1694_v61  ;;  %v1701_v3 = vor.u32 %v2183_v63, %v1700_v62  ;;  %v1836_v60 = vld [vmem:[%s3191_s0 + $0x200] sm:$0xf]  ;;  %v2218_v61 = vld [vmem:[%s3191_s0 + $0x220] sm:$0xf0]  ;;  %v1838_v63 = vld [vmem:[%s3191_s0 + $0x224] sm:$0xf0] }
  0x43   :  { %1196 = vmatmul.bf16.vlgmr.msrb.gmra.mxu3 %v1589_v14  ;;  %1245 = vmatmul.bf16.vlgmr.msrb.gmra.mxu0 %v1593_v15  ;;  %v1736_v14 = vld [vmem:[%s3191_s0 + $0x130] sm:$0xf]  ;;  %v2192_v15 = vld [vmem:[%s3191_s0 + $0x150] sm:$0xf0]  ;;  %v2214_v62 = vld [vmem:[%s3191_s0 + $0x204] sm:$0xf] }
  0x44   :  { %1384 = vmatpush.bf16.msra.mxu3 %v2285_v10  ;;  %1433 = vmatpush.bf16.msra.mxu0 %v2293_v11  ;;  %v1728_v10 = vld [vmem:[%s3191_s0 + $0x128] sm:$0xf]  ;;  %v2191_v11 = vld [vmem:[%s3191_s0 + $0x148] sm:$0xf0] }
  0x46   :  { %1336 = vmatpush.bf16.msra.mxu2 %v2276_v16  ;;  %1287 = vmatpush.bf16.msra.mxu1 %v2268_v17  ;;  %v1725_v16 = vor.u32 %v2186_v8, %v1722_v9  ;;  %v1729_v17 = vor.u32 %v2191_v11, %v1728_v10 }
  0x48   :  { %1385 = vmatpush.bf16.msra.mxu3 %v2284_v18  ;;  %1434 = vmatpush.bf16.msra.mxu0 %v2292_v19  ;;  %v1733_v18 = vor.u32 %v2187_v12, %v1730_v13  ;;  %v1737_v19 = vor.u32 %v2192_v15, %v1736_v14  ;;  %v2152_v14 = vld [vmem:[%s3191_s0 + $0x14] sm:$0xf]  ;;  %v1594_v15 = vld [vmem:[%s3191_s0 + $0x34] sm:$0xf0] }
  0x4a   :  { %1337 = vmatpush.bf16.msra.mxu2 %v2275_v20  ;;  %1288 = vmatpush.bf16.msra.mxu1 %v2267_v21  ;;  %v2271_v20 = vld [vmem:[%s3190_s1 + $0x188] sm:$0xff] }
  0x4b   :  { %v2279_v21 = vld [vmem:[%s3190_s1 + $0x1c8] sm:$0xff] }
  0x4c   :  { %1386 = vmatpush.bf16.msra.mxu3 %v2283_v22  ;;  %1435 = vmatpush.bf16.msra.mxu0 %v2291_v23  ;;  %v2263_v22 = vld [vmem:[%s3190_s1 + $0x148] sm:$0xff] }
  0x4d   :  { %v2287_v23 = vld [vmem:[%s3190_s1 + $0x208] sm:$0xff] }
  0x4e   :  { %1338 = vmatpush.bf16.msra.mxu2 %v2274_v36  ;;  %1289 = vmatpush.bf16.msra.mxu1 %v2266_v38  ;;  %v2270_v36 = vld [vmem:[%s3190_s1 + $0x180] sm:$0xff] }
  0x4f   :  { %v2262_v38 = vld [vmem:[%s3190_s1 + $0x140] sm:$0xff] }
  0x50   :  { %1387 = vmatpush.bf16.msra.mxu3 %v2282_v37  ;;  %1436 = vmatpush.bf16.msra.mxu0 %v2290_v39  ;;  %v2278_v37 = vld [vmem:[%s3190_s1 + $0x1c0] sm:$0xff] }
  0x51   :  { %1103 = vmatmul.bf16.gmra.mxu1 %v1617_v32  ;;  %1152 = vmatmul.bf16.gmra.mxu2 %v1621_v33  ;;  %v1761_v32 = vor.u32 %v2195_v24, %v1758_v25  ;;  %v1765_v33 = vor.u32 %v2200_v27, %v1764_v26  ;;  %v2286_v39 = vld [vmem:[%s3190_s1 + $0x200] sm:$0xff]  ;;  %v1597_v24 = vor.u32 %v2152_v14, %v1594_v15 }
  0x52   :  { %1339 = vmatpush.bf16.msra.mxu2 %v2273_v52  ;;  %1290 = vmatpush.bf16.msra.mxu1 %v2265_v54  ;;  %v1809_v52 = vor.u32 %v2210_v47, %v1808_v46  ;;  %v2167_v46 = vld [vmem:[%s3191_s0 + $0x88] sm:$0xf0]  ;;  %v2170_v14 = vld [vmem:[%s3191_s0 + $0xa4] sm:$0xf] }
  0x53   :  { %1201 = vmatmul.bf16.gmra.mxu3 %v1625_v34  ;;  %1250 = vmatmul.bf16.gmra.mxu0 %v1629_v35  ;;  %v1769_v34 = vor.u32 %v2196_v28, %v1766_v29  ;;  %v1773_v35 = vor.u32 %v2201_v31, %v1772_v30 }
  0x54   :  { %1388 = vmatpush.bf16.msra.mxu3 %v2281_v53  ;;  %1437 = vmatpush.bf16.msra.mxu0 %v2289_v55 }
  0x56   :  { %1340 = vmatpush.bf16.msra.mxu2 %v2272_v4  ;;  %1291 = vmatpush.bf16.msra.mxu1 %v2264_v6  ;;  %v1833_v4 = vor.u32 %v2213_v58, %v1830_v59 }
  0x58   :  { %1389 = vmatpush.bf16.msra.mxu3 %v2280_v5  ;;  %1438 = vmatpush.bf16.msra.mxu0 %v2288_v7  ;;  %v1837_v5 = vor.u32 %v2218_v61, %v1836_v60  ;;  %v1841_v7 = vor.u32 %v2214_v62, %v1838_v63 }
  0x5a   :  { %1341 = vmatpush.bf16.msra.mxu2 %v2271_v20  ;;  %1292 = vmatpush.bf16.msra.mxu1 %v2263_v22  ;;  %v1608_v20 = vld [vmem:[%s3191_s0 + $0x20] sm:$0xf] }
  0x5c   :  { %1390 = vmatpush.bf16.msra.mxu3 %v2279_v21  ;;  %1439 = vmatpush.bf16.msra.mxu0 %v2287_v23  ;;  %v2158_v21 = vld [vmem:[%s3191_s0 + $0x40] sm:$0xf0] }
  0x5d   :  { %v1609_v28 = vor.u32 %v2158_v21, %v1608_v20  ;;  %v2176_v20 = vld [vmem:[%s3191_s0 + $0xd0] sm:$0xf0] }
  0x5e   :  { %1342 = vmatpush.bf16.msra.mxu2 %v2270_v36  ;;  %1293 = vmatpush.bf16.msra.mxu1 %v2262_v38  ;;  %v2161_v38 = vld [vmem:[%s3191_s0 + $0x5c] sm:$0xf] }
  0x60   :  { %1391 = vmatpush.bf16.msra.mxu3 %v2278_v37  ;;  %1440 = vmatpush.bf16.msra.mxu0 %v2286_v39  ;;  %v1630_v39 = vld [vmem:[%s3191_s0 + $0x7c] sm:$0xf0] }
  0x61   :  { %1108 = vmatmul.bf16.gmra.mxu1 %v1653_v48  ;;  %1157 = vmatmul.bf16.gmra.mxu2 %v1657_v49  ;;  %v1797_v48 = vor.u32 %v2204_v40, %v1794_v41  ;;  %v1801_v49 = vor.u32 %v2209_v43, %v1800_v42  ;;  %v1636_v41 = vld [vmem:[%s3191_s0 + $0x60] sm:$0xf]  ;;  %v2166_v42 = vld [vmem:[%s3191_s0 + $0x80] sm:$0xf0] }
  0x62   :  { %v2162_v43 = vld [vmem:[%s3191_s0 + $0x64] sm:$0xf] }
  0x63   :  { %1206 = vmatmul.bf16.gmra.mxu3 %v1661_v50  ;;  %1255 = vmatmul.bf16.gmra.mxu0 %v1665_v51  ;;  %v1805_v51 = vor.u32 %v2205_v44, %v1802_v45  ;;  %v1638_v44 = vld [vmem:[%s3191_s0 + $0x84] sm:$0xf0] }
  0x64   :  { %v1644_v45 = vld [vmem:[%s3191_s0 + $0x68] sm:$0xf] }
  0x65   :  { %v1645_v58 = vor.u32 %v2167_v46, %v1644_v45  ;;  %v1708_v45 = vld [vmem:[%s3191_s0 + $0xf0] sm:$0xf]  ;;  %v2184_v46 = vld [vmem:[%s3191_s0 + $0x110] sm:$0xf0] }
  0x71   :  { %1113 = vmatmul.bf16.gmra.mxu1 %v1689_v0  ;;  %1162 = vmatmul.bf16.gmra.mxu2 %v1693_v1  ;;  %v1844_v0 = vld [vmem:[%s3191_s0 + $0x208] sm:$0xf]  ;;  %v2219_v1 = vld [vmem:[%s3191_s0 + $0x228] sm:$0xf0] }
  0x72   :  { %v1845_v8 = vor.u32 %v2219_v1, %v1844_v0 }
  0x73   :  { %1211 = vmatmul.bf16.gmra.mxu3 %v1697_v2  ;;  %1260 = vmatmul.bf16.gmra.mxu0 %v1701_v3 }
  0x81   :  { %1118 = vmatmul.bf16.gmra.mxu1 %v1725_v16  ;;  %1167 = vmatmul.bf16.gmra.mxu2 %v1729_v17  ;;  %v1600_v16 = vld [vmem:[%s3191_s0 + $0x18] sm:$0xf]  ;;  %v2157_v17 = vld [vmem:[%s3191_s0 + $0x38] sm:$0xf0] }
  0x82   :  { %v1601_v25 = vor.u32 %v2157_v17, %v1600_v16  ;;  %v1672_v16 = vld [vmem:[%s3191_s0 + $0xa8] sm:$0xf]  ;;  %v2175_v17 = vld [vmem:[%s3191_s0 + $0xc8] sm:$0xf0] }
  0x83   :  { %1216 = vmatmul.bf16.gmra.mxu3 %v1733_v18  ;;  %1265 = vmatmul.bf16.gmra.mxu0 %v1737_v19  ;;  %v2153_v18 = vld [vmem:[%s3191_s0 + $0x1c] sm:$0xf]  ;;  %v1602_v19 = vld [vmem:[%s3191_s0 + $0x3c] sm:$0xf0] }
  0x84   :  { %v1605_v27 = vor.u32 %v2153_v18, %v1602_v19  ;;  %v1674_v18 = vld [vmem:[%s3191_s0 + $0xcc] sm:$0xf0] }
  0x85   :  { %v1680_v19 = vld [vmem:[%s3191_s0 + $0xb0] sm:$0xf] }
  0x91   :  { %1123 = vmatmul.bf16.gmra.mxu1 %v1761_v32  ;;  %1172 = vmatmul.bf16.gmra.mxu2 %v1765_v33 }
  0x93   :  { %1221 = vmatmul.bf16.gmra.mxu3 %v1769_v34  ;;  %1270 = vmatmul.bf16.gmra.mxu0 %v1773_v35 }
  0x9e   :  { %v2824_v50 = vpop.f32.mrf.mxu1 }
  0xa0   :  { %v1050_v53 = vpop.f32.mrf.mxu0 }
  0xa1   :  { %1128 = vmatmul.bf16.gmra.mxu1 %v1797_v48  ;;  %1177 = vmatmul.bf16.gmra.mxu2 %v1801_v49 }
  0xa3   :  { %1226 = vmatmul.bf16.gmra.mxu3 %v1805_v51  ;;  %1275 = vmatmul.bf16.gmra.mxu0 %v1809_v52  ;;  %v1633_v51 = vor.u32 %v2161_v38, %v1630_v39  ;;  %v1637_v52 = vor.u32 %v2166_v42, %v1636_v41 }
  0xa4   :  { %v2826_v54 = vpop.f32.mrf.mxu2 }
  0xa6   :  { %v2828_v55 = vpop.f32.mrf.mxu3  ;;  %v2830_v56 = vpop.f32.mrf.mxu1 }
  0xa8   :  { %v1052_v57 = vpop.f32.mrf.mxu0 }
  0xac   :  { %v2856_v2 = vpop.f32.mrf.mxu2 }
  0xae   :  { %v2858_v3 = vpop.f32.mrf.mxu3  ;;  %v2860_v6 = vpop.f32.mrf.mxu1 }
  0xb0   :  { %v1055_v9 = vpop.f32.mrf.mxu0 }
  0xb1   :  { %1133 = vmatmul.bf16.gmra.mxu1 %v1833_v4  ;;  %1182 = vmatmul.bf16.gmra.mxu2 %v1837_v5 }
  0xb3   :  { %1231 = vmatmul.bf16.gmra.mxu3 %v1841_v7  ;;  %1280 = vmatmul.bf16.gmra.mxu0 %v1845_v8 }
  0xb4   :  { %v2862_v10 = vpop.f32.mrf.mxu2 }
  0xb6   :  { %v2864_v11 = vpop.f32.mrf.mxu3  ;;  %v2866_v12 = vpop.f32.mrf.mxu1 }
  0xb8   :  { %v1057_v13 = vpop.f32.mrf.mxu0 }
  0xbc   :  { %v2892_v22 = vpop.f32.mrf.mxu2 }
  0xbe   :  { %v2894_v23 = vpop.f32.mrf.mxu3  ;;  %v1099_v26 = vpop.f32.mrf.mxu1 }
  0xbf   :  { %v1100_v29 = vadd.f32 %v1099_v26, %v1050_v53 }
  0xc0   :  { %v1246_v30 = vpop.f32.mrf.mxu0 }
  0xc1   :  { %1294 = vmatmul.bf16.vlgmr.msra.gmra.mxu1 %v1597_v24  ;;  %1343 = vmatmul.bf16.vlgmr.msra.gmra.mxu2 %v1601_v25 }
  0xc3   :  { %1392 = vmatmul.bf16.vlgmr.msra.gmra.mxu3 %v1605_v27  ;;  %1441 = vmatmul.bf16.vlgmr.msra.gmra.mxu0 %v1609_v28  ;;  %v1673_v27 = vor.u32 %v2175_v17, %v1672_v16 }
  0xc4   :  { %v1148_v31 = vpop.f32.mrf.mxu2 }
  0xc5   :  { %v1149_v32 = vadd.f32 %v1148_v31, %v1100_v29 }
  0xc6   :  { %v1197_v33 = vpop.f32.mrf.mxu3  ;;  %v1101_v34 = vpop.f32.mrf.mxu1 }
  0xc7   :  { %v1198_v35 = vadd.f32 %v1197_v33, %v1149_v32  ;;  %v1102_v36 = vadd.f32 %v1101_v34, %v1052_v57  ;;  %v1641_v57 = vor.u32 %v2162_v43, %v1638_v44  ;;  %v2179_v43 = vld [vmem:[%s3191_s0 + $0xec] sm:$0xf] }
  0xc8   :  { %v1248_v37 = vpop.f32.mrf.mxu0 }
  0xc9   :  { %v2902_v40 = vadd.f32 %v1246_v30, %v1198_v35  ;;  %v1681_v30 = vor.u32 %v2176_v20, %v1680_v19  ;;  %v1744_v19 = vld [vmem:[%s3191_s0 + $0x138] sm:$0xf]  ;;  %v2193_v20 = vld [vmem:[%s3191_s0 + $0x158] sm:$0xf0] }
  0xcc   :  { %v1150_v47 = vpop.f32.mrf.mxu2 }
  0xcd   :  { %v1151_v48 = vadd.f32 %v1150_v47, %v1102_v36  ;;  %v1710_v47 = vld [vmem:[%s3191_s0 + $0x114] sm:$0xf0] }
  0xce   :  { %v1199_v49 = vpop.f32.mrf.mxu3  ;;  %v1104_v53 = vpop.f32.mrf.mxu1 }
  0xcf   :  { %v1200_v59 = vadd.f32 %v1199_v49, %v1151_v48  ;;  %v1105_v60 = vadd.f32 %v1104_v53, %v1055_v9  ;;  %v1666_v9 = vld [vmem:[%s3191_s0 + $0xc4] sm:$0xf0]  ;;  %v1716_v48 = vld [vmem:[%s3191_s0 + $0xf8] sm:$0xf]  ;;  %v2185_v49 = vld [vmem:[%s3191_s0 + $0x118] sm:$0xf0] }
  0xd0   :  { %v1251_v61 = vpop.f32.mrf.mxu0  ;;  %v1669_v26 = vor.u32 %v2170_v14, %v1666_v9 }
  0xd1   :  { %1299 = vmatmul.bf16.gmra.mxu1 %v1633_v51  ;;  %1348 = vmatmul.bf16.gmra.mxu2 %v1637_v52  ;;  %v2922_v62 = vadd.f32 %v1248_v37, %v1200_v59 }
  0xd3   :  { %1397 = vmatmul.bf16.gmra.mxu3 %v1641_v57  ;;  %1446 = vmatmul.bf16.gmra.mxu0 %v1645_v58  ;;  %v1709_v58 = vor.u32 %v2184_v46, %v1708_v45  ;;  %v2197_v46 = vld [vmem:[%s3191_s0 + $0x17c] sm:$0xf] }
  0xd4   :  { %v1153_v63 = vpop.f32.mrf.mxu2 }
  0xd5   :  { %v1154_v0 = vadd.f32 %v1153_v63, %v1105_v60 }
  0xd6   :  { %v1202_v1 = vpop.f32.mrf.mxu3  ;;  %v1106_v4 = vpop.f32.mrf.mxu1 }
  0xd7   :  { %v1203_v5 = vadd.f32 %v1202_v1, %v1154_v0  ;;  %v1107_v7 = vadd.f32 %v1106_v4, %v1057_v13  ;;  %v2171_v13 = vld [vmem:[%s3191_s0 + $0xac] sm:$0xf] }
  0xd8   :  { %v1253_v8 = vpop.f32.mrf.mxu0  ;;  %v1677_v29 = vor.u32 %v2171_v13, %v1674_v18  ;;  %v2188_v13 = vld [vmem:[%s3191_s0 + $0x134] sm:$0xf] }
  0xd9   :  { %v2930_v15 = vadd.f32 %v1251_v61, %v1203_v5  ;;  %v1717_v61 = vor.u32 %v2185_v49, %v1716_v48  ;;  %v2202_v48 = vld [vmem:[%s3191_s0 + $0x1a0] sm:$0xf0] }
  0xda   :  { %v2198_v49 = vld [vmem:[%s3191_s0 + $0x184] sm:$0xf] }
  0xdc   :  { %v1155_v21 = vpop.f32.mrf.mxu2 }
  0xdd   :  { %v1156_v24 = vadd.f32 %v1155_v21, %v1107_v7  ;;  %v1746_v21 = vld [vmem:[%s3191_s0 + $0x15c] sm:$0xf0] }
  0xde   :  { %v1204_v25 = vpop.f32.mrf.mxu3  ;;  %v1109_v28 = vpop.f32.mrf.mxu1 }
  0xdf   :  { %v1205_v31 = vadd.f32 %v1204_v25, %v1156_v24  ;;  %v1110_v32 = vadd.f32 %v1109_v28, %v2824_v50  ;;  %v1702_v50 = vld [vmem:[%s3191_s0 + $0x10c] sm:$0xf0]  ;;  %v1752_v24 = vld [vmem:[%s3191_s0 + $0x140] sm:$0xf]  ;;  %v2194_v25 = vld [vmem:[%s3191_s0 + $0x160] sm:$0xf0] }
  0xe0   :  { %v1256_v33 = vpop.f32.mrf.mxu0  ;;  %v1705_v57 = vor.u32 %v2179_v43, %v1702_v50 }
  0xe1   :  { %1304 = vmatmul.bf16.gmra.mxu1 %v1669_v26  ;;  %1353 = vmatmul.bf16.gmra.mxu2 %v1673_v27  ;;  %v2951_v34 = vadd.f32 %v1253_v8, %v1205_v31 }
  0xe3   :  { %1402 = vmatmul.bf16.gmra.mxu3 %v1677_v29  ;;  %1451 = vmatmul.bf16.gmra.mxu0 %v1681_v30  ;;  %v1745_v30 = vor.u32 %v2193_v20, %v1744_v19  ;;  %v2206_v20 = vld [vmem:[%s3191_s0 + $0x1c4] sm:$0xf] }
  0xe4   :  { %v1158_v35 = vpop.f32.mrf.mxu2 }
  0xe5   :  { %v1159_v36 = vadd.f32 %v1158_v35, %v1110_v32 }
  0xe6   :  { %v1207_v37 = vpop.f32.mrf.mxu3  ;;  %v1111_v38 = vpop.f32.mrf.mxu1 }
  0xe7   :  { %v1208_v39 = vadd.f32 %v1207_v37, %v1159_v36  ;;  %v1112_v41 = vadd.f32 %v1111_v38, %v2830_v56  ;;  %v2180_v56 = vld [vmem:[%s3191_s0 + $0xf4] sm:$0xf] }
  0xe8   :  { %v1258_v42 = vpop.f32.mrf.mxu0  ;;  %v1713_v60 = vor.u32 %v2180_v56, %v1710_v47  ;;  %v1774_v56 = vld [vmem:[%s3191_s0 + $0x19c] sm:$0xf0] }
  0xe9   :  { %v2960_v44 = vadd.f32 %v1256_v33, %v1208_v39  ;;  %v1753_v33 = vor.u32 %v2194_v25, %v1752_v24  ;;  %v2211_v24 = vld [vmem:[%s3191_s0 + $0x1e8] sm:$0xf0] }
  0xea   :  { %v2207_v25 = vld [vmem:[%s3191_s0 + $0x1cc] sm:$0xf] }
  0xec   :  { %v1160_v51 = vpop.f32.mrf.mxu2 }
  0xed   :  { %v1161_v52 = vadd.f32 %v1160_v51, %v1112_v41 }
  0xee   :  { %v1209_v53 = vpop.f32.mrf.mxu3  ;;  %v1114_v59 = vpop.f32.mrf.mxu1 }
  0xef   :  { %v1210_v63 = vadd.f32 %v1209_v53, %v1161_v52  ;;  %v1115_v0 = vadd.f32 %v1114_v59, %v2860_v6  ;;  %v1738_v6 = vld [vmem:[%s3191_s0 + $0x154] sm:$0xf0]  ;;  %v1782_v52 = vld [vmem:[%s3191_s0 + $0x1a4] sm:$0xf0] }
  0xf0   :  { %v1261_v1 = vpop.f32.mrf.mxu0  ;;  %v1741_v29 = vor.u32 %v2188_v13, %v1738_v6  ;;  %v1788_v53 = vld [vmem:[%s3191_s0 + $0x188] sm:$0xf] }
  0xf1   :  { %1309 = vmatmul.bf16.gmra.mxu1 %v1705_v57  ;;  %1358 = vmatmul.bf16.gmra.mxu2 %v1709_v58  ;;  %v2981_v4 = vadd.f32 %v1258_v42, %v1210_v63  ;;  %v2203_v57 = vld [vmem:[%s3191_s0 + $0x1a8] sm:$0xf0] }
  0xf3   :  { %1407 = vmatmul.bf16.gmra.mxu3 %v1713_v60  ;;  %1456 = vmatmul.bf16.gmra.mxu0 %v1717_v61  ;;  %v1777_v61 = vor.u32 %v2197_v46, %v1774_v56 }
  0xf4   :  { %v1163_v5 = vpop.f32.mrf.mxu2 }
  0xf5   :  { %v1164_v7 = vadd.f32 %v1163_v5, %v1115_v0 }
  0xf6   :  { %v1212_v8 = vpop.f32.mrf.mxu3  ;;  %v1116_v14 = vpop.f32.mrf.mxu1 }
  0xf7   :  { %v1213_v9 = vadd.f32 %v1212_v8, %v1164_v7  ;;  %v1117_v16 = vadd.f32 %v1116_v14, %v2866_v12  ;;  %v2189_v12 = vld [vmem:[%s3191_s0 + $0x13c] sm:$0xf] }
  0xf8   :  { %v1263_v17 = vpop.f32.mrf.mxu0  ;;  %v1749_v32 = vor.u32 %v2189_v12, %v1746_v21  ;;  %v1810_v12 = vld [vmem:[%s3191_s0 + $0x1e4] sm:$0xf0] }
  0xf9   :  { %v2990_v18 = vadd.f32 %v1261_v1, %v1213_v9  ;;  %v1785_v1 = vor.u32 %v2198_v49, %v1782_v52  ;;  %v2215_v49 = vld [vmem:[%s3191_s0 + $0x20c] sm:$0xf] }
  0xfc   :  { %v1165_v26 = vpop.f32.mrf.mxu2 }
  0xfd   :  { %v1166_v27 = vadd.f32 %v1165_v26, %v1117_v16 }
  0xfe   :  { %v1214_v28 = vpop.f32.mrf.mxu3  ;;  %v1119_v31 = vpop.f32.mrf.mxu1 }
  0xff   :  { %v1215_v35 = vadd.f32 %v1214_v28, %v1166_v27  ;;  %v1120_v38 = vadd.f32 %v1119_v31, %v2826_v54  ;;  %v1780_v54 = vld [vmem:[%s3191_s0 + $0x180] sm:$0xf]  ;;  %v1818_v27 = vld [vmem:[%s3191_s0 + $0x1ec] sm:$0xf0] }
 0x100   :  { %v1266_v36 = vpop.f32.mrf.mxu0  ;;  %v1781_v63 = vor.u32 %v2202_v48, %v1780_v54  ;;  %v1824_v28 = vld [vmem:[%s3191_s0 + $0x1d0] sm:$0xf] }
 0x101   :  { %1314 = vmatmul.bf16.gmra.mxu1 %v1741_v29  ;;  %1363 = vmatmul.bf16.gmra.mxu2 %v1745_v30  ;;  %v3010_v37 = vadd.f32 %v1263_v17, %v1215_v35  ;;  %v2212_v29 = vld [vmem:[%s3191_s0 + $0x1f0] sm:$0xf0] }
 0x103   :  { %1412 = vmatmul.bf16.gmra.mxu3 %v1749_v32  ;;  %1461 = vmatmul.bf16.gmra.mxu0 %v1753_v33  ;;  %v1813_v33 = vor.u32 %v2206_v20, %v1810_v12 }
 0x104   :  { %v1168_v39 = vpop.f32.mrf.mxu2 }
 0x105   :  { %v1169_v41 = vadd.f32 %v1168_v39, %v1120_v38  ;;  %v1821_v38 = vor.u32 %v2207_v25, %v1818_v27 }
 0x106   :  { %v1217_v42 = vpop.f32.mrf.mxu3  ;;  %v1121_v43 = vpop.f32.mrf.mxu1 }
 0x107   :  { %v1218_v50 = vadd.f32 %v1217_v42, %v1169_v41  ;;  %v1122_v51 = vadd.f32 %v1121_v43, %v2856_v2  ;;  %v1789_v2 = vor.u32 %v2203_v57, %v1788_v53  ;;  %v2220_v53 = vld [vmem:[%s3191_s0 + $0x230] sm:$0xf0] }
 0x108   :  { %v1268_v45 = vpop.f32.mrf.mxu0  ;;  %v2216_v57 = vld [vmem:[%s3191_s0 + $0x214] sm:$0xf] }
 0x109   :  { %v3019_v47 = vadd.f32 %v1266_v36, %v1218_v50 }
 0x10c   :  { %v1170_v58 = vpop.f32.mrf.mxu2 }
 0x10d   :  { %v1171_v59 = vadd.f32 %v1170_v58, %v1122_v51  ;;  %v1846_v51 = vld [vmem:[%s3191_s0 + $0x22c] sm:$0xf0] }
 0x10e   :  { %v1219_v60 = vpop.f32.mrf.mxu3  ;;  %v1124_v0 = vpop.f32.mrf.mxu1 }
 0x10f   :  { %v1220_v5 = vadd.f32 %v1219_v60, %v1171_v59  ;;  %v1125_v14 = vadd.f32 %v1124_v0, %v2862_v10  ;;  %v1816_v10 = vld [vmem:[%s3191_s0 + $0x1c8] sm:$0xf]  ;;  %v1854_v59 = vld [vmem:[%s3191_s0 + $0x234] sm:$0xf0] }
 0x110   :  { %v1271_v7 = vpop.f32.mrf.mxu0  ;;  %v1817_v35 = vor.u32 %v2211_v24, %v1816_v10  ;;  %v1860_v60 = vld [vmem:[%s3191_s0 + $0x218] sm:$0xf] }
 0x111   :  { %1319 = vmatmul.bf16.gmra.mxu1 %v1777_v61  ;;  %1368 = vmatmul.bf16.gmra.mxu2 %v1781_v63  ;;  %v3040_v8 = vadd.f32 %v1268_v45, %v1220_v5  ;;  %v2221_v61 = vld [vmem:[%s3191_s0 + $0x238] sm:$0xf0] }
 0x113   :  { %1417 = vmatmul.bf16.gmra.mxu3 %v1785_v1  ;;  %1466 = vmatmul.bf16.gmra.mxu0 %v1789_v2  ;;  %v1849_v2 = vor.u32 %v2215_v49, %v1846_v51 }
 0x114   :  { %v1173_v9 = vpop.f32.mrf.mxu2 }
 0x115   :  { %v1174_v16 = vadd.f32 %v1173_v9, %v1125_v14  ;;  %v1857_v14 = vor.u32 %v2216_v57, %v1854_v59 }
 0x116   :  { %v1222_v17 = vpop.f32.mrf.mxu3  ;;  %v1126_v13 = vpop.f32.mrf.mxu1 }
 0x117   :  { %v1223_v6 = vadd.f32 %v1222_v17, %v1174_v16  ;;  %v1127_v26 = vadd.f32 %v1126_v13, %v2892_v22  ;;  %v1825_v22 = vor.u32 %v2212_v29, %v1824_v28 }
 0x118   :  { %v1273_v19 = vpop.f32.mrf.mxu0 }
 0x119   :  { %v3049_v21 = vadd.f32 %v1271_v7, %v1223_v6 }
 0x11c   :  { %v1175_v30 = vpop.f32.mrf.mxu2 }
 0x11d   :  { %v1176_v31 = vadd.f32 %v1175_v30, %v1127_v26 }
 0x11e   :  { %v1224_v32 = vpop.f32.mrf.mxu3  ;;  %v1129_v36 = vpop.f32.mrf.mxu1 }
 0x11f   :  { %v1225_v39 = vadd.f32 %v1224_v32, %v1176_v31  ;;  %v1130_v43 = vadd.f32 %v1129_v36, %v2828_v55  ;;  %v1852_v55 = vld [vmem:[%s3191_s0 + $0x210] sm:$0xf] }
 0x120   :  { %v1276_v41 = vpop.f32.mrf.mxu0  ;;  %v1853_v5 = vor.u32 %v2220_v53, %v1852_v55 }
 0x121   :  { %1324 = vmatmul.bf16.gmra.mxu1 %v1813_v33  ;;  %1373 = vmatmul.bf16.gmra.mxu2 %v1817_v35  ;;  %v3070_v42 = vadd.f32 %v1273_v19, %v1225_v39 }
 0x123   :  { %1422 = vmatmul.bf16.gmra.mxu3 %v1821_v38  ;;  %1471 = vmatmul.bf16.gmra.mxu0 %v1825_v22 }
 0x124   :  { %v1178_v50 = vpop.f32.mrf.mxu2 }
 0x125   :  { %v1179_v45 = vadd.f32 %v1178_v50, %v1130_v43 }
 0x126   :  { %v1227_v46 = vpop.f32.mrf.mxu3  ;;  %v1131_v56 = vpop.f32.mrf.mxu1 }
 0x127   :  { %v1228_v54 = vadd.f32 %v1227_v46, %v1179_v45  ;;  %v1132_v58 = vadd.f32 %v1131_v56, %v2858_v3  ;;  %v1861_v3 = vor.u32 %v2221_v61, %v1860_v60 }
 0x128   :  { %v1278_v48 = vpop.f32.mrf.mxu0 }
 0x129   :  { %v3079_v52 = vadd.f32 %v1276_v41, %v1228_v54 }
 0x12c   :  { %v1180_v63 = vpop.f32.mrf.mxu2 }
 0x12d   :  { %v1181_v0 = vadd.f32 %v1180_v63, %v1132_v58 }
 0x12e   :  { %v1229_v1 = vpop.f32.mrf.mxu3  ;;  %v1134_v7 = vpop.f32.mrf.mxu1 }
 0x12f   :  { %v1230_v9 = vadd.f32 %v1229_v1, %v1181_v0  ;;  %v1135_v13 = vadd.f32 %v1134_v7, %v2864_v11 }
 0x130   :  { %v1281_v16 = vpop.f32.mrf.mxu0 }
 0x131   :  { %1329 = vmatmul.bf16.gmra.mxu1 %v1849_v2  ;;  %1378 = vmatmul.bf16.gmra.mxu2 %v1853_v5  ;;  %v3100_v17 = vadd.f32 %v1278_v48, %v1230_v9  ;;  %v3119_v48 = vld [vmem:[%s3193_s3] ss:$0 sm:$0xff] }
 0x133   :  { %1427 = vmatmul.bf16.gmra.mxu3 %v1857_v14  ;;  %1476 = vmatmul.bf16.gmra.mxu0 %v1861_v3 }
 0x134   :  { %v1183_v6 = vpop.f32.mrf.mxu2 }
 0x135   :  { %v1184_v19 = vadd.f32 %v1183_v6, %v1135_v13 }
 0x136   :  { %v1232_v20 = vpop.f32.mrf.mxu3  ;;  %v1136_v12 = vpop.f32.mrf.mxu1 }
 0x137   :  { %v1233_v10 = vadd.f32 %v1232_v20, %v1184_v19  ;;  %v1137_v26 = vadd.f32 %v1136_v12, %v2894_v23  ;;  %v3112_v23 = vld [vmem:[%s3192_s2] ss:$0 sm:$0xff] }
 0x138   :  { %v1283_v24 = vpop.f32.mrf.mxu0 }
 0x139   :  { %v3103_v25 = vadd.f32 %v1281_v16, %v1233_v10 }
 0x13c   :  { %v1185_v27 = vpop.f32.mrf.mxu2 }
 0x13d   :  { %v1186_v28 = vadd.f32 %v1185_v27, %v1137_v26 }
 0x13e   :  { %v1234_v29 = vpop.f32.mrf.mxu3  ;;  %v1295_v30 = vpop.f32.mrf.mxu1 }
 0x13f   :  { %v1235_v31 = vadd.f32 %v1234_v29, %v1186_v28  ;;  %v1296_v11 = vadd.f32 %v1295_v30, %v2902_v40 }
 0x140   :  { %v1442_v32 = vpop.f32.mrf.mxu0 }
 0x141   :  { %v3106_v33 = vadd.f32 %v1283_v24, %v1235_v31 }
 0x144   :  { %v1344_v35 = vpop.f32.mrf.mxu2 }
 0x145   :  { %v1345_v36 = vadd.f32 %v1344_v35, %v1296_v11 }
 0x146   :  { %v1393_v38 = vpop.f32.mrf.mxu3  ;;  %v1297_v22 = vpop.f32.mrf.mxu1 }
 0x147   :  { %v1394_v39 = vadd.f32 %v1393_v38, %v1345_v36  ;;  %v1298_v50 = vadd.f32 %v1297_v22, %v2922_v62 }
 0x148   :  { %v1444_v41 = vpop.f32.mrf.mxu0 }
 0x149   :  { %v1443_v43 = vadd.f32 %v1442_v32, %v1394_v39 }
 0x14b   :  { %v1487_v40 = vmul.f32 %v3112_v23, %v1443_v43 }
 0x14c   :  { %v1346_v45 = vpop.f32.mrf.mxu2 }
 0x14d   :  { %v1347_v46 = vadd.f32 %v1346_v45, %v1298_v50  ;;  %v1506_v53 = vadd.f32 %v3119_v48, %v1487_v40 }
 0x14e   :  { %v1395_v56 = vpop.f32.mrf.mxu3  ;;  %v1300_v54 = vpop.f32.mrf.mxu1 }
 0x14f   :  { %v1396_v49 = vadd.f32 %v1395_v56, %v1347_v46  ;;  %v1301_v62 = vadd.f32 %v1300_v54, %v2930_v15  ;;  %v1522_v0 = vmax.f32 %v1506_v53, 0.0 }
 0x150   :  { %v1447_v51 = vpop.f32.mrf.mxu0 }
 0x151   :  { %v1445_v55 = vadd.f32 %v1444_v41, %v1396_v49 }
 0x153   :  { %v1488_v57 = vmul.f32 %v3112_v23, %v1445_v55 }
 0x154   :  { %v1349_v58 = vpop.f32.mrf.mxu2 }
 0x155   :  { %v1507_v59 = vadd.f32 %v3119_v48, %v1488_v57  ;;  %v1350_v60 = vadd.f32 %v1349_v58, %v1301_v62 }
 0x156   :  { %v1398_v61 = vpop.f32.mrf.mxu3  ;;  %v1302_v63 = vpop.f32.mrf.mxu1 }
 0x157   :  { %v1523_v1 = vmax.f32 %v1507_v59, 0.0  ;;  %v1399_v2 = vadd.f32 %v1398_v61, %v1350_v60  ;;  %v1303_v3 = vadd.f32 %v1302_v63, %v2951_v34 }
 0x158   :  { %v1449_v5 = vpop.f32.mrf.mxu0 }
 0x159   :  { %v2297_v7 = vpack.c.bf16 %v1523_v1, %v1522_v0  ;;  %v1448_v14 = vadd.f32 %v1447_v51, %v1399_v2 }
 0x15b   :  { %2298 = vst [vmem:[%s3194_s4] sm:$0xff] %v2297_v7   ;;  %v1489_v6 = vmul.f32 %v3112_v23, %v1448_v14 }
 0x15c   :  { %v1351_v9 = vpop.f32.mrf.mxu2 }
 0x15d   :  { %v1352_v15 = vadd.f32 %v1351_v9, %v1303_v3  ;;  %v1508_v10 = vadd.f32 %v3119_v48, %v1489_v6 }
 0x15e   :  { %v1400_v16 = vpop.f32.mrf.mxu3  ;;  %v1305_v13 = vpop.f32.mrf.mxu1 }
 0x15f   :  { %v1401_v19 = vadd.f32 %v1400_v16, %v1352_v15  ;;  %v1306_v26 = vadd.f32 %v1305_v13, %v2960_v44  ;;  %v1524_v31 = vmax.f32 %v1508_v10, 0.0 }
 0x160   :  { %v1452_v20 = vpop.f32.mrf.mxu0 }
 0x161   :  { %v1450_v12 = vadd.f32 %v1449_v5, %v1401_v19 }
 0x163   :  { %v1490_v24 = vmul.f32 %v3112_v23, %v1450_v12 }
 0x164   :  { %v1354_v27 = vpop.f32.mrf.mxu2 }
 0x165   :  { %v1509_v28 = vadd.f32 %v3119_v48, %v1490_v24  ;;  %v1355_v29 = vadd.f32 %v1354_v27, %v1306_v26 }
 0x166   :  { %v1403_v34 = vpop.f32.mrf.mxu3  ;;  %v1307_v30 = vpop.f32.mrf.mxu1 }
 0x167   :  { %v1525_v32 = vmax.f32 %v1509_v28, 0.0  ;;  %v1404_v11 = vadd.f32 %v1403_v34, %v1355_v29  ;;  %v1308_v22 = vadd.f32 %v1307_v30, %v2981_v4 }
 0x168   :  { %v1454_v35 = vpop.f32.mrf.mxu0 }
 0x169   :  { %v2302_v36 = vpack.c.bf16 %v1525_v32, %v1524_v31  ;;  %v1453_v38 = vadd.f32 %v1452_v20, %v1404_v11 }
 0x16b   :  { %2334 = vst [vmem:[%s3194_s4 + $0x8] sm:$0xff] %v2302_v36   ;;  %v1491_v50 = vmul.f32 %v3112_v23, %v1453_v38 }
 0x16c   :  { %v1356_v39 = vpop.f32.mrf.mxu2 }
 0x16d   :  { %v1357_v44 = vadd.f32 %v1356_v39, %v1308_v22  ;;  %v1510_v54 = vadd.f32 %v3119_v48, %v1491_v50 }
 0x16e   :  { %v1405_v41 = vpop.f32.mrf.mxu3  ;;  %v1310_v43 = vpop.f32.mrf.mxu1 }
 0x16f   :  { %v1406_v45 = vadd.f32 %v1405_v41, %v1357_v44  ;;  %v1311_v49 = vadd.f32 %v1310_v43, %v2990_v18  ;;  %v1526_v62 = vmax.f32 %v1510_v54, 0.0 }
 0x170   :  { %v1457_v46 = vpop.f32.mrf.mxu0 }
 0x171   :  { %v1455_v56 = vadd.f32 %v1454_v35, %v1406_v45 }
 0x173   :  { %v1492_v40 = vmul.f32 %v3112_v23, %v1455_v56 }
 0x174   :  { %v1359_v51 = vpop.f32.mrf.mxu2 }
 0x175   :  { %v1511_v55 = vadd.f32 %v3119_v48, %v1492_v40  ;;  %v1360_v53 = vadd.f32 %v1359_v51, %v1311_v49 }
 0x176   :  { %v1408_v4 = vpop.f32.mrf.mxu3  ;;  %v1312_v57 = vpop.f32.mrf.mxu1 }
 0x177   :  { %v1527_v58 = vmax.f32 %v1511_v55, 0.0  ;;  %v1409_v59 = vadd.f32 %v1408_v4, %v1360_v53  ;;  %v1313_v0 = vadd.f32 %v1312_v57, %v3010_v37 }
 0x178   :  { %v1459_v60 = vpop.f32.mrf.mxu0 }
 0x179   :  { %v2307_v61 = vpack.c.bf16 %v1527_v58, %v1526_v62  ;;  %v1458_v63 = vadd.f32 %v1457_v46, %v1409_v59 }
 0x17b   :  { %2335 = vst [vmem:[%s3194_s4 + $0x10] sm:$0xff] %v2307_v61   ;;  %v1493_v7 = vmul.f32 %v3112_v23, %v1458_v63 }
 0x17c   :  { %v1361_v1 = vpop.f32.mrf.mxu2 }
 0x17d   :  { %v1362_v18 = vadd.f32 %v1361_v1, %v1313_v0  ;;  %v1512_v15 = vadd.f32 %v3119_v48, %v1493_v7 }
 0x17e   :  { %v1410_v2 = vpop.f32.mrf.mxu3  ;;  %v1315_v5 = vpop.f32.mrf.mxu1 }
 0x17f   :  { %v1411_v14 = vadd.f32 %v1410_v2, %v1362_v18  ;;  %v1316_v13 = vadd.f32 %v1315_v5, %v3019_v47  ;;  %v1528_v10 = vmax.f32 %v1512_v15, 0.0 }
 0x180   :  { %v1462_v3 = vpop.f32.mrf.mxu0 }
 0x181   :  { %v1460_v9 = vadd.f32 %v1459_v60, %v1411_v14 }
 0x183   :  { %v1494_v16 = vmul.f32 %v3112_v23, %v1460_v9 }
 0x184   :  { %v1364_v6 = vpop.f32.mrf.mxu2 }
 0x185   :  { %v1513_v19 = vadd.f32 %v3119_v48, %v1494_v16  ;;  %v1365_v20 = vadd.f32 %v1364_v6, %v1316_v13 }
 0x186   :  { %v1413_v37 = vpop.f32.mrf.mxu3  ;;  %v1317_v12 = vpop.f32.mrf.mxu1 }
 0x187   :  { %v1529_v24 = vmax.f32 %v1513_v19, 0.0  ;;  %v1414_v26 = vadd.f32 %v1413_v37, %v1365_v20  ;;  %v1318_v34 = vadd.f32 %v1317_v12, %v3040_v8 }
 0x188   :  { %v1464_v27 = vpop.f32.mrf.mxu0 }
 0x189   :  { %v2312_v28 = vpack.c.bf16 %v1529_v24, %v1528_v10  ;;  %v1463_v29 = vadd.f32 %v1462_v3, %v1414_v26 }
 0x18b   :  { %2336 = vst [vmem:[%s3194_s4 + $0x18] sm:$0xff] %v2312_v28   ;;  %v1495_v11 = vmul.f32 %v3112_v23, %v1463_v29 }
 0x18c   :  { %v1366_v30 = vpop.f32.mrf.mxu2 }
 0x18d   :  { %v1367_v47 = vadd.f32 %v1366_v30, %v1318_v34  ;;  %v1514_v22 = vadd.f32 %v3119_v48, %v1495_v11 }
 0x18e   :  { %v1415_v31 = vpop.f32.mrf.mxu3  ;;  %v1320_v32 = vpop.f32.mrf.mxu1 }
 0x18f   :  { %v1416_v35 = vadd.f32 %v1415_v31, %v1367_v47  ;;  %v1321_v44 = vadd.f32 %v1320_v32, %v3049_v21  ;;  %v1530_v46 = vmax.f32 %v1514_v22, 0.0 }
 0x190   :  { %v1467_v36 = vpop.f32.mrf.mxu0 }
 0x191   :  { %v1465_v38 = vadd.f32 %v1464_v27, %v1416_v35 }
 0x193   :  { %v1496_v39 = vmul.f32 %v3112_v23, %v1465_v38 }
 0x194   :  { %v1369_v41 = vpop.f32.mrf.mxu2 }
 0x195   :  { %v1515_v43 = vadd.f32 %v3119_v48, %v1496_v39  ;;  %v1370_v50 = vadd.f32 %v1369_v41, %v1321_v44 }
 0x196   :  { %v1418_v8 = vpop.f32.mrf.mxu3  ;;  %v1322_v45 = vpop.f32.mrf.mxu1 }
 0x197   :  { %v1531_v56 = vmax.f32 %v1515_v43, 0.0  ;;  %v1419_v54 = vadd.f32 %v1418_v8, %v1370_v50  ;;  %v1323_v55 = vadd.f32 %v1322_v45, %v3070_v42 }
 0x198   :  { %v1469_v40 = vpop.f32.mrf.mxu0 }
 0x199   :  { %v2317_v49 = vpack.c.bf16 %v1531_v56, %v1530_v46  ;;  %v1468_v51 = vadd.f32 %v1467_v36, %v1419_v54 }
 0x19b   :  { %2337 = vst [vmem:[%s3194_s4 + $0x20] sm:$0xff] %v2317_v49   ;;  %v1497_v62 = vmul.f32 %v3112_v23, %v1468_v51 }
 0x19c   :  { %v1371_v53 = vpop.f32.mrf.mxu2 }
 0x19d   :  { %v1372_v21 = vadd.f32 %v1371_v53, %v1323_v55  ;;  %v1516_v61 = vadd.f32 %v3119_v48, %v1497_v62 }
 0x19e   :  { %v1420_v4 = vpop.f32.mrf.mxu3  ;;  %v1325_v57 = vpop.f32.mrf.mxu1 }
 0x19f   :  { %v1421_v58 = vadd.f32 %v1420_v4, %v1372_v21  ;;  %v1326_v0 = vadd.f32 %v1325_v57, %v3079_v52  ;;  %v1532_v7 = vmax.f32 %v1516_v61, 0.0 }
 0x1a0   :  { %v1472_v60 = vpop.f32.mrf.mxu0 }
 0x1a1   :  { %v1470_v59 = vadd.f32 %v1469_v40, %v1421_v58 }
 0x1a3   :  { %v1498_v63 = vmul.f32 %v3112_v23, %v1470_v59 }
 0x1a4   :  { %v1374_v1 = vpop.f32.mrf.mxu2 }
 0x1a5   :  { %v1517_v18 = vadd.f32 %v3119_v48, %v1498_v63  ;;  %v1375_v2 = vadd.f32 %v1374_v1, %v1326_v0 }
 0x1a6   :  { %v1423_v42 = vpop.f32.mrf.mxu3  ;;  %v1327_v5 = vpop.f32.mrf.mxu1 }
 0x1a7   :  { %v1533_v14 = vmax.f32 %v1517_v18, 0.0  ;;  %v1424_v3 = vadd.f32 %v1423_v42, %v1375_v2  ;;  %v1328_v16 = vadd.f32 %v1327_v5, %v3100_v17 }
 0x1a8   :  { %v1474_v13 = vpop.f32.mrf.mxu0 }
 0x1a9   :  { %v2322_v9 = vpack.c.bf16 %v1533_v14, %v1532_v7  ;;  %v1473_v15 = vadd.f32 %v1472_v60, %v1424_v3 }
 0x1ab   :  { %2338 = vst [vmem:[%s3194_s4 + $0x28] sm:$0xff] %v2322_v9   ;;  %v1499_v37 = vmul.f32 %v3112_v23, %v1473_v15 }
 0x1ac   :  { %v1376_v6 = vpop.f32.mrf.mxu2 }
 0x1ad   :  { %v1377_v52 = vadd.f32 %v1376_v6, %v1328_v16  ;;  %v1518_v24 = vadd.f32 %v3119_v48, %v1499_v37 }
 0x1ae   :  { %v1425_v19 = vpop.f32.mrf.mxu3  ;;  %v1330_v20 = vpop.f32.mrf.mxu1 }
 0x1af   :  { %v1426_v12 = vadd.f32 %v1425_v19, %v1377_v52  ;;  %v1331_v27 = vadd.f32 %v1330_v20, %v3103_v25  ;;  %v1534_v47 = vmax.f32 %v1518_v24, 0.0 }
 0x1b0   :  { %v1477_v30 = vpop.f32.mrf.mxu0 }
 0x1b1   :  { %v1475_v10 = vadd.f32 %v1474_v13, %v1426_v12 }
 0x1b3   :  { %v1500_v26 = vmul.f32 %v3112_v23, %v1475_v10 }
 0x1b4   :  { %v1379_v28 = vpop.f32.mrf.mxu2 }
 0x1b5   :  { %v1519_v29 = vadd.f32 %v3119_v48, %v1500_v26  ;;  %v1380_v34 = vadd.f32 %v1379_v28, %v1331_v27 }
 0x1b6   :  { %v1428_v17 = vpop.f32.mrf.mxu3  ;;  %v1332_v11 = vpop.f32.mrf.mxu1 }
 0x1b7   :  { %v1535_v31 = vmax.f32 %v1519_v29, 0.0  ;;  %v1429_v32 = vadd.f32 %v1428_v17, %v1380_v34  ;;  %v1333_v38 = vadd.f32 %v1332_v11, %v3106_v33 }
 0x1b8   :  { %v1479_v43 = vpop.f32.mrf.mxu0 }
 0x1b9   :  { %v2327_v35 = vpack.c.bf16 %v1535_v31, %v1534_v47  ;;  %v1478_v36 = vadd.f32 %v1477_v30, %v1429_v32 }
 0x1bb   :  { %2339 = vst [vmem:[%s3194_s4 + $0x30] sm:$0xff] %v2327_v35   ;;  %v1501_v44 = vmul.f32 %v3112_v23, %v1478_v36 }
 0x1bc   :  { %v1381_v22 = vpop.f32.mrf.mxu2 }
 0x1bd   :  { %v1382_v25 = vadd.f32 %v1381_v22, %v1333_v38  ;;  %v1520_v8 = vadd.f32 %v3119_v48, %v1501_v44 }
 0x1be   :  { %v1430_v39 = vpop.f32.mrf.mxu3 }
 0x1bf   :  { %v1431_v41 = vadd.f32 %v1430_v39, %v1382_v25  ;;  %v1536_v56 = vmax.f32 %v1520_v8, 0.0 }
 0x1c1   :  { %v1480_v50 = vadd.f32 %v1479_v43, %v1431_v41 }
 0x1c3   :  { %v1502_v45 = vmul.f32 %v3112_v23, %v1480_v50 }
 0x1c5   :  { %v1521_v46 = vadd.f32 %v3119_v48, %v1502_v45 }
 0x1c7   :  { %v1537_v54 = vmax.f32 %v1521_v46, 0.0 }
 0x1c9   :  { %v2332_v40 = vpack.c.bf16 %v1537_v54, %v1536_v56 }
 0x1cb   :  { %2340 = vst [vmem:[%s3194_s4 + $0x38] sm:$0xff] %v2332_v40  }

// kernel: forward.64
= control target key start
LH: loop header
LB: loop body
LE: loop exit
PB: predicated region body
PF: predicated region fallthrough
CT: control target
= control target key end

     0   :  { %9 = vsyncpa [#allocation3], 0  ;;  %s664_s0 = inlined_call_operand.vmem [shape: bf16[128,128], index: 0, kind: input, shape index: {}]   ;;  %s665_s1 = inlined_call_operand.vmem [shape: bf16[128,128], index: 1, kind: input, shape index: {}]   ;;  %s666_s2 = inlined_call_operand.hbm [shape: f32[1,128], index: 2, kind: input, shape index: {}]   ;;  %s667_s3 = inlined_call_operand.hbm [shape: f32[1,128], index: 3, kind: input, shape index: {}]   ;;  %s668_s4 = inlined_call_operand.vmem [shape: bf16[128,128], index: 4, kind: output, shape index: {}]  }
   0x1   :  { %s20_s17 = sshll.u32 %s666_s2, 4  ;;  %s21_s17 = int_to_ptr.hbm [resolvable:$true] %s20_s17 }
   0x2   :  { %10 = vsyncpa [#allocation5], 0  ;;  %s523_s18 = smov [#allocation2]   ;;  %s31_s22 = sshll.u32 %s667_s3, 4  ;;  %s32_s22 = int_to_ptr.hbm [resolvable:$true] %s31_s22 }
   0x3   :  { %s22_s19 = sshll.u32 %s523_s18, 4  ;;  %s524_s23 = smov [#allocation4]   ;;  %s23_s19 = int_to_ptr.vmem [resolvable:$true] %s22_s19 }
   0x4   :  { %25 = dma.hbm_to_vmem [thread:$0]  %s21_s17, 16, %s23_s19, [#allocation3]  }
   0x5   :  { %s33_s24 = sshll.u32 %s524_s23, 4  ;;  %s34_s24 = int_to_ptr.vmem [resolvable:$true] %s33_s24 }
   0x6   :  { %36 = dma.hbm_to_vmem [thread:$0]  %s32_s22, 16, %s34_s24, [#allocation5]  }
   0x7   :  { %519 = dma.done.wait [#allocation3], 16  }
   0x8   :  { %520 = vsyncadd [#allocation3], 4294967280 }
   0x9   :  { %521 = dma.done.wait [#allocation5], 16  }
   0xa   :  { %522 = vsyncadd [#allocation5], 4294967280  ;;  %v395_v0 = vld [vmem:[%s665_s1 + $0x38] sm:$0xff]  ;;  %v394_v1 = vld [vmem:[%s665_s1 + $0x30] sm:$0xff] }
   0xb   :  { %173 = vmatpush.bf16.msra.mxu0 %v395_v0  ;;  %443 = vmatpush.bf16.msra.mxu1 %v395_v0  ;;  %v393_v2 = vld [vmem:[%s665_s1 + $0x28] sm:$0xff]  ;;  %v392_v3 = vld [vmem:[%s665_s1 + $0x20] sm:$0xff]  ;;  %v391_v4 = vld [vmem:[%s665_s1 + $0x18] sm:$0xff] }
   0xc   :  { %444 = vmatpush.bf16.msra.mxu2 %v395_v0  ;;  %445 = vmatpush.bf16.msra.mxu3 %v395_v0  ;;  %v390_v5 = vld [vmem:[%s665_s1 + $0x10] sm:$0xff]  ;;  %v389_v6 = vld [vmem:[%s665_s1 + $0x8] sm:$0xff]  ;;  %v388_v7 = vld [vmem:[%s665_s1] sm:$0xff] }
   0xd   :  { %v380_v8 = vld [vmem:[%s664_s0] sm:$0xff]  ;;  %v382_v9 = vld [vmem:[%s664_s0 + $0x10] sm:$0xff]  ;;  %v381_v12 = vld [vmem:[%s664_s0 + $0x8] sm:$0xff] }
   0xe   :  { %v384_v10 = vld [vmem:[%s664_s0 + $0x20] sm:$0xff]  ;;  %v386_v11 = vld [vmem:[%s664_s0 + $0x30] sm:$0xff]  ;;  %v383_v13 = vld [vmem:[%s664_s0 + $0x18] sm:$0xff] }
   0xf   :  { %174 = vmatpush.bf16.msra.mxu0 %v394_v1  ;;  %446 = vmatpush.bf16.msra.mxu1 %v394_v1  ;;  %v385_v14 = vld [vmem:[%s664_s0 + $0x28] sm:$0xff]  ;;  %v387_v15 = vld [vmem:[%s664_s0 + $0x38] sm:$0xff]  ;;  %v604_v18 = vld [vmem:[#allocation2] ss:$0 sm:$0xff] }
  0x10   :  { %447 = vmatpush.bf16.msra.mxu2 %v394_v1  ;;  %448 = vmatpush.bf16.msra.mxu3 %v394_v1  ;;  %v607_v20 = vld [vmem:[#allocation4] ss:$0 sm:$0xff] }
  0x13   :  { %175 = vmatpush.bf16.msra.mxu0 %v393_v2  ;;  %449 = vmatpush.bf16.msra.mxu1 %v393_v2 }
  0x14   :  { %450 = vmatpush.bf16.msra.mxu2 %v393_v2  ;;  %451 = vmatpush.bf16.msra.mxu3 %v393_v2 }
  0x17   :  { %176 = vmatpush.bf16.msra.mxu0 %v392_v3  ;;  %452 = vmatpush.bf16.msra.mxu1 %v392_v3 }
  0x18   :  { %453 = vmatpush.bf16.msra.mxu2 %v392_v3  ;;  %454 = vmatpush.bf16.msra.mxu3 %v392_v3 }
  0x1b   :  { %177 = vmatpush.bf16.msra.mxu0 %v391_v4  ;;  %455 = vmatpush.bf16.msra.mxu1 %v391_v4 }
  0x1c   :  { %456 = vmatpush.bf16.msra.mxu2 %v391_v4  ;;  %457 = vmatpush.bf16.msra.mxu3 %v391_v4 }
  0x1f   :  { %178 = vmatpush.bf16.msra.mxu0 %v390_v5  ;;  %458 = vmatpush.bf16.msra.mxu1 %v390_v5 }
  0x20   :  { %459 = vmatpush.bf16.msra.mxu2 %v390_v5  ;;  %460 = vmatpush.bf16.msra.mxu3 %v390_v5 }
  0x23   :  { %179 = vmatpush.bf16.msra.mxu0 %v389_v6  ;;  %461 = vmatpush.bf16.msra.mxu1 %v389_v6 }
  0x24   :  { %462 = vmatpush.bf16.msra.mxu2 %v389_v6  ;;  %463 = vmatpush.bf16.msra.mxu3 %v389_v6 }
  0x27   :  { %180 = vmatpush.bf16.msra.mxu0 %v388_v7  ;;  %464 = vmatpush.bf16.msra.mxu1 %v388_v7 }
  0x28   :  { %465 = vmatpush.bf16.msra.mxu2 %v388_v7  ;;  %466 = vmatpush.bf16.msra.mxu3 %v388_v7 }
  0x2a   :  { %181 = vmatmul.bf16.vlgmr.msra.gmra.mxu0 %v380_v8  ;;  %191 = vmatmul.bf16.vlgmr.msra.gmra.mxu1 %v382_v9 }
  0x2b   :  { %201 = vmatmul.bf16.vlgmr.msra.gmra.mxu2 %v384_v10  ;;  %211 = vmatmul.bf16.vlgmr.msra.gmra.mxu3 %v386_v11 }
  0x3a   :  { %186 = vmatmul.bf16.gmra.mxu0 %v381_v12  ;;  %196 = vmatmul.bf16.gmra.mxu1 %v383_v13 }
  0x3b   :  { %206 = vmatmul.bf16.gmra.mxu2 %v385_v14  ;;  %216 = vmatmul.bf16.gmra.mxu3 %v387_v15 }
  0xa7   :  { %v182_v16 = vpop.f32.mrf.mxu0  ;;  %v192_v17 = vpop.f32.mrf.mxu1 }
  0xa8   :  { %v227_v19 = vmul.f32 %v604_v18, %v182_v16  ;;  %v231_v21 = vmul.f32 %v604_v18, %v192_v17 }
  0xaa   :  { %v246_v26 = vadd.f32 %v607_v20, %v227_v19  ;;  %v250_v27 = vadd.f32 %v607_v20, %v231_v21 }
  0xac   :  { %v262_v34 = vmax.f32 %v246_v26, 0.0  ;;  %v266_v35 = vmax.f32 %v250_v27, 0.0 }
  0xae   :  { %v202_v22 = vpop.f32.mrf.mxu2  ;;  %v212_v23 = vpop.f32.mrf.mxu3 }
  0xaf   :  { %v184_v24 = vpop.f32.mrf.mxu0  ;;  %v194_v25 = vpop.f32.mrf.mxu1  ;;  %v235_v32 = vmul.f32 %v604_v18, %v202_v22  ;;  %v239_v33 = vmul.f32 %v604_v18, %v212_v23 }
  0xb0   :  { %v228_v28 = vmul.f32 %v604_v18, %v184_v24  ;;  %v232_v29 = vmul.f32 %v604_v18, %v194_v25 }
  0xb1   :  { %v254_v42 = vadd.f32 %v607_v20, %v235_v32  ;;  %v258_v43 = vadd.f32 %v607_v20, %v239_v33 }
  0xb2   :  { %v247_v30 = vadd.f32 %v607_v20, %v228_v28  ;;  %v251_v31 = vadd.f32 %v607_v20, %v232_v29 }
  0xb3   :  { %v270_v50 = vmax.f32 %v254_v42, 0.0  ;;  %v274_v51 = vmax.f32 %v258_v43, 0.0 }
  0xb4   :  { %v263_v36 = vmax.f32 %v247_v30, 0.0  ;;  %v267_v37 = vmax.f32 %v251_v31, 0.0 }
  0xb6   :  { %v399_v38 = vpack.c.bf16 %v263_v36, %v262_v34  ;;  %v409_v39 = vpack.c.bf16 %v267_v37, %v266_v35  ;;  %v204_v40 = vpop.f32.mrf.mxu2  ;;  %v214_v41 = vpop.f32.mrf.mxu3 }
  0xb7   :  { %v236_v44 = vmul.f32 %v604_v18, %v204_v40  ;;  %v240_v45 = vmul.f32 %v604_v18, %v214_v41  ;;  %v187_v46 = vpop.f32.mrf.mxu0  ;;  %v197_v47 = vpop.f32.mrf.mxu1 }
  0xb8   :  { %400 = vst [vmem:[%s668_s4] sm:$0xff] %v399_v38   ;;  %v229_v54 = vmul.f32 %v604_v18, %v187_v46  ;;  %v233_v55 = vmul.f32 %v604_v18, %v197_v47 }
  0xb9   :  { %437 = vst [vmem:[%s668_s4 + $0x10] sm:$0xff] %v409_v39   ;;  %v255_v48 = vadd.f32 %v607_v20, %v236_v44  ;;  %v259_v49 = vadd.f32 %v607_v20, %v240_v45 }
  0xba   :  { %v248_v62 = vadd.f32 %v607_v20, %v229_v54  ;;  %v252_v63 = vadd.f32 %v607_v20, %v233_v55 }
  0xbb   :  { %v271_v52 = vmax.f32 %v255_v48, 0.0  ;;  %v275_v53 = vmax.f32 %v259_v49, 0.0 }
  0xbc   :  { %v264_v6 = vmax.f32 %v248_v62, 0.0  ;;  %v268_v7 = vmax.f32 %v252_v63, 0.0 }
  0xbd   :  { %v419_v56 = vpack.c.bf16 %v271_v52, %v270_v50  ;;  %v429_v57 = vpack.c.bf16 %v275_v53, %v274_v51 }
  0xbe   :  { %v207_v58 = vpop.f32.mrf.mxu2  ;;  %v217_v59 = vpop.f32.mrf.mxu3 }
  0xbf   :  { %439 = vst [vmem:[%s668_s4 + $0x20] sm:$0xff] %v419_v56   ;;  %v189_v60 = vpop.f32.mrf.mxu0  ;;  %v199_v61 = vpop.f32.mrf.mxu1  ;;  %v237_v4 = vmul.f32 %v604_v18, %v207_v58  ;;  %v241_v5 = vmul.f32 %v604_v18, %v217_v59 }
  0xc0   :  { %441 = vst [vmem:[%s668_s4 + $0x30] sm:$0xff] %v429_v57   ;;  %v230_v0 = vmul.f32 %v604_v18, %v189_v60  ;;  %v234_v1 = vmul.f32 %v604_v18, %v199_v61 }
  0xc1   :  { %v256_v14 = vadd.f32 %v607_v20, %v237_v4  ;;  %v260_v15 = vadd.f32 %v607_v20, %v241_v5 }
  0xc2   :  { %v249_v2 = vadd.f32 %v607_v20, %v230_v0  ;;  %v253_v3 = vadd.f32 %v607_v20, %v234_v1 }
  0xc3   :  { %v272_v22 = vmax.f32 %v256_v14, 0.0  ;;  %v276_v23 = vmax.f32 %v260_v15, 0.0 }
  0xc4   :  { %v265_v8 = vmax.f32 %v249_v2, 0.0  ;;  %v269_v9 = vmax.f32 %v253_v3, 0.0 }
  0xc6   :  { %v404_v10 = vpack.c.bf16 %v265_v8, %v264_v6  ;;  %v414_v11 = vpack.c.bf16 %v269_v9, %v268_v7  ;;  %v209_v12 = vpop.f32.mrf.mxu2  ;;  %v219_v13 = vpop.f32.mrf.mxu3 }
  0xc7   :  { %v238_v16 = vmul.f32 %v604_v18, %v209_v12  ;;  %v242_v17 = vmul.f32 %v604_v18, %v219_v13 }
  0xc8   :  { %436 = vst [vmem:[%s668_s4 + $0x8] sm:$0xff] %v404_v10  }
  0xc9   :  { %438 = vst [vmem:[%s668_s4 + $0x18] sm:$0xff] %v414_v11   ;;  %v257_v19 = vadd.f32 %v607_v20, %v238_v16  ;;  %v261_v21 = vadd.f32 %v607_v20, %v242_v17 }
  0xcb   :  { %v273_v24 = vmax.f32 %v257_v19, 0.0  ;;  %v277_v25 = vmax.f32 %v261_v21, 0.0 }
  0xcd   :  { %v424_v26 = vpack.c.bf16 %v273_v24, %v272_v22  ;;  %v434_v27 = vpack.c.bf16 %v277_v25, %v276_v23 }
  0xcf   :  { %440 = vst [vmem:[%s668_s4 + $0x28] sm:$0xff] %v424_v26  }
  0xd0   :  { %442 = vst [vmem:[%s668_s4 + $0x38] sm:$0xff] %v434_v27  }
  0xd1   :  { %314 = vsyncpa [#allocation3], 1 }
  0xd2   :  { %315 = vsyncpa [#allocation5], 1 }

// kernel: forward.66
= control target key start
LH: loop header
LB: loop body
LE: loop exit
PB: predicated region body
PF: predicated region fallthrough
CT: control target
= control target key end

     0   :  { %10 = vsyncpa [#allocation3], 0  ;;  %s783_s0 = inlined_call_operand.vmem [shape: bf16[128,128], index: 0, kind: input, shape index: {}]   ;;  %s784_s1 = inlined_call_operand.vmem [shape: bf16[128,128], index: 1, kind: input, shape index: {}]   ;;  %s785_s2 = inlined_call_operand.hbm [shape: f32[1,128], index: 2, kind: input, shape index: {}]   ;;  %s786_s3 = inlined_call_operand.hbm [shape: f32[1,128], index: 3, kind: input, shape index: {}]   ;;  %s787_s4 = inlined_call_operand.vmem [shape: bf16[128,128], index: 4, kind: input, shape index: {}]   ;;  %s788_s5 = inlined_call_operand.vmem [shape: bf16[128,128], index: 5, kind: output, shape index: {}]  }
   0x1   :  { %s21_s20 = sshll.u32 %s785_s2, 4  ;;  %s22_s20 = int_to_ptr.hbm [resolvable:$true] %s21_s20 }
   0x2   :  { %11 = vsyncpa [#allocation5], 0  ;;  %s613_s21 = smov [#allocation2]   ;;  %s32_s25 = sshll.u32 %s786_s3, 4  ;;  %s33_s25 = int_to_ptr.hbm [resolvable:$true] %s32_s25 }
   0x3   :  { %s23_s22 = sshll.u32 %s613_s21, 4  ;;  %s614_s26 = smov [#allocation4]   ;;  %s24_s22 = int_to_ptr.vmem [resolvable:$true] %s23_s22 }
   0x4   :  { %26 = dma.hbm_to_vmem [thread:$0]  %s22_s20, 16, %s24_s22, [#allocation3]  }
   0x5   :  { %s34_s27 = sshll.u32 %s614_s26, 4  ;;  %s35_s27 = int_to_ptr.vmem [resolvable:$true] %s34_s27 }
   0x6   :  { %37 = dma.hbm_to_vmem [thread:$0]  %s33_s25, 16, %s35_s27, [#allocation5]  }
   0x7   :  { %609 = dma.done.wait [#allocation3], 16  }
   0x8   :  { %610 = vsyncadd [#allocation3], 4294967280 }
   0x9   :  { %611 = dma.done.wait [#allocation5], 16  }
   0xa   :  { %612 = vsyncadd [#allocation5], 4294967280  ;;  %v446_v0 = vld [vmem:[%s784_s1 + $0x38] sm:$0xff]  ;;  %v445_v1 = vld [vmem:[%s784_s1 + $0x30] sm:$0xff] }
   0xb   :  { %176 = vmatpush.bf16.msra.mxu0 %v446_v0  ;;  %533 = vmatpush.bf16.msra.mxu1 %v446_v0  ;;  %v444_v2 = vld [vmem:[%s784_s1 + $0x28] sm:$0xff]  ;;  %v443_v3 = vld [vmem:[%s784_s1 + $0x20] sm:$0xff]  ;;  %v442_v4 = vld [vmem:[%s784_s1 + $0x18] sm:$0xff] }
   0xc   :  { %534 = vmatpush.bf16.msra.mxu2 %v446_v0  ;;  %535 = vmatpush.bf16.msra.mxu3 %v446_v0  ;;  %v441_v5 = vld [vmem:[%s784_s1 + $0x10] sm:$0xff]  ;;  %v440_v6 = vld [vmem:[%s784_s1 + $0x8] sm:$0xff]  ;;  %v439_v7 = vld [vmem:[%s784_s1] sm:$0xff] }
   0xd   :  { %v431_v8 = vld [vmem:[%s783_s0] sm:$0xff]  ;;  %v433_v9 = vld [vmem:[%s783_s0 + $0x10] sm:$0xff]  ;;  %v432_v12 = vld [vmem:[%s783_s0 + $0x8] sm:$0xff] }
   0xe   :  { %v435_v10 = vld [vmem:[%s783_s0 + $0x20] sm:$0xff]  ;;  %v437_v11 = vld [vmem:[%s783_s0 + $0x30] sm:$0xff]  ;;  %v434_v13 = vld [vmem:[%s783_s0 + $0x18] sm:$0xff] }
   0xf   :  { %177 = vmatpush.bf16.msra.mxu0 %v445_v1  ;;  %536 = vmatpush.bf16.msra.mxu1 %v445_v1  ;;  %v436_v14 = vld [vmem:[%s783_s0 + $0x28] sm:$0xff]  ;;  %v438_v15 = vld [vmem:[%s783_s0 + $0x38] sm:$0xff]  ;;  %v699_v16 = vld [vmem:[#allocation2] ss:$0 sm:$0xff] }
  0x10   :  { %537 = vmatpush.bf16.msra.mxu2 %v445_v1  ;;  %538 = vmatpush.bf16.msra.mxu3 %v445_v1  ;;  %v702_v20 = vld [vmem:[#allocation4] ss:$0 sm:$0xff]  ;;  %v520_v23 = vld [vmem:[%s787_s4 + $0x10] sm:$0xff]  }
  0x11   :  { %v448_v22 = vld [vmem:[%s787_s4] sm:$0xff]   ;;  %v457_v26 = vunpack.c.l.bf16 %v520_v23  ;;  %v458_v34 = vunpack.c.h.bf16 %v520_v23  ;;  %v524_v41 = vld [vmem:[%s787_s4 + $0x30] sm:$0xff]  }
  0x12   :  { %v449_v24 = vunpack.c.l.bf16 %v448_v22  ;;  %v450_v32 = vunpack.c.h.bf16 %v448_v22  ;;  %v522_v40 = vld [vmem:[%s787_s4 + $0x20] sm:$0xff]   ;;  %v473_v48 = vunpack.c.l.bf16 %v524_v41  ;;  %v474_v58 = vunpack.c.h.bf16 %v524_v41 }
  0x13   :  { %178 = vmatpush.bf16.msra.mxu0 %v444_v2  ;;  %539 = vmatpush.bf16.msra.mxu1 %v444_v2  ;;  %v465_v46 = vunpack.c.l.bf16 %v522_v40  ;;  %v466_v56 = vunpack.c.h.bf16 %v522_v40 }
  0x14   :  { %540 = vmatpush.bf16.msra.mxu2 %v444_v2  ;;  %541 = vmatpush.bf16.msra.mxu3 %v444_v2 }
  0x17   :  { %179 = vmatpush.bf16.msra.mxu0 %v443_v3  ;;  %542 = vmatpush.bf16.msra.mxu1 %v443_v3 }
  0x18   :  { %543 = vmatpush.bf16.msra.mxu2 %v443_v3  ;;  %544 = vmatpush.bf16.msra.mxu3 %v443_v3 }
  0x1b   :  { %180 = vmatpush.bf16.msra.mxu0 %v442_v4  ;;  %545 = vmatpush.bf16.msra.mxu1 %v442_v4 }
  0x1c   :  { %546 = vmatpush.bf16.msra.mxu2 %v442_v4  ;;  %547 = vmatpush.bf16.msra.mxu3 %v442_v4 }
  0x1f   :  { %181 = vmatpush.bf16.msra.mxu0 %v441_v5  ;;  %548 = vmatpush.bf16.msra.mxu1 %v441_v5 }
  0x20   :  { %549 = vmatpush.bf16.msra.mxu2 %v441_v5  ;;  %550 = vmatpush.bf16.msra.mxu3 %v441_v5 }
  0x23   :  { %182 = vmatpush.bf16.msra.mxu0 %v440_v6  ;;  %551 = vmatpush.bf16.msra.mxu1 %v440_v6 }
  0x24   :  { %552 = vmatpush.bf16.msra.mxu2 %v440_v6  ;;  %553 = vmatpush.bf16.msra.mxu3 %v440_v6 }
  0x27   :  { %183 = vmatpush.bf16.msra.mxu0 %v439_v7  ;;  %554 = vmatpush.bf16.msra.mxu1 %v439_v7 }
  0x28   :  { %555 = vmatpush.bf16.msra.mxu2 %v439_v7  ;;  %556 = vmatpush.bf16.msra.mxu3 %v439_v7 }
  0x2a   :  { %184 = vmatmul.bf16.vlgmr.msra.gmra.mxu0 %v431_v8  ;;  %194 = vmatmul.bf16.vlgmr.msra.gmra.mxu1 %v433_v9  ;;  %v519_v8 = vld [vmem:[%s787_s4 + $0x8] sm:$0xff]   ;;  %v521_v9 = vld [vmem:[%s787_s4 + $0x18] sm:$0xff]  }
  0x2b   :  { %204 = vmatmul.bf16.vlgmr.msra.gmra.mxu2 %v435_v10  ;;  %214 = vmatmul.bf16.vlgmr.msra.gmra.mxu3 %v437_v11 }
  0x3a   :  { %189 = vmatmul.bf16.gmra.mxu0 %v432_v12  ;;  %199 = vmatmul.bf16.gmra.mxu1 %v434_v13 }
  0x3b   :  { %209 = vmatmul.bf16.gmra.mxu2 %v436_v14  ;;  %219 = vmatmul.bf16.gmra.mxu3 %v438_v15  ;;  %v453_v14 = vunpack.c.l.bf16 %v519_v8 }
  0xa7   :  { %v185_v17 = vpop.f32.mrf.mxu0  ;;  %v195_v18 = vpop.f32.mrf.mxu1 }
  0xa8   :  { %v246_v19 = vmul.f32 %v699_v16, %v185_v17  ;;  %v250_v21 = vmul.f32 %v699_v16, %v195_v18  ;;  %v461_v17 = vunpack.c.l.bf16 %v521_v9 }
  0xaa   :  { %v265_v25 = vadd.f32 %v702_v20, %v246_v19  ;;  %v269_v27 = vadd.f32 %v702_v20, %v250_v21 }
  0xac   :  { %v297_v38 = vadd.f32 %v449_v24, %v265_v25  ;;  %v301_v39 = vadd.f32 %v457_v26, %v269_v27  ;;  %v454_v26 = vunpack.c.h.bf16 %v519_v8 }
  0xae   :  { %v205_v28 = vpop.f32.mrf.mxu2  ;;  %v215_v29 = vpop.f32.mrf.mxu3  ;;  %v313_v50 = vmax.f32 %v297_v38, 0.0  ;;  %v317_v51 = vmax.f32 %v301_v39, 0.0 }
  0xaf   :  { %v187_v30 = vpop.f32.mrf.mxu0  ;;  %v197_v31 = vpop.f32.mrf.mxu1  ;;  %v254_v36 = vmul.f32 %v699_v16, %v205_v28  ;;  %v258_v37 = vmul.f32 %v699_v16, %v215_v29  ;;  %v462_v28 = vunpack.c.h.bf16 %v521_v9 }
  0xb0   :  { %v247_v33 = vmul.f32 %v699_v16, %v187_v30  ;;  %v251_v35 = vmul.f32 %v699_v16, %v197_v31 }
  0xb1   :  { %v273_v47 = vadd.f32 %v702_v20, %v254_v36  ;;  %v277_v49 = vadd.f32 %v702_v20, %v258_v37 }
  0xb2   :  { %v266_v42 = vadd.f32 %v702_v20, %v247_v33  ;;  %v270_v43 = vadd.f32 %v702_v20, %v251_v35  ;;  %v525_v35 = vld [vmem:[%s787_s4 + $0x38] sm:$0xff]  }
  0xb3   :  { %v305_v0 = vadd.f32 %v465_v46, %v273_v47  ;;  %v309_v1 = vadd.f32 %v473_v48, %v277_v49 }
  0xb4   :  { %v298_v44 = vadd.f32 %v450_v32, %v266_v42  ;;  %v302_v45 = vadd.f32 %v458_v34, %v270_v43  ;;  %v523_v34 = vld [vmem:[%s787_s4 + $0x28] sm:$0xff]   ;;  %v477_v42 = vunpack.c.l.bf16 %v525_v35 }
  0xb5   :  { %v321_v10 = vmax.f32 %v305_v0, 0.0  ;;  %v325_v11 = vmax.f32 %v309_v1, 0.0  ;;  %v469_v40 = vunpack.c.l.bf16 %v523_v34 }
  0xb6   :  { %v314_v52 = vmax.f32 %v298_v44, 0.0  ;;  %v318_v53 = vmax.f32 %v302_v45, 0.0  ;;  %v207_v54 = vpop.f32.mrf.mxu2  ;;  %v217_v55 = vpop.f32.mrf.mxu3 }
  0xb7   :  { %v255_v57 = vmul.f32 %v699_v16, %v207_v54  ;;  %v259_v59 = vmul.f32 %v699_v16, %v217_v55  ;;  %v190_v60 = vpop.f32.mrf.mxu0  ;;  %v200_v61 = vpop.f32.mrf.mxu1 }
  0xb8   :  { %v482_v62 = vpack.c.bf16 %v314_v52, %v313_v50  ;;  %v492_v63 = vpack.c.bf16 %v318_v53, %v317_v51  ;;  %v248_v4 = vmul.f32 %v699_v16, %v190_v60  ;;  %v252_v5 = vmul.f32 %v699_v16, %v200_v61 }
  0xb9   :  { %v274_v2 = vadd.f32 %v702_v20, %v255_v57  ;;  %v278_v3 = vadd.f32 %v702_v20, %v259_v59  ;;  %v470_v50 = vunpack.c.h.bf16 %v523_v34  ;;  %v478_v52 = vunpack.c.h.bf16 %v525_v35 }
  0xba   :  { %483 = vst [vmem:[%s788_s5] sm:$0xff] %v482_v62   ;;  %v267_v15 = vadd.f32 %v702_v20, %v248_v4  ;;  %v271_v18 = vadd.f32 %v702_v20, %v252_v5 }
  0xbb   :  { %527 = vst [vmem:[%s788_s5 + $0x10] sm:$0xff] %v492_v63   ;;  %v306_v6 = vadd.f32 %v466_v56, %v274_v2  ;;  %v310_v7 = vadd.f32 %v474_v58, %v278_v3 }
  0xbc   :  { %v299_v32 = vadd.f32 %v453_v14, %v267_v15  ;;  %v303_v33 = vadd.f32 %v461_v17, %v271_v18 }
  0xbd   :  { %v322_v12 = vmax.f32 %v306_v6, 0.0  ;;  %v326_v13 = vmax.f32 %v310_v7, 0.0 }
  0xbe   :  { %v210_v19 = vpop.f32.mrf.mxu2  ;;  %v220_v21 = vpop.f32.mrf.mxu3  ;;  %v315_v44 = vmax.f32 %v299_v32, 0.0  ;;  %v319_v45 = vmax.f32 %v303_v33, 0.0 }
  0xbf   :  { %v502_v22 = vpack.c.bf16 %v322_v12, %v321_v10  ;;  %v512_v23 = vpack.c.bf16 %v326_v13, %v325_v11  ;;  %v192_v24 = vpop.f32.mrf.mxu0  ;;  %v202_v25 = vpop.f32.mrf.mxu1  ;;  %v256_v30 = vmul.f32 %v699_v16, %v210_v19  ;;  %v260_v31 = vmul.f32 %v699_v16, %v220_v21 }
  0xc0   :  { %v249_v27 = vmul.f32 %v699_v16, %v192_v24  ;;  %v253_v29 = vmul.f32 %v699_v16, %v202_v25 }
  0xc1   :  { %529 = vst [vmem:[%s788_s5 + $0x20] sm:$0xff] %v502_v22   ;;  %v275_v41 = vadd.f32 %v702_v20, %v256_v30  ;;  %v279_v43 = vadd.f32 %v702_v20, %v260_v31 }
  0xc2   :  { %531 = vst [vmem:[%s788_s5 + $0x30] sm:$0xff] %v512_v23   ;;  %v268_v36 = vadd.f32 %v702_v20, %v249_v27  ;;  %v272_v37 = vadd.f32 %v702_v20, %v253_v29 }
  0xc3   :  { %v307_v56 = vadd.f32 %v469_v40, %v275_v41  ;;  %v311_v57 = vadd.f32 %v477_v42, %v279_v43 }
  0xc4   :  { %v300_v38 = vadd.f32 %v454_v26, %v268_v36  ;;  %v304_v39 = vadd.f32 %v462_v28, %v272_v37 }
  0xc5   :  { %v323_v62 = vmax.f32 %v307_v56, 0.0 }
  0xc6   :  { %v316_v46 = vmax.f32 %v300_v38, 0.0  ;;  %v320_v47 = vmax.f32 %v304_v39, 0.0  ;;  %v212_v48 = vpop.f32.mrf.mxu2  ;;  %v222_v49 = vpop.f32.mrf.mxu3 }
  0xc7   :  { %v257_v51 = vmul.f32 %v699_v16, %v212_v48  ;;  %v261_v53 = vmul.f32 %v699_v16, %v222_v49  ;;  %v327_v16 = vmax.f32 %v311_v57, 0.0 }
  0xc8   :  { %v487_v54 = vpack.c.bf16 %v316_v46, %v315_v44  ;;  %v497_v55 = vpack.c.bf16 %v320_v47, %v319_v45 }
  0xc9   :  { %v276_v58 = vadd.f32 %v702_v20, %v257_v51  ;;  %v280_v59 = vadd.f32 %v702_v20, %v261_v53 }
  0xca   :  { %526 = vst [vmem:[%s788_s5 + $0x8] sm:$0xff] %v487_v54  }
  0xcb   :  { %528 = vst [vmem:[%s788_s5 + $0x18] sm:$0xff] %v497_v55   ;;  %v308_v60 = vadd.f32 %v470_v50, %v276_v58  ;;  %v312_v61 = vadd.f32 %v478_v52, %v280_v59 }
  0xcd   :  { %v324_v63 = vmax.f32 %v308_v60, 0.0  ;;  %v328_v0 = vmax.f32 %v312_v61, 0.0 }
  0xcf   :  { %v507_v1 = vpack.c.bf16 %v324_v63, %v323_v62  ;;  %v517_v2 = vpack.c.bf16 %v328_v0, %v327_v16 }
  0xd1   :  { %530 = vst [vmem:[%s788_s5 + $0x28] sm:$0xff] %v507_v1  }
  0xd2   :  { %532 = vst [vmem:[%s788_s5 + $0x38] sm:$0xff] %v517_v2  }
  0xd3   :  { %365 = vsyncpa [#allocation3], 1 }
  0xd4   :  { %366 = vsyncpa [#allocation5], 1 }

// kernel: forward.65
= control target key start
LH: loop header
LB: loop body
LE: loop exit
PB: predicated region body
PF: predicated region fallthrough
CT: control target
= control target key end

     0   :  { %9 = vsyncpa [#allocation3], 0  ;;  %s3276_s0 = inlined_call_operand.vmem [shape: bf16[128,1152], index: 0, kind: input, shape index: {}]   ;;  %s3277_s1 = inlined_call_operand.vmem [shape: bf16[1152,128], index: 1, kind: input, shape index: {}]   ;;  %s3278_s2 = inlined_call_operand.hbm [shape: f32[1,128], index: 2, kind: input, shape index: {}]   ;;  %s3279_s3 = inlined_call_operand.hbm [shape: f32[1,128], index: 3, kind: input, shape index: {}]   ;;  %s3280_s4 = inlined_call_operand.vmem [shape: bf16[128,128], index: 4, kind: output, shape index: {}]  }
   0x1   :  { %s20_s17 = sshll.u32 %s3278_s2, 4  ;;  %s21_s17 = int_to_ptr.hbm [resolvable:$true] %s20_s17 }
   0x2   :  { %10 = vsyncpa [#allocation5], 0  ;;  %s2451_s18 = smov [#allocation2]   ;;  %s31_s22 = sshll.u32 %s3279_s3, 4  ;;  %s32_s22 = int_to_ptr.hbm [resolvable:$true] %s31_s22 }
   0x3   :  { %s22_s19 = sshll.u32 %s2451_s18, 4  ;;  %s2452_s23 = smov [#allocation4]   ;;  %s23_s19 = int_to_ptr.vmem [resolvable:$true] %s22_s19 }
   0x4   :  { %25 = dma.hbm_to_vmem [thread:$0]  %s21_s17, 16, %s23_s19, [#allocation3]  }
   0x5   :  { %s33_s24 = sshll.u32 %s2452_s23, 4  ;;  %s34_s24 = int_to_ptr.vmem [resolvable:$true] %s33_s24 }
   0x6   :  { %36 = dma.hbm_to_vmem [thread:$0]  %s32_s22, 16, %s34_s24, [#allocation5]  }
   0x7   :  { %2447 = dma.done.wait [#allocation3], 16  }
   0x8   :  { %2448 = vsyncadd [#allocation3], 4294967280 }
   0x9   :  { %2449 = dma.done.wait [#allocation5], 16  }
   0xa   :  { %2450 = vsyncadd [#allocation5], 4294967280  ;;  %v2259_v0 = vld [vmem:[%s3277_s1 + $0x38] sm:$0xff]  ;;  %v2258_v1 = vld [vmem:[%s3277_s1 + $0x30] sm:$0xff] }
   0xb   :  { %2371 = vmatpush.bf16.msra.mxu1 %v2259_v0  ;;  %2372 = vmatpush.bf16.msra.mxu2 %v2259_v0  ;;  %v2257_v2 = vld [vmem:[%s3277_s1 + $0x28] sm:$0xff]  ;;  %v2256_v3 = vld [vmem:[%s3277_s1 + $0x20] sm:$0xff]  ;;  %v2255_v4 = vld [vmem:[%s3277_s1 + $0x18] sm:$0xff] }
   0xc   :  { %2373 = vmatpush.bf16.msra.mxu3 %v2259_v0  ;;  %1069 = vmatpush.bf16.msra.mxu0 %v2259_v0  ;;  %v2254_v5 = vld [vmem:[%s3277_s1 + $0x10] sm:$0xff]  ;;  %v2253_v6 = vld [vmem:[%s3277_s1 + $0x8] sm:$0xff]  ;;  %v2252_v7 = vld [vmem:[%s3277_s1] sm:$0xff] }
   0xd   :  { %v1678_v8 = vld [vmem:[%s3276_s0 + $0x90] sm:$0xf]  ;;  %v2202_v9 = vld [vmem:[%s3276_s0 + $0xb0] sm:$0xf0]  ;;  %v1750_v10 = vld [vmem:[%s3276_s0 + $0x120] sm:$0xf] }
   0xe   :  { %v2220_v11 = vld [vmem:[%s3276_s0 + $0x140] sm:$0xf0]  ;;  %v1822_v12 = vld [vmem:[%s3276_s0 + $0x1b0] sm:$0xf]  ;;  %v2238_v13 = vld [vmem:[%s3276_s0 + $0x1d0] sm:$0xf0]  ;;  %v1679_v18 = vor.u32 %v2202_v9, %v1678_v8 }
   0xf   :  { %2374 = vmatpush.bf16.msra.mxu1 %v2258_v1  ;;  %2375 = vmatpush.bf16.msra.mxu2 %v2258_v1  ;;  %v1606_v14 = vld [vmem:[%s3276_s0] sm:$0xf]  ;;  %v2184_v15 = vld [vmem:[%s3276_s0 + $0x20] sm:$0xf0]  ;;  %v2275_v16 = vld [vmem:[%s3277_s1 + $0xb8] sm:$0xff]  ;;  %v1751_v19 = vor.u32 %v2220_v11, %v1750_v10  ;;  %v1823_v20 = vor.u32 %v2238_v13, %v1822_v12 }
  0x10   :  { %2376 = vmatpush.bf16.msra.mxu3 %v2258_v1  ;;  %1070 = vmatpush.bf16.msra.mxu0 %v2258_v1  ;;  %v2267_v17 = vld [vmem:[%s3277_s1 + $0x78] sm:$0xff]  ;;  %v1607_v21 = vor.u32 %v2184_v15, %v1606_v14  ;;  %v2274_v24 = vld [vmem:[%s3277_s1 + $0xb0] sm:$0xff]  ;;  %v2273_v28 = vld [vmem:[%s3277_s1 + $0xa8] sm:$0xff] }
  0x11   :  { %v2283_v22 = vld [vmem:[%s3277_s1 + $0xf8] sm:$0xff]  ;;  %v2266_v25 = vld [vmem:[%s3277_s1 + $0x70] sm:$0xff]  ;;  %v2265_v29 = vld [vmem:[%s3277_s1 + $0x68] sm:$0xff] }
  0x12   :  { %v2291_v23 = vld [vmem:[%s3277_s1 + $0x138] sm:$0xff]  ;;  %v2282_v26 = vld [vmem:[%s3277_s1 + $0xf0] sm:$0xff]  ;;  %v2281_v30 = vld [vmem:[%s3277_s1 + $0xe8] sm:$0xff] }
  0x13   :  { %2377 = vmatpush.bf16.msra.mxu1 %v2257_v2  ;;  %2378 = vmatpush.bf16.msra.mxu2 %v2257_v2  ;;  %v2290_v27 = vld [vmem:[%s3277_s1 + $0x130] sm:$0xff]  ;;  %v2289_v31 = vld [vmem:[%s3277_s1 + $0x128] sm:$0xff]  ;;  %v2272_v32 = vld [vmem:[%s3277_s1 + $0xa0] sm:$0xff] }
  0x14   :  { %2379 = vmatpush.bf16.msra.mxu3 %v2257_v2  ;;  %1071 = vmatpush.bf16.msra.mxu0 %v2257_v2  ;;  %v2264_v33 = vld [vmem:[%s3277_s1 + $0x60] sm:$0xff]  ;;  %v1714_v36 = vld [vmem:[%s3276_s0 + $0xd8] sm:$0xf]  ;;  %v2211_v37 = vld [vmem:[%s3276_s0 + $0xf8] sm:$0xf0] }
  0x15   :  { %v2280_v34 = vld [vmem:[%s3277_s1 + $0xe0] sm:$0xff]  ;;  %v1786_v38 = vld [vmem:[%s3276_s0 + $0x168] sm:$0xf]  ;;  %v2229_v39 = vld [vmem:[%s3276_s0 + $0x188] sm:$0xf0]  ;;  %v1715_v46 = vor.u32 %v2211_v37, %v1714_v36 }
  0x16   :  { %v2288_v35 = vld [vmem:[%s3277_s1 + $0x120] sm:$0xff]  ;;  %v1858_v40 = vld [vmem:[%s3276_s0 + $0x1f8] sm:$0xf]  ;;  %v2247_v41 = vld [vmem:[%s3276_s0 + $0x218] sm:$0xf0]  ;;  %v1787_v47 = vor.u32 %v2229_v39, %v1786_v38 }
  0x17   :  { %2380 = vmatpush.bf16.msra.mxu1 %v2256_v3  ;;  %2381 = vmatpush.bf16.msra.mxu2 %v2256_v3  ;;  %v1642_v42 = vld [vmem:[%s3276_s0 + $0x48] sm:$0xf]  ;;  %v2193_v43 = vld [vmem:[%s3276_s0 + $0x68] sm:$0xf0]  ;;  %v2271_v44 = vld [vmem:[%s3277_s1 + $0x98] sm:$0xff]  ;;  %v1859_v48 = vor.u32 %v2247_v41, %v1858_v40 }
  0x18   :  { %2382 = vmatpush.bf16.msra.mxu3 %v2256_v3  ;;  %1072 = vmatpush.bf16.msra.mxu0 %v2256_v3  ;;  %v2263_v45 = vld [vmem:[%s3277_s1 + $0x58] sm:$0xff]  ;;  %v1643_v49 = vor.u32 %v2193_v43, %v1642_v42  ;;  %v2270_v52 = vld [vmem:[%s3277_s1 + $0x90] sm:$0xff]  ;;  %v2269_v56 = vld [vmem:[%s3277_s1 + $0x88] sm:$0xff] }
  0x19   :  { %v2279_v50 = vld [vmem:[%s3277_s1 + $0xd8] sm:$0xff]  ;;  %v2262_v53 = vld [vmem:[%s3277_s1 + $0x50] sm:$0xff]  ;;  %v2261_v57 = vld [vmem:[%s3277_s1 + $0x48] sm:$0xff] }
  0x1a   :  { %v2287_v51 = vld [vmem:[%s3277_s1 + $0x118] sm:$0xff]  ;;  %v2278_v54 = vld [vmem:[%s3277_s1 + $0xd0] sm:$0xff]  ;;  %v2277_v58 = vld [vmem:[%s3277_s1 + $0xc8] sm:$0xff] }
  0x1b   :  { %2383 = vmatpush.bf16.msra.mxu1 %v2255_v4  ;;  %2384 = vmatpush.bf16.msra.mxu2 %v2255_v4  ;;  %v2286_v55 = vld [vmem:[%s3277_s1 + $0x110] sm:$0xff]  ;;  %v2285_v59 = vld [vmem:[%s3277_s1 + $0x108] sm:$0xff]  ;;  %v2268_v60 = vld [vmem:[%s3277_s1 + $0x80] sm:$0xff] }
  0x1c   :  { %2385 = vmatpush.bf16.msra.mxu3 %v2255_v4  ;;  %1073 = vmatpush.bf16.msra.mxu0 %v2255_v4  ;;  %v2260_v61 = vld [vmem:[%s3277_s1 + $0x40] sm:$0xff]  ;;  %v1608_v1 = vld [vmem:[%s3276_s0 + $0x24] sm:$0xf0]  ;;  %v2307_v2 = vld [vmem:[%s3277_s1 + $0x1b8] sm:$0xff] }
  0x1d   :  { %v2180_v62 = vld [vmem:[%s3276_s0 + $0x4] sm:$0xf]  ;;  %v2299_v3 = vld [vmem:[%s3277_s1 + $0x178] sm:$0xff]  ;;  %v1614_v4 = vld [vmem:[%s3276_s0 + $0x8] sm:$0xf] }
  0x1e   :  { %v2276_v63 = vld [vmem:[%s3277_s1 + $0xc0] sm:$0xff]  ;;  %v1622_v8 = vld [vmem:[%s3276_s0 + $0x10] sm:$0xf]  ;;  %v2186_v9 = vld [vmem:[%s3276_s0 + $0x30] sm:$0xf0]  ;;  %v1611_v12 = vor.u32 %v2180_v62, %v1608_v1 }
  0x1f   :  { %2386 = vmatpush.bf16.msra.mxu1 %v2254_v5  ;;  %2387 = vmatpush.bf16.msra.mxu2 %v2254_v5  ;;  %v2284_v0 = vld [vmem:[%s3277_s1 + $0x100] sm:$0xff]  ;;  %v2315_v10 = vld [vmem:[%s3277_s1 + $0x1f8] sm:$0xff]  ;;  %v1623_v15 = vor.u32 %v2186_v9, %v1622_v8  ;;  %v2198_v40 = vld [vmem:[%s3276_s0 + $0x94] sm:$0xf] }
  0x20   :  { %2388 = vmatpush.bf16.msra.mxu3 %v2254_v5  ;;  %1074 = vmatpush.bf16.msra.mxu0 %v2254_v5  ;;  %v2185_v5 = vld [vmem:[%s3276_s0 + $0x28] sm:$0xf0]  ;;  %v2323_v11 = vld [vmem:[%s3277_s1 + $0x238] sm:$0xff]  ;;  %v2304_v36 = vld [vmem:[%s3277_s1 + $0x1a0] sm:$0xff] }
  0x21   :  { %v1615_v13 = vor.u32 %v2185_v5, %v1614_v4  ;;  %v2312_v37 = vld [vmem:[%s3277_s1 + $0x1e0] sm:$0xff]  ;;  %v1680_v41 = vld [vmem:[%s3276_s0 + $0xb4] sm:$0xf0]  ;;  %v2203_v43 = vld [vmem:[%s3276_s0 + $0xb8] sm:$0xf0] }
  0x22   :  { %v2296_v38 = vld [vmem:[%s3277_s1 + $0x160] sm:$0xff]  ;;  %v1686_v42 = vld [vmem:[%s3276_s0 + $0x98] sm:$0xf]  ;;  %v1730_v62 = vld [vmem:[%s3276_s0 + $0xe8] sm:$0xf] }
  0x23   :  { %2389 = vmatpush.bf16.msra.mxu1 %v2253_v6  ;;  %2390 = vmatpush.bf16.msra.mxu2 %v2253_v6  ;;  %v2320_v39 = vld [vmem:[%s3277_s1 + $0x220] sm:$0xff]  ;;  %v2302_v4 = vld [vmem:[%s3277_s1 + $0x190] sm:$0xff]  ;;  %v1752_v9 = vld [vmem:[%s3276_s0 + $0x144] sm:$0xf0] }
  0x24   :  { %2391 = vmatpush.bf16.msra.mxu3 %v2253_v6  ;;  %1075 = vmatpush.bf16.msra.mxu0 %v2253_v6  ;;  %v2181_v6 = vld [vmem:[%s3276_s0 + $0xc] sm:$0xf]  ;;  %v2310_v5 = vld [vmem:[%s3277_s1 + $0x1d0] sm:$0xff]  ;;  %v2216_v8 = vld [vmem:[%s3276_s0 + $0x124] sm:$0xf] }
  0x27   :  { %2392 = vmatpush.bf16.msra.mxu1 %v2252_v7  ;;  %2393 = vmatpush.bf16.msra.mxu2 %v2252_v7 }
  0x28   :  { %2394 = vmatpush.bf16.msra.mxu3 %v2252_v7  ;;  %1076 = vmatpush.bf16.msra.mxu0 %v2252_v7  ;;  %v1616_v7 = vld [vmem:[%s3276_s0 + $0x2c] sm:$0xf0] }
  0x29   :  { %v1619_v14 = vor.u32 %v2181_v6, %v1616_v7  ;;  %v2294_v6 = vld [vmem:[%s3277_s1 + $0x150] sm:$0xff] }
  0x2a   :  { %1087 = vmatmul.bf16.vlgmr.msra.gmra.mxu1 %v1679_v18  ;;  %1097 = vmatmul.bf16.vlgmr.msra.gmra.mxu2 %v1751_v19  ;;  %v2314_v18 = vld [vmem:[%s3277_s1 + $0x1f0] sm:$0xff] }
  0x2b   :  { %1167 = vmatpush.bf16.msrb.mxu2 %v2275_v16  ;;  %1118 = vmatpush.bf16.msrb.mxu1 %v2267_v17  ;;  %v2306_v16 = vld [vmem:[%s3277_s1 + $0x1b0] sm:$0xff] }
  0x2c   :  { %1107 = vmatmul.bf16.vlgmr.msra.gmra.mxu3 %v1823_v20  ;;  %1077 = vmatmul.bf16.vlgmr.msra.gmra.mxu0 %v1607_v21  ;;  %v2298_v17 = vld [vmem:[%s3277_s1 + $0x170] sm:$0xff]  ;;  %v2305_v20 = vld [vmem:[%s3277_s1 + $0x1a8] sm:$0xff] }
  0x2d   :  { %1216 = vmatpush.bf16.msrb.mxu3 %v2283_v22  ;;  %1265 = vmatpush.bf16.msrb.mxu0 %v2291_v23  ;;  %v2322_v19 = vld [vmem:[%s3277_s1 + $0x230] sm:$0xff]  ;;  %v2297_v21 = vld [vmem:[%s3277_s1 + $0x168] sm:$0xff] }
  0x2e   :  { %v2313_v22 = vld [vmem:[%s3277_s1 + $0x1e8] sm:$0xff]  ;;  %v2318_v7 = vld [vmem:[%s3277_s1 + $0x210] sm:$0xff] }
  0x2f   :  { %1168 = vmatpush.bf16.msrb.mxu2 %v2274_v24  ;;  %1119 = vmatpush.bf16.msrb.mxu1 %v2266_v25  ;;  %v2321_v23 = vld [vmem:[%s3277_s1 + $0x228] sm:$0xff]  ;;  %v1644_v25 = vld [vmem:[%s3276_s0 + $0x6c] sm:$0xf0] }
  0x30   :  { %v2189_v24 = vld [vmem:[%s3276_s0 + $0x4c] sm:$0xf] }
  0x31   :  { %1217 = vmatpush.bf16.msrb.mxu3 %v2282_v26  ;;  %1266 = vmatpush.bf16.msrb.mxu0 %v2290_v27  ;;  %v1650_v26 = vld [vmem:[%s3276_s0 + $0x50] sm:$0xf]  ;;  %v2194_v27 = vld [vmem:[%s3276_s0 + $0x70] sm:$0xf0] }
  0x33   :  { %1169 = vmatpush.bf16.msrb.mxu2 %v2273_v28  ;;  %1120 = vmatpush.bf16.msrb.mxu1 %v2265_v29  ;;  %v2190_v28 = vld [vmem:[%s3276_s0 + $0x54] sm:$0xf]  ;;  %v1652_v29 = vld [vmem:[%s3276_s0 + $0x74] sm:$0xf0] }
  0x35   :  { %1218 = vmatpush.bf16.msrb.mxu3 %v2281_v30  ;;  %1267 = vmatpush.bf16.msrb.mxu0 %v2289_v31  ;;  %v1658_v30 = vld [vmem:[%s3276_s0 + $0x58] sm:$0xf]  ;;  %v2195_v31 = vld [vmem:[%s3276_s0 + $0x78] sm:$0xf0] }
  0x37   :  { %1170 = vmatpush.bf16.msrb.mxu2 %v2272_v32  ;;  %1121 = vmatpush.bf16.msrb.mxu1 %v2264_v33  ;;  %v1647_v32 = vor.u32 %v2189_v24, %v1644_v25  ;;  %v1651_v33 = vor.u32 %v2194_v27, %v1650_v26  ;;  %v2225_v24 = vld [vmem:[%s3276_s0 + $0x16c] sm:$0xf]  ;;  %v1788_v25 = vld [vmem:[%s3276_s0 + $0x18c] sm:$0xf0]  ;;  %v2230_v27 = vld [vmem:[%s3276_s0 + $0x190] sm:$0xf0] }
  0x38   :  { %v1794_v26 = vld [vmem:[%s3276_s0 + $0x170] sm:$0xf] }
  0x39   :  { %1219 = vmatpush.bf16.msrb.mxu3 %v2280_v34  ;;  %1268 = vmatpush.bf16.msrb.mxu0 %v2288_v35  ;;  %v1655_v34 = vor.u32 %v2190_v28, %v1652_v29  ;;  %v1659_v35 = vor.u32 %v2195_v31, %v1658_v30  ;;  %v2226_v28 = vld [vmem:[%s3276_s0 + $0x174] sm:$0xf]  ;;  %v1796_v29 = vld [vmem:[%s3276_s0 + $0x194] sm:$0xf0]  ;;  %v2231_v31 = vld [vmem:[%s3276_s0 + $0x198] sm:$0xf0] }
  0x3a   :  { %1092 = vmatmul.bf16.gmra.mxu1 %v1715_v46  ;;  %1102 = vmatmul.bf16.gmra.mxu2 %v1787_v47  ;;  %v1694_v46 = vld [vmem:[%s3276_s0 + $0xa0] sm:$0xf]  ;;  %v2204_v47 = vld [vmem:[%s3276_s0 + $0xc0] sm:$0xf0]  ;;  %v1802_v30 = vld [vmem:[%s3276_s0 + $0x178] sm:$0xf] }
  0x3b   :  { %1171 = vmatpush.bf16.msrb.mxu2 %v2271_v44  ;;  %1122 = vmatpush.bf16.msrb.mxu1 %v2263_v45  ;;  %v2199_v44 = vld [vmem:[%s3276_s0 + $0x9c] sm:$0xf]  ;;  %v1688_v45 = vld [vmem:[%s3276_s0 + $0xbc] sm:$0xf0] }
  0x3c   :  { %1112 = vmatmul.bf16.gmra.mxu3 %v1859_v48  ;;  %1082 = vmatmul.bf16.gmra.mxu0 %v1643_v49  ;;  %v1683_v48 = vor.u32 %v2198_v40, %v1680_v41  ;;  %v1687_v49 = vor.u32 %v2203_v43, %v1686_v42  ;;  %v2234_v40 = vld [vmem:[%s3276_s0 + $0x1b4] sm:$0xf]  ;;  %v1824_v41 = vld [vmem:[%s3276_s0 + $0x1d4] sm:$0xf0]  ;;  %v2239_v43 = vld [vmem:[%s3276_s0 + $0x1d8] sm:$0xf0] }
  0x3d   :  { %1220 = vmatpush.bf16.msrb.mxu3 %v2279_v50  ;;  %1269 = vmatpush.bf16.msrb.mxu0 %v2287_v51  ;;  %v1691_v50 = vor.u32 %v2199_v44, %v1688_v45  ;;  %v1695_v51 = vor.u32 %v2204_v47, %v1694_v46  ;;  %v1830_v42 = vld [vmem:[%s3276_s0 + $0x1b8] sm:$0xf]  ;;  %v2235_v44 = vld [vmem:[%s3276_s0 + $0x1bc] sm:$0xf]  ;;  %v1832_v45 = vld [vmem:[%s3276_s0 + $0x1dc] sm:$0xf0] }
  0x3e   :  { %v1838_v46 = vld [vmem:[%s3276_s0 + $0x1c0] sm:$0xf]  ;;  %v2240_v47 = vld [vmem:[%s3276_s0 + $0x1e0] sm:$0xf0] }
  0x3f   :  { %1172 = vmatpush.bf16.msrb.mxu2 %v2270_v52  ;;  %1123 = vmatpush.bf16.msrb.mxu1 %v2262_v53  ;;  %v2303_v52 = vld [vmem:[%s3277_s1 + $0x198] sm:$0xff] }
  0x40   :  { %v2311_v53 = vld [vmem:[%s3277_s1 + $0x1d8] sm:$0xff] }
  0x41   :  { %1221 = vmatpush.bf16.msrb.mxu3 %v2278_v54  ;;  %1270 = vmatpush.bf16.msrb.mxu0 %v2286_v55  ;;  %v2295_v54 = vld [vmem:[%s3277_s1 + $0x158] sm:$0xff] }
  0x42   :  { %v2319_v55 = vld [vmem:[%s3277_s1 + $0x218] sm:$0xff] }
  0x43   :  { %1173 = vmatpush.bf16.msrb.mxu2 %v2269_v56  ;;  %1124 = vmatpush.bf16.msrb.mxu1 %v2261_v57  ;;  %v2207_v56 = vld [vmem:[%s3276_s0 + $0xdc] sm:$0xf]  ;;  %v1716_v57 = vld [vmem:[%s3276_s0 + $0xfc] sm:$0xf0] }
  0x45   :  { %1222 = vmatpush.bf16.msrb.mxu3 %v2277_v58  ;;  %1271 = vmatpush.bf16.msrb.mxu0 %v2285_v59  ;;  %v1722_v58 = vld [vmem:[%s3276_s0 + $0xe0] sm:$0xf]  ;;  %v2212_v59 = vld [vmem:[%s3276_s0 + $0x100] sm:$0xf0] }
  0x46   :  { %v1723_v1 = vor.u32 %v2212_v59, %v1722_v58  ;;  %v2243_v58 = vld [vmem:[%s3276_s0 + $0x1fc] sm:$0xf]  ;;  %v1860_v59 = vld [vmem:[%s3276_s0 + $0x21c] sm:$0xf0] }
  0x47   :  { %1174 = vmatpush.bf16.msrb.mxu2 %v2268_v60  ;;  %1125 = vmatpush.bf16.msrb.mxu1 %v2260_v61  ;;  %v2208_v60 = vld [vmem:[%s3276_s0 + $0xe4] sm:$0xf]  ;;  %v1724_v61 = vld [vmem:[%s3276_s0 + $0x104] sm:$0xf0] }
  0x49   :  { %1223 = vmatpush.bf16.msrb.mxu3 %v2276_v63  ;;  %1272 = vmatpush.bf16.msrb.mxu0 %v2284_v0  ;;  %v2213_v63 = vld [vmem:[%s3276_s0 + $0x108] sm:$0xf0]  ;;  %v1719_v0 = vor.u32 %v2207_v56, %v1716_v57 }
  0x4a   :  { %1126 = vmatmul.bf16.vlgmr.msrb.gmra.mxu1 %v1611_v12  ;;  %1175 = vmatmul.bf16.vlgmr.msrb.gmra.mxu2 %v1615_v13  ;;  %v2217_v12 = vld [vmem:[%s3276_s0 + $0x12c] sm:$0xf]  ;;  %v1760_v13 = vld [vmem:[%s3276_s0 + $0x14c] sm:$0xf0] }
  0x4b   :  { %1363 = vmatpush.bf16.msra.mxu2 %v2307_v2  ;;  %1314 = vmatpush.bf16.msra.mxu1 %v2299_v3  ;;  %v1727_v2 = vor.u32 %v2208_v60, %v1724_v61  ;;  %v1731_v3 = vor.u32 %v2213_v63, %v1730_v62  ;;  %v1866_v60 = vld [vmem:[%s3276_s0 + $0x200] sm:$0xf]  ;;  %v2248_v61 = vld [vmem:[%s3276_s0 + $0x220] sm:$0xf0]  ;;  %v1868_v63 = vld [vmem:[%s3276_s0 + $0x224] sm:$0xf0] }
  0x4c   :  { %1224 = vmatmul.bf16.vlgmr.msrb.gmra.mxu3 %v1619_v14  ;;  %1273 = vmatmul.bf16.vlgmr.msrb.gmra.mxu0 %v1623_v15  ;;  %v1766_v14 = vld [vmem:[%s3276_s0 + $0x130] sm:$0xf]  ;;  %v2222_v15 = vld [vmem:[%s3276_s0 + $0x150] sm:$0xf0]  ;;  %v2244_v62 = vld [vmem:[%s3276_s0 + $0x204] sm:$0xf] }
  0x4d   :  { %1412 = vmatpush.bf16.msra.mxu3 %v2315_v10  ;;  %1461 = vmatpush.bf16.msra.mxu0 %v2323_v11  ;;  %v1758_v10 = vld [vmem:[%s3276_s0 + $0x128] sm:$0xf]  ;;  %v2221_v11 = vld [vmem:[%s3276_s0 + $0x148] sm:$0xf0] }
  0x4f   :  { %1364 = vmatpush.bf16.msra.mxu2 %v2306_v16  ;;  %1315 = vmatpush.bf16.msra.mxu1 %v2298_v17  ;;  %v1755_v16 = vor.u32 %v2216_v8, %v1752_v9  ;;  %v1759_v17 = vor.u32 %v2221_v11, %v1758_v10 }
  0x51   :  { %1413 = vmatpush.bf16.msra.mxu3 %v2314_v18  ;;  %1462 = vmatpush.bf16.msra.mxu0 %v2322_v19  ;;  %v1763_v18 = vor.u32 %v2217_v12, %v1760_v13  ;;  %v1767_v19 = vor.u32 %v2222_v15, %v1766_v14  ;;  %v2182_v14 = vld [vmem:[%s3276_s0 + $0x14] sm:$0xf]  ;;  %v1624_v15 = vld [vmem:[%s3276_s0 + $0x34] sm:$0xf0] }
  0x53   :  { %1365 = vmatpush.bf16.msra.mxu2 %v2305_v20  ;;  %1316 = vmatpush.bf16.msra.mxu1 %v2297_v21  ;;  %v2301_v20 = vld [vmem:[%s3277_s1 + $0x188] sm:$0xff] }
  0x54   :  { %v2309_v21 = vld [vmem:[%s3277_s1 + $0x1c8] sm:$0xff] }
  0x55   :  { %1414 = vmatpush.bf16.msra.mxu3 %v2313_v22  ;;  %1463 = vmatpush.bf16.msra.mxu0 %v2321_v23  ;;  %v2293_v22 = vld [vmem:[%s3277_s1 + $0x148] sm:$0xff] }
  0x56   :  { %v2317_v23 = vld [vmem:[%s3277_s1 + $0x208] sm:$0xff] }
  0x57   :  { %1366 = vmatpush.bf16.msra.mxu2 %v2304_v36  ;;  %1317 = vmatpush.bf16.msra.mxu1 %v2296_v38  ;;  %v2300_v36 = vld [vmem:[%s3277_s1 + $0x180] sm:$0xff] }
  0x58   :  { %v2292_v38 = vld [vmem:[%s3277_s1 + $0x140] sm:$0xff] }
  0x59   :  { %1415 = vmatpush.bf16.msra.mxu3 %v2312_v37  ;;  %1464 = vmatpush.bf16.msra.mxu0 %v2320_v39  ;;  %v2308_v37 = vld [vmem:[%s3277_s1 + $0x1c0] sm:$0xff] }
  0x5a   :  { %1131 = vmatmul.bf16.gmra.mxu1 %v1647_v32  ;;  %1180 = vmatmul.bf16.gmra.mxu2 %v1651_v33  ;;  %v1791_v32 = vor.u32 %v2225_v24, %v1788_v25  ;;  %v1795_v33 = vor.u32 %v2230_v27, %v1794_v26  ;;  %v2316_v39 = vld [vmem:[%s3277_s1 + $0x200] sm:$0xff]  ;;  %v1627_v24 = vor.u32 %v2182_v14, %v1624_v15 }
  0x5b   :  { %1367 = vmatpush.bf16.msra.mxu2 %v2303_v52  ;;  %1318 = vmatpush.bf16.msra.mxu1 %v2295_v54  ;;  %v1839_v52 = vor.u32 %v2240_v47, %v1838_v46  ;;  %v2197_v46 = vld [vmem:[%s3276_s0 + $0x88] sm:$0xf0]  ;;  %v2200_v14 = vld [vmem:[%s3276_s0 + $0xa4] sm:$0xf] }
  0x5c   :  { %1229 = vmatmul.bf16.gmra.mxu3 %v1655_v34  ;;  %1278 = vmatmul.bf16.gmra.mxu0 %v1659_v35  ;;  %v1799_v34 = vor.u32 %v2226_v28, %v1796_v29  ;;  %v1803_v35 = vor.u32 %v2231_v31, %v1802_v30 }
  0x5d   :  { %1416 = vmatpush.bf16.msra.mxu3 %v2311_v53  ;;  %1465 = vmatpush.bf16.msra.mxu0 %v2319_v55 }
  0x5f   :  { %1368 = vmatpush.bf16.msra.mxu2 %v2302_v4  ;;  %1319 = vmatpush.bf16.msra.mxu1 %v2294_v6  ;;  %v1863_v4 = vor.u32 %v2243_v58, %v1860_v59 }
  0x61   :  { %1417 = vmatpush.bf16.msra.mxu3 %v2310_v5  ;;  %1466 = vmatpush.bf16.msra.mxu0 %v2318_v7  ;;  %v1867_v5 = vor.u32 %v2248_v61, %v1866_v60  ;;  %v1871_v7 = vor.u32 %v2244_v62, %v1868_v63 }
  0x63   :  { %1369 = vmatpush.bf16.msra.mxu2 %v2301_v20  ;;  %1320 = vmatpush.bf16.msra.mxu1 %v2293_v22  ;;  %v1638_v20 = vld [vmem:[%s3276_s0 + $0x20] sm:$0xf] }
  0x65   :  { %1418 = vmatpush.bf16.msra.mxu3 %v2309_v21  ;;  %1467 = vmatpush.bf16.msra.mxu0 %v2317_v23  ;;  %v2188_v21 = vld [vmem:[%s3276_s0 + $0x40] sm:$0xf0] }
  0x66   :  { %v1639_v28 = vor.u32 %v2188_v21, %v1638_v20  ;;  %v2206_v20 = vld [vmem:[%s3276_s0 + $0xd0] sm:$0xf0] }
  0x67   :  { %1370 = vmatpush.bf16.msra.mxu2 %v2300_v36  ;;  %1321 = vmatpush.bf16.msra.mxu1 %v2292_v38  ;;  %v2191_v38 = vld [vmem:[%s3276_s0 + $0x5c] sm:$0xf] }
  0x69   :  { %1419 = vmatpush.bf16.msra.mxu3 %v2308_v37  ;;  %1468 = vmatpush.bf16.msra.mxu0 %v2316_v39  ;;  %v1660_v39 = vld [vmem:[%s3276_s0 + $0x7c] sm:$0xf0] }
  0x6a   :  { %1136 = vmatmul.bf16.gmra.mxu1 %v1683_v48  ;;  %1185 = vmatmul.bf16.gmra.mxu2 %v1687_v49  ;;  %v1827_v48 = vor.u32 %v2234_v40, %v1824_v41  ;;  %v1831_v49 = vor.u32 %v2239_v43, %v1830_v42  ;;  %v1666_v41 = vld [vmem:[%s3276_s0 + $0x60] sm:$0xf]  ;;  %v2196_v42 = vld [vmem:[%s3276_s0 + $0x80] sm:$0xf0] }
  0x6b   :  { %v2192_v43 = vld [vmem:[%s3276_s0 + $0x64] sm:$0xf] }
  0x6c   :  { %1234 = vmatmul.bf16.gmra.mxu3 %v1691_v50  ;;  %1283 = vmatmul.bf16.gmra.mxu0 %v1695_v51  ;;  %v1835_v51 = vor.u32 %v2235_v44, %v1832_v45  ;;  %v1668_v44 = vld [vmem:[%s3276_s0 + $0x84] sm:$0xf0] }
  0x6d   :  { %v1674_v45 = vld [vmem:[%s3276_s0 + $0x68] sm:$0xf] }
  0x6e   :  { %v1675_v58 = vor.u32 %v2197_v46, %v1674_v45  ;;  %v1738_v45 = vld [vmem:[%s3276_s0 + $0xf0] sm:$0xf]  ;;  %v2214_v46 = vld [vmem:[%s3276_s0 + $0x110] sm:$0xf0] }
  0x7a   :  { %1141 = vmatmul.bf16.gmra.mxu1 %v1719_v0  ;;  %1190 = vmatmul.bf16.gmra.mxu2 %v1723_v1  ;;  %v1874_v0 = vld [vmem:[%s3276_s0 + $0x208] sm:$0xf]  ;;  %v2249_v1 = vld [vmem:[%s3276_s0 + $0x228] sm:$0xf0] }
  0x7b   :  { %v1875_v8 = vor.u32 %v2249_v1, %v1874_v0 }
  0x7c   :  { %1239 = vmatmul.bf16.gmra.mxu3 %v1727_v2  ;;  %1288 = vmatmul.bf16.gmra.mxu0 %v1731_v3 }
  0x8a   :  { %1146 = vmatmul.bf16.gmra.mxu1 %v1755_v16  ;;  %1195 = vmatmul.bf16.gmra.mxu2 %v1759_v17  ;;  %v1630_v16 = vld [vmem:[%s3276_s0 + $0x18] sm:$0xf]  ;;  %v2187_v17 = vld [vmem:[%s3276_s0 + $0x38] sm:$0xf0] }
  0x8b   :  { %v1631_v25 = vor.u32 %v2187_v17, %v1630_v16  ;;  %v1702_v16 = vld [vmem:[%s3276_s0 + $0xa8] sm:$0xf]  ;;  %v2205_v17 = vld [vmem:[%s3276_s0 + $0xc8] sm:$0xf0] }
  0x8c   :  { %1244 = vmatmul.bf16.gmra.mxu3 %v1763_v18  ;;  %1293 = vmatmul.bf16.gmra.mxu0 %v1767_v19  ;;  %v2183_v18 = vld [vmem:[%s3276_s0 + $0x1c] sm:$0xf]  ;;  %v1632_v19 = vld [vmem:[%s3276_s0 + $0x3c] sm:$0xf0] }
  0x8d   :  { %v1635_v27 = vor.u32 %v2183_v18, %v1632_v19  ;;  %v1704_v18 = vld [vmem:[%s3276_s0 + $0xcc] sm:$0xf0] }
  0x8e   :  { %v1710_v19 = vld [vmem:[%s3276_s0 + $0xb0] sm:$0xf] }
  0x9a   :  { %1151 = vmatmul.bf16.gmra.mxu1 %v1791_v32  ;;  %1200 = vmatmul.bf16.gmra.mxu2 %v1795_v33 }
  0x9c   :  { %1249 = vmatmul.bf16.gmra.mxu3 %v1799_v34  ;;  %1298 = vmatmul.bf16.gmra.mxu0 %v1803_v35 }
  0xa7   :  { %v2916_v50 = vpop.f32.mrf.mxu1 }
  0xa9   :  { %v1078_v53 = vpop.f32.mrf.mxu0 }
  0xaa   :  { %1156 = vmatmul.bf16.gmra.mxu1 %v1827_v48  ;;  %1205 = vmatmul.bf16.gmra.mxu2 %v1831_v49 }
  0xac   :  { %1254 = vmatmul.bf16.gmra.mxu3 %v1835_v51  ;;  %1303 = vmatmul.bf16.gmra.mxu0 %v1839_v52  ;;  %v1663_v51 = vor.u32 %v2191_v38, %v1660_v39  ;;  %v1667_v52 = vor.u32 %v2196_v42, %v1666_v41 }
  0xad   :  { %v2918_v54 = vpop.f32.mrf.mxu2 }
  0xaf   :  { %v2920_v55 = vpop.f32.mrf.mxu3  ;;  %v2922_v56 = vpop.f32.mrf.mxu1 }
  0xb1   :  { %v1080_v57 = vpop.f32.mrf.mxu0 }
  0xb5   :  { %v2948_v2 = vpop.f32.mrf.mxu2 }
  0xb7   :  { %v2950_v3 = vpop.f32.mrf.mxu3  ;;  %v2952_v6 = vpop.f32.mrf.mxu1 }
  0xb9   :  { %v1083_v9 = vpop.f32.mrf.mxu0 }
  0xba   :  { %1161 = vmatmul.bf16.gmra.mxu1 %v1863_v4  ;;  %1210 = vmatmul.bf16.gmra.mxu2 %v1867_v5 }
  0xbc   :  { %1259 = vmatmul.bf16.gmra.mxu3 %v1871_v7  ;;  %1308 = vmatmul.bf16.gmra.mxu0 %v1875_v8 }
  0xbd   :  { %v2954_v10 = vpop.f32.mrf.mxu2 }
  0xbf   :  { %v2956_v11 = vpop.f32.mrf.mxu3  ;;  %v2958_v12 = vpop.f32.mrf.mxu1 }
  0xc1   :  { %v1085_v13 = vpop.f32.mrf.mxu0 }
  0xc5   :  { %v2984_v22 = vpop.f32.mrf.mxu2 }
  0xc7   :  { %v2986_v23 = vpop.f32.mrf.mxu3  ;;  %v1127_v26 = vpop.f32.mrf.mxu1 }
  0xc8   :  { %v1128_v29 = vadd.f32 %v1127_v26, %v1078_v53 }
  0xc9   :  { %v1274_v30 = vpop.f32.mrf.mxu0 }
  0xca   :  { %1322 = vmatmul.bf16.vlgmr.msra.gmra.mxu1 %v1627_v24  ;;  %1371 = vmatmul.bf16.vlgmr.msra.gmra.mxu2 %v1631_v25 }
  0xcc   :  { %1420 = vmatmul.bf16.vlgmr.msra.gmra.mxu3 %v1635_v27  ;;  %1469 = vmatmul.bf16.vlgmr.msra.gmra.mxu0 %v1639_v28  ;;  %v1703_v27 = vor.u32 %v2205_v17, %v1702_v16 }
  0xcd   :  { %v1176_v31 = vpop.f32.mrf.mxu2 }
  0xce   :  { %v1177_v32 = vadd.f32 %v1176_v31, %v1128_v29 }
  0xcf   :  { %v1225_v33 = vpop.f32.mrf.mxu3  ;;  %v1129_v34 = vpop.f32.mrf.mxu1 }
  0xd0   :  { %v1226_v35 = vadd.f32 %v1225_v33, %v1177_v32  ;;  %v1130_v36 = vadd.f32 %v1129_v34, %v1080_v57  ;;  %v1671_v57 = vor.u32 %v2192_v43, %v1668_v44  ;;  %v2209_v43 = vld [vmem:[%s3276_s0 + $0xec] sm:$0xf] }
  0xd1   :  { %v1276_v37 = vpop.f32.mrf.mxu0 }
  0xd2   :  { %v2994_v40 = vadd.f32 %v1274_v30, %v1226_v35  ;;  %v1711_v30 = vor.u32 %v2206_v20, %v1710_v19  ;;  %v1774_v19 = vld [vmem:[%s3276_s0 + $0x138] sm:$0xf]  ;;  %v2223_v20 = vld [vmem:[%s3276_s0 + $0x158] sm:$0xf0] }
  0xd5   :  { %v1178_v47 = vpop.f32.mrf.mxu2 }
  0xd6   :  { %v1179_v48 = vadd.f32 %v1178_v47, %v1130_v36  ;;  %v1740_v47 = vld [vmem:[%s3276_s0 + $0x114] sm:$0xf0] }
  0xd7   :  { %v1227_v49 = vpop.f32.mrf.mxu3  ;;  %v1132_v53 = vpop.f32.mrf.mxu1 }
  0xd8   :  { %v1228_v59 = vadd.f32 %v1227_v49, %v1179_v48  ;;  %v1133_v60 = vadd.f32 %v1132_v53, %v1083_v9  ;;  %v1696_v9 = vld [vmem:[%s3276_s0 + $0xc4] sm:$0xf0]  ;;  %v1746_v48 = vld [vmem:[%s3276_s0 + $0xf8] sm:$0xf]  ;;  %v2215_v49 = vld [vmem:[%s3276_s0 + $0x118] sm:$0xf0] }
  0xd9   :  { %v1279_v61 = vpop.f32.mrf.mxu0  ;;  %v1699_v26 = vor.u32 %v2200_v14, %v1696_v9 }
  0xda   :  { %1327 = vmatmul.bf16.gmra.mxu1 %v1663_v51  ;;  %1376 = vmatmul.bf16.gmra.mxu2 %v1667_v52  ;;  %v3014_v62 = vadd.f32 %v1276_v37, %v1228_v59 }
  0xdc   :  { %1425 = vmatmul.bf16.gmra.mxu3 %v1671_v57  ;;  %1474 = vmatmul.bf16.gmra.mxu0 %v1675_v58  ;;  %v1739_v58 = vor.u32 %v2214_v46, %v1738_v45  ;;  %v2227_v46 = vld [vmem:[%s3276_s0 + $0x17c] sm:$0xf] }
  0xdd   :  { %v1181_v63 = vpop.f32.mrf.mxu2 }
  0xde   :  { %v1182_v0 = vadd.f32 %v1181_v63, %v1133_v60 }
  0xdf   :  { %v1230_v1 = vpop.f32.mrf.mxu3  ;;  %v1134_v4 = vpop.f32.mrf.mxu1 }
  0xe0   :  { %v1231_v5 = vadd.f32 %v1230_v1, %v1182_v0  ;;  %v1135_v7 = vadd.f32 %v1134_v4, %v1085_v13  ;;  %v2201_v13 = vld [vmem:[%s3276_s0 + $0xac] sm:$0xf] }
  0xe1   :  { %v1281_v8 = vpop.f32.mrf.mxu0  ;;  %v1707_v29 = vor.u32 %v2201_v13, %v1704_v18  ;;  %v2218_v13 = vld [vmem:[%s3276_s0 + $0x134] sm:$0xf] }
  0xe2   :  { %v3022_v15 = vadd.f32 %v1279_v61, %v1231_v5  ;;  %v1747_v61 = vor.u32 %v2215_v49, %v1746_v48  ;;  %v2232_v48 = vld [vmem:[%s3276_s0 + $0x1a0] sm:$0xf0] }
  0xe3   :  { %v2228_v49 = vld [vmem:[%s3276_s0 + $0x184] sm:$0xf] }
  0xe5   :  { %v1183_v21 = vpop.f32.mrf.mxu2 }
  0xe6   :  { %v1184_v24 = vadd.f32 %v1183_v21, %v1135_v7  ;;  %v1776_v21 = vld [vmem:[%s3276_s0 + $0x15c] sm:$0xf0] }
  0xe7   :  { %v1232_v25 = vpop.f32.mrf.mxu3  ;;  %v1137_v28 = vpop.f32.mrf.mxu1 }
  0xe8   :  { %v1233_v31 = vadd.f32 %v1232_v25, %v1184_v24  ;;  %v1138_v32 = vadd.f32 %v1137_v28, %v2916_v50  ;;  %v1732_v50 = vld [vmem:[%s3276_s0 + $0x10c] sm:$0xf0]  ;;  %v1782_v24 = vld [vmem:[%s3276_s0 + $0x140] sm:$0xf]  ;;  %v2224_v25 = vld [vmem:[%s3276_s0 + $0x160] sm:$0xf0] }
  0xe9   :  { %v1284_v33 = vpop.f32.mrf.mxu0  ;;  %v1735_v57 = vor.u32 %v2209_v43, %v1732_v50 }
  0xea   :  { %1332 = vmatmul.bf16.gmra.mxu1 %v1699_v26  ;;  %1381 = vmatmul.bf16.gmra.mxu2 %v1703_v27  ;;  %v3043_v34 = vadd.f32 %v1281_v8, %v1233_v31 }
  0xec   :  { %1430 = vmatmul.bf16.gmra.mxu3 %v1707_v29  ;;  %1479 = vmatmul.bf16.gmra.mxu0 %v1711_v30  ;;  %v1775_v30 = vor.u32 %v2223_v20, %v1774_v19  ;;  %v2236_v20 = vld [vmem:[%s3276_s0 + $0x1c4] sm:$0xf] }
  0xed   :  { %v1186_v35 = vpop.f32.mrf.mxu2 }
  0xee   :  { %v1187_v36 = vadd.f32 %v1186_v35, %v1138_v32 }
  0xef   :  { %v1235_v37 = vpop.f32.mrf.mxu3  ;;  %v1139_v38 = vpop.f32.mrf.mxu1 }
  0xf0   :  { %v1236_v39 = vadd.f32 %v1235_v37, %v1187_v36  ;;  %v1140_v41 = vadd.f32 %v1139_v38, %v2922_v56  ;;  %v2210_v56 = vld [vmem:[%s3276_s0 + $0xf4] sm:$0xf] }
  0xf1   :  { %v1286_v42 = vpop.f32.mrf.mxu0  ;;  %v1743_v60 = vor.u32 %v2210_v56, %v1740_v47  ;;  %v1804_v56 = vld [vmem:[%s3276_s0 + $0x19c] sm:$0xf0] }
  0xf2   :  { %v3052_v44 = vadd.f32 %v1284_v33, %v1236_v39  ;;  %v1783_v33 = vor.u32 %v2224_v25, %v1782_v24  ;;  %v2241_v24 = vld [vmem:[%s3276_s0 + $0x1e8] sm:$0xf0] }
  0xf3   :  { %v2237_v25 = vld [vmem:[%s3276_s0 + $0x1cc] sm:$0xf] }
  0xf5   :  { %v1188_v51 = vpop.f32.mrf.mxu2 }
  0xf6   :  { %v1189_v52 = vadd.f32 %v1188_v51, %v1140_v41 }
  0xf7   :  { %v1237_v53 = vpop.f32.mrf.mxu3  ;;  %v1142_v59 = vpop.f32.mrf.mxu1 }
  0xf8   :  { %v1238_v63 = vadd.f32 %v1237_v53, %v1189_v52  ;;  %v1143_v0 = vadd.f32 %v1142_v59, %v2952_v6  ;;  %v1768_v6 = vld [vmem:[%s3276_s0 + $0x154] sm:$0xf0]  ;;  %v1812_v52 = vld [vmem:[%s3276_s0 + $0x1a4] sm:$0xf0] }
  0xf9   :  { %v1289_v1 = vpop.f32.mrf.mxu0  ;;  %v1771_v29 = vor.u32 %v2218_v13, %v1768_v6  ;;  %v1818_v53 = vld [vmem:[%s3276_s0 + $0x188] sm:$0xf] }
  0xfa   :  { %1337 = vmatmul.bf16.gmra.mxu1 %v1735_v57  ;;  %1386 = vmatmul.bf16.gmra.mxu2 %v1739_v58  ;;  %v3073_v4 = vadd.f32 %v1286_v42, %v1238_v63  ;;  %v2233_v57 = vld [vmem:[%s3276_s0 + $0x1a8] sm:$0xf0] }
  0xfc   :  { %1435 = vmatmul.bf16.gmra.mxu3 %v1743_v60  ;;  %1484 = vmatmul.bf16.gmra.mxu0 %v1747_v61  ;;  %v1807_v61 = vor.u32 %v2227_v46, %v1804_v56 }
  0xfd   :  { %v1191_v5 = vpop.f32.mrf.mxu2 }
  0xfe   :  { %v1192_v7 = vadd.f32 %v1191_v5, %v1143_v0 }
  0xff   :  { %v1240_v8 = vpop.f32.mrf.mxu3  ;;  %v1144_v14 = vpop.f32.mrf.mxu1 }
 0x100   :  { %v1241_v9 = vadd.f32 %v1240_v8, %v1192_v7  ;;  %v1145_v16 = vadd.f32 %v1144_v14, %v2958_v12  ;;  %v2219_v12 = vld [vmem:[%s3276_s0 + $0x13c] sm:$0xf] }
 0x101   :  { %v1291_v17 = vpop.f32.mrf.mxu0  ;;  %v1779_v32 = vor.u32 %v2219_v12, %v1776_v21  ;;  %v1840_v12 = vld [vmem:[%s3276_s0 + $0x1e4] sm:$0xf0] }
 0x102   :  { %v3082_v18 = vadd.f32 %v1289_v1, %v1241_v9  ;;  %v1815_v1 = vor.u32 %v2228_v49, %v1812_v52  ;;  %v2245_v49 = vld [vmem:[%s3276_s0 + $0x20c] sm:$0xf] }
 0x105   :  { %v1193_v26 = vpop.f32.mrf.mxu2 }
 0x106   :  { %v1194_v27 = vadd.f32 %v1193_v26, %v1145_v16 }
 0x107   :  { %v1242_v28 = vpop.f32.mrf.mxu3  ;;  %v1147_v31 = vpop.f32.mrf.mxu1 }
 0x108   :  { %v1243_v35 = vadd.f32 %v1242_v28, %v1194_v27  ;;  %v1148_v38 = vadd.f32 %v1147_v31, %v2918_v54  ;;  %v1810_v54 = vld [vmem:[%s3276_s0 + $0x180] sm:$0xf]  ;;  %v1848_v27 = vld [vmem:[%s3276_s0 + $0x1ec] sm:$0xf0] }
 0x109   :  { %v1294_v36 = vpop.f32.mrf.mxu0  ;;  %v1811_v63 = vor.u32 %v2232_v48, %v1810_v54  ;;  %v1854_v28 = vld [vmem:[%s3276_s0 + $0x1d0] sm:$0xf] }
 0x10a   :  { %1342 = vmatmul.bf16.gmra.mxu1 %v1771_v29  ;;  %1391 = vmatmul.bf16.gmra.mxu2 %v1775_v30  ;;  %v3102_v37 = vadd.f32 %v1291_v17, %v1243_v35  ;;  %v2242_v29 = vld [vmem:[%s3276_s0 + $0x1f0] sm:$0xf0] }
 0x10c   :  { %1440 = vmatmul.bf16.gmra.mxu3 %v1779_v32  ;;  %1489 = vmatmul.bf16.gmra.mxu0 %v1783_v33  ;;  %v1843_v33 = vor.u32 %v2236_v20, %v1840_v12 }
 0x10d   :  { %v1196_v39 = vpop.f32.mrf.mxu2 }
 0x10e   :  { %v1197_v41 = vadd.f32 %v1196_v39, %v1148_v38  ;;  %v1851_v38 = vor.u32 %v2237_v25, %v1848_v27 }
 0x10f   :  { %v1245_v42 = vpop.f32.mrf.mxu3  ;;  %v1149_v43 = vpop.f32.mrf.mxu1 }
 0x110   :  { %v1246_v50 = vadd.f32 %v1245_v42, %v1197_v41  ;;  %v1150_v51 = vadd.f32 %v1149_v43, %v2948_v2  ;;  %v1819_v2 = vor.u32 %v2233_v57, %v1818_v53  ;;  %v2250_v53 = vld [vmem:[%s3276_s0 + $0x230] sm:$0xf0] }
 0x111   :  { %v1296_v45 = vpop.f32.mrf.mxu0  ;;  %v2246_v57 = vld [vmem:[%s3276_s0 + $0x214] sm:$0xf] }
 0x112   :  { %v3111_v47 = vadd.f32 %v1294_v36, %v1246_v50 }
 0x115   :  { %v1198_v58 = vpop.f32.mrf.mxu2 }
 0x116   :  { %v1199_v59 = vadd.f32 %v1198_v58, %v1150_v51  ;;  %v1876_v51 = vld [vmem:[%s3276_s0 + $0x22c] sm:$0xf0] }
 0x117   :  { %v1247_v60 = vpop.f32.mrf.mxu3  ;;  %v1152_v0 = vpop.f32.mrf.mxu1 }
 0x118   :  { %v1248_v5 = vadd.f32 %v1247_v60, %v1199_v59  ;;  %v1153_v14 = vadd.f32 %v1152_v0, %v2954_v10  ;;  %v1846_v10 = vld [vmem:[%s3276_s0 + $0x1c8] sm:$0xf]  ;;  %v1884_v59 = vld [vmem:[%s3276_s0 + $0x234] sm:$0xf0] }
 0x119   :  { %v1299_v7 = vpop.f32.mrf.mxu0  ;;  %v1847_v35 = vor.u32 %v2241_v24, %v1846_v10  ;;  %v1890_v60 = vld [vmem:[%s3276_s0 + $0x218] sm:$0xf] }
 0x11a   :  { %1347 = vmatmul.bf16.gmra.mxu1 %v1807_v61  ;;  %1396 = vmatmul.bf16.gmra.mxu2 %v1811_v63  ;;  %v3132_v8 = vadd.f32 %v1296_v45, %v1248_v5  ;;  %v2251_v61 = vld [vmem:[%s3276_s0 + $0x238] sm:$0xf0] }
 0x11c   :  { %1445 = vmatmul.bf16.gmra.mxu3 %v1815_v1  ;;  %1494 = vmatmul.bf16.gmra.mxu0 %v1819_v2  ;;  %v1879_v2 = vor.u32 %v2245_v49, %v1876_v51  ;;  %v3205_v49 = vld [vmem:[#allocation4] ss:$0 sm:$0xff] }
 0x11d   :  { %v1201_v9 = vpop.f32.mrf.mxu2 }
 0x11e   :  { %v1202_v16 = vadd.f32 %v1201_v9, %v1153_v14  ;;  %v1887_v14 = vor.u32 %v2246_v57, %v1884_v59 }
 0x11f   :  { %v1250_v17 = vpop.f32.mrf.mxu3  ;;  %v1154_v13 = vpop.f32.mrf.mxu1 }
 0x120   :  { %v1251_v6 = vadd.f32 %v1250_v17, %v1202_v16  ;;  %v1155_v26 = vadd.f32 %v1154_v13, %v2984_v22  ;;  %v1855_v22 = vor.u32 %v2242_v29, %v1854_v28 }
 0x121   :  { %v1301_v19 = vpop.f32.mrf.mxu0 }
 0x122   :  { %v3141_v21 = vadd.f32 %v1299_v7, %v1251_v6 }
 0x125   :  { %v1203_v30 = vpop.f32.mrf.mxu2 }
 0x126   :  { %v1204_v31 = vadd.f32 %v1203_v30, %v1155_v26 }
 0x127   :  { %v1252_v32 = vpop.f32.mrf.mxu3  ;;  %v1157_v36 = vpop.f32.mrf.mxu1 }
 0x128   :  { %v1253_v39 = vadd.f32 %v1252_v32, %v1204_v31  ;;  %v1158_v43 = vadd.f32 %v1157_v36, %v2920_v55  ;;  %v1882_v55 = vld [vmem:[%s3276_s0 + $0x210] sm:$0xf] }
 0x129   :  { %v1304_v41 = vpop.f32.mrf.mxu0  ;;  %v1883_v5 = vor.u32 %v2250_v53, %v1882_v55 }
 0x12a   :  { %1352 = vmatmul.bf16.gmra.mxu1 %v1843_v33  ;;  %1401 = vmatmul.bf16.gmra.mxu2 %v1847_v35  ;;  %v3162_v42 = vadd.f32 %v1301_v19, %v1253_v39 }
 0x12c   :  { %1450 = vmatmul.bf16.gmra.mxu3 %v1851_v38  ;;  %1499 = vmatmul.bf16.gmra.mxu0 %v1855_v22 }
 0x12d   :  { %v1206_v50 = vpop.f32.mrf.mxu2 }
 0x12e   :  { %v1207_v45 = vadd.f32 %v1206_v50, %v1158_v43  ;;  %v3201_v50 = vld [vmem:[#allocation2] ss:$0 sm:$0xff] }
 0x12f   :  { %v1255_v46 = vpop.f32.mrf.mxu3  ;;  %v1159_v56 = vpop.f32.mrf.mxu1 }
 0x130   :  { %v1256_v54 = vadd.f32 %v1255_v46, %v1207_v45  ;;  %v1160_v58 = vadd.f32 %v1159_v56, %v2950_v3  ;;  %v1891_v3 = vor.u32 %v2251_v61, %v1890_v60 }
 0x131   :  { %v1306_v48 = vpop.f32.mrf.mxu0 }
 0x132   :  { %v3171_v52 = vadd.f32 %v1304_v41, %v1256_v54 }
 0x135   :  { %v1208_v63 = vpop.f32.mrf.mxu2 }
 0x136   :  { %v1209_v0 = vadd.f32 %v1208_v63, %v1160_v58 }
 0x137   :  { %v1257_v1 = vpop.f32.mrf.mxu3  ;;  %v1162_v7 = vpop.f32.mrf.mxu1 }
 0x138   :  { %v1258_v9 = vadd.f32 %v1257_v1, %v1209_v0  ;;  %v1163_v13 = vadd.f32 %v1162_v7, %v2956_v11 }
 0x139   :  { %v1309_v16 = vpop.f32.mrf.mxu0 }
 0x13a   :  { %1357 = vmatmul.bf16.gmra.mxu1 %v1879_v2  ;;  %1406 = vmatmul.bf16.gmra.mxu2 %v1883_v5  ;;  %v3192_v17 = vadd.f32 %v1306_v48, %v1258_v9 }
 0x13c   :  { %1455 = vmatmul.bf16.gmra.mxu3 %v1887_v14  ;;  %1504 = vmatmul.bf16.gmra.mxu0 %v1891_v3 }
 0x13d   :  { %v1211_v6 = vpop.f32.mrf.mxu2 }
 0x13e   :  { %v1212_v19 = vadd.f32 %v1211_v6, %v1163_v13 }
 0x13f   :  { %v1260_v20 = vpop.f32.mrf.mxu3  ;;  %v1164_v12 = vpop.f32.mrf.mxu1 }
 0x140   :  { %v1261_v10 = vadd.f32 %v1260_v20, %v1212_v19  ;;  %v1165_v26 = vadd.f32 %v1164_v12, %v2986_v23 }
 0x141   :  { %v1311_v24 = vpop.f32.mrf.mxu0 }
 0x142   :  { %v3195_v25 = vadd.f32 %v1309_v16, %v1261_v10 }
 0x145   :  { %v1213_v27 = vpop.f32.mrf.mxu2 }
 0x146   :  { %v1214_v28 = vadd.f32 %v1213_v27, %v1165_v26 }
 0x147   :  { %v1262_v29 = vpop.f32.mrf.mxu3  ;;  %v1323_v30 = vpop.f32.mrf.mxu1 }
 0x148   :  { %v1263_v31 = vadd.f32 %v1262_v29, %v1214_v28  ;;  %v1324_v11 = vadd.f32 %v1323_v30, %v2994_v40 }
 0x149   :  { %v1470_v32 = vpop.f32.mrf.mxu0 }
 0x14a   :  { %v3198_v33 = vadd.f32 %v1311_v24, %v1263_v31 }
 0x14d   :  { %v1372_v35 = vpop.f32.mrf.mxu2 }
 0x14e   :  { %v1373_v36 = vadd.f32 %v1372_v35, %v1324_v11 }
 0x14f   :  { %v1421_v38 = vpop.f32.mrf.mxu3  ;;  %v1325_v22 = vpop.f32.mrf.mxu1 }
 0x150   :  { %v1422_v39 = vadd.f32 %v1421_v38, %v1373_v36  ;;  %v1326_v23 = vadd.f32 %v1325_v22, %v3014_v62 }
 0x151   :  { %v1472_v41 = vpop.f32.mrf.mxu0 }
 0x152   :  { %v1471_v43 = vadd.f32 %v1470_v32, %v1422_v39 }
 0x154   :  { %v1515_v48 = vmul.f32 %v3201_v50, %v1471_v43 }
 0x155   :  { %v1374_v45 = vpop.f32.mrf.mxu2 }
 0x156   :  { %v1375_v46 = vadd.f32 %v1374_v45, %v1326_v23  ;;  %v1534_v53 = vadd.f32 %v3205_v49, %v1515_v48 }
 0x157   :  { %v1423_v56 = vpop.f32.mrf.mxu3  ;;  %v1328_v54 = vpop.f32.mrf.mxu1 }
 0x158   :  { %v1424_v40 = vadd.f32 %v1423_v56, %v1375_v46  ;;  %v1329_v58 = vadd.f32 %v1328_v54, %v3022_v15  ;;  %v1550_v0 = vmax.f32 %v1534_v53, 0.0 }
 0x159   :  { %v1475_v51 = vpop.f32.mrf.mxu0 }
 0x15a   :  { %v1473_v55 = vadd.f32 %v1472_v41, %v1424_v40 }
 0x15c   :  { %v1516_v57 = vmul.f32 %v3201_v50, %v1473_v55 }
 0x15d   :  { %v1377_v59 = vpop.f32.mrf.mxu2 }
 0x15e   :  { %v1535_v62 = vadd.f32 %v3205_v49, %v1516_v57  ;;  %v1378_v60 = vadd.f32 %v1377_v59, %v1329_v58 }
 0x15f   :  { %v1426_v61 = vpop.f32.mrf.mxu3  ;;  %v1330_v63 = vpop.f32.mrf.mxu1 }
 0x160   :  { %v1551_v1 = vmax.f32 %v1535_v62, 0.0  ;;  %v1427_v2 = vadd.f32 %v1426_v61, %v1378_v60  ;;  %v1331_v3 = vadd.f32 %v1330_v63, %v3043_v34 }
 0x161   :  { %v1477_v5 = vpop.f32.mrf.mxu0 }
 0x162   :  { %v2327_v7 = vpack.c.bf16 %v1551_v1, %v1550_v0  ;;  %v1476_v14 = vadd.f32 %v1475_v51, %v1427_v2 }
 0x164   :  { %2328 = vst [vmem:[%s3280_s4] sm:$0xff] %v2327_v7   ;;  %v1517_v6 = vmul.f32 %v3201_v50, %v1476_v14 }
 0x165   :  { %v1379_v9 = vpop.f32.mrf.mxu2 }
 0x166   :  { %v1380_v15 = vadd.f32 %v1379_v9, %v1331_v3  ;;  %v1536_v10 = vadd.f32 %v3205_v49, %v1517_v6 }
 0x167   :  { %v1428_v16 = vpop.f32.mrf.mxu3  ;;  %v1333_v13 = vpop.f32.mrf.mxu1 }
 0x168   :  { %v1429_v19 = vadd.f32 %v1428_v16, %v1380_v15  ;;  %v1334_v26 = vadd.f32 %v1333_v13, %v3052_v44  ;;  %v1552_v31 = vmax.f32 %v1536_v10, 0.0 }
 0x169   :  { %v1480_v20 = vpop.f32.mrf.mxu0 }
 0x16a   :  { %v1478_v12 = vadd.f32 %v1477_v5, %v1429_v19 }
 0x16c   :  { %v1518_v24 = vmul.f32 %v3201_v50, %v1478_v12 }
 0x16d   :  { %v1382_v27 = vpop.f32.mrf.mxu2 }
 0x16e   :  { %v1537_v28 = vadd.f32 %v3205_v49, %v1518_v24  ;;  %v1383_v29 = vadd.f32 %v1382_v27, %v1334_v26 }
 0x16f   :  { %v1431_v34 = vpop.f32.mrf.mxu3  ;;  %v1335_v30 = vpop.f32.mrf.mxu1 }
 0x170   :  { %v1553_v32 = vmax.f32 %v1537_v28, 0.0  ;;  %v1432_v11 = vadd.f32 %v1431_v34, %v1383_v29  ;;  %v1336_v22 = vadd.f32 %v1335_v30, %v3073_v4 }
 0x171   :  { %v1482_v35 = vpop.f32.mrf.mxu0 }
 0x172   :  { %v2332_v36 = vpack.c.bf16 %v1553_v32, %v1552_v31  ;;  %v1481_v38 = vadd.f32 %v1480_v20, %v1432_v11 }
 0x174   :  { %2364 = vst [vmem:[%s3280_s4 + $0x8] sm:$0xff] %v2332_v36   ;;  %v1519_v23 = vmul.f32 %v3201_v50, %v1481_v38 }
 0x175   :  { %v1384_v39 = vpop.f32.mrf.mxu2 }
 0x176   :  { %v1385_v44 = vadd.f32 %v1384_v39, %v1336_v22  ;;  %v1538_v54 = vadd.f32 %v3205_v49, %v1519_v23 }
 0x177   :  { %v1433_v41 = vpop.f32.mrf.mxu3  ;;  %v1338_v43 = vpop.f32.mrf.mxu1 }
 0x178   :  { %v1434_v45 = vadd.f32 %v1433_v41, %v1385_v44  ;;  %v1339_v40 = vadd.f32 %v1338_v43, %v3082_v18  ;;  %v1554_v58 = vmax.f32 %v1538_v54, 0.0 }
 0x179   :  { %v1485_v46 = vpop.f32.mrf.mxu0 }
 0x17a   :  { %v1483_v56 = vadd.f32 %v1482_v35, %v1434_v45 }
 0x17c   :  { %v1520_v48 = vmul.f32 %v3201_v50, %v1483_v56 }
 0x17d   :  { %v1387_v51 = vpop.f32.mrf.mxu2 }
 0x17e   :  { %v1539_v55 = vadd.f32 %v3205_v49, %v1520_v48  ;;  %v1388_v53 = vadd.f32 %v1387_v51, %v1339_v40 }
 0x17f   :  { %v1436_v4 = vpop.f32.mrf.mxu3  ;;  %v1340_v57 = vpop.f32.mrf.mxu1 }
 0x180   :  { %v1555_v59 = vmax.f32 %v1539_v55, 0.0  ;;  %v1437_v62 = vadd.f32 %v1436_v4, %v1388_v53  ;;  %v1341_v0 = vadd.f32 %v1340_v57, %v3102_v37 }
 0x181   :  { %v1487_v60 = vpop.f32.mrf.mxu0 }
 0x182   :  { %v2337_v61 = vpack.c.bf16 %v1555_v59, %v1554_v58  ;;  %v1486_v63 = vadd.f32 %v1485_v46, %v1437_v62 }
 0x184   :  { %2365 = vst [vmem:[%s3280_s4 + $0x10] sm:$0xff] %v2337_v61   ;;  %v1521_v7 = vmul.f32 %v3201_v50, %v1486_v63 }
 0x185   :  { %v1389_v1 = vpop.f32.mrf.mxu2 }
 0x186   :  { %v1390_v18 = vadd.f32 %v1389_v1, %v1341_v0  ;;  %v1540_v15 = vadd.f32 %v3205_v49, %v1521_v7 }
 0x187   :  { %v1438_v2 = vpop.f32.mrf.mxu3  ;;  %v1343_v5 = vpop.f32.mrf.mxu1 }
 0x188   :  { %v1439_v14 = vadd.f32 %v1438_v2, %v1390_v18  ;;  %v1344_v13 = vadd.f32 %v1343_v5, %v3111_v47  ;;  %v1556_v10 = vmax.f32 %v1540_v15, 0.0 }
 0x189   :  { %v1490_v3 = vpop.f32.mrf.mxu0 }
 0x18a   :  { %v1488_v9 = vadd.f32 %v1487_v60, %v1439_v14 }
 0x18c   :  { %v1522_v16 = vmul.f32 %v3201_v50, %v1488_v9 }
 0x18d   :  { %v1392_v6 = vpop.f32.mrf.mxu2 }
 0x18e   :  { %v1541_v19 = vadd.f32 %v3205_v49, %v1522_v16  ;;  %v1393_v20 = vadd.f32 %v1392_v6, %v1344_v13 }
 0x18f   :  { %v1441_v37 = vpop.f32.mrf.mxu3  ;;  %v1345_v12 = vpop.f32.mrf.mxu1 }
 0x190   :  { %v1557_v24 = vmax.f32 %v1541_v19, 0.0  ;;  %v1442_v26 = vadd.f32 %v1441_v37, %v1393_v20  ;;  %v1346_v34 = vadd.f32 %v1345_v12, %v3132_v8 }
 0x191   :  { %v1492_v27 = vpop.f32.mrf.mxu0 }
 0x192   :  { %v2342_v28 = vpack.c.bf16 %v1557_v24, %v1556_v10  ;;  %v1491_v29 = vadd.f32 %v1490_v3, %v1442_v26 }
 0x194   :  { %2366 = vst [vmem:[%s3280_s4 + $0x18] sm:$0xff] %v2342_v28   ;;  %v1523_v11 = vmul.f32 %v3201_v50, %v1491_v29 }
 0x195   :  { %v1394_v30 = vpop.f32.mrf.mxu2 }
 0x196   :  { %v1395_v47 = vadd.f32 %v1394_v30, %v1346_v34  ;;  %v1542_v22 = vadd.f32 %v3205_v49, %v1523_v11 }
 0x197   :  { %v1443_v31 = vpop.f32.mrf.mxu3  ;;  %v1348_v32 = vpop.f32.mrf.mxu1 }
 0x198   :  { %v1444_v35 = vadd.f32 %v1443_v31, %v1395_v47  ;;  %v1349_v44 = vadd.f32 %v1348_v32, %v3141_v21  ;;  %v1558_v46 = vmax.f32 %v1542_v22, 0.0 }
 0x199   :  { %v1495_v36 = vpop.f32.mrf.mxu0 }
 0x19a   :  { %v1493_v38 = vadd.f32 %v1492_v27, %v1444_v35 }
 0x19c   :  { %v1524_v39 = vmul.f32 %v3201_v50, %v1493_v38 }
 0x19d   :  { %v1397_v41 = vpop.f32.mrf.mxu2 }
 0x19e   :  { %v1543_v43 = vadd.f32 %v3205_v49, %v1524_v39  ;;  %v1398_v23 = vadd.f32 %v1397_v41, %v1349_v44 }
 0x19f   :  { %v1446_v8 = vpop.f32.mrf.mxu3  ;;  %v1350_v45 = vpop.f32.mrf.mxu1 }
 0x1a0   :  { %v1559_v56 = vmax.f32 %v1543_v43, 0.0  ;;  %v1447_v54 = vadd.f32 %v1446_v8, %v1398_v23  ;;  %v1351_v55 = vadd.f32 %v1350_v45, %v3162_v42 }
 0x1a1   :  { %v1497_v48 = vpop.f32.mrf.mxu0 }
 0x1a2   :  { %v2347_v40 = vpack.c.bf16 %v1559_v56, %v1558_v46  ;;  %v1496_v51 = vadd.f32 %v1495_v36, %v1447_v54 }
 0x1a4   :  { %2367 = vst [vmem:[%s3280_s4 + $0x20] sm:$0xff] %v2347_v40   ;;  %v1525_v58 = vmul.f32 %v3201_v50, %v1496_v51 }
 0x1a5   :  { %v1399_v53 = vpop.f32.mrf.mxu2 }
 0x1a6   :  { %v1400_v21 = vadd.f32 %v1399_v53, %v1351_v55  ;;  %v1544_v61 = vadd.f32 %v3205_v49, %v1525_v58 }
 0x1a7   :  { %v1448_v4 = vpop.f32.mrf.mxu3  ;;  %v1353_v57 = vpop.f32.mrf.mxu1 }
 0x1a8   :  { %v1449_v59 = vadd.f32 %v1448_v4, %v1400_v21  ;;  %v1354_v0 = vadd.f32 %v1353_v57, %v3171_v52  ;;  %v1560_v7 = vmax.f32 %v1544_v61, 0.0 }
 0x1a9   :  { %v1500_v60 = vpop.f32.mrf.mxu0 }
 0x1aa   :  { %v1498_v62 = vadd.f32 %v1497_v48, %v1449_v59 }
 0x1ac   :  { %v1526_v63 = vmul.f32 %v3201_v50, %v1498_v62 }
 0x1ad   :  { %v1402_v1 = vpop.f32.mrf.mxu2 }
 0x1ae   :  { %v1545_v18 = vadd.f32 %v3205_v49, %v1526_v63  ;;  %v1403_v2 = vadd.f32 %v1402_v1, %v1354_v0 }
 0x1af   :  { %v1451_v42 = vpop.f32.mrf.mxu3  ;;  %v1355_v5 = vpop.f32.mrf.mxu1 }
 0x1b0   :  { %v1561_v14 = vmax.f32 %v1545_v18, 0.0  ;;  %v1452_v3 = vadd.f32 %v1451_v42, %v1403_v2  ;;  %v1356_v16 = vadd.f32 %v1355_v5, %v3192_v17 }
 0x1b1   :  { %v1502_v13 = vpop.f32.mrf.mxu0 }
 0x1b2   :  { %v2352_v9 = vpack.c.bf16 %v1561_v14, %v1560_v7  ;;  %v1501_v15 = vadd.f32 %v1500_v60, %v1452_v3 }
 0x1b4   :  { %2368 = vst [vmem:[%s3280_s4 + $0x28] sm:$0xff] %v2352_v9   ;;  %v1527_v37 = vmul.f32 %v3201_v50, %v1501_v15 }
 0x1b5   :  { %v1404_v6 = vpop.f32.mrf.mxu2 }
 0x1b6   :  { %v1405_v52 = vadd.f32 %v1404_v6, %v1356_v16  ;;  %v1546_v24 = vadd.f32 %v3205_v49, %v1527_v37 }
 0x1b7   :  { %v1453_v19 = vpop.f32.mrf.mxu3  ;;  %v1358_v20 = vpop.f32.mrf.mxu1 }
 0x1b8   :  { %v1454_v12 = vadd.f32 %v1453_v19, %v1405_v52  ;;  %v1359_v27 = vadd.f32 %v1358_v20, %v3195_v25  ;;  %v1562_v47 = vmax.f32 %v1546_v24, 0.0 }
 0x1b9   :  { %v1505_v30 = vpop.f32.mrf.mxu0 }
 0x1ba   :  { %v1503_v10 = vadd.f32 %v1502_v13, %v1454_v12 }
 0x1bc   :  { %v1528_v26 = vmul.f32 %v3201_v50, %v1503_v10 }
 0x1bd   :  { %v1407_v28 = vpop.f32.mrf.mxu2 }
 0x1be   :  { %v1547_v29 = vadd.f32 %v3205_v49, %v1528_v26  ;;  %v1408_v34 = vadd.f32 %v1407_v28, %v1359_v27 }
 0x1bf   :  { %v1456_v17 = vpop.f32.mrf.mxu3  ;;  %v1360_v11 = vpop.f32.mrf.mxu1 }
 0x1c0   :  { %v1563_v31 = vmax.f32 %v1547_v29, 0.0  ;;  %v1457_v32 = vadd.f32 %v1456_v17, %v1408_v34  ;;  %v1361_v38 = vadd.f32 %v1360_v11, %v3198_v33 }
 0x1c1   :  { %v1507_v43 = vpop.f32.mrf.mxu0 }
 0x1c2   :  { %v2357_v35 = vpack.c.bf16 %v1563_v31, %v1562_v47  ;;  %v1506_v36 = vadd.f32 %v1505_v30, %v1457_v32 }
 0x1c4   :  { %2369 = vst [vmem:[%s3280_s4 + $0x30] sm:$0xff] %v2357_v35   ;;  %v1529_v44 = vmul.f32 %v3201_v50, %v1506_v36 }
 0x1c5   :  { %v1409_v22 = vpop.f32.mrf.mxu2 }
 0x1c6   :  { %v1410_v25 = vadd.f32 %v1409_v22, %v1361_v38  ;;  %v1548_v8 = vadd.f32 %v3205_v49, %v1529_v44 }
 0x1c7   :  { %v1458_v39 = vpop.f32.mrf.mxu3 }
 0x1c8   :  { %v1459_v41 = vadd.f32 %v1458_v39, %v1410_v25  ;;  %v1564_v56 = vmax.f32 %v1548_v8, 0.0 }
 0x1ca   :  { %v1508_v23 = vadd.f32 %v1507_v43, %v1459_v41 }
 0x1cc   :  { %v1530_v45 = vmul.f32 %v3201_v50, %v1508_v23 }
 0x1ce   :  { %v1549_v46 = vadd.f32 %v3205_v49, %v1530_v45 }
 0x1d0   :  { %v1565_v54 = vmax.f32 %v1549_v46, 0.0 }
 0x1d2   :  { %v2362_v48 = vpack.c.bf16 %v1565_v54, %v1564_v56 }
 0x1d4   :  { %2370 = vst [vmem:[%s3280_s4 + $0x38] sm:$0xff] %v2362_v48  }
 0x1d5   :  { %1602 = vsyncpa [#allocation3], 1 }
 0x1d6   :  { %1603 = vsyncpa [#allocation5], 1 }

// kernel: forward.69
= control target key start
LH: loop header
LB: loop body
LE: loop exit
PB: predicated region body
PF: predicated region fallthrough
CT: control target
= control target key end

     0   :  { %9 = vsyncpa [#allocation3], 0  ;;  %s368_s0 = inlined_call_operand.vmem [shape: bf16[32,128], index: 0, kind: input, shape index: {}]   ;;  %s369_s1 = inlined_call_operand.vmem [shape: bf16[128,128], index: 1, kind: input, shape index: {}]   ;;  %s370_s2 = inlined_call_operand.hbm [shape: f32[1,128], index: 2, kind: input, shape index: {}]   ;;  %s371_s3 = inlined_call_operand.hbm [shape: f32[1,128], index: 3, kind: input, shape index: {}]   ;;  %s372_s4 = inlined_call_operand.vmem [shape: bf16[32,128], index: 4, kind: output, shape index: {}]  }
   0x1   :  { %s20_s17 = sshll.u32 %s370_s2, 4  ;;  %s21_s17 = int_to_ptr.hbm [resolvable:$true] %s20_s17 }
   0x2   :  { %10 = vsyncpa [#allocation5], 0  ;;  %s299_s18 = smov [#allocation2]   ;;  %s31_s22 = sshll.u32 %s371_s3, 4  ;;  %s32_s22 = int_to_ptr.hbm [resolvable:$true] %s31_s22 }
   0x3   :  { %s22_s19 = sshll.u32 %s299_s18, 4  ;;  %s300_s23 = smov [#allocation4]   ;;  %s23_s19 = int_to_ptr.vmem [resolvable:$true] %s22_s19 }
   0x4   :  { %25 = dma.hbm_to_vmem [thread:$0]  %s21_s17, 16, %s23_s19, [#allocation3]  }
   0x5   :  { %s33_s24 = sshll.u32 %s300_s23, 4  ;;  %s34_s24 = int_to_ptr.vmem [resolvable:$true] %s33_s24 }
   0x6   :  { %36 = dma.hbm_to_vmem [thread:$0]  %s32_s22, 16, %s34_s24, [#allocation5]  }
   0x7   :  { %295 = dma.done.wait [#allocation3], 16  }
   0x8   :  { %296 = vsyncadd [#allocation3], 4294967280 }
   0x9   :  { %297 = dma.done.wait [#allocation5], 16  }
   0xa   :  { %298 = vsyncadd [#allocation5], 4294967280  ;;  %v223_v0 = vld [vmem:[%s369_s1 + $0x38] sm:$0xff]  ;;  %v222_v1 = vld [vmem:[%s369_s1 + $0x30] sm:$0xff] }
   0xb   :  { %125 = vmatpush.bf16.msra.mxu0 %v223_v0  ;;  %235 = vmatpush.bf16.msra.mxu1 %v223_v0  ;;  %v221_v2 = vld [vmem:[%s369_s1 + $0x28] sm:$0xff]  ;;  %v220_v3 = vld [vmem:[%s369_s1 + $0x20] sm:$0xff]  ;;  %v219_v4 = vld [vmem:[%s369_s1 + $0x18] sm:$0xff] }
   0xc   :  { %v218_v5 = vld [vmem:[%s369_s1 + $0x10] sm:$0xff]  ;;  %v217_v6 = vld [vmem:[%s369_s1 + $0x8] sm:$0xff]  ;;  %v216_v7 = vld [vmem:[%s369_s1] sm:$0xff] }
   0xd   :  { %v214_v8 = vld [vmem:[%s368_s0] sm:$0xff]  ;;  %v215_v9 = vld [vmem:[%s368_s0 + $0x8] sm:$0xff] }
   0xe   :  { %v245_v12 = vld [vmem:[#allocation2] ss:$0 sm:$0xff]  ;;  %v246_v14 = vld [vmem:[#allocation4] ss:$0 sm:$0xff] }
   0xf   :  { %126 = vmatpush.bf16.msra.mxu0 %v222_v1  ;;  %236 = vmatpush.bf16.msra.mxu1 %v222_v1 }
  0x13   :  { %127 = vmatpush.bf16.msra.mxu0 %v221_v2  ;;  %237 = vmatpush.bf16.msra.mxu1 %v221_v2 }
  0x17   :  { %128 = vmatpush.bf16.msra.mxu0 %v220_v3  ;;  %238 = vmatpush.bf16.msra.mxu1 %v220_v3 }
  0x1b   :  { %129 = vmatpush.bf16.msra.mxu0 %v219_v4  ;;  %239 = vmatpush.bf16.msra.mxu1 %v219_v4 }
  0x1f   :  { %130 = vmatpush.bf16.msra.mxu0 %v218_v5  ;;  %240 = vmatpush.bf16.msra.mxu1 %v218_v5 }
  0x23   :  { %131 = vmatpush.bf16.msra.mxu0 %v217_v6  ;;  %241 = vmatpush.bf16.msra.mxu1 %v217_v6 }
  0x27   :  { %132 = vmatpush.bf16.msra.mxu0 %v216_v7  ;;  %242 = vmatpush.bf16.msra.mxu1 %v216_v7 }
  0x2a   :  { %133 = vmatmul.bf16.vlgmr.msra.gmra.mxu0 %v214_v8  ;;  %138 = vmatmul.bf16.vlgmr.msra.gmra.mxu1 %v215_v9 }
  0xa7   :  { %v134_v10 = vpop.f32.mrf.mxu0  ;;  %v139_v11 = vpop.f32.mrf.mxu1 }
  0xa8   :  { %v149_v13 = vmul.f32 %v245_v12, %v134_v10  ;;  %v151_v15 = vmul.f32 %v245_v12, %v139_v11 }
  0xaa   :  { %v156_v20 = vadd.f32 %v246_v14, %v149_v13  ;;  %v158_v21 = vadd.f32 %v246_v14, %v151_v15 }
  0xaf   :  { %v136_v16 = vpop.f32.mrf.mxu0  ;;  %v141_v17 = vpop.f32.mrf.mxu1 }
  0xb0   :  { %v150_v18 = vmul.f32 %v245_v12, %v136_v16  ;;  %v152_v19 = vmul.f32 %v245_v12, %v141_v17 }
  0xb2   :  { %v157_v22 = vadd.f32 %v246_v14, %v150_v18  ;;  %v159_v23 = vadd.f32 %v246_v14, %v152_v19 }
  0xb4   :  { %v227_v24 = vpack.c.bf16 %v157_v22, %v156_v20  ;;  %v232_v25 = vpack.c.bf16 %v159_v23, %v158_v21 }
  0xb6   :  { %228 = vst [vmem:[%s372_s4] sm:$0xff] %v227_v24  }
  0xb7   :  { %234 = vst [vmem:[%s372_s4 + $0x8] sm:$0xff] %v232_v25  }
  0xb8   :  { %172 = vsyncpa [#allocation3], 1 }
  0xb9   :  { %173 = vsyncpa [#allocation5], 1 }

// kernel: forward.70
= control target key start
LH: loop header
LB: loop body
LE: loop exit
PB: predicated region body
PF: predicated region fallthrough
CT: control target
= control target key end

     0   :  { %10 = vsyncpa [#allocation3], 0  ;;  %s407_s0 = inlined_call_operand.vmem [shape: bf16[32,128], index: 0, kind: input, shape index: {}]   ;;  %s408_s1 = inlined_call_operand.vmem [shape: bf16[128,128], index: 1, kind: input, shape index: {}]   ;;  %s409_s2 = inlined_call_operand.hbm [shape: f32[1,128], index: 2, kind: input, shape index: {}]   ;;  %s410_s3 = inlined_call_operand.hbm [shape: f32[1,128], index: 3, kind: input, shape index: {}]   ;;  %s411_s4 = inlined_call_operand.vmem [shape: bf16[32,128], index: 4, kind: input, shape index: {}]   ;;  %s412_s5 = inlined_call_operand.vmem [shape: bf16[32,128], index: 5, kind: output, shape index: {}]  }
   0x1   :  { %s21_s20 = sshll.u32 %s409_s2, 4  ;;  %s22_s20 = int_to_ptr.hbm [resolvable:$true] %s21_s20 }
   0x2   :  { %11 = vsyncpa [#allocation5], 0  ;;  %s327_s21 = smov [#allocation2]   ;;  %s32_s25 = sshll.u32 %s410_s3, 4  ;;  %s33_s25 = int_to_ptr.hbm [resolvable:$true] %s32_s25 }
   0x3   :  { %s23_s22 = sshll.u32 %s327_s21, 4  ;;  %s328_s26 = smov [#allocation4]   ;;  %s24_s22 = int_to_ptr.vmem [resolvable:$true] %s23_s22 }
   0x4   :  { %26 = dma.hbm_to_vmem [thread:$0]  %s22_s20, 16, %s24_s22, [#allocation3]  }
   0x5   :  { %s34_s27 = sshll.u32 %s328_s26, 4  ;;  %s35_s27 = int_to_ptr.vmem [resolvable:$true] %s34_s27 }
   0x6   :  { %37 = dma.hbm_to_vmem [thread:$0]  %s33_s25, 16, %s35_s27, [#allocation5]  }
   0x7   :  { %323 = dma.done.wait [#allocation3], 16  }
   0x8   :  { %324 = vsyncadd [#allocation3], 4294967280 }
   0x9   :  { %325 = dma.done.wait [#allocation5], 16  }
   0xa   :  { %326 = vsyncadd [#allocation5], 4294967280  ;;  %v242_v0 = vld [vmem:[%s408_s1 + $0x38] sm:$0xff]  ;;  %v241_v1 = vld [vmem:[%s408_s1 + $0x30] sm:$0xff] }
   0xb   :  { %128 = vmatpush.bf16.msra.mxu0 %v242_v0  ;;  %263 = vmatpush.bf16.msra.mxu1 %v242_v0  ;;  %v240_v2 = vld [vmem:[%s408_s1 + $0x28] sm:$0xff]  ;;  %v239_v3 = vld [vmem:[%s408_s1 + $0x20] sm:$0xff]  ;;  %v238_v4 = vld [vmem:[%s408_s1 + $0x18] sm:$0xff] }
   0xc   :  { %v237_v5 = vld [vmem:[%s408_s1 + $0x10] sm:$0xff]  ;;  %v236_v6 = vld [vmem:[%s408_s1 + $0x8] sm:$0xff]  ;;  %v235_v7 = vld [vmem:[%s408_s1] sm:$0xff] }
   0xd   :  { %v233_v8 = vld [vmem:[%s407_s0] sm:$0xff]  ;;  %v234_v9 = vld [vmem:[%s407_s0 + $0x8] sm:$0xff] }
   0xe   :  { %v273_v10 = vld [vmem:[#allocation2] ss:$0 sm:$0xff]  ;;  %v274_v14 = vld [vmem:[#allocation4] ss:$0 sm:$0xff]  ;;  %v261_v17 = vld [vmem:[%s411_s4 + $0x8] sm:$0xff]  }
   0xf   :  { %129 = vmatpush.bf16.msra.mxu0 %v241_v1  ;;  %264 = vmatpush.bf16.msra.mxu1 %v241_v1  ;;  %v244_v16 = vld [vmem:[%s411_s4] sm:$0xff]   ;;  %v249_v20 = vunpack.c.l.bf16 %v261_v17  ;;  %v250_v26 = vunpack.c.h.bf16 %v261_v17 }
  0x10   :  { %v245_v18 = vunpack.c.l.bf16 %v244_v16  ;;  %v246_v24 = vunpack.c.h.bf16 %v244_v16 }
  0x13   :  { %130 = vmatpush.bf16.msra.mxu0 %v240_v2  ;;  %265 = vmatpush.bf16.msra.mxu1 %v240_v2 }
  0x17   :  { %131 = vmatpush.bf16.msra.mxu0 %v239_v3  ;;  %266 = vmatpush.bf16.msra.mxu1 %v239_v3 }
  0x1b   :  { %132 = vmatpush.bf16.msra.mxu0 %v238_v4  ;;  %267 = vmatpush.bf16.msra.mxu1 %v238_v4 }
  0x1f   :  { %133 = vmatpush.bf16.msra.mxu0 %v237_v5  ;;  %268 = vmatpush.bf16.msra.mxu1 %v237_v5 }
  0x23   :  { %134 = vmatpush.bf16.msra.mxu0 %v236_v6  ;;  %269 = vmatpush.bf16.msra.mxu1 %v236_v6 }
  0x27   :  { %135 = vmatpush.bf16.msra.mxu0 %v235_v7  ;;  %270 = vmatpush.bf16.msra.mxu1 %v235_v7 }
  0x2a   :  { %136 = vmatmul.bf16.vlgmr.msra.gmra.mxu0 %v233_v8  ;;  %141 = vmatmul.bf16.vlgmr.msra.gmra.mxu1 %v234_v9 }
  0xa7   :  { %v137_v11 = vpop.f32.mrf.mxu0  ;;  %v142_v12 = vpop.f32.mrf.mxu1 }
  0xa8   :  { %v156_v13 = vmul.f32 %v273_v10, %v137_v11  ;;  %v158_v15 = vmul.f32 %v273_v10, %v142_v12 }
  0xaa   :  { %v163_v19 = vadd.f32 %v274_v14, %v156_v13  ;;  %v165_v21 = vadd.f32 %v274_v14, %v158_v15 }
  0xac   :  { %v171_v28 = vadd.f32 %v245_v18, %v163_v19  ;;  %v173_v29 = vadd.f32 %v249_v20, %v165_v21 }
  0xae   :  { %v175_v34 = vmax.f32 %v171_v28, 0.0  ;;  %v177_v35 = vmax.f32 %v173_v29, 0.0 }
  0xaf   :  { %v139_v22 = vpop.f32.mrf.mxu0  ;;  %v144_v23 = vpop.f32.mrf.mxu1 }
  0xb0   :  { %v157_v25 = vmul.f32 %v273_v10, %v139_v22  ;;  %v159_v27 = vmul.f32 %v273_v10, %v144_v23 }
  0xb2   :  { %v164_v30 = vadd.f32 %v274_v14, %v157_v25  ;;  %v166_v31 = vadd.f32 %v274_v14, %v159_v27 }
  0xb4   :  { %v172_v32 = vadd.f32 %v246_v24, %v164_v30  ;;  %v174_v33 = vadd.f32 %v250_v26, %v166_v31 }
  0xb6   :  { %v176_v36 = vmax.f32 %v172_v32, 0.0  ;;  %v178_v37 = vmax.f32 %v174_v33, 0.0 }
  0xb8   :  { %v254_v38 = vpack.c.bf16 %v176_v36, %v175_v34  ;;  %v259_v39 = vpack.c.bf16 %v178_v37, %v177_v35 }
  0xba   :  { %255 = vst [vmem:[%s412_s5] sm:$0xff] %v254_v38  }
  0xbb   :  { %262 = vst [vmem:[%s412_s5 + $0x8] sm:$0xff] %v259_v39  }
  0xbc   :  { %191 = vsyncpa [#allocation3], 1 }
  0xbd   :  { %192 = vsyncpa [#allocation5], 1 }

// kernel: forward.68
= control target key start
LH: loop header
LB: loop body
LE: loop exit
PB: predicated region body
PF: predicated region fallthrough
CT: control target
= control target key end

     0   :  { %9 = vsyncpa [#allocation3], 0  ;;  %s1826_s0 = inlined_call_operand.vmem [shape: bf16[32,1152], index: 0, kind: input, shape index: {}]   ;;  %s1827_s1 = inlined_call_operand.vmem [shape: bf16[1152,128], index: 1, kind: input, shape index: {}]   ;;  %s1828_s2 = inlined_call_operand.hbm [shape: f32[1,128], index: 2, kind: input, shape index: {}]   ;;  %s1829_s3 = inlined_call_operand.hbm [shape: f32[1,128], index: 3, kind: input, shape index: {}]   ;;  %s1830_s4 = inlined_call_operand.vmem [shape: bf16[32,128], index: 4, kind: output, shape index: {}]  }
   0x1   :  { %s20_s17 = sshll.u32 %s1828_s2, 4  ;;  %s21_s17 = int_to_ptr.hbm [resolvable:$true] %s20_s17 }
   0x2   :  { %10 = vsyncpa [#allocation5], 0  ;;  %s1463_s18 = smov [#allocation2]   ;;  %s31_s22 = sshll.u32 %s1829_s3, 4  ;;  %s32_s22 = int_to_ptr.hbm [resolvable:$true] %s31_s22 }
   0x3   :  { %s22_s19 = sshll.u32 %s1463_s18, 4  ;;  %s1464_s23 = smov [#allocation4]   ;;  %s23_s19 = int_to_ptr.vmem [resolvable:$true] %s22_s19 }
   0x4   :  { %25 = dma.hbm_to_vmem [thread:$0]  %s21_s17, 16, %s23_s19, [#allocation3]  }
   0x5   :  { %s33_s24 = sshll.u32 %s1464_s23, 4  ;;  %s34_s24 = int_to_ptr.vmem [resolvable:$true] %s33_s24 }
   0x6   :  { %36 = dma.hbm_to_vmem [thread:$0]  %s32_s22, 16, %s34_s24, [#allocation5]  }
   0x7   :  { %1459 = dma.done.wait [#allocation3], 16  }
   0x8   :  { %1460 = vsyncadd [#allocation3], 4294967280 }
   0x9   :  { %1461 = dma.done.wait [#allocation5], 16  }
   0xa   :  { %1462 = vsyncadd [#allocation5], 4294967280  ;;  %v1323_v0 = vld [vmem:[%s1827_s1 + $0x38] sm:$0xff]  ;;  %v1322_v4 = vld [vmem:[%s1827_s1 + $0x30] sm:$0xff] }
   0xb   :  { %v1331_v1 = vld [vmem:[%s1827_s1 + $0x78] sm:$0xff]  ;;  %733 = vmatpush.bf16.msra.mxu0 %v1323_v0  ;;  %v1330_v5 = vld [vmem:[%s1827_s1 + $0x70] sm:$0xff]  ;;  %v1321_v8 = vld [vmem:[%s1827_s1 + $0x28] sm:$0xff] }
   0xc   :  { %v1339_v2 = vld [vmem:[%s1827_s1 + $0xb8] sm:$0xff]  ;;  %752 = vmatpush.bf16.msra.mxu1 %v1331_v1  ;;  %v1338_v6 = vld [vmem:[%s1827_s1 + $0xb0] sm:$0xff]  ;;  %v1329_v9 = vld [vmem:[%s1827_s1 + $0x68] sm:$0xff] }
   0xd   :  { %v1347_v3 = vld [vmem:[%s1827_s1 + $0xf8] sm:$0xff]  ;;  %771 = vmatpush.bf16.msra.mxu2 %v1339_v2  ;;  %v1346_v7 = vld [vmem:[%s1827_s1 + $0xf0] sm:$0xff]  ;;  %v1337_v10 = vld [vmem:[%s1827_s1 + $0xa8] sm:$0xff] }
   0xe   :  { %790 = vmatpush.bf16.msra.mxu3 %v1347_v3  ;;  %v1345_v11 = vld [vmem:[%s1827_s1 + $0xe8] sm:$0xff]  ;;  %v1320_v12 = vld [vmem:[%s1827_s1 + $0x20] sm:$0xff]  ;;  %v1319_v16 = vld [vmem:[%s1827_s1 + $0x18] sm:$0xff] }
   0xf   :  { %734 = vmatpush.bf16.msra.mxu0 %v1322_v4  ;;  %v1328_v13 = vld [vmem:[%s1827_s1 + $0x60] sm:$0xff]  ;;  %v1327_v17 = vld [vmem:[%s1827_s1 + $0x58] sm:$0xff]  ;;  %v1318_v20 = vld [vmem:[%s1827_s1 + $0x10] sm:$0xff] }
  0x10   :  { %753 = vmatpush.bf16.msra.mxu1 %v1330_v5  ;;  %v1336_v14 = vld [vmem:[%s1827_s1 + $0xa0] sm:$0xff]  ;;  %v1335_v18 = vld [vmem:[%s1827_s1 + $0x98] sm:$0xff]  ;;  %v1326_v21 = vld [vmem:[%s1827_s1 + $0x50] sm:$0xff] }
  0x11   :  { %772 = vmatpush.bf16.msra.mxu2 %v1338_v6  ;;  %v1344_v15 = vld [vmem:[%s1827_s1 + $0xe0] sm:$0xff]  ;;  %v1343_v19 = vld [vmem:[%s1827_s1 + $0xd8] sm:$0xff]  ;;  %v1334_v22 = vld [vmem:[%s1827_s1 + $0x90] sm:$0xff] }
  0x12   :  { %791 = vmatpush.bf16.msra.mxu3 %v1346_v7  ;;  %v1342_v23 = vld [vmem:[%s1827_s1 + $0xd0] sm:$0xff]  ;;  %v1317_v24 = vld [vmem:[%s1827_s1 + $0x8] sm:$0xff]  ;;  %v1316_v28 = vld [vmem:[%s1827_s1] sm:$0xff] }
  0x13   :  { %735 = vmatpush.bf16.msra.mxu0 %v1321_v8  ;;  %v1325_v25 = vld [vmem:[%s1827_s1 + $0x48] sm:$0xff]  ;;  %v1324_v29 = vld [vmem:[%s1827_s1 + $0x40] sm:$0xff]  ;;  %v950_v39 = vld [vmem:[%s1826_s0 + $0x2c] sm:$0xf0] }
  0x14   :  { %754 = vmatpush.bf16.msra.mxu1 %v1329_v9  ;;  %v1333_v26 = vld [vmem:[%s1827_s1 + $0x88] sm:$0xff]  ;;  %v940_v30 = vld [vmem:[%s1826_s0] sm:$0xf]  ;;  %v1302_v33 = vld [vmem:[%s1826_s0 + $0x20] sm:$0xf0] }
  0x15   :  { %773 = vmatpush.bf16.msra.mxu2 %v1337_v10  ;;  %v1341_v27 = vld [vmem:[%s1827_s1 + $0xc8] sm:$0xff]  ;;  %v1332_v31 = vld [vmem:[%s1827_s1 + $0x80] sm:$0xff]  ;;  %v1355_v40 = vld [vmem:[%s1827_s1 + $0x138] sm:$0xff]  ;;  %v941_v42 = vor.u32 %v1302_v33, %v940_v30 }
  0x16   :  { %792 = vmatpush.bf16.msra.mxu3 %v1345_v11  ;;  %v1340_v32 = vld [vmem:[%s1827_s1 + $0xc0] sm:$0xff]  ;;  %v942_v35 = vld [vmem:[%s1826_s0 + $0x24] sm:$0xf0]  ;;  %v1303_v37 = vld [vmem:[%s1826_s0 + $0x28] sm:$0xf0] }
  0x17   :  { %736 = vmatpush.bf16.msra.mxu0 %v1320_v12  ;;  %v1298_v34 = vld [vmem:[%s1826_s0 + $0x4] sm:$0xf]  ;;  %v948_v36 = vld [vmem:[%s1826_s0 + $0x8] sm:$0xf]  ;;  %v1299_v38 = vld [vmem:[%s1826_s0 + $0xc] sm:$0xf] }
  0x18   :  { %755 = vmatpush.bf16.msra.mxu1 %v1328_v13  ;;  %v1363_v41 = vld [vmem:[%s1827_s1 + $0x178] sm:$0xff]  ;;  %v945_v43 = vor.u32 %v1298_v34, %v942_v35  ;;  %v949_v44 = vor.u32 %v1303_v37, %v948_v36  ;;  %v953_v45 = vor.u32 %v1299_v38, %v950_v39  ;;  %v1354_v48 = vld [vmem:[%s1827_s1 + $0x130] sm:$0xff]  ;;  %v1353_v52 = vld [vmem:[%s1827_s1 + $0x128] sm:$0xff] }
  0x19   :  { %774 = vmatpush.bf16.msra.mxu2 %v1336_v14  ;;  %v1371_v46 = vld [vmem:[%s1827_s1 + $0x1b8] sm:$0xff]  ;;  %v1362_v49 = vld [vmem:[%s1827_s1 + $0x170] sm:$0xff]  ;;  %v1361_v53 = vld [vmem:[%s1827_s1 + $0x168] sm:$0xff] }
  0x1a   :  { %793 = vmatpush.bf16.msra.mxu3 %v1344_v15  ;;  %v1379_v47 = vld [vmem:[%s1827_s1 + $0x1f8] sm:$0xff]  ;;  %v1370_v50 = vld [vmem:[%s1827_s1 + $0x1b0] sm:$0xff]  ;;  %v1369_v54 = vld [vmem:[%s1827_s1 + $0x1a8] sm:$0xff] }
  0x1b   :  { %737 = vmatpush.bf16.msra.mxu0 %v1319_v16  ;;  %v1378_v51 = vld [vmem:[%s1827_s1 + $0x1f0] sm:$0xff]  ;;  %v1377_v55 = vld [vmem:[%s1827_s1 + $0x1e8] sm:$0xff]  ;;  %v1352_v56 = vld [vmem:[%s1827_s1 + $0x120] sm:$0xff] }
  0x1c   :  { %756 = vmatpush.bf16.msra.mxu1 %v1327_v17  ;;  %v1360_v57 = vld [vmem:[%s1827_s1 + $0x160] sm:$0xff]  ;;  %v976_v60 = vld [vmem:[%s1826_s0 + $0x48] sm:$0xf]  ;;  %v1311_v61 = vld [vmem:[%s1826_s0 + $0x68] sm:$0xf0] }
  0x1d   :  { %775 = vmatpush.bf16.msra.mxu2 %v1335_v18  ;;  %v1368_v58 = vld [vmem:[%s1827_s1 + $0x1a0] sm:$0xff]  ;;  %v1307_v62 = vld [vmem:[%s1826_s0 + $0x4c] sm:$0xf]  ;;  %v978_v63 = vld [vmem:[%s1826_s0 + $0x6c] sm:$0xf0]  ;;  %v977_v6 = vor.u32 %v1311_v61, %v976_v60 }
  0x1e   :  { %794 = vmatpush.bf16.msra.mxu3 %v1343_v19  ;;  %v1376_v59 = vld [vmem:[%s1827_s1 + $0x1e0] sm:$0xff]  ;;  %v984_v0 = vld [vmem:[%s1826_s0 + $0x50] sm:$0xf]  ;;  %v1312_v1 = vld [vmem:[%s1826_s0 + $0x70] sm:$0xf0]  ;;  %v981_v7 = vor.u32 %v1307_v62, %v978_v63 }
  0x1f   :  { %738 = vmatpush.bf16.msra.mxu0 %v1318_v20  ;;  %v1308_v2 = vld [vmem:[%s1826_s0 + $0x54] sm:$0xf]  ;;  %v986_v3 = vld [vmem:[%s1826_s0 + $0x74] sm:$0xf0]  ;;  %v985_v8 = vor.u32 %v1312_v1, %v984_v0  ;;  %v1349_v16 = vld [vmem:[%s1827_s1 + $0x108] sm:$0xff] }
  0x20   :  { %757 = vmatpush.bf16.msra.mxu1 %v1326_v21  ;;  %v1351_v4 = vld [vmem:[%s1827_s1 + $0x118] sm:$0xff]  ;;  %v989_v9 = vor.u32 %v1308_v2, %v986_v3  ;;  %v1350_v12 = vld [vmem:[%s1827_s1 + $0x110] sm:$0xff]  ;;  %v1357_v17 = vld [vmem:[%s1827_s1 + $0x148] sm:$0xff] }
  0x21   :  { %776 = vmatpush.bf16.msra.mxu2 %v1334_v22  ;;  %v1359_v5 = vld [vmem:[%s1827_s1 + $0x158] sm:$0xff]  ;;  %v1358_v13 = vld [vmem:[%s1827_s1 + $0x150] sm:$0xff]  ;;  %v1365_v18 = vld [vmem:[%s1827_s1 + $0x188] sm:$0xff] }
  0x22   :  { %795 = vmatpush.bf16.msra.mxu3 %v1342_v23  ;;  %v1367_v10 = vld [vmem:[%s1827_s1 + $0x198] sm:$0xff]  ;;  %v1366_v14 = vld [vmem:[%s1827_s1 + $0x190] sm:$0xff]  ;;  %v1373_v19 = vld [vmem:[%s1827_s1 + $0x1c8] sm:$0xff] }
  0x23   :  { %739 = vmatpush.bf16.msra.mxu0 %v1317_v24  ;;  %v1375_v11 = vld [vmem:[%s1827_s1 + $0x1d8] sm:$0xff]  ;;  %v1374_v15 = vld [vmem:[%s1827_s1 + $0x1d0] sm:$0xff]  ;;  %v1348_v20 = vld [vmem:[%s1827_s1 + $0x100] sm:$0xff] }
  0x24   :  { %758 = vmatpush.bf16.msra.mxu1 %v1325_v25  ;;  %v1356_v21 = vld [vmem:[%s1827_s1 + $0x140] sm:$0xff]  ;;  %v956_v24 = vld [vmem:[%s1826_s0 + $0x10] sm:$0xf]  ;;  %v1304_v25 = vld [vmem:[%s1826_s0 + $0x30] sm:$0xf0] }
  0x25   :  { %777 = vmatpush.bf16.msra.mxu2 %v1333_v26  ;;  %v1364_v22 = vld [vmem:[%s1827_s1 + $0x180] sm:$0xff]  ;;  %v1387_v26 = vld [vmem:[%s1827_s1 + $0x238] sm:$0xff]  ;;  %v957_v33 = vor.u32 %v1304_v25, %v956_v24  ;;  %v1386_v37 = vld [vmem:[%s1827_s1 + $0x230] sm:$0xff] }
  0x26   :  { %796 = vmatpush.bf16.msra.mxu3 %v1341_v27  ;;  %v1372_v23 = vld [vmem:[%s1827_s1 + $0x1c0] sm:$0xff]  ;;  %v1300_v27 = vld [vmem:[%s1826_s0 + $0x14] sm:$0xf]  ;;  %v1305_v30 = vld [vmem:[%s1826_s0 + $0x38] sm:$0xf0] }
  0x27   :  { %740 = vmatpush.bf16.msra.mxu0 %v1316_v28  ;;  %v958_v28 = vld [vmem:[%s1826_s0 + $0x34] sm:$0xf0]  ;;  %v1385_v38 = vld [vmem:[%s1827_s1 + $0x228] sm:$0xff]  ;;  %v1384_v39 = vld [vmem:[%s1827_s1 + $0x220] sm:$0xff] }
  0x28   :  { %759 = vmatpush.bf16.msra.mxu1 %v1324_v29  ;;  %v964_v29 = vld [vmem:[%s1826_s0 + $0x18] sm:$0xf]  ;;  %v961_v34 = vor.u32 %v1300_v27, %v958_v28 }
  0x29   :  { %778 = vmatpush.bf16.msra.mxu2 %v1332_v31  ;;  %v1301_v31 = vld [vmem:[%s1826_s0 + $0x1c] sm:$0xf]  ;;  %v965_v35 = vor.u32 %v1305_v30, %v964_v29 }
  0x2a   :  { %797 = vmatpush.bf16.msra.mxu3 %v1340_v32  ;;  %741 = vmatmul.bf16.vlgmr.msra.gmra.mxu0 %v941_v42  ;;  %v966_v32 = vld [vmem:[%s1826_s0 + $0x3c] sm:$0xf0]  ;;  %v1309_v42 = vld [vmem:[%s1826_s0 + $0x5c] sm:$0xf] }
  0x2b   :  { %809 = vmatpush.bf16.msrb.mxu0 %v1355_v40  ;;  %760 = vmatmul.bf16.vlgmr.msra.gmra.mxu1 %v945_v43  ;;  %v969_v36 = vor.u32 %v1301_v31, %v966_v32  ;;  %v992_v40 = vld [vmem:[%s1826_s0 + $0x58] sm:$0xf]  ;;  %v994_v43 = vld [vmem:[%s1826_s0 + $0x7c] sm:$0xf0] }
  0x2c   :  { %828 = vmatpush.bf16.msrb.mxu1 %v1363_v41  ;;  %779 = vmatmul.bf16.vlgmr.msra.gmra.mxu2 %v949_v44  ;;  %v1313_v41 = vld [vmem:[%s1826_s0 + $0x78] sm:$0xf0]  ;;  %v1000_v44 = vld [vmem:[%s1826_s0 + $0x60] sm:$0xf] }
  0x2d   :  { %798 = vmatmul.bf16.vlgmr.msra.gmra.mxu3 %v953_v45  ;;  %847 = vmatpush.bf16.msrb.mxu2 %v1371_v46  ;;  %v1314_v45 = vld [vmem:[%s1826_s0 + $0x80] sm:$0xf0] }
  0x2e   :  { %866 = vmatpush.bf16.msrb.mxu3 %v1379_v47  ;;  %v1310_v46 = vld [vmem:[%s1826_s0 + $0x64] sm:$0xf]  ;;  %v1002_v47 = vld [vmem:[%s1826_s0 + $0x84] sm:$0xf0] }
  0x2f   :  { %810 = vmatpush.bf16.msrb.mxu0 %v1354_v48  ;;  %v1383_v48 = vld [vmem:[%s1827_s1 + $0x218] sm:$0xff] }
  0x30   :  { %829 = vmatpush.bf16.msrb.mxu1 %v1362_v49  ;;  %v993_v49 = vor.u32 %v1313_v41, %v992_v40 }
  0x31   :  { %848 = vmatpush.bf16.msrb.mxu2 %v1370_v50  ;;  %v997_v50 = vor.u32 %v1309_v42, %v994_v43 }
  0x32   :  { %867 = vmatpush.bf16.msrb.mxu3 %v1378_v51  ;;  %v1001_v51 = vor.u32 %v1314_v45, %v1000_v44 }
  0x33   :  { %811 = vmatpush.bf16.msrb.mxu0 %v1353_v52  ;;  %v1005_v52 = vor.u32 %v1310_v46, %v1002_v47 }
  0x34   :  { %830 = vmatpush.bf16.msrb.mxu1 %v1361_v53  ;;  %v1382_v53 = vld [vmem:[%s1827_s1 + $0x210] sm:$0xff] }
  0x35   :  { %849 = vmatpush.bf16.msrb.mxu2 %v1369_v54  ;;  %v1381_v54 = vld [vmem:[%s1827_s1 + $0x208] sm:$0xff] }
  0x36   :  { %868 = vmatpush.bf16.msrb.mxu3 %v1377_v55  ;;  %v1380_v55 = vld [vmem:[%s1827_s1 + $0x200] sm:$0xff] }
  0x37   :  { %812 = vmatpush.bf16.msrb.mxu0 %v1352_v56  ;;  %v972_v56 = vld [vmem:[%s1826_s0 + $0x20] sm:$0xf] }
  0x38   :  { %831 = vmatpush.bf16.msrb.mxu1 %v1360_v57  ;;  %v1306_v57 = vld [vmem:[%s1826_s0 + $0x40] sm:$0xf0] }
  0x39   :  { %850 = vmatpush.bf16.msrb.mxu2 %v1368_v58  ;;  %v1008_v58 = vld [vmem:[%s1826_s0 + $0x68] sm:$0xf]  ;;  %v973_v60 = vor.u32 %v1306_v57, %v972_v56 }
  0x3a   :  { %869 = vmatpush.bf16.msrb.mxu3 %v1376_v59  ;;  %746 = vmatmul.bf16.gmra.mxu0 %v977_v6  ;;  %v1315_v59 = vld [vmem:[%s1826_s0 + $0x88] sm:$0xf0] }
  0x3b   :  { %813 = vmatpush.bf16.msrb.mxu0 %v1351_v4  ;;  %765 = vmatmul.bf16.gmra.mxu1 %v981_v7  ;;  %v1009_v61 = vor.u32 %v1315_v59, %v1008_v58  ;;  %v1409_v58 = vld [vmem:[#allocation2] ss:$0 sm:$0xff] }
  0x3c   :  { %832 = vmatpush.bf16.msrb.mxu1 %v1359_v5  ;;  %784 = vmatmul.bf16.gmra.mxu2 %v985_v8 }
  0x3d   :  { %803 = vmatmul.bf16.gmra.mxu3 %v989_v9  ;;  %851 = vmatpush.bf16.msrb.mxu2 %v1367_v10 }
  0x3e   :  { %870 = vmatpush.bf16.msrb.mxu3 %v1375_v11 }
  0x3f   :  { %814 = vmatpush.bf16.msrb.mxu0 %v1350_v12 }
  0x40   :  { %833 = vmatpush.bf16.msrb.mxu1 %v1358_v13 }
  0x41   :  { %852 = vmatpush.bf16.msrb.mxu2 %v1366_v14 }
  0x42   :  { %871 = vmatpush.bf16.msrb.mxu3 %v1374_v15 }
  0x43   :  { %815 = vmatpush.bf16.msrb.mxu0 %v1349_v16 }
  0x44   :  { %834 = vmatpush.bf16.msrb.mxu1 %v1357_v17 }
  0x45   :  { %853 = vmatpush.bf16.msrb.mxu2 %v1365_v18 }
  0x46   :  { %872 = vmatpush.bf16.msrb.mxu3 %v1373_v19 }
  0x47   :  { %816 = vmatpush.bf16.msrb.mxu0 %v1348_v20 }
  0x48   :  { %835 = vmatpush.bf16.msrb.mxu1 %v1356_v21 }
  0x49   :  { %854 = vmatpush.bf16.msrb.mxu2 %v1364_v22 }
  0x4a   :  { %873 = vmatpush.bf16.msrb.mxu3 %v1372_v23  ;;  %817 = vmatmul.bf16.vlgmr.msrb.gmra.mxu0 %v957_v33 }
  0x4b   :  { %885 = vmatpush.bf16.msra.mxu0 %v1387_v26  ;;  %836 = vmatmul.bf16.vlgmr.msrb.gmra.mxu1 %v961_v34 }
  0x4c   :  { %1399 = vmatpush.bf16.msra.mxu1 %v1387_v26  ;;  %855 = vmatmul.bf16.vlgmr.msrb.gmra.mxu2 %v965_v35 }
  0x4d   :  { %874 = vmatmul.bf16.vlgmr.msrb.gmra.mxu3 %v969_v36 }
  0x4f   :  { %886 = vmatpush.bf16.msra.mxu0 %v1386_v37 }
  0x50   :  { %1400 = vmatpush.bf16.msra.mxu1 %v1386_v37 }
  0x53   :  { %887 = vmatpush.bf16.msra.mxu0 %v1385_v38 }
  0x54   :  { %1401 = vmatpush.bf16.msra.mxu1 %v1385_v38 }
  0x57   :  { %888 = vmatpush.bf16.msra.mxu0 %v1384_v39 }
  0x58   :  { %1402 = vmatpush.bf16.msra.mxu1 %v1384_v39 }
  0x5a   :  { %822 = vmatmul.bf16.gmra.mxu0 %v993_v49 }
  0x5b   :  { %889 = vmatpush.bf16.msra.mxu0 %v1383_v48  ;;  %841 = vmatmul.bf16.gmra.mxu1 %v997_v50 }
  0x5c   :  { %1403 = vmatpush.bf16.msra.mxu1 %v1383_v48  ;;  %860 = vmatmul.bf16.gmra.mxu2 %v1001_v51 }
  0x5d   :  { %879 = vmatmul.bf16.gmra.mxu3 %v1005_v52 }
  0x5f   :  { %890 = vmatpush.bf16.msra.mxu0 %v1382_v53 }
  0x60   :  { %1404 = vmatpush.bf16.msra.mxu1 %v1382_v53 }
  0x63   :  { %891 = vmatpush.bf16.msra.mxu0 %v1381_v54 }
  0x64   :  { %1405 = vmatpush.bf16.msra.mxu1 %v1381_v54 }
  0x67   :  { %892 = vmatpush.bf16.msra.mxu0 %v1380_v55 }
  0x68   :  { %1406 = vmatpush.bf16.msra.mxu1 %v1380_v55 }
  0x6a   :  { %893 = vmatmul.bf16.vlgmr.msra.gmra.mxu0 %v973_v60 }
  0x6b   :  { %898 = vmatmul.bf16.vlgmr.msra.gmra.mxu1 %v1009_v61 }
  0xa7   :  { %v742_v62 = vpop.f32.mrf.mxu0 }
  0xa8   :  { %v761_v63 = vpop.f32.mrf.mxu1 }
  0xa9   :  { %v762_v20 = vadd.f32 %v761_v63, %v742_v62 }
  0xaf   :  { %v780_v0 = vpop.f32.mrf.mxu2  ;;  %v744_v2 = vpop.f32.mrf.mxu0 }
  0xb0   :  { %v799_v1 = vpop.f32.mrf.mxu3  ;;  %v763_v3 = vpop.f32.mrf.mxu1  ;;  %v781_v25 = vadd.f32 %v780_v0, %v762_v20  ;;  %v1410_v0 = vld [vmem:[#allocation4] ss:$0 sm:$0xff] }
  0xb1   :  { %v764_v29 = vadd.f32 %v763_v3, %v744_v2 }
  0xb2   :  { %v800_v28 = vadd.f32 %v799_v1, %v781_v25 }
  0xb7   :  { %v782_v4 = vpop.f32.mrf.mxu2  ;;  %v747_v6 = vpop.f32.mrf.mxu0 }
  0xb8   :  { %v801_v5 = vpop.f32.mrf.mxu3  ;;  %v766_v7 = vpop.f32.mrf.mxu1  ;;  %v783_v32 = vadd.f32 %v782_v4, %v764_v29 }
  0xb9   :  { %v767_v21 = vadd.f32 %v766_v7, %v747_v6 }
  0xba   :  { %v802_v39 = vadd.f32 %v801_v5, %v783_v32 }
  0xbf   :  { %v785_v8 = vpop.f32.mrf.mxu2  ;;  %v749_v10 = vpop.f32.mrf.mxu0 }
  0xc0   :  { %v804_v9 = vpop.f32.mrf.mxu3  ;;  %v768_v11 = vpop.f32.mrf.mxu1  ;;  %v786_v26 = vadd.f32 %v785_v8, %v767_v21 }
  0xc1   :  { %v769_v31 = vadd.f32 %v768_v11, %v749_v10 }
  0xc2   :  { %v805_v30 = vadd.f32 %v804_v9, %v786_v26 }
  0xc7   :  { %v787_v12 = vpop.f32.mrf.mxu2  ;;  %v818_v14 = vpop.f32.mrf.mxu0 }
  0xc8   :  { %v806_v13 = vpop.f32.mrf.mxu3  ;;  %v837_v15 = vpop.f32.mrf.mxu1  ;;  %v788_v33 = vadd.f32 %v787_v12, %v769_v31  ;;  %v819_v34 = vadd.f32 %v818_v14, %v800_v28 }
  0xca   :  { %v807_v40 = vadd.f32 %v806_v13, %v788_v33  ;;  %v838_v41 = vadd.f32 %v837_v15, %v819_v34 }
  0xcf   :  { %v856_v16 = vpop.f32.mrf.mxu2  ;;  %v820_v18 = vpop.f32.mrf.mxu0 }
  0xd0   :  { %v875_v17 = vpop.f32.mrf.mxu3  ;;  %v839_v19 = vpop.f32.mrf.mxu1  ;;  %v857_v44 = vadd.f32 %v856_v16, %v838_v41  ;;  %v821_v45 = vadd.f32 %v820_v18, %v802_v39 }
  0xd2   :  { %v876_v51 = vadd.f32 %v875_v17, %v857_v44  ;;  %v840_v52 = vadd.f32 %v839_v19, %v821_v45 }
  0xd7   :  { %v858_v22 = vpop.f32.mrf.mxu2  ;;  %v823_v23 = vpop.f32.mrf.mxu0 }
  0xd8   :  { %v842_v24 = vpop.f32.mrf.mxu1  ;;  %v877_v27 = vpop.f32.mrf.mxu3  ;;  %v824_v35 = vadd.f32 %v823_v23, %v805_v30  ;;  %v859_v55 = vadd.f32 %v858_v22, %v840_v52 }
  0xda   :  { %v843_v42 = vadd.f32 %v842_v24, %v824_v35  ;;  %v878_v61 = vadd.f32 %v877_v27, %v859_v55 }
  0xdf   :  { %v861_v36 = vpop.f32.mrf.mxu2  ;;  %v825_v37 = vpop.f32.mrf.mxu0 }
  0xe0   :  { %v844_v38 = vpop.f32.mrf.mxu1  ;;  %v880_v43 = vpop.f32.mrf.mxu3  ;;  %v862_v46 = vadd.f32 %v861_v36, %v843_v42  ;;  %v826_v47 = vadd.f32 %v825_v37, %v807_v40 }
  0xe2   :  { %v881_v53 = vadd.f32 %v880_v43, %v862_v46  ;;  %v845_v54 = vadd.f32 %v844_v38, %v826_v47 }
  0xe7   :  { %v863_v48 = vpop.f32.mrf.mxu2  ;;  %v894_v49 = vpop.f32.mrf.mxu0 }
  0xe8   :  { %v899_v50 = vpop.f32.mrf.mxu1  ;;  %v864_v56 = vadd.f32 %v863_v48, %v845_v54  ;;  %v895_v57 = vadd.f32 %v894_v49, %v876_v51  ;;  %v882_v60 = vpop.f32.mrf.mxu3 }
  0xe9   :  { %v900_v59 = vadd.f32 %v899_v50, %v881_v53 }
  0xea   :  { %v883_v62 = vadd.f32 %v882_v60, %v864_v56  ;;  %v909_v63 = vmul.f32 %v1409_v58, %v895_v57 }
  0xeb   :  { %v911_v1 = vmul.f32 %v1409_v58, %v900_v59 }
  0xec   :  { %v916_v6 = vadd.f32 %v1410_v0, %v909_v63 }
  0xed   :  { %v918_v7 = vadd.f32 %v1410_v0, %v911_v1 }
  0xee   :  { %v920_v12 = vmax.f32 %v916_v6, 0.0 }
  0xef   :  { %v896_v2 = vpop.f32.mrf.mxu0  ;;  %v922_v13 = vmax.f32 %v918_v7, 0.0 }
  0xf0   :  { %v901_v3 = vpop.f32.mrf.mxu1  ;;  %v897_v4 = vadd.f32 %v896_v2, %v878_v61 }
  0xf1   :  { %v902_v5 = vadd.f32 %v901_v3, %v883_v62 }
  0xf2   :  { %v910_v8 = vmul.f32 %v1409_v58, %v897_v4 }
  0xf3   :  { %v912_v9 = vmul.f32 %v1409_v58, %v902_v5 }
  0xf4   :  { %v917_v10 = vadd.f32 %v1410_v0, %v910_v8 }
  0xf5   :  { %v919_v11 = vadd.f32 %v1410_v0, %v912_v9 }
  0xf6   :  { %v921_v14 = vmax.f32 %v917_v10, 0.0 }
  0xf7   :  { %v923_v15 = vmax.f32 %v919_v11, 0.0 }
  0xf8   :  { %v1391_v16 = vpack.c.bf16 %v921_v14, %v920_v12 }
  0xf9   :  { %v1396_v17 = vpack.c.bf16 %v923_v15, %v922_v13 }
  0xfa   :  { %1392 = vst [vmem:[%s1830_s4] sm:$0xff] %v1391_v16  }
  0xfb   :  { %1398 = vst [vmem:[%s1830_s4 + $0x8] sm:$0xff] %v1396_v17  }
  0xfc   :  { %936 = vsyncpa [#allocation3], 1 }
  0xfd   :  { %937 = vsyncpa [#allocation5], 1 }

// kernel: forward.71
= control target key start
LH: loop header
LB: loop body
LE: loop exit
PB: predicated region body
PF: predicated region fallthrough
CT: control target
= control target key end

     0   :  { %9 = vsyncpa [#allocation3], 0  ;;  %s372_s0 = inlined_call_operand.vmem [shape: bf16[32,128], index: 0, kind: input, shape index: {}]   ;;  %s373_s1 = inlined_call_operand.vmem [shape: bf16[128,128], index: 1, kind: input, shape index: {}]   ;;  %s374_s2 = inlined_call_operand.hbm [shape: f32[1,128], index: 2, kind: input, shape index: {}]   ;;  %s375_s3 = inlined_call_operand.hbm [shape: f32[1,128], index: 3, kind: input, shape index: {}]   ;;  %s376_s4 = inlined_call_operand.vmem [shape: bf16[32,128], index: 4, kind: output, shape index: {}]  }
   0x1   :  { %s20_s17 = sshll.u32 %s374_s2, 4  ;;  %s21_s17 = int_to_ptr.hbm [resolvable:$true] %s20_s17 }
   0x2   :  { %10 = vsyncpa [#allocation5], 0  ;;  %s303_s18 = smov [#allocation2]   ;;  %s31_s22 = sshll.u32 %s375_s3, 4  ;;  %s32_s22 = int_to_ptr.hbm [resolvable:$true] %s31_s22 }
   0x3   :  { %s22_s19 = sshll.u32 %s303_s18, 4  ;;  %s304_s23 = smov [#allocation4]   ;;  %s23_s19 = int_to_ptr.vmem [resolvable:$true] %s22_s19 }
   0x4   :  { %25 = dma.hbm_to_vmem [thread:$0]  %s21_s17, 16, %s23_s19, [#allocation3]  }
   0x5   :  { %s33_s24 = sshll.u32 %s304_s23, 4  ;;  %s34_s24 = int_to_ptr.vmem [resolvable:$true] %s33_s24 }
   0x6   :  { %36 = dma.hbm_to_vmem [thread:$0]  %s32_s22, 16, %s34_s24, [#allocation5]  }
   0x7   :  { %299 = dma.done.wait [#allocation3], 16  }
   0x8   :  { %300 = vsyncadd [#allocation3], 4294967280 }
   0x9   :  { %301 = dma.done.wait [#allocation5], 16  }
   0xa   :  { %302 = vsyncadd [#allocation5], 4294967280  ;;  %v227_v0 = vld [vmem:[%s373_s1 + $0x38] sm:$0xff]  ;;  %v226_v1 = vld [vmem:[%s373_s1 + $0x30] sm:$0xff] }
   0xb   :  { %125 = vmatpush.bf16.msra.mxu0 %v227_v0  ;;  %239 = vmatpush.bf16.msra.mxu1 %v227_v0  ;;  %v225_v2 = vld [vmem:[%s373_s1 + $0x28] sm:$0xff]  ;;  %v224_v3 = vld [vmem:[%s373_s1 + $0x20] sm:$0xff]  ;;  %v223_v4 = vld [vmem:[%s373_s1 + $0x18] sm:$0xff] }
   0xc   :  { %v222_v5 = vld [vmem:[%s373_s1 + $0x10] sm:$0xff]  ;;  %v221_v6 = vld [vmem:[%s373_s1 + $0x8] sm:$0xff]  ;;  %v220_v7 = vld [vmem:[%s373_s1] sm:$0xff] }
   0xd   :  { %v218_v8 = vld [vmem:[%s372_s0] sm:$0xff]  ;;  %v219_v9 = vld [vmem:[%s372_s0 + $0x8] sm:$0xff] }
   0xe   :  { %v249_v12 = vld [vmem:[#allocation2] ss:$0 sm:$0xff]  ;;  %v250_v14 = vld [vmem:[#allocation4] ss:$0 sm:$0xff] }
   0xf   :  { %126 = vmatpush.bf16.msra.mxu0 %v226_v1  ;;  %240 = vmatpush.bf16.msra.mxu1 %v226_v1 }
  0x13   :  { %127 = vmatpush.bf16.msra.mxu0 %v225_v2  ;;  %241 = vmatpush.bf16.msra.mxu1 %v225_v2 }
  0x17   :  { %128 = vmatpush.bf16.msra.mxu0 %v224_v3  ;;  %242 = vmatpush.bf16.msra.mxu1 %v224_v3 }
  0x1b   :  { %129 = vmatpush.bf16.msra.mxu0 %v223_v4  ;;  %243 = vmatpush.bf16.msra.mxu1 %v223_v4 }
  0x1f   :  { %130 = vmatpush.bf16.msra.mxu0 %v222_v5  ;;  %244 = vmatpush.bf16.msra.mxu1 %v222_v5 }
  0x23   :  { %131 = vmatpush.bf16.msra.mxu0 %v221_v6  ;;  %245 = vmatpush.bf16.msra.mxu1 %v221_v6 }
  0x27   :  { %132 = vmatpush.bf16.msra.mxu0 %v220_v7  ;;  %246 = vmatpush.bf16.msra.mxu1 %v220_v7 }
  0x2a   :  { %133 = vmatmul.bf16.vlgmr.msra.gmra.mxu0 %v218_v8  ;;  %138 = vmatmul.bf16.vlgmr.msra.gmra.mxu1 %v219_v9 }
  0xa7   :  { %v134_v10 = vpop.f32.mrf.mxu0  ;;  %v139_v11 = vpop.f32.mrf.mxu1 }
  0xa8   :  { %v149_v13 = vmul.f32 %v249_v12, %v134_v10  ;;  %v151_v15 = vmul.f32 %v249_v12, %v139_v11 }
  0xaa   :  { %v156_v18 = vadd.f32 %v250_v14, %v149_v13  ;;  %v158_v19 = vadd.f32 %v250_v14, %v151_v15 }
  0xac   :  { %v160_v24 = vmax.f32 %v156_v18, 0.0  ;;  %v162_v25 = vmax.f32 %v158_v19, 0.0 }
  0xaf   :  { %v136_v16 = vpop.f32.mrf.mxu0  ;;  %v141_v17 = vpop.f32.mrf.mxu1 }
  0xb0   :  { %v150_v20 = vmul.f32 %v249_v12, %v136_v16  ;;  %v152_v21 = vmul.f32 %v249_v12, %v141_v17 }
  0xb2   :  { %v157_v22 = vadd.f32 %v250_v14, %v150_v20  ;;  %v159_v23 = vadd.f32 %v250_v14, %v152_v21 }
  0xb4   :  { %v161_v26 = vmax.f32 %v157_v22, 0.0  ;;  %v163_v27 = vmax.f32 %v159_v23, 0.0 }
  0xb6   :  { %v231_v28 = vpack.c.bf16 %v161_v26, %v160_v24  ;;  %v236_v29 = vpack.c.bf16 %v163_v27, %v162_v25 }
  0xb8   :  { %232 = vst [vmem:[%s376_s4] sm:$0xff] %v231_v28  }
  0xb9   :  { %238 = vst [vmem:[%s376_s4 + $0x8] sm:$0xff] %v236_v29  }
  0xba   :  { %176 = vsyncpa [#allocation3], 1 }
  0xbb   :  { %177 = vsyncpa [#allocation5], 1 }

// kernel: forward.80
= control target key start
LH: loop header
LB: loop body
LE: loop exit
PB: predicated region body
PF: predicated region fallthrough
CT: control target
= control target key end

     0   :  { %9 = vsyncpa [#allocation3], 0  ;;  %s396_s0 = inlined_call_operand.vmem [shape: bf16[32,128], index: 0, kind: input, shape index: {}]   ;;  %s397_s1 = inlined_call_operand.hbm [shape: bf16[128,128], index: 1, kind: input, shape index: {}]   ;;  %s398_s2 = inlined_call_operand.hbm [shape: f32[1,128], index: 2, kind: input, shape index: {}]   ;;  %s399_s3 = inlined_call_operand.hbm [shape: f32[1,128], index: 3, kind: input, shape index: {}]   ;;  %s400_s4 = inlined_call_operand.vmem [shape: bf16[32,128], index: 4, kind: output, shape index: {}]  }
   0x1   :  { %10 = vsyncpa [#allocation5], 0  ;;  %s31_s17 = sshll.u32 %s398_s2, 4  ;;  %s345_s18 = smov [#allocation4]   ;;  %s32_s17 = int_to_ptr.hbm [resolvable:$true] %s31_s17 }
   0x2   :  { %s33_s19 = sshll.u32 %s345_s18, 4  ;;  %s17_s22 = sshll.u32 %s397_s1, 4  ;;  %s34_s19 = int_to_ptr.vmem [resolvable:$true] %s33_s19  ;;  %s18_s22 = int_to_ptr.hbm [resolvable:$true] %s17_s22 }
   0x3   :  { %36 = dma.hbm_to_vmem [thread:$0]  %s32_s17, 16, %s34_s19, [#allocation5]  }
   0x4   :  { %s346_s23 = smov [#allocation2]   ;;  %s347_s25 = smov 64  }
   0x5   :  { %s19_s24 = sshll.u32 %s346_s23, 4  ;;  %s348_s26 = smov 4   ;;  %s20_s24 = int_to_ptr.vmem [resolvable:$true] %s19_s24 }
   0x6   :  { %25 = dma.hbm_to_vmem [thread:$0]  %s18_s22, 1024, %s20_s24, [#allocation3], %s347_s25, %s347_s25, %s348_s26  }
   0x7   :  { %s42_s2 = sshll.u32 %s399_s3, 4  ;;  %s349_s29 = smov [#allocation6]   ;;  %s43_s2 = int_to_ptr.hbm [resolvable:$true] %s42_s2 }
   0x8   :  { %s44_s30 = sshll.u32 %s349_s29, 4  ;;  %s45_s30 = int_to_ptr.vmem [resolvable:$true] %s44_s30 }
   0x9   :  { %47 = dma.hbm_to_vmem [thread:$0]  %s43_s2, 16, %s45_s30, [#allocation5]  }
   0xa   :  { %341 = dma.done.wait [#allocation3], 1024  }
   0xb   :  { %342 = vsyncadd [#allocation3], 4294966272 }
   0xc   :  { %343 = dma.done.wait [#allocation5], 32  }
   0xd   :  { %344 = vsyncadd [#allocation5], 4294967264  ;;  %v242_v0 = vld [vmem:[#allocation2 + $0x38] sm:$0xff]  ;;  %v241_v1 = vld [vmem:[#allocation2 + $0x30] sm:$0xff] }
   0xe   :  { %140 = vmatpush.bf16.msra.mxu0 %v242_v0  ;;  %254 = vmatpush.bf16.msra.mxu1 %v242_v0  ;;  %v240_v2 = vld [vmem:[#allocation2 + $0x28] sm:$0xff]  ;;  %v239_v3 = vld [vmem:[#allocation2 + $0x20] sm:$0xff]  ;;  %v238_v4 = vld [vmem:[#allocation2 + $0x18] sm:$0xff] }
   0xf   :  { %v237_v5 = vld [vmem:[#allocation2 + $0x10] sm:$0xff]  ;;  %v236_v6 = vld [vmem:[#allocation2 + $0x8] sm:$0xff]  ;;  %v235_v7 = vld [vmem:[#allocation2] sm:$0xff] }
  0x10   :  { %v233_v8 = vld [vmem:[%s396_s0] sm:$0xff]  ;;  %v234_v9 = vld [vmem:[%s396_s0 + $0x8] sm:$0xff] }
  0x11   :  { %v267_v12 = vld [vmem:[#allocation4] ss:$0 sm:$0xff]  ;;  %v268_v14 = vld [vmem:[#allocation6] ss:$0 sm:$0xff] }
  0x12   :  { %141 = vmatpush.bf16.msra.mxu0 %v241_v1  ;;  %255 = vmatpush.bf16.msra.mxu1 %v241_v1 }
  0x16   :  { %142 = vmatpush.bf16.msra.mxu0 %v240_v2  ;;  %256 = vmatpush.bf16.msra.mxu1 %v240_v2 }
  0x1a   :  { %143 = vmatpush.bf16.msra.mxu0 %v239_v3  ;;  %257 = vmatpush.bf16.msra.mxu1 %v239_v3 }
  0x1e   :  { %144 = vmatpush.bf16.msra.mxu0 %v238_v4  ;;  %258 = vmatpush.bf16.msra.mxu1 %v238_v4 }
  0x22   :  { %145 = vmatpush.bf16.msra.mxu0 %v237_v5  ;;  %259 = vmatpush.bf16.msra.mxu1 %v237_v5 }
  0x26   :  { %146 = vmatpush.bf16.msra.mxu0 %v236_v6  ;;  %260 = vmatpush.bf16.msra.mxu1 %v236_v6 }
  0x2a   :  { %147 = vmatpush.bf16.msra.mxu0 %v235_v7  ;;  %261 = vmatpush.bf16.msra.mxu1 %v235_v7 }
  0x2d   :  { %148 = vmatmul.bf16.vlgmr.msra.gmra.mxu0 %v233_v8  ;;  %153 = vmatmul.bf16.vlgmr.msra.gmra.mxu1 %v234_v9 }
  0xaa   :  { %v149_v10 = vpop.f32.mrf.mxu0  ;;  %v154_v11 = vpop.f32.mrf.mxu1 }
  0xab   :  { %v164_v13 = vmul.f32 %v267_v12, %v149_v10  ;;  %v166_v15 = vmul.f32 %v267_v12, %v154_v11 }
  0xad   :  { %v171_v18 = vadd.f32 %v268_v14, %v164_v13  ;;  %v173_v19 = vadd.f32 %v268_v14, %v166_v15 }
  0xaf   :  { %v175_v24 = vmax.f32 %v171_v18, 0.0  ;;  %v177_v25 = vmax.f32 %v173_v19, 0.0 }
  0xb2   :  { %v151_v16 = vpop.f32.mrf.mxu0  ;;  %v156_v17 = vpop.f32.mrf.mxu1 }
  0xb3   :  { %v165_v20 = vmul.f32 %v267_v12, %v151_v16  ;;  %v167_v21 = vmul.f32 %v267_v12, %v156_v17 }
  0xb5   :  { %v172_v22 = vadd.f32 %v268_v14, %v165_v20  ;;  %v174_v23 = vadd.f32 %v268_v14, %v167_v21 }
  0xb7   :  { %v176_v26 = vmax.f32 %v172_v22, 0.0  ;;  %v178_v27 = vmax.f32 %v174_v23, 0.0 }
  0xb9   :  { %v246_v28 = vpack.c.bf16 %v176_v26, %v175_v24  ;;  %v251_v29 = vpack.c.bf16 %v178_v27, %v177_v25 }
  0xbb   :  { %247 = vst [vmem:[%s400_s4] sm:$0xff] %v246_v28  }
  0xbc   :  { %253 = vst [vmem:[%s400_s4 + $0x8] sm:$0xff] %v251_v29  }
  0xbd   :  { %191 = vsyncpa [#allocation3], 1 }
  0xbe   :  { %192 = vsyncpa [#allocation5], 1 }

// kernel: forward.72
= control target key start
LH: loop header
LB: loop body
LE: loop exit
PB: predicated region body
PF: predicated region fallthrough
CT: control target
= control target key end

     0   :  { %s1740_s1 = inlined_call_operand.vmem [shape: bf16[1152,128], index: 1, kind: input, shape index: {}]   ;;  %s1741_s0 = inlined_call_operand.vmem [shape: bf16[32,1152], index: 0, kind: input, shape index: {}]   ;;  %s1742_s2 = inlined_call_operand.vmem [shape: f32[1,128], index: 2, kind: input, shape index: {}]   ;;  %s1743_s3 = inlined_call_operand.vmem [shape: f32[1,128], index: 3, kind: input, shape index: {}]   ;;  %s1744_s4 = inlined_call_operand.vmem [shape: bf16[32,128], index: 4, kind: output, shape index: {}]  }
   0x1   :  { %v1293_v0 = vld [vmem:[%s1740_s1 + $0x38] sm:$0xff]  ;;  %v1292_v4 = vld [vmem:[%s1740_s1 + $0x30] sm:$0xff]  ;;  %v1291_v8 = vld [vmem:[%s1740_s1 + $0x28] sm:$0xff] }
   0x2   :  { %v1301_v1 = vld [vmem:[%s1740_s1 + $0x78] sm:$0xff]  ;;  %705 = vmatpush.bf16.msra.mxu0 %v1293_v0  ;;  %v1300_v5 = vld [vmem:[%s1740_s1 + $0x70] sm:$0xff]  ;;  %v1299_v9 = vld [vmem:[%s1740_s1 + $0x68] sm:$0xff] }
   0x3   :  { %v1309_v2 = vld [vmem:[%s1740_s1 + $0xb8] sm:$0xff]  ;;  %724 = vmatpush.bf16.msra.mxu1 %v1301_v1  ;;  %v1308_v6 = vld [vmem:[%s1740_s1 + $0xb0] sm:$0xff]  ;;  %v1307_v10 = vld [vmem:[%s1740_s1 + $0xa8] sm:$0xff] }
   0x4   :  { %v1317_v3 = vld [vmem:[%s1740_s1 + $0xf8] sm:$0xff]  ;;  %743 = vmatpush.bf16.msra.mxu2 %v1309_v2  ;;  %v1316_v7 = vld [vmem:[%s1740_s1 + $0xf0] sm:$0xff]  ;;  %v1315_v11 = vld [vmem:[%s1740_s1 + $0xe8] sm:$0xff] }
   0x5   :  { %762 = vmatpush.bf16.msra.mxu3 %v1317_v3  ;;  %v1290_v12 = vld [vmem:[%s1740_s1 + $0x20] sm:$0xff]  ;;  %v1289_v16 = vld [vmem:[%s1740_s1 + $0x18] sm:$0xff]  ;;  %v1288_v20 = vld [vmem:[%s1740_s1 + $0x10] sm:$0xff] }
   0x6   :  { %706 = vmatpush.bf16.msra.mxu0 %v1292_v4  ;;  %v1298_v13 = vld [vmem:[%s1740_s1 + $0x60] sm:$0xff]  ;;  %v1297_v17 = vld [vmem:[%s1740_s1 + $0x58] sm:$0xff]  ;;  %v1296_v21 = vld [vmem:[%s1740_s1 + $0x50] sm:$0xff] }
   0x7   :  { %725 = vmatpush.bf16.msra.mxu1 %v1300_v5  ;;  %v1306_v14 = vld [vmem:[%s1740_s1 + $0xa0] sm:$0xff]  ;;  %v1305_v18 = vld [vmem:[%s1740_s1 + $0x98] sm:$0xff]  ;;  %v1304_v22 = vld [vmem:[%s1740_s1 + $0x90] sm:$0xff] }
   0x8   :  { %744 = vmatpush.bf16.msra.mxu2 %v1308_v6  ;;  %v1314_v15 = vld [vmem:[%s1740_s1 + $0xe0] sm:$0xff]  ;;  %v1313_v19 = vld [vmem:[%s1740_s1 + $0xd8] sm:$0xff]  ;;  %v1312_v23 = vld [vmem:[%s1740_s1 + $0xd0] sm:$0xff] }
   0x9   :  { %763 = vmatpush.bf16.msra.mxu3 %v1316_v7  ;;  %v1287_v24 = vld [vmem:[%s1740_s1 + $0x8] sm:$0xff]  ;;  %v1286_v28 = vld [vmem:[%s1740_s1] sm:$0xff]  ;;  %v920_v39 = vld [vmem:[%s1741_s0 + $0x2c] sm:$0xf0] }
   0xa   :  { %707 = vmatpush.bf16.msra.mxu0 %v1291_v8  ;;  %v1295_v25 = vld [vmem:[%s1740_s1 + $0x48] sm:$0xff]  ;;  %v1294_v29 = vld [vmem:[%s1740_s1 + $0x40] sm:$0xff]  ;;  %v1325_v40 = vld [vmem:[%s1740_s1 + $0x138] sm:$0xff] }
   0xb   :  { %726 = vmatpush.bf16.msra.mxu1 %v1299_v9  ;;  %v1303_v26 = vld [vmem:[%s1740_s1 + $0x88] sm:$0xff]  ;;  %v1302_v30 = vld [vmem:[%s1740_s1 + $0x80] sm:$0xff]  ;;  %v1333_v41 = vld [vmem:[%s1740_s1 + $0x178] sm:$0xff] }
   0xc   :  { %745 = vmatpush.bf16.msra.mxu2 %v1307_v10  ;;  %v1311_v27 = vld [vmem:[%s1740_s1 + $0xc8] sm:$0xff]  ;;  %v1310_v31 = vld [vmem:[%s1740_s1 + $0xc0] sm:$0xff]  ;;  %v1341_v46 = vld [vmem:[%s1740_s1 + $0x1b8] sm:$0xff] }
   0xd   :  { %764 = vmatpush.bf16.msra.mxu3 %v1315_v11  ;;  %v910_v32 = vld [vmem:[%s1741_s0] sm:$0xf]  ;;  %v1272_v33 = vld [vmem:[%s1741_s0 + $0x20] sm:$0xf0]  ;;  %v912_v35 = vld [vmem:[%s1741_s0 + $0x24] sm:$0xf0] }
   0xe   :  { %708 = vmatpush.bf16.msra.mxu0 %v1290_v12  ;;  %v1268_v34 = vld [vmem:[%s1741_s0 + $0x4] sm:$0xf]  ;;  %v918_v36 = vld [vmem:[%s1741_s0 + $0x8] sm:$0xf]  ;;  %v1273_v37 = vld [vmem:[%s1741_s0 + $0x28] sm:$0xf0]  ;;  %v911_v42 = vor.u32 %v1272_v33, %v910_v32 }
   0xf   :  { %727 = vmatpush.bf16.msra.mxu1 %v1298_v13  ;;  %v1269_v38 = vld [vmem:[%s1741_s0 + $0xc] sm:$0xf]  ;;  %v915_v43 = vor.u32 %v1268_v34, %v912_v35  ;;  %v919_v44 = vor.u32 %v1273_v37, %v918_v36  ;;  %v1349_v47 = vld [vmem:[%s1740_s1 + $0x1f8] sm:$0xff]  ;;  %v1324_v48 = vld [vmem:[%s1740_s1 + $0x130] sm:$0xff] }
  0x10   :  { %746 = vmatpush.bf16.msra.mxu2 %v1306_v14  ;;  %v923_v45 = vor.u32 %v1269_v38, %v920_v39  ;;  %v1332_v49 = vld [vmem:[%s1740_s1 + $0x170] sm:$0xff]  ;;  %v1323_v52 = vld [vmem:[%s1740_s1 + $0x128] sm:$0xff]  ;;  %v1322_v56 = vld [vmem:[%s1740_s1 + $0x120] sm:$0xff] }
  0x11   :  { %765 = vmatpush.bf16.msra.mxu3 %v1314_v15  ;;  %v1340_v50 = vld [vmem:[%s1740_s1 + $0x1b0] sm:$0xff]  ;;  %v1331_v53 = vld [vmem:[%s1740_s1 + $0x168] sm:$0xff]  ;;  %v1330_v57 = vld [vmem:[%s1740_s1 + $0x160] sm:$0xff] }
  0x12   :  { %709 = vmatpush.bf16.msra.mxu0 %v1289_v16  ;;  %v1348_v51 = vld [vmem:[%s1740_s1 + $0x1f0] sm:$0xff]  ;;  %v1339_v54 = vld [vmem:[%s1740_s1 + $0x1a8] sm:$0xff]  ;;  %v1338_v58 = vld [vmem:[%s1740_s1 + $0x1a0] sm:$0xff] }
  0x13   :  { %728 = vmatpush.bf16.msra.mxu1 %v1297_v17  ;;  %v1347_v55 = vld [vmem:[%s1740_s1 + $0x1e8] sm:$0xff]  ;;  %v1346_v59 = vld [vmem:[%s1740_s1 + $0x1e0] sm:$0xff]  ;;  %v948_v63 = vld [vmem:[%s1741_s0 + $0x6c] sm:$0xf0] }
  0x14   :  { %747 = vmatpush.bf16.msra.mxu2 %v1305_v18  ;;  %v946_v60 = vld [vmem:[%s1741_s0 + $0x48] sm:$0xf]  ;;  %v1281_v61 = vld [vmem:[%s1741_s0 + $0x68] sm:$0xf0]  ;;  %v954_v0 = vld [vmem:[%s1741_s0 + $0x50] sm:$0xf] }
  0x15   :  { %766 = vmatpush.bf16.msra.mxu3 %v1313_v19  ;;  %v1277_v62 = vld [vmem:[%s1741_s0 + $0x4c] sm:$0xf]  ;;  %v1282_v1 = vld [vmem:[%s1741_s0 + $0x70] sm:$0xf0]  ;;  %v956_v3 = vld [vmem:[%s1741_s0 + $0x74] sm:$0xf0]  ;;  %v947_v6 = vor.u32 %v1281_v61, %v946_v60 }
  0x16   :  { %710 = vmatpush.bf16.msra.mxu0 %v1288_v20  ;;  %v1278_v2 = vld [vmem:[%s1741_s0 + $0x54] sm:$0xf]  ;;  %v1321_v4 = vld [vmem:[%s1740_s1 + $0x118] sm:$0xff]  ;;  %v951_v7 = vor.u32 %v1277_v62, %v948_v63  ;;  %v955_v8 = vor.u32 %v1282_v1, %v954_v0  ;;  %v1319_v16 = vld [vmem:[%s1740_s1 + $0x108] sm:$0xff] }
  0x17   :  { %729 = vmatpush.bf16.msra.mxu1 %v1296_v21  ;;  %v1329_v5 = vld [vmem:[%s1740_s1 + $0x158] sm:$0xff]  ;;  %v959_v9 = vor.u32 %v1278_v2, %v956_v3  ;;  %v1320_v12 = vld [vmem:[%s1740_s1 + $0x110] sm:$0xff]  ;;  %v1327_v17 = vld [vmem:[%s1740_s1 + $0x148] sm:$0xff] }
  0x18   :  { %748 = vmatpush.bf16.msra.mxu2 %v1304_v22  ;;  %v1337_v10 = vld [vmem:[%s1740_s1 + $0x198] sm:$0xff]  ;;  %v1328_v13 = vld [vmem:[%s1740_s1 + $0x150] sm:$0xff]  ;;  %v1335_v18 = vld [vmem:[%s1740_s1 + $0x188] sm:$0xff] }
  0x19   :  { %767 = vmatpush.bf16.msra.mxu3 %v1312_v23  ;;  %v1345_v11 = vld [vmem:[%s1740_s1 + $0x1d8] sm:$0xff]  ;;  %v1336_v14 = vld [vmem:[%s1740_s1 + $0x190] sm:$0xff]  ;;  %v1343_v19 = vld [vmem:[%s1740_s1 + $0x1c8] sm:$0xff] }
  0x1a   :  { %711 = vmatpush.bf16.msra.mxu0 %v1287_v24  ;;  %v1344_v15 = vld [vmem:[%s1740_s1 + $0x1d0] sm:$0xff]  ;;  %v1318_v20 = vld [vmem:[%s1740_s1 + $0x100] sm:$0xff]  ;;  %v1355_v38 = vld [vmem:[%s1740_s1 + $0x228] sm:$0xff] }
  0x1b   :  { %730 = vmatpush.bf16.msra.mxu1 %v1295_v25  ;;  %v1326_v21 = vld [vmem:[%s1740_s1 + $0x140] sm:$0xff]  ;;  %v926_v24 = vld [vmem:[%s1741_s0 + $0x10] sm:$0xf]  ;;  %v1274_v25 = vld [vmem:[%s1741_s0 + $0x30] sm:$0xf0] }
  0x1c   :  { %749 = vmatpush.bf16.msra.mxu2 %v1303_v26  ;;  %v1334_v22 = vld [vmem:[%s1740_s1 + $0x180] sm:$0xff]  ;;  %v1357_v26 = vld [vmem:[%s1740_s1 + $0x238] sm:$0xff]  ;;  %v927_v33 = vor.u32 %v1274_v25, %v926_v24  ;;  %v1356_v37 = vld [vmem:[%s1740_s1 + $0x230] sm:$0xff] }
  0x1d   :  { %768 = vmatpush.bf16.msra.mxu3 %v1311_v27  ;;  %v1342_v23 = vld [vmem:[%s1740_s1 + $0x1c0] sm:$0xff]  ;;  %v1270_v27 = vld [vmem:[%s1741_s0 + $0x14] sm:$0xf] }
  0x1e   :  { %712 = vmatpush.bf16.msra.mxu0 %v1286_v28  ;;  %v928_v28 = vld [vmem:[%s1741_s0 + $0x34] sm:$0xf0]  ;;  %v936_v32 = vld [vmem:[%s1741_s0 + $0x3c] sm:$0xf0] }
  0x1f   :  { %731 = vmatpush.bf16.msra.mxu1 %v1294_v29  ;;  %v934_v29 = vld [vmem:[%s1741_s0 + $0x18] sm:$0xf]  ;;  %v931_v34 = vor.u32 %v1270_v27, %v928_v28  ;;  %v1354_v39 = vld [vmem:[%s1740_s1 + $0x220] sm:$0xff] }
  0x20   :  { %750 = vmatpush.bf16.msra.mxu2 %v1302_v30  ;;  %v1275_v30 = vld [vmem:[%s1741_s0 + $0x38] sm:$0xf0] }
  0x21   :  { %769 = vmatpush.bf16.msra.mxu3 %v1310_v31  ;;  %713 = vmatmul.bf16.vlgmr.msra.gmra.mxu0 %v911_v42  ;;  %v1271_v31 = vld [vmem:[%s1741_s0 + $0x1c] sm:$0xf]  ;;  %v935_v35 = vor.u32 %v1275_v30, %v934_v29 }
  0x22   :  { %781 = vmatpush.bf16.msrb.mxu0 %v1325_v40  ;;  %732 = vmatmul.bf16.vlgmr.msra.gmra.mxu1 %v915_v43  ;;  %v939_v36 = vor.u32 %v1271_v31, %v936_v32  ;;  %v962_v40 = vld [vmem:[%s1741_s0 + $0x58] sm:$0xf]  ;;  %v1279_v42 = vld [vmem:[%s1741_s0 + $0x5c] sm:$0xf]  ;;  %v964_v43 = vld [vmem:[%s1741_s0 + $0x7c] sm:$0xf0] }
  0x23   :  { %800 = vmatpush.bf16.msrb.mxu1 %v1333_v41  ;;  %751 = vmatmul.bf16.vlgmr.msra.gmra.mxu2 %v919_v44  ;;  %v1283_v41 = vld [vmem:[%s1741_s0 + $0x78] sm:$0xf0]  ;;  %v970_v44 = vld [vmem:[%s1741_s0 + $0x60] sm:$0xf] }
  0x24   :  { %770 = vmatmul.bf16.vlgmr.msra.gmra.mxu3 %v923_v45  ;;  %819 = vmatpush.bf16.msrb.mxu2 %v1341_v46  ;;  %v1284_v45 = vld [vmem:[%s1741_s0 + $0x80] sm:$0xf0] }
  0x25   :  { %838 = vmatpush.bf16.msrb.mxu3 %v1349_v47  ;;  %v1280_v46 = vld [vmem:[%s1741_s0 + $0x64] sm:$0xf]  ;;  %v972_v47 = vld [vmem:[%s1741_s0 + $0x84] sm:$0xf0] }
  0x26   :  { %782 = vmatpush.bf16.msrb.mxu0 %v1324_v48  ;;  %v1353_v48 = vld [vmem:[%s1740_s1 + $0x218] sm:$0xff] }
  0x27   :  { %801 = vmatpush.bf16.msrb.mxu1 %v1332_v49  ;;  %v963_v49 = vor.u32 %v1283_v41, %v962_v40 }
  0x28   :  { %820 = vmatpush.bf16.msrb.mxu2 %v1340_v50  ;;  %v967_v50 = vor.u32 %v1279_v42, %v964_v43 }
  0x29   :  { %839 = vmatpush.bf16.msrb.mxu3 %v1348_v51  ;;  %v971_v51 = vor.u32 %v1284_v45, %v970_v44 }
  0x2a   :  { %783 = vmatpush.bf16.msrb.mxu0 %v1323_v52  ;;  %v975_v52 = vor.u32 %v1280_v46, %v972_v47 }
  0x2b   :  { %802 = vmatpush.bf16.msrb.mxu1 %v1331_v53  ;;  %v1352_v53 = vld [vmem:[%s1740_s1 + $0x210] sm:$0xff] }
  0x2c   :  { %821 = vmatpush.bf16.msrb.mxu2 %v1339_v54  ;;  %v1351_v54 = vld [vmem:[%s1740_s1 + $0x208] sm:$0xff] }
  0x2d   :  { %840 = vmatpush.bf16.msrb.mxu3 %v1347_v55  ;;  %v1350_v55 = vld [vmem:[%s1740_s1 + $0x200] sm:$0xff] }
  0x2e   :  { %784 = vmatpush.bf16.msrb.mxu0 %v1322_v56  ;;  %v942_v56 = vld [vmem:[%s1741_s0 + $0x20] sm:$0xf] }
  0x2f   :  { %803 = vmatpush.bf16.msrb.mxu1 %v1330_v57  ;;  %v1276_v57 = vld [vmem:[%s1741_s0 + $0x40] sm:$0xf0] }
  0x30   :  { %822 = vmatpush.bf16.msrb.mxu2 %v1338_v58  ;;  %v978_v58 = vld [vmem:[%s1741_s0 + $0x68] sm:$0xf]  ;;  %v943_v60 = vor.u32 %v1276_v57, %v942_v56 }
  0x31   :  { %841 = vmatpush.bf16.msrb.mxu3 %v1346_v59  ;;  %718 = vmatmul.bf16.gmra.mxu0 %v947_v6  ;;  %v1285_v59 = vld [vmem:[%s1741_s0 + $0x88] sm:$0xf0] }
  0x32   :  { %785 = vmatpush.bf16.msrb.mxu0 %v1321_v4  ;;  %737 = vmatmul.bf16.gmra.mxu1 %v951_v7  ;;  %v979_v61 = vor.u32 %v1285_v59, %v978_v58  ;;  %v1377_v58 = vld [vmem:[%s1742_s2] ss:$0 sm:$0xff] }
  0x33   :  { %804 = vmatpush.bf16.msrb.mxu1 %v1329_v5  ;;  %756 = vmatmul.bf16.gmra.mxu2 %v955_v8 }
  0x34   :  { %775 = vmatmul.bf16.gmra.mxu3 %v959_v9  ;;  %823 = vmatpush.bf16.msrb.mxu2 %v1337_v10 }
  0x35   :  { %842 = vmatpush.bf16.msrb.mxu3 %v1345_v11 }
  0x36   :  { %786 = vmatpush.bf16.msrb.mxu0 %v1320_v12 }
  0x37   :  { %805 = vmatpush.bf16.msrb.mxu1 %v1328_v13 }
  0x38   :  { %824 = vmatpush.bf16.msrb.mxu2 %v1336_v14 }
  0x39   :  { %843 = vmatpush.bf16.msrb.mxu3 %v1344_v15 }
  0x3a   :  { %787 = vmatpush.bf16.msrb.mxu0 %v1319_v16 }
  0x3b   :  { %806 = vmatpush.bf16.msrb.mxu1 %v1327_v17 }
  0x3c   :  { %825 = vmatpush.bf16.msrb.mxu2 %v1335_v18 }
  0x3d   :  { %844 = vmatpush.bf16.msrb.mxu3 %v1343_v19 }
  0x3e   :  { %788 = vmatpush.bf16.msrb.mxu0 %v1318_v20 }
  0x3f   :  { %807 = vmatpush.bf16.msrb.mxu1 %v1326_v21 }
  0x40   :  { %826 = vmatpush.bf16.msrb.mxu2 %v1334_v22 }
  0x41   :  { %845 = vmatpush.bf16.msrb.mxu3 %v1342_v23  ;;  %789 = vmatmul.bf16.vlgmr.msrb.gmra.mxu0 %v927_v33 }
  0x42   :  { %857 = vmatpush.bf16.msra.mxu0 %v1357_v26  ;;  %808 = vmatmul.bf16.vlgmr.msrb.gmra.mxu1 %v931_v34 }
  0x43   :  { %1369 = vmatpush.bf16.msra.mxu1 %v1357_v26  ;;  %827 = vmatmul.bf16.vlgmr.msrb.gmra.mxu2 %v935_v35 }
  0x44   :  { %846 = vmatmul.bf16.vlgmr.msrb.gmra.mxu3 %v939_v36 }
  0x46   :  { %858 = vmatpush.bf16.msra.mxu0 %v1356_v37 }
  0x47   :  { %1370 = vmatpush.bf16.msra.mxu1 %v1356_v37 }
  0x4a   :  { %859 = vmatpush.bf16.msra.mxu0 %v1355_v38 }
  0x4b   :  { %1371 = vmatpush.bf16.msra.mxu1 %v1355_v38 }
  0x4e   :  { %860 = vmatpush.bf16.msra.mxu0 %v1354_v39 }
  0x4f   :  { %1372 = vmatpush.bf16.msra.mxu1 %v1354_v39 }
  0x51   :  { %794 = vmatmul.bf16.gmra.mxu0 %v963_v49 }
  0x52   :  { %861 = vmatpush.bf16.msra.mxu0 %v1353_v48  ;;  %813 = vmatmul.bf16.gmra.mxu1 %v967_v50 }
  0x53   :  { %1373 = vmatpush.bf16.msra.mxu1 %v1353_v48  ;;  %832 = vmatmul.bf16.gmra.mxu2 %v971_v51 }
  0x54   :  { %851 = vmatmul.bf16.gmra.mxu3 %v975_v52 }
  0x56   :  { %862 = vmatpush.bf16.msra.mxu0 %v1352_v53 }
  0x57   :  { %1374 = vmatpush.bf16.msra.mxu1 %v1352_v53 }
  0x5a   :  { %863 = vmatpush.bf16.msra.mxu0 %v1351_v54 }
  0x5b   :  { %1375 = vmatpush.bf16.msra.mxu1 %v1351_v54 }
  0x5e   :  { %864 = vmatpush.bf16.msra.mxu0 %v1350_v55 }
  0x5f   :  { %1376 = vmatpush.bf16.msra.mxu1 %v1350_v55 }
  0x61   :  { %865 = vmatmul.bf16.vlgmr.msra.gmra.mxu0 %v943_v60 }
  0x62   :  { %870 = vmatmul.bf16.vlgmr.msra.gmra.mxu1 %v979_v61 }
  0x9e   :  { %v714_v62 = vpop.f32.mrf.mxu0 }
  0x9f   :  { %v733_v63 = vpop.f32.mrf.mxu1 }
  0xa0   :  { %v734_v20 = vadd.f32 %v733_v63, %v714_v62 }
  0xa6   :  { %v752_v0 = vpop.f32.mrf.mxu2  ;;  %v716_v2 = vpop.f32.mrf.mxu0 }
  0xa7   :  { %v771_v1 = vpop.f32.mrf.mxu3  ;;  %v735_v3 = vpop.f32.mrf.mxu1  ;;  %v753_v25 = vadd.f32 %v752_v0, %v734_v20  ;;  %v1378_v0 = vld [vmem:[%s1743_s3] ss:$0 sm:$0xff] }
  0xa8   :  { %v736_v29 = vadd.f32 %v735_v3, %v716_v2 }
  0xa9   :  { %v772_v28 = vadd.f32 %v771_v1, %v753_v25 }
  0xae   :  { %v754_v4 = vpop.f32.mrf.mxu2  ;;  %v719_v6 = vpop.f32.mrf.mxu0 }
  0xaf   :  { %v773_v5 = vpop.f32.mrf.mxu3  ;;  %v738_v7 = vpop.f32.mrf.mxu1  ;;  %v755_v32 = vadd.f32 %v754_v4, %v736_v29 }
  0xb0   :  { %v739_v21 = vadd.f32 %v738_v7, %v719_v6 }
  0xb1   :  { %v774_v39 = vadd.f32 %v773_v5, %v755_v32 }
  0xb6   :  { %v757_v8 = vpop.f32.mrf.mxu2  ;;  %v721_v10 = vpop.f32.mrf.mxu0 }
  0xb7   :  { %v776_v9 = vpop.f32.mrf.mxu3  ;;  %v740_v11 = vpop.f32.mrf.mxu1  ;;  %v758_v26 = vadd.f32 %v757_v8, %v739_v21 }
  0xb8   :  { %v741_v31 = vadd.f32 %v740_v11, %v721_v10 }
  0xb9   :  { %v777_v30 = vadd.f32 %v776_v9, %v758_v26 }
  0xbe   :  { %v759_v12 = vpop.f32.mrf.mxu2  ;;  %v790_v14 = vpop.f32.mrf.mxu0 }
  0xbf   :  { %v778_v13 = vpop.f32.mrf.mxu3  ;;  %v809_v15 = vpop.f32.mrf.mxu1  ;;  %v760_v33 = vadd.f32 %v759_v12, %v741_v31  ;;  %v791_v34 = vadd.f32 %v790_v14, %v772_v28 }
  0xc1   :  { %v779_v40 = vadd.f32 %v778_v13, %v760_v33  ;;  %v810_v41 = vadd.f32 %v809_v15, %v791_v34 }
  0xc6   :  { %v828_v16 = vpop.f32.mrf.mxu2  ;;  %v792_v18 = vpop.f32.mrf.mxu0 }
  0xc7   :  { %v847_v17 = vpop.f32.mrf.mxu3  ;;  %v811_v19 = vpop.f32.mrf.mxu1  ;;  %v829_v44 = vadd.f32 %v828_v16, %v810_v41  ;;  %v793_v45 = vadd.f32 %v792_v18, %v774_v39 }
  0xc9   :  { %v848_v51 = vadd.f32 %v847_v17, %v829_v44  ;;  %v812_v52 = vadd.f32 %v811_v19, %v793_v45 }
  0xce   :  { %v830_v22 = vpop.f32.mrf.mxu2  ;;  %v795_v23 = vpop.f32.mrf.mxu0 }
  0xcf   :  { %v814_v24 = vpop.f32.mrf.mxu1  ;;  %v849_v27 = vpop.f32.mrf.mxu3  ;;  %v796_v35 = vadd.f32 %v795_v23, %v777_v30  ;;  %v831_v55 = vadd.f32 %v830_v22, %v812_v52 }
  0xd1   :  { %v815_v42 = vadd.f32 %v814_v24, %v796_v35  ;;  %v850_v61 = vadd.f32 %v849_v27, %v831_v55 }
  0xd6   :  { %v833_v36 = vpop.f32.mrf.mxu2  ;;  %v797_v37 = vpop.f32.mrf.mxu0 }
  0xd7   :  { %v816_v38 = vpop.f32.mrf.mxu1  ;;  %v852_v43 = vpop.f32.mrf.mxu3  ;;  %v834_v46 = vadd.f32 %v833_v36, %v815_v42  ;;  %v798_v47 = vadd.f32 %v797_v37, %v779_v40 }
  0xd9   :  { %v853_v53 = vadd.f32 %v852_v43, %v834_v46  ;;  %v817_v54 = vadd.f32 %v816_v38, %v798_v47 }
  0xde   :  { %v835_v48 = vpop.f32.mrf.mxu2  ;;  %v866_v49 = vpop.f32.mrf.mxu0 }
  0xdf   :  { %v871_v50 = vpop.f32.mrf.mxu1  ;;  %v836_v56 = vadd.f32 %v835_v48, %v817_v54  ;;  %v867_v57 = vadd.f32 %v866_v49, %v848_v51  ;;  %v854_v60 = vpop.f32.mrf.mxu3 }
  0xe0   :  { %v872_v59 = vadd.f32 %v871_v50, %v853_v53 }
  0xe1   :  { %v855_v62 = vadd.f32 %v854_v60, %v836_v56  ;;  %v881_v63 = vmul.f32 %v1377_v58, %v867_v57 }
  0xe2   :  { %v883_v1 = vmul.f32 %v1377_v58, %v872_v59 }
  0xe3   :  { %v888_v6 = vadd.f32 %v1378_v0, %v881_v63 }
  0xe4   :  { %v890_v7 = vadd.f32 %v1378_v0, %v883_v1 }
  0xe5   :  { %v892_v12 = vmax.f32 %v888_v6, 0.0 }
  0xe6   :  { %v868_v2 = vpop.f32.mrf.mxu0  ;;  %v894_v13 = vmax.f32 %v890_v7, 0.0 }
  0xe7   :  { %v873_v3 = vpop.f32.mrf.mxu1  ;;  %v869_v4 = vadd.f32 %v868_v2, %v850_v61 }
  0xe8   :  { %v874_v5 = vadd.f32 %v873_v3, %v855_v62 }
  0xe9   :  { %v882_v8 = vmul.f32 %v1377_v58, %v869_v4 }
  0xea   :  { %v884_v9 = vmul.f32 %v1377_v58, %v874_v5 }
  0xeb   :  { %v889_v10 = vadd.f32 %v1378_v0, %v882_v8 }
  0xec   :  { %v891_v11 = vadd.f32 %v1378_v0, %v884_v9 }
  0xed   :  { %v893_v14 = vmax.f32 %v889_v10, 0.0 }
  0xee   :  { %v895_v15 = vmax.f32 %v891_v11, 0.0 }
  0xef   :  { %v1361_v16 = vpack.c.bf16 %v893_v14, %v892_v12 }
  0xf0   :  { %v1366_v17 = vpack.c.bf16 %v895_v15, %v894_v13 }
  0xf1   :  { %1362 = vst [vmem:[%s1744_s4] sm:$0xff] %v1361_v16  }
  0xf2   :  { %1368 = vst [vmem:[%s1744_s4 + $0x8] sm:$0xff] %v1366_v17  }

// kernel: forward.83
= control target key start
LH: loop header
LB: loop body
LE: loop exit
PB: predicated region body
PF: predicated region fallthrough
CT: control target
= control target key end

     0   :  { %10 = vsyncpa [#allocation3], 0  ;;  %s339_s0 = inlined_call_operand.vmem [shape: bf16[8,128], index: 0, kind: input, shape index: {}]   ;;  %s340_s1 = inlined_call_operand.hbm [shape: bf16[128,128], index: 1, kind: input, shape index: {}]   ;;  %s341_s2 = inlined_call_operand.hbm [shape: f32[1,128], index: 2, kind: input, shape index: {}]   ;;  %s342_s3 = inlined_call_operand.hbm [shape: f32[1,128], index: 3, kind: input, shape index: {}]   ;;  %s343_s4 = inlined_call_operand.vmem [shape: bf16[8,128], index: 4, kind: input, shape index: {}]   ;;  %s344_s5 = inlined_call_operand.vmem [shape: bf16[8,128], index: 5, kind: output, shape index: {}]  }
   0x1   :  { %11 = vsyncpa [#allocation5], 0  ;;  %s32_s20 = sshll.u32 %s341_s2, 4  ;;  %s286_s21 = smov [#allocation4]   ;;  %s33_s20 = int_to_ptr.hbm [resolvable:$true] %s32_s20 }
   0x2   :  { %s34_s22 = sshll.u32 %s286_s21, 4  ;;  %s18_s25 = sshll.u32 %s340_s1, 4  ;;  %s35_s22 = int_to_ptr.vmem [resolvable:$true] %s34_s22  ;;  %s19_s25 = int_to_ptr.hbm [resolvable:$true] %s18_s25 }
   0x3   :  { %37 = dma.hbm_to_vmem [thread:$0]  %s33_s20, 16, %s35_s22, [#allocation5]  }
   0x4   :  { %s287_s26 = smov [#allocation2]   ;;  %s288_s28 = smov 64  }
   0x5   :  { %s20_s27 = sshll.u32 %s287_s26, 4  ;;  %s289_s29 = smov 4   ;;  %s21_s27 = int_to_ptr.vmem [resolvable:$true] %s20_s27 }
   0x6   :  { %26 = dma.hbm_to_vmem [thread:$0]  %s19_s25, 1024, %s21_s27, [#allocation3], %s288_s28, %s288_s28, %s289_s29  }
   0x7   :  { %s43_s2 = sshll.u32 %s342_s3, 4  ;;  %s290_s7 = smov [#allocation6]   ;;  %s44_s2 = int_to_ptr.hbm [resolvable:$true] %s43_s2 }
   0x8   :  { %s45_s8 = sshll.u32 %s290_s7, 4  ;;  %s46_s8 = int_to_ptr.vmem [resolvable:$true] %s45_s8 }
   0x9   :  { %48 = dma.hbm_to_vmem [thread:$0]  %s44_s2, 16, %s46_s8, [#allocation5]  }
   0xa   :  { %282 = dma.done.wait [#allocation3], 1024  }
   0xb   :  { %283 = vsyncadd [#allocation3], 4294966272 }
   0xc   :  { %284 = dma.done.wait [#allocation5], 32  }
   0xd   :  { %285 = vsyncadd [#allocation5], 4294967264  ;;  %v202_v0 = vld [vmem:[#allocation2 + $0x38] sm:$0xff]  ;;  %v201_v1 = vld [vmem:[#allocation2 + $0x30] sm:$0xff] }
   0xe   :  { %128 = vmatpush.bf16.msra.mxu0 %v202_v0  ;;  %v200_v2 = vld [vmem:[#allocation2 + $0x28] sm:$0xff]  ;;  %v199_v3 = vld [vmem:[#allocation2 + $0x20] sm:$0xff]  ;;  %v198_v4 = vld [vmem:[#allocation2 + $0x18] sm:$0xff] }
   0xf   :  { %v197_v5 = vld [vmem:[#allocation2 + $0x10] sm:$0xff]  ;;  %v196_v6 = vld [vmem:[#allocation2 + $0x8] sm:$0xff]  ;;  %v195_v7 = vld [vmem:[#allocation2] sm:$0xff] }
  0x10   :  { %v63_v8 = vld [vmem:[%s339_s0] sm:$0xf] }
  0x11   :  { %v208_v9 = vld [vmem:[#allocation4] ss:$0 sm:$0xff]  ;;  %v209_v11 = vld [vmem:[#allocation6] ss:$0 sm:$0xff] }
  0x12   :  { %129 = vmatpush.bf16.msra.mxu0 %v201_v1  ;;  %v143_v10 = vld [vmem:[%s343_s4] sm:$0xf] }
  0x13   :  { %v152_v14 = vunpack.c.l.bf16 %v143_v10 }
  0x16   :  { %130 = vmatpush.bf16.msra.mxu0 %v200_v2 }
  0x1a   :  { %131 = vmatpush.bf16.msra.mxu0 %v199_v3 }
  0x1e   :  { %132 = vmatpush.bf16.msra.mxu0 %v198_v4 }
  0x22   :  { %133 = vmatpush.bf16.msra.mxu0 %v197_v5 }
  0x26   :  { %134 = vmatpush.bf16.msra.mxu0 %v196_v6 }
  0x2a   :  { %135 = vmatpush.bf16.msra.mxu0 %v195_v7 }
  0x2d   :  { %136 = vmatmul.bf16.vlgmr.msra.gmra.mxu0 %v63_v8 }
  0xaa   :  { %v137_v12 = vpop.f32.mrf.mxu0 }
  0xab   :  { %v147_v13 = vmul.f32 %v208_v9, %v137_v12 }
  0xad   :  { %v151_v15 = vadd.f32 %v209_v11, %v147_v13 }
  0xaf   :  { %v153_v16 = vadd.f32 %v152_v14, %v151_v15 }
  0xb1   :  { %v154_v17 = vmax.f32 %v153_v16, 0.0 }
  0xb2   :  { %v139_v18 = vpop.f32.mrf.mxu0 }
  0xb3   :  { %v155_v19 = vpack.c.bf16 %v154_v17, %v154_v17 }
  0xb5   :  { %156 = vst [vmem:[%s344_s5] sm:$0xf] %v155_v19 }
  0xb6   :  { %161 = vsyncpa [#allocation3], 1 }
  0xb7   :  { %162 = vsyncpa [#allocation5], 1 }

// kernel: forward.82
= control target key start
LH: loop header
LB: loop body
LE: loop exit
PB: predicated region body
PF: predicated region fallthrough
CT: control target
= control target key end

     0   :  { %9 = vsyncpa [#allocation3], 0  ;;  %s300_s0 = inlined_call_operand.vmem [shape: bf16[8,128], index: 0, kind: input, shape index: {}]   ;;  %s301_s1 = inlined_call_operand.vmem [shape: bf16[128,128], index: 1, kind: input, shape index: {}]   ;;  %s302_s2 = inlined_call_operand.hbm [shape: f32[1,128], index: 2, kind: input, shape index: {}]   ;;  %s303_s3 = inlined_call_operand.hbm [shape: f32[1,128], index: 3, kind: input, shape index: {}]   ;;  %s304_s4 = inlined_call_operand.vmem [shape: bf16[8,128], index: 4, kind: output, shape index: {}]  }
   0x1   :  { %s20_s17 = sshll.u32 %s302_s2, 4  ;;  %s21_s17 = int_to_ptr.hbm [resolvable:$true] %s20_s17 }
   0x2   :  { %10 = vsyncpa [#allocation5], 0  ;;  %s237_s18 = smov [#allocation2]   ;;  %s31_s22 = sshll.u32 %s303_s3, 4  ;;  %s32_s22 = int_to_ptr.hbm [resolvable:$true] %s31_s22 }
   0x3   :  { %s22_s19 = sshll.u32 %s237_s18, 4  ;;  %s238_s23 = smov [#allocation4]   ;;  %s23_s19 = int_to_ptr.vmem [resolvable:$true] %s22_s19 }
   0x4   :  { %25 = dma.hbm_to_vmem [thread:$0]  %s21_s17, 16, %s23_s19, [#allocation3]  }
   0x5   :  { %s33_s24 = sshll.u32 %s238_s23, 4  ;;  %s34_s24 = int_to_ptr.vmem [resolvable:$true] %s33_s24 }
   0x6   :  { %36 = dma.hbm_to_vmem [thread:$0]  %s32_s22, 16, %s34_s24, [#allocation5]  }
   0x7   :  { %233 = dma.done.wait [#allocation3], 16  }
   0x8   :  { %234 = vsyncadd [#allocation3], 4294967280 }
   0x9   :  { %235 = dma.done.wait [#allocation5], 16  }
   0xa   :  { %236 = vsyncadd [#allocation5], 4294967280  ;;  %v180_v0 = vld [vmem:[%s301_s1 + $0x38] sm:$0xff]  ;;  %v179_v1 = vld [vmem:[%s301_s1 + $0x30] sm:$0xff] }
   0xb   :  { %110 = vmatpush.bf16.msra.mxu0 %v180_v0  ;;  %v178_v2 = vld [vmem:[%s301_s1 + $0x28] sm:$0xff]  ;;  %v177_v3 = vld [vmem:[%s301_s1 + $0x20] sm:$0xff]  ;;  %v176_v4 = vld [vmem:[%s301_s1 + $0x18] sm:$0xff] }
   0xc   :  { %v175_v5 = vld [vmem:[%s301_s1 + $0x10] sm:$0xff]  ;;  %v174_v6 = vld [vmem:[%s301_s1 + $0x8] sm:$0xff]  ;;  %v173_v7 = vld [vmem:[%s301_s1] sm:$0xff] }
   0xd   :  { %v45_v8 = vld [vmem:[%s300_s0] sm:$0xf] }
   0xe   :  { %v183_v9 = vld [vmem:[#allocation2] ss:$0 sm:$0xff]  ;;  %v184_v10 = vld [vmem:[#allocation4] ss:$0 sm:$0xff] }
   0xf   :  { %111 = vmatpush.bf16.msra.mxu0 %v179_v1 }
  0x13   :  { %112 = vmatpush.bf16.msra.mxu0 %v178_v2 }
  0x17   :  { %113 = vmatpush.bf16.msra.mxu0 %v177_v3 }
  0x1b   :  { %114 = vmatpush.bf16.msra.mxu0 %v176_v4 }
  0x1f   :  { %115 = vmatpush.bf16.msra.mxu0 %v175_v5 }
  0x23   :  { %116 = vmatpush.bf16.msra.mxu0 %v174_v6 }
  0x27   :  { %117 = vmatpush.bf16.msra.mxu0 %v173_v7 }
  0x2a   :  { %118 = vmatmul.bf16.vlgmr.msra.gmra.mxu0 %v45_v8 }
  0xa7   :  { %v119_v11 = vpop.f32.mrf.mxu0 }
  0xa8   :  { %v128_v12 = vmul.f32 %v183_v9, %v119_v11 }
  0xaa   :  { %v132_v13 = vadd.f32 %v184_v10, %v128_v12 }
  0xac   :  { %v133_v14 = vpack.c.bf16 %v132_v13, %v132_v13 }
  0xae   :  { %134 = vst [vmem:[%s304_s4] sm:$0xf] %v133_v14 }
  0xaf   :  { %v121_v15 = vpop.f32.mrf.mxu0 }
  0xb0   :  { %139 = vsyncpa [#allocation3], 1 }
  0xb1   :  { %140 = vsyncpa [#allocation5], 1 }

// kernel: forward.81
= control target key start
LH: loop header
LB: loop body
LE: loop exit
PB: predicated region body
PF: predicated region fallthrough
CT: control target
= control target key end

     0   :  { %9 = vsyncpa [#allocation3], 0  ;;  %s1477_s0 = inlined_call_operand.vmem [shape: bf16[8,1152], index: 0, kind: input, shape index: {}]   ;;  %s1478_s1 = inlined_call_operand.vmem [shape: bf16[1152,128], index: 1, kind: input, shape index: {}]   ;;  %s1479_s2 = inlined_call_operand.hbm [shape: f32[1,128], index: 2, kind: input, shape index: {}]   ;;  %s1480_s3 = inlined_call_operand.hbm [shape: f32[1,128], index: 3, kind: input, shape index: {}]   ;;  %s1481_s4 = inlined_call_operand.vmem [shape: bf16[8,128], index: 4, kind: output, shape index: {}]  }
   0x1   :  { %s20_s17 = sshll.u32 %s1479_s2, 4  ;;  %s21_s17 = int_to_ptr.hbm [resolvable:$true] %s20_s17 }
   0x2   :  { %10 = vsyncpa [#allocation5], 0  ;;  %s1210_s18 = smov [#allocation2]   ;;  %s31_s22 = sshll.u32 %s1480_s3, 4  ;;  %s32_s22 = int_to_ptr.hbm [resolvable:$true] %s31_s22 }
   0x3   :  { %s22_s19 = sshll.u32 %s1210_s18, 4  ;;  %s1211_s23 = smov [#allocation4]   ;;  %s23_s19 = int_to_ptr.vmem [resolvable:$true] %s22_s19 }
   0x4   :  { %25 = dma.hbm_to_vmem [thread:$0]  %s21_s17, 16, %s23_s19, [#allocation3]  }
   0x5   :  { %s33_s24 = sshll.u32 %s1211_s23, 4  ;;  %s34_s24 = int_to_ptr.vmem [resolvable:$true] %s33_s24 }
   0x6   :  { %36 = dma.hbm_to_vmem [thread:$0]  %s32_s22, 16, %s34_s24, [#allocation5]  }
   0x7   :  { %1206 = dma.done.wait [#allocation3], 16  }
   0x8   :  { %1207 = vsyncadd [#allocation3], 4294967280 }
   0x9   :  { %1208 = dma.done.wait [#allocation5], 16  }
   0xa   :  { %1209 = vsyncadd [#allocation5], 4294967280  ;;  %v1089_v0 = vld [vmem:[%s1478_s1 + $0x38] sm:$0xff]  ;;  %v1088_v4 = vld [vmem:[%s1478_s1 + $0x30] sm:$0xff] }
   0xb   :  { %v1105_v1 = vld [vmem:[%s1478_s1 + $0xb8] sm:$0xff]  ;;  %658 = vmatpush.bf16.msra.mxu0 %v1089_v0  ;;  %v1104_v5 = vld [vmem:[%s1478_s1 + $0xb0] sm:$0xff]  ;;  %v1087_v8 = vld [vmem:[%s1478_s1 + $0x28] sm:$0xff] }
   0xc   :  { %v1113_v2 = vld [vmem:[%s1478_s1 + $0xf8] sm:$0xff]  ;;  %684 = vmatpush.bf16.msra.mxu2 %v1105_v1  ;;  %v1112_v6 = vld [vmem:[%s1478_s1 + $0xf0] sm:$0xff]  ;;  %v1103_v9 = vld [vmem:[%s1478_s1 + $0xa8] sm:$0xff] }
   0xd   :  { %v1097_v3 = vld [vmem:[%s1478_s1 + $0x78] sm:$0xff]  ;;  %697 = vmatpush.bf16.msra.mxu3 %v1113_v2  ;;  %v1096_v7 = vld [vmem:[%s1478_s1 + $0x70] sm:$0xff]  ;;  %v1111_v10 = vld [vmem:[%s1478_s1 + $0xe8] sm:$0xff] }
   0xe   :  { %671 = vmatpush.bf16.msra.mxu1 %v1097_v3  ;;  %v1095_v11 = vld [vmem:[%s1478_s1 + $0x68] sm:$0xff]  ;;  %v1086_v12 = vld [vmem:[%s1478_s1 + $0x20] sm:$0xff]  ;;  %v1085_v16 = vld [vmem:[%s1478_s1 + $0x18] sm:$0xff] }
   0xf   :  { %659 = vmatpush.bf16.msra.mxu0 %v1088_v4  ;;  %v1102_v13 = vld [vmem:[%s1478_s1 + $0xa0] sm:$0xff]  ;;  %v1101_v17 = vld [vmem:[%s1478_s1 + $0x98] sm:$0xff]  ;;  %v1084_v20 = vld [vmem:[%s1478_s1 + $0x10] sm:$0xff] }
  0x10   :  { %685 = vmatpush.bf16.msra.mxu2 %v1104_v5  ;;  %v1110_v14 = vld [vmem:[%s1478_s1 + $0xe0] sm:$0xff]  ;;  %v1109_v18 = vld [vmem:[%s1478_s1 + $0xd8] sm:$0xff]  ;;  %v1100_v21 = vld [vmem:[%s1478_s1 + $0x90] sm:$0xff] }
  0x11   :  { %698 = vmatpush.bf16.msra.mxu3 %v1112_v6  ;;  %v1094_v15 = vld [vmem:[%s1478_s1 + $0x60] sm:$0xff]  ;;  %v1093_v19 = vld [vmem:[%s1478_s1 + $0x58] sm:$0xff]  ;;  %v1108_v22 = vld [vmem:[%s1478_s1 + $0xd0] sm:$0xff] }
  0x12   :  { %672 = vmatpush.bf16.msra.mxu1 %v1096_v7  ;;  %v1092_v23 = vld [vmem:[%s1478_s1 + $0x50] sm:$0xff]  ;;  %v1083_v24 = vld [vmem:[%s1478_s1 + $0x8] sm:$0xff]  ;;  %v45_v29 = vld [vmem:[%s1477_s0] sm:$0xff] }
  0x13   :  { %660 = vmatpush.bf16.msra.mxu0 %v1087_v8  ;;  %v1099_v25 = vld [vmem:[%s1478_s1 + $0x88] sm:$0xff]  ;;  %v1082_v30 = vld [vmem:[%s1478_s1] sm:$0xff]  ;;  %v199_v33 = vunpack.c.l.b16 %v45_v29  ;;  %v1121_v34 = vld [vmem:[%s1478_s1 + $0x138] sm:$0xff]  ;;  %v200_v39 = vunpack.c.h.b16 %v45_v29 }
  0x14   :  { %686 = vmatpush.bf16.msra.mxu2 %v1103_v9  ;;  %v1107_v26 = vld [vmem:[%s1478_s1 + $0xc8] sm:$0xff]  ;;  %v1098_v31 = vld [vmem:[%s1478_s1 + $0x80] sm:$0xff]  ;;  %v1137_v35 = vld [vmem:[%s1478_s1 + $0x1b8] sm:$0xff] }
  0x15   :  { %699 = vmatpush.bf16.msra.mxu3 %v1111_v10  ;;  %v1091_v27 = vld [vmem:[%s1478_s1 + $0x48] sm:$0xff]  ;;  %v1106_v36 = vld [vmem:[%s1478_s1 + $0xc0] sm:$0xff]  ;;  %v1145_v40 = vld [vmem:[%s1478_s1 + $0x1f8] sm:$0xff]  ;;  %v208_v43 = vpack.c.b16 %v199_v33, %v199_v33  ;;  %v209_v47 = vpack.c.b16 %v200_v39, %v200_v39 }
  0x16   :  { %673 = vmatpush.bf16.msra.mxu1 %v1095_v11  ;;  %v46_v28 = vld [vmem:[%s1477_s0 + $0x8] sm:$0xff]  ;;  %v1090_v37 = vld [vmem:[%s1478_s1 + $0x40] sm:$0xff]  ;;  %v1129_v41 = vld [vmem:[%s1478_s1 + $0x178] sm:$0xff] }
  0x17   :  { %661 = vmatpush.bf16.msra.mxu0 %v1086_v12  ;;  %v201_v32 = vunpack.c.l.b16 %v46_v28  ;;  %v202_v38 = vunpack.c.h.b16 %v46_v28  ;;  %v1120_v44 = vld [vmem:[%s1478_s1 + $0x130] sm:$0xff]  ;;  %v1119_v50 = vld [vmem:[%s1478_s1 + $0x128] sm:$0xff]  ;;  %v1118_v54 = vld [vmem:[%s1478_s1 + $0x120] sm:$0xff] }
  0x18   :  { %687 = vmatpush.bf16.msra.mxu2 %v1102_v13  ;;  %v1136_v45 = vld [vmem:[%s1478_s1 + $0x1b0] sm:$0xff]  ;;  %v1135_v51 = vld [vmem:[%s1478_s1 + $0x1a8] sm:$0xff]  ;;  %v1134_v55 = vld [vmem:[%s1478_s1 + $0x1a0] sm:$0xff] }
  0x19   :  { %700 = vmatpush.bf16.msra.mxu3 %v1110_v14  ;;  %v210_v42 = vpack.c.b16 %v201_v32, %v201_v32  ;;  %v211_v46 = vpack.c.b16 %v202_v38, %v202_v38  ;;  %v1144_v48 = vld [vmem:[%s1478_s1 + $0x1f0] sm:$0xff]  ;;  %v1143_v52 = vld [vmem:[%s1478_s1 + $0x1e8] sm:$0xff]  ;;  %v1142_v56 = vld [vmem:[%s1478_s1 + $0x1e0] sm:$0xff] }
  0x1a   :  { %674 = vmatpush.bf16.msra.mxu1 %v1094_v15  ;;  %v1128_v49 = vld [vmem:[%s1478_s1 + $0x170] sm:$0xff]  ;;  %v1127_v53 = vld [vmem:[%s1478_s1 + $0x168] sm:$0xff]  ;;  %v1126_v57 = vld [vmem:[%s1478_s1 + $0x160] sm:$0xff] }
  0x1b   :  { %662 = vmatpush.bf16.msra.mxu0 %v1085_v16  ;;  %v1117_v58 = vld [vmem:[%s1478_s1 + $0x118] sm:$0xff]  ;;  %v1116_v62 = vld [vmem:[%s1478_s1 + $0x110] sm:$0xff]  ;;  %v1115_v2 = vld [vmem:[%s1478_s1 + $0x108] sm:$0xff] }
  0x1c   :  { %688 = vmatpush.bf16.msra.mxu2 %v1101_v17  ;;  %v1133_v59 = vld [vmem:[%s1478_s1 + $0x198] sm:$0xff]  ;;  %v1132_v63 = vld [vmem:[%s1478_s1 + $0x190] sm:$0xff]  ;;  %v1131_v3 = vld [vmem:[%s1478_s1 + $0x188] sm:$0xff] }
  0x1d   :  { %701 = vmatpush.bf16.msra.mxu3 %v1109_v18  ;;  %v1141_v60 = vld [vmem:[%s1478_s1 + $0x1d8] sm:$0xff]  ;;  %v1140_v0 = vld [vmem:[%s1478_s1 + $0x1d0] sm:$0xff]  ;;  %v1139_v6 = vld [vmem:[%s1478_s1 + $0x1c8] sm:$0xff] }
  0x1e   :  { %675 = vmatpush.bf16.msra.mxu1 %v1093_v19  ;;  %v1125_v61 = vld [vmem:[%s1478_s1 + $0x158] sm:$0xff]  ;;  %v1124_v1 = vld [vmem:[%s1478_s1 + $0x150] sm:$0xff]  ;;  %v1123_v7 = vld [vmem:[%s1478_s1 + $0x148] sm:$0xff] }
  0x1f   :  { %663 = vmatpush.bf16.msra.mxu0 %v1084_v20  ;;  %v48_v4 = vld [vmem:[%s1477_s0 + $0x18] sm:$0xff]  ;;  %v47_v5 = vld [vmem:[%s1477_s0 + $0x10] sm:$0xff]  ;;  %v1114_v10 = vld [vmem:[%s1478_s1 + $0x100] sm:$0xff] }
  0x20   :  { %689 = vmatpush.bf16.msra.mxu2 %v1100_v21  ;;  %v205_v8 = vunpack.c.l.b16 %v48_v4  ;;  %v203_v9 = vunpack.c.l.b16 %v47_v5  ;;  %v1130_v11 = vld [vmem:[%s1478_s1 + $0x180] sm:$0xff]  ;;  %v1153_v12 = vld [vmem:[%s1478_s1 + $0x238] sm:$0xff]  ;;  %v206_v13 = vunpack.c.h.b16 %v48_v4  ;;  %v204_v16 = vunpack.c.h.b16 %v47_v5  ;;  %v1152_v19 = vld [vmem:[%s1478_s1 + $0x230] sm:$0xff] }
  0x21   :  { %702 = vmatpush.bf16.msra.mxu3 %v1108_v22  ;;  %v1138_v14 = vld [vmem:[%s1478_s1 + $0x1c0] sm:$0xff]  ;;  %v1151_v22 = vld [vmem:[%s1478_s1 + $0x228] sm:$0xff] }
  0x22   :  { %676 = vmatpush.bf16.msra.mxu1 %v1092_v23  ;;  %v1122_v15 = vld [vmem:[%s1478_s1 + $0x140] sm:$0xff]  ;;  %v214_v17 = vpack.c.b16 %v205_v8, %v205_v8  ;;  %v212_v18 = vpack.c.b16 %v203_v9, %v203_v9  ;;  %v215_v20 = vpack.c.b16 %v206_v13, %v206_v13  ;;  %v213_v21 = vpack.c.b16 %v204_v16, %v204_v16 }
  0x23   :  { %664 = vmatpush.bf16.msra.mxu0 %v1083_v24  ;;  %v1150_v23 = vld [vmem:[%s1478_s1 + $0x220] sm:$0xff]  ;;  %v1149_v24 = vld [vmem:[%s1478_s1 + $0x218] sm:$0xff] }
  0x24   :  { %690 = vmatpush.bf16.msra.mxu2 %v1099_v25  ;;  %v1148_v25 = vld [vmem:[%s1478_s1 + $0x210] sm:$0xff]  ;;  %v1146_v29 = vld [vmem:[%s1478_s1 + $0x200] sm:$0xff] }
  0x25   :  { %703 = vmatpush.bf16.msra.mxu3 %v1107_v26  ;;  %v1147_v26 = vld [vmem:[%s1478_s1 + $0x208] sm:$0xff] }
  0x26   :  { %677 = vmatpush.bf16.msra.mxu1 %v1091_v27  ;;  %v49_v27 = vld [vmem:[%s1477_s0 + $0x20] sm:$0xf] }
  0x27   :  { %665 = vmatpush.bf16.msra.mxu0 %v1082_v30  ;;  %v207_v28 = vunpack.c.l.b16 %v49_v27 }
  0x28   :  { %691 = vmatpush.bf16.msra.mxu2 %v1098_v31 }
  0x29   :  { %704 = vmatpush.bf16.msra.mxu3 %v1106_v36  ;;  %v216_v30 = vpack.c.b16 %v207_v28, %v207_v28 }
  0x2a   :  { %678 = vmatpush.bf16.msra.mxu1 %v1090_v37  ;;  %666 = vmatmul.bf16.vlgmr.msra.gmra.mxu0 %v208_v43 }
  0x2b   :  { %710 = vmatpush.bf16.msrb.mxu0 %v1121_v34  ;;  %692 = vmatmul.bf16.vlgmr.msra.gmra.mxu2 %v210_v42 }
  0x2c   :  { %736 = vmatpush.bf16.msrb.mxu2 %v1137_v35  ;;  %705 = vmatmul.bf16.vlgmr.msra.gmra.mxu3 %v211_v46 }
  0x2d   :  { %749 = vmatpush.bf16.msrb.mxu3 %v1145_v40  ;;  %679 = vmatmul.bf16.vlgmr.msra.gmra.mxu1 %v209_v47 }
  0x2e   :  { %723 = vmatpush.bf16.msrb.mxu1 %v1129_v41 }
  0x2f   :  { %711 = vmatpush.bf16.msrb.mxu0 %v1120_v44 }
  0x30   :  { %737 = vmatpush.bf16.msrb.mxu2 %v1136_v45 }
  0x31   :  { %750 = vmatpush.bf16.msrb.mxu3 %v1144_v48 }
  0x32   :  { %724 = vmatpush.bf16.msrb.mxu1 %v1128_v49 }
  0x33   :  { %712 = vmatpush.bf16.msrb.mxu0 %v1119_v50 }
  0x34   :  { %738 = vmatpush.bf16.msrb.mxu2 %v1135_v51 }
  0x35   :  { %751 = vmatpush.bf16.msrb.mxu3 %v1143_v52 }
  0x36   :  { %725 = vmatpush.bf16.msrb.mxu1 %v1127_v53 }
  0x37   :  { %713 = vmatpush.bf16.msrb.mxu0 %v1118_v54  ;;  %v1156_v54 = vld [vmem:[#allocation2] ss:$0 sm:$0xff] }
  0x38   :  { %739 = vmatpush.bf16.msrb.mxu2 %v1134_v55 }
  0x39   :  { %752 = vmatpush.bf16.msrb.mxu3 %v1142_v56 }
  0x3a   :  { %726 = vmatpush.bf16.msrb.mxu1 %v1126_v57  ;;  %v1157_v57 = vld [vmem:[#allocation4] ss:$0 sm:$0xff] }
  0x3b   :  { %714 = vmatpush.bf16.msrb.mxu0 %v1117_v58 }
  0x3c   :  { %740 = vmatpush.bf16.msrb.mxu2 %v1133_v59 }
  0x3d   :  { %753 = vmatpush.bf16.msrb.mxu3 %v1141_v60 }
  0x3e   :  { %727 = vmatpush.bf16.msrb.mxu1 %v1125_v61 }
  0x3f   :  { %715 = vmatpush.bf16.msrb.mxu0 %v1116_v62 }
  0x40   :  { %741 = vmatpush.bf16.msrb.mxu2 %v1132_v63 }
  0x41   :  { %754 = vmatpush.bf16.msrb.mxu3 %v1140_v0 }
  0x42   :  { %728 = vmatpush.bf16.msrb.mxu1 %v1124_v1 }
  0x43   :  { %716 = vmatpush.bf16.msrb.mxu0 %v1115_v2 }
  0x44   :  { %742 = vmatpush.bf16.msrb.mxu2 %v1131_v3 }
  0x45   :  { %755 = vmatpush.bf16.msrb.mxu3 %v1139_v6 }
  0x46   :  { %729 = vmatpush.bf16.msrb.mxu1 %v1123_v7 }
  0x47   :  { %717 = vmatpush.bf16.msrb.mxu0 %v1114_v10 }
  0x48   :  { %743 = vmatpush.bf16.msrb.mxu2 %v1130_v11 }
  0x49   :  { %756 = vmatpush.bf16.msrb.mxu3 %v1138_v14 }
  0x4a   :  { %730 = vmatpush.bf16.msrb.mxu1 %v1122_v15  ;;  %718 = vmatmul.bf16.vlgmr.msrb.gmra.mxu0 %v212_v18 }
  0x4b   :  { %762 = vmatpush.bf16.msra.mxu0 %v1153_v12  ;;  %744 = vmatmul.bf16.vlgmr.msrb.gmra.mxu2 %v214_v17 }
  0x4c   :  { %757 = vmatmul.bf16.vlgmr.msrb.gmra.mxu3 %v215_v20 }
  0x4d   :  { %731 = vmatmul.bf16.vlgmr.msrb.gmra.mxu1 %v213_v21 }
  0x4f   :  { %763 = vmatpush.bf16.msra.mxu0 %v1152_v19 }
  0x53   :  { %764 = vmatpush.bf16.msra.mxu0 %v1151_v22 }
  0x57   :  { %765 = vmatpush.bf16.msra.mxu0 %v1150_v23 }
  0x5b   :  { %766 = vmatpush.bf16.msra.mxu0 %v1149_v24 }
  0x5f   :  { %767 = vmatpush.bf16.msra.mxu0 %v1148_v25 }
  0x63   :  { %768 = vmatpush.bf16.msra.mxu0 %v1147_v26 }
  0x67   :  { %769 = vmatpush.bf16.msra.mxu0 %v1146_v29 }
  0x6a   :  { %770 = vmatmul.bf16.vlgmr.msra.gmra.mxu0 %v216_v30 }
  0xa7   :  { %v667_v31 = vpop.f32.mrf.mxu0 }
  0xaa   :  { %v680_v32 = vpop.f32.mrf.mxu1 }
  0xab   :  { %v681_v41 = vadd.f32 %v680_v32, %v667_v31 }
  0xae   :  { %v693_v33 = vpop.f32.mrf.mxu2 }
  0xaf   :  { %v706_v34 = vpop.f32.mrf.mxu3  ;;  %v669_v35 = vpop.f32.mrf.mxu0  ;;  %v694_v43 = vadd.f32 %v693_v33, %v681_v41 }
  0xb1   :  { %v707_v47 = vadd.f32 %v706_v34, %v694_v43 }
  0xb2   :  { %v682_v36 = vpop.f32.mrf.mxu1 }
  0xb6   :  { %v695_v37 = vpop.f32.mrf.mxu2 }
  0xb7   :  { %v708_v38 = vpop.f32.mrf.mxu3 }
  0xc7   :  { %v719_v39 = vpop.f32.mrf.mxu0 }
  0xc8   :  { %v720_v49 = vadd.f32 %v719_v39, %v707_v47 }
  0xca   :  { %v732_v40 = vpop.f32.mrf.mxu1 }
  0xcb   :  { %v733_v51 = vadd.f32 %v732_v40, %v720_v49 }
  0xce   :  { %v745_v42 = vpop.f32.mrf.mxu2 }
  0xcf   :  { %v758_v44 = vpop.f32.mrf.mxu3  ;;  %v721_v45 = vpop.f32.mrf.mxu0  ;;  %v746_v52 = vadd.f32 %v745_v42, %v733_v51 }
  0xd1   :  { %v759_v53 = vadd.f32 %v758_v44, %v746_v52 }
  0xd2   :  { %v734_v46 = vpop.f32.mrf.mxu1 }
  0xd6   :  { %v747_v48 = vpop.f32.mrf.mxu2 }
  0xd7   :  { %v760_v50 = vpop.f32.mrf.mxu3 }
  0xe7   :  { %v771_v55 = vpop.f32.mrf.mxu0 }
  0xe8   :  { %v772_v56 = vadd.f32 %v771_v55, %v759_v53 }
  0xea   :  { %v780_v58 = vmul.f32 %v1156_v54, %v772_v56 }
  0xec   :  { %v784_v59 = vadd.f32 %v1157_v57, %v780_v58 }
  0xee   :  { %v785_v60 = vmax.f32 %v784_v59, 0.0 }
  0xef   :  { %v773_v61 = vpop.f32.mrf.mxu0 }
  0xf0   :  { %v786_v62 = vpack.c.bf16 %v785_v60, %v785_v60 }
  0xf2   :  { %787 = vst [vmem:[%s1481_s4] sm:$0xf] %v786_v62 }
  0xf3   :  { %792 = vsyncpa [#allocation3], 1 }
  0xf4   :  { %793 = vsyncpa [#allocation5], 1 }

// kernel: forward.84
= control target key start
LH: loop header
LB: loop body
LE: loop exit
PB: predicated region body
PF: predicated region fallthrough
CT: control target
= control target key end

     0   :  { %9 = vsyncpa [#allocation3], 0  ;;  %s325_s0 = inlined_call_operand.vmem [shape: bf16[8,128], index: 0, kind: input, shape index: {}]   ;;  %s326_s1 = inlined_call_operand.hbm [shape: bf16[128,128], index: 1, kind: input, shape index: {}]   ;;  %s327_s2 = inlined_call_operand.hbm [shape: f32[1,128], index: 2, kind: input, shape index: {}]   ;;  %s328_s3 = inlined_call_operand.hbm [shape: f32[1,128], index: 3, kind: input, shape index: {}]   ;;  %s329_s4 = inlined_call_operand.vmem [shape: bf16[8,128], index: 4, kind: output, shape index: {}]  }
   0x1   :  { %10 = vsyncpa [#allocation5], 0  ;;  %s31_s17 = sshll.u32 %s327_s2, 4  ;;  %s280_s18 = smov [#allocation4]   ;;  %s32_s17 = int_to_ptr.hbm [resolvable:$true] %s31_s17 }
   0x2   :  { %s33_s19 = sshll.u32 %s280_s18, 4  ;;  %s17_s22 = sshll.u32 %s326_s1, 4  ;;  %s34_s19 = int_to_ptr.vmem [resolvable:$true] %s33_s19  ;;  %s18_s22 = int_to_ptr.hbm [resolvable:$true] %s17_s22 }
   0x3   :  { %36 = dma.hbm_to_vmem [thread:$0]  %s32_s17, 16, %s34_s19, [#allocation5]  }
   0x4   :  { %s281_s23 = smov [#allocation2]   ;;  %s282_s25 = smov 64  }
   0x5   :  { %s19_s24 = sshll.u32 %s281_s23, 4  ;;  %s283_s26 = smov 4   ;;  %s20_s24 = int_to_ptr.vmem [resolvable:$true] %s19_s24 }
   0x6   :  { %25 = dma.hbm_to_vmem [thread:$0]  %s18_s22, 1024, %s20_s24, [#allocation3], %s282_s25, %s282_s25, %s283_s26  }
   0x7   :  { %s42_s2 = sshll.u32 %s328_s3, 4  ;;  %s284_s29 = smov [#allocation6]   ;;  %s43_s2 = int_to_ptr.hbm [resolvable:$true] %s42_s2 }
   0x8   :  { %s44_s30 = sshll.u32 %s284_s29, 4  ;;  %s45_s30 = int_to_ptr.vmem [resolvable:$true] %s44_s30 }
   0x9   :  { %47 = dma.hbm_to_vmem [thread:$0]  %s43_s2, 16, %s45_s30, [#allocation5]  }
   0xa   :  { %276 = dma.done.wait [#allocation3], 1024  }
   0xb   :  { %277 = vsyncadd [#allocation3], 4294966272 }
   0xc   :  { %278 = dma.done.wait [#allocation5], 32  }
   0xd   :  { %279 = vsyncadd [#allocation5], 4294967264  ;;  %v196_v0 = vld [vmem:[#allocation2 + $0x38] sm:$0xff]  ;;  %v195_v1 = vld [vmem:[#allocation2 + $0x30] sm:$0xff] }
   0xe   :  { %125 = vmatpush.bf16.msra.mxu0 %v196_v0  ;;  %v194_v2 = vld [vmem:[#allocation2 + $0x28] sm:$0xff]  ;;  %v193_v3 = vld [vmem:[#allocation2 + $0x20] sm:$0xff]  ;;  %v192_v4 = vld [vmem:[#allocation2 + $0x18] sm:$0xff] }
   0xf   :  { %v191_v5 = vld [vmem:[#allocation2 + $0x10] sm:$0xff]  ;;  %v190_v6 = vld [vmem:[#allocation2 + $0x8] sm:$0xff]  ;;  %v189_v7 = vld [vmem:[#allocation2] sm:$0xff] }
  0x10   :  { %v60_v8 = vld [vmem:[%s325_s0] sm:$0xf] }
  0x11   :  { %v202_v9 = vld [vmem:[#allocation4] ss:$0 sm:$0xff]  ;;  %v203_v10 = vld [vmem:[#allocation6] ss:$0 sm:$0xff] }
  0x12   :  { %126 = vmatpush.bf16.msra.mxu0 %v195_v1 }
  0x16   :  { %127 = vmatpush.bf16.msra.mxu0 %v194_v2 }
  0x1a   :  { %128 = vmatpush.bf16.msra.mxu0 %v193_v3 }
  0x1e   :  { %129 = vmatpush.bf16.msra.mxu0 %v192_v4 }
  0x22   :  { %130 = vmatpush.bf16.msra.mxu0 %v191_v5 }
  0x26   :  { %131 = vmatpush.bf16.msra.mxu0 %v190_v6 }
  0x2a   :  { %132 = vmatpush.bf16.msra.mxu0 %v189_v7 }
  0x2d   :  { %133 = vmatmul.bf16.vlgmr.msra.gmra.mxu0 %v60_v8 }
  0xaa   :  { %v134_v11 = vpop.f32.mrf.mxu0 }
  0xab   :  { %v143_v12 = vmul.f32 %v202_v9, %v134_v11 }
  0xad   :  { %v147_v13 = vadd.f32 %v203_v10, %v143_v12 }
  0xaf   :  { %v148_v14 = vmax.f32 %v147_v13, 0.0 }
  0xb1   :  { %v149_v15 = vpack.c.bf16 %v148_v14, %v148_v14 }
  0xb2   :  { %v136_v16 = vpop.f32.mrf.mxu0 }
  0xb3   :  { %150 = vst [vmem:[%s329_s4] sm:$0xf] %v149_v15 }
  0xb4   :  { %155 = vsyncpa [#allocation3], 1 }
  0xb5   :  { %156 = vsyncpa [#allocation5], 1 }

// kernel: forward.101
= control target key start
LH: loop header
LB: loop body
LE: loop exit
PB: predicated region body
PF: predicated region fallthrough
CT: control target
= control target key end

     0   :  { %s375_s1 = inlined_call_operand.vmem [shape: bf16[128,256], index: 1, kind: input, shape index: {}]   ;;  %s376_s0 = inlined_call_operand.vmem [shape: bf16[8,128], index: 0, kind: input, shape index: {}]   ;;  %s377_s2 = inlined_call_operand.vmem [shape: f32[1,256], index: 2, kind: input, shape index: {}]   ;;  %s378_s3 = inlined_call_operand.vmem [shape: f32[1,256], index: 3, kind: input, shape index: {}]   ;;  %s379_s4 = inlined_call_operand.vmem [shape: bf16[8,256], index: 4, kind: output, shape index: {}]  }
   0x1   :  { %v220_v0 = vld [vmem:[%s375_s1 + $0x70] sm:$0xf]  ;;  %v241_v1 = vld [vmem:[%s375_s1 + $0x74] sm:$0xf0]  ;;  %v240_v2 = vld [vmem:[%s375_s1 + $0x74] sm:$0xf] }
   0x2   :  { %v221_v3 = vor.u32 %v241_v1, %v220_v0  ;;  %v222_v4 = vld [vmem:[%s375_s1 + $0x78] sm:$0xf0]  ;;  %v212_v5 = vld [vmem:[%s375_s1 + $0x60] sm:$0xf]  ;;  %v239_v6 = vld [vmem:[%s375_s1 + $0x64] sm:$0xf0] }
   0x3   :  { %v225_v7 = vor.u32 %v240_v2, %v222_v4  ;;  %v238_v8 = vld [vmem:[%s375_s1 + $0x64] sm:$0xf]  ;;  %v214_v9 = vld [vmem:[%s375_s1 + $0x68] sm:$0xf0]  ;;  %v213_v10 = vor.u32 %v239_v6, %v212_v5  ;;  %v204_v12 = vld [vmem:[%s375_s1 + $0x50] sm:$0xf] }
   0x4   :  { %114 = vmatpush.bf16.msra.mxu0 %v221_v3  ;;  %v217_v11 = vor.u32 %v238_v8, %v214_v9  ;;  %v237_v13 = vld [vmem:[%s375_s1 + $0x54] sm:$0xf0]  ;;  %v236_v14 = vld [vmem:[%s375_s1 + $0x54] sm:$0xf]  ;;  %v206_v15 = vld [vmem:[%s375_s1 + $0x58] sm:$0xf0] }
   0x5   :  { %127 = vmatpush.bf16.msra.mxu1 %v225_v7  ;;  %v205_v16 = vor.u32 %v237_v13, %v204_v12  ;;  %v209_v17 = vor.u32 %v236_v14, %v206_v15  ;;  %v196_v18 = vld [vmem:[%s375_s1 + $0x40] sm:$0xf]  ;;  %v235_v19 = vld [vmem:[%s375_s1 + $0x44] sm:$0xf0]  ;;  %v234_v20 = vld [vmem:[%s375_s1 + $0x44] sm:$0xf] }
   0x6   :  { %v198_v21 = vld [vmem:[%s375_s1 + $0x48] sm:$0xf0]  ;;  %v197_v22 = vor.u32 %v235_v19, %v196_v18  ;;  %v188_v24 = vld [vmem:[%s375_s1 + $0x30] sm:$0xf]  ;;  %v233_v25 = vld [vmem:[%s375_s1 + $0x34] sm:$0xf0] }
   0x7   :  { %v201_v23 = vor.u32 %v234_v20, %v198_v21  ;;  %v232_v26 = vld [vmem:[%s375_s1 + $0x34] sm:$0xf]  ;;  %v190_v27 = vld [vmem:[%s375_s1 + $0x38] sm:$0xf0]  ;;  %v189_v28 = vor.u32 %v233_v25, %v188_v24  ;;  %v180_v30 = vld [vmem:[%s375_s1 + $0x20] sm:$0xf] }
   0x8   :  { %115 = vmatpush.bf16.msra.mxu0 %v213_v10  ;;  %v193_v29 = vor.u32 %v232_v26, %v190_v27  ;;  %v231_v31 = vld [vmem:[%s375_s1 + $0x24] sm:$0xf0]  ;;  %v230_v32 = vld [vmem:[%s375_s1 + $0x24] sm:$0xf]  ;;  %v182_v33 = vld [vmem:[%s375_s1 + $0x28] sm:$0xf0] }
   0x9   :  { %128 = vmatpush.bf16.msra.mxu1 %v217_v11  ;;  %v181_v34 = vor.u32 %v231_v31, %v180_v30  ;;  %v185_v35 = vor.u32 %v230_v32, %v182_v33  ;;  %v172_v36 = vld [vmem:[%s375_s1 + $0x10] sm:$0xf]  ;;  %v229_v37 = vld [vmem:[%s375_s1 + $0x14] sm:$0xf0]  ;;  %v228_v38 = vld [vmem:[%s375_s1 + $0x14] sm:$0xf] }
   0xa   :  { %v174_v39 = vld [vmem:[%s375_s1 + $0x18] sm:$0xf0]  ;;  %v173_v40 = vor.u32 %v229_v37, %v172_v36  ;;  %v164_v42 = vld [vmem:[%s375_s1] sm:$0xf]  ;;  %v227_v43 = vld [vmem:[%s375_s1 + $0x4] sm:$0xf0] }
   0xb   :  { %v177_v41 = vor.u32 %v228_v38, %v174_v39  ;;  %v226_v44 = vld [vmem:[%s375_s1 + $0x4] sm:$0xf]  ;;  %v166_v45 = vld [vmem:[%s375_s1 + $0x8] sm:$0xf0]  ;;  %v165_v46 = vor.u32 %v227_v43, %v164_v42  ;;  %v17_v48 = vld [vmem:[%s376_s0] sm:$0xf] }
   0xc   :  { %116 = vmatpush.bf16.msra.mxu0 %v205_v16  ;;  %v169_v47 = vor.u32 %v226_v44, %v166_v45  ;;  %v140_v49 = vld [vmem:[%s377_s2] sm:$0x3] }
   0xd   :  { %129 = vmatpush.bf16.msra.mxu1 %v209_v17  ;;  %v141_v50 = vld [vmem:[%s378_s3] sm:$0x3]  ;;  %v143_v51 = vperm.slane %v140_v49, 0  ;;  %v144_v52 = vperm.slane %v140_v49, 1 }
   0xe   :  { %v150_v53 = vperm.slane %v141_v50, 0  ;;  %v151_v55 = vperm.slane %v141_v50, 1 }
  0x10   :  { %117 = vmatpush.bf16.msra.mxu0 %v197_v22 }
  0x11   :  { %130 = vmatpush.bf16.msra.mxu1 %v201_v23 }
  0x14   :  { %118 = vmatpush.bf16.msra.mxu0 %v189_v28 }
  0x15   :  { %131 = vmatpush.bf16.msra.mxu1 %v193_v29 }
  0x18   :  { %119 = vmatpush.bf16.msra.mxu0 %v181_v34 }
  0x19   :  { %132 = vmatpush.bf16.msra.mxu1 %v185_v35 }
  0x1c   :  { %120 = vmatpush.bf16.msra.mxu0 %v173_v40 }
  0x1d   :  { %133 = vmatpush.bf16.msra.mxu1 %v177_v41 }
  0x20   :  { %121 = vmatpush.bf16.msra.mxu0 %v165_v46 }
  0x21   :  { %134 = vmatpush.bf16.msra.mxu1 %v169_v47 }
  0x23   :  { %122 = vmatmul.bf16.vlgmr.msra.gmra.mxu0 %v17_v48 }
  0x24   :  { %135 = vmatmul.bf16.vlgmr.msra.gmra.mxu1 %v17_v48 }
  0xa0   :  { %v123_v54 = vpop.f32.mrf.mxu0 }
  0xa1   :  { %v147_v56 = vmul.f32 %v143_v51, %v123_v54  ;;  %v136_v57 = vpop.f32.mrf.mxu1 }
  0xa2   :  { %v148_v58 = vmul.f32 %v144_v52, %v136_v57 }
  0xa3   :  { %v154_v59 = vadd.f32 %v150_v53, %v147_v56 }
  0xa4   :  { %v155_v60 = vadd.f32 %v151_v55, %v148_v58 }
  0xa6   :  { %v156_v61 = vpack.c.bf16 %v155_v60, %v154_v59 }
  0xa8   :  { %157 = vst [vmem:[%s379_s4] sm:$0xff] %v156_v61  ;;  %v125_v62 = vpop.f32.mrf.mxu0 }
  0xa9   :  { %v138_v63 = vpop.f32.mrf.mxu1 }

// kernel: forward.103
= control target key start
LH: loop header
LB: loop body
LE: loop exit
PB: predicated region body
PF: predicated region fallthrough
CT: control target
= control target key end

     0   :  { %9 = vsyncpa [#allocation3], 0  ;;  %s449_s0 = inlined_call_operand.vmem [shape: bf16[8,256], index: 0, kind: input, shape index: {}]   ;;  %s450_s1 = inlined_call_operand.vmem [shape: bf16[256,128], index: 1, kind: input, shape index: {}]   ;;  %s451_s2 = inlined_call_operand.hbm [shape: f32[1,128], index: 2, kind: input, shape index: {}]   ;;  %s452_s3 = inlined_call_operand.hbm [shape: f32[1,128], index: 3, kind: input, shape index: {}]   ;;  %s453_s4 = inlined_call_operand.vmem [shape: bf16[8,128], index: 4, kind: output, shape index: {}]  }
   0x1   :  { %s20_s17 = sshll.u32 %s451_s2, 4  ;;  %s21_s17 = int_to_ptr.hbm [resolvable:$true] %s20_s17 }
   0x2   :  { %10 = vsyncpa [#allocation5], 0  ;;  %s362_s18 = smov [#allocation2]   ;;  %s31_s22 = sshll.u32 %s452_s3, 4  ;;  %s32_s22 = int_to_ptr.hbm [resolvable:$true] %s31_s22 }
   0x3   :  { %s22_s19 = sshll.u32 %s362_s18, 4  ;;  %s363_s23 = smov [#allocation4]   ;;  %s23_s19 = int_to_ptr.vmem [resolvable:$true] %s22_s19 }
   0x4   :  { %25 = dma.hbm_to_vmem [thread:$0]  %s21_s17, 16, %s23_s19, [#allocation3]  }
   0x5   :  { %s33_s24 = sshll.u32 %s363_s23, 4  ;;  %s34_s24 = int_to_ptr.vmem [resolvable:$true] %s33_s24 }
   0x6   :  { %36 = dma.hbm_to_vmem [thread:$0]  %s32_s22, 16, %s34_s24, [#allocation5]  }
   0x7   :  { %358 = dma.done.wait [#allocation3], 16  }
   0x8   :  { %359 = vsyncadd [#allocation3], 4294967280 }
   0x9   :  { %360 = dma.done.wait [#allocation5], 16  }
   0xa   :  { %361 = vsyncadd [#allocation5], 4294967280  ;;  %v297_v0 = vld [vmem:[%s450_s1 + $0x38] sm:$0xff]  ;;  %v296_v2 = vld [vmem:[%s450_s1 + $0x30] sm:$0xff] }
   0xb   :  { %v305_v1 = vld [vmem:[%s450_s1 + $0x78] sm:$0xff]  ;;  %181 = vmatpush.bf16.msra.mxu0 %v297_v0  ;;  %v304_v3 = vld [vmem:[%s450_s1 + $0x70] sm:$0xff]  ;;  %v295_v4 = vld [vmem:[%s450_s1 + $0x28] sm:$0xff] }
   0xc   :  { %194 = vmatpush.bf16.msra.mxu1 %v305_v1  ;;  %v303_v5 = vld [vmem:[%s450_s1 + $0x68] sm:$0xff]  ;;  %v294_v6 = vld [vmem:[%s450_s1 + $0x20] sm:$0xff]  ;;  %v293_v8 = vld [vmem:[%s450_s1 + $0x18] sm:$0xff] }
   0xd   :  { %v302_v7 = vld [vmem:[%s450_s1 + $0x60] sm:$0xff]  ;;  %v301_v9 = vld [vmem:[%s450_s1 + $0x58] sm:$0xff]  ;;  %v292_v10 = vld [vmem:[%s450_s1 + $0x10] sm:$0xff] }
   0xe   :  { %v300_v11 = vld [vmem:[%s450_s1 + $0x50] sm:$0xff]  ;;  %v291_v12 = vld [vmem:[%s450_s1 + $0x8] sm:$0xff]  ;;  %v45_v14 = vld [vmem:[%s449_s0] sm:$0xff] }
   0xf   :  { %182 = vmatpush.bf16.msra.mxu0 %v296_v2  ;;  %v299_v13 = vld [vmem:[%s450_s1 + $0x48] sm:$0xff]  ;;  %v79_v15 = vunpack.c.l.b16 %v45_v14  ;;  %v80_v16 = vunpack.c.h.b16 %v45_v14  ;;  %v290_v17 = vld [vmem:[%s450_s1] sm:$0xff] }
  0x10   :  { %195 = vmatpush.bf16.msra.mxu1 %v304_v3  ;;  %v298_v18 = vld [vmem:[%s450_s1 + $0x40] sm:$0xff] }
  0x11   :  { %v81_v19 = vpack.c.b16 %v79_v15, %v79_v15  ;;  %v82_v20 = vpack.c.b16 %v80_v16, %v80_v16  ;;  %v308_v21 = vld [vmem:[#allocation2] ss:$0 sm:$0xff]  ;;  %v309_v25 = vld [vmem:[#allocation4] ss:$0 sm:$0xff] }
  0x13   :  { %183 = vmatpush.bf16.msra.mxu0 %v295_v4 }
  0x14   :  { %196 = vmatpush.bf16.msra.mxu1 %v303_v5 }
  0x17   :  { %184 = vmatpush.bf16.msra.mxu0 %v294_v6 }
  0x18   :  { %197 = vmatpush.bf16.msra.mxu1 %v302_v7 }
  0x1b   :  { %185 = vmatpush.bf16.msra.mxu0 %v293_v8 }
  0x1c   :  { %198 = vmatpush.bf16.msra.mxu1 %v301_v9 }
  0x1f   :  { %186 = vmatpush.bf16.msra.mxu0 %v292_v10 }
  0x20   :  { %199 = vmatpush.bf16.msra.mxu1 %v300_v11 }
  0x23   :  { %187 = vmatpush.bf16.msra.mxu0 %v291_v12 }
  0x24   :  { %200 = vmatpush.bf16.msra.mxu1 %v299_v13 }
  0x27   :  { %188 = vmatpush.bf16.msra.mxu0 %v290_v17 }
  0x28   :  { %201 = vmatpush.bf16.msra.mxu1 %v298_v18 }
  0x2a   :  { %189 = vmatmul.bf16.vlgmr.msra.gmra.mxu0 %v81_v19 }
  0x2b   :  { %202 = vmatmul.bf16.vlgmr.msra.gmra.mxu1 %v82_v20 }
  0xa7   :  { %v190_v22 = vpop.f32.mrf.mxu0 }
  0xa8   :  { %v203_v23 = vpop.f32.mrf.mxu1 }
  0xa9   :  { %v204_v24 = vadd.f32 %v203_v23, %v190_v22 }
  0xab   :  { %v212_v26 = vmul.f32 %v308_v21, %v204_v24 }
  0xad   :  { %v216_v27 = vadd.f32 %v309_v25, %v212_v26 }
  0xaf   :  { %v217_v28 = vmax.f32 %v216_v27, 0.0  ;;  %v192_v29 = vpop.f32.mrf.mxu0 }
  0xb0   :  { %v205_v30 = vpop.f32.mrf.mxu1 }
  0xb1   :  { %v218_v31 = vpack.c.bf16 %v217_v28, %v217_v28 }
  0xb3   :  { %219 = vst [vmem:[%s453_s4] sm:$0xf] %v218_v31 }
  0xb4   :  { %224 = vsyncpa [#allocation3], 1 }
  0xb5   :  { %225 = vsyncpa [#allocation5], 1 }

// kernel: forward.102
= control target key start
LH: loop header
LB: loop body
LE: loop exit
PB: predicated region body
PF: predicated region fallthrough
CT: control target
= control target key end

     0   :  { %s393_s1 = inlined_call_operand.vmem [shape: bf16[128,256], index: 1, kind: input, shape index: {}]   ;;  %s394_s0 = inlined_call_operand.vmem [shape: bf16[8,128], index: 0, kind: input, shape index: {}]   ;;  %s395_s2 = inlined_call_operand.vmem [shape: f32[1,256], index: 2, kind: input, shape index: {}]   ;;  %s396_s3 = inlined_call_operand.vmem [shape: f32[1,256], index: 3, kind: input, shape index: {}]   ;;  %s397_s4 = inlined_call_operand.vmem [shape: bf16[8,256], index: 4, kind: input, shape index: {}]   ;;  %s398_s5 = inlined_call_operand.vmem [shape: bf16[8,256], index: 5, kind: output, shape index: {}]  }
   0x1   :  { %v230_v0 = vld [vmem:[%s393_s1 + $0x70] sm:$0xf]  ;;  %v251_v1 = vld [vmem:[%s393_s1 + $0x74] sm:$0xf0]  ;;  %v250_v2 = vld [vmem:[%s393_s1 + $0x74] sm:$0xf] }
   0x2   :  { %v231_v3 = vor.u32 %v251_v1, %v230_v0  ;;  %v232_v4 = vld [vmem:[%s393_s1 + $0x78] sm:$0xf0]  ;;  %v222_v5 = vld [vmem:[%s393_s1 + $0x60] sm:$0xf]  ;;  %v249_v6 = vld [vmem:[%s393_s1 + $0x64] sm:$0xf0] }
   0x3   :  { %v235_v7 = vor.u32 %v250_v2, %v232_v4  ;;  %v248_v8 = vld [vmem:[%s393_s1 + $0x64] sm:$0xf]  ;;  %v224_v9 = vld [vmem:[%s393_s1 + $0x68] sm:$0xf0]  ;;  %v223_v10 = vor.u32 %v249_v6, %v222_v5  ;;  %v214_v12 = vld [vmem:[%s393_s1 + $0x50] sm:$0xf] }
   0x4   :  { %117 = vmatpush.bf16.msra.mxu0 %v231_v3  ;;  %v227_v11 = vor.u32 %v248_v8, %v224_v9  ;;  %v247_v13 = vld [vmem:[%s393_s1 + $0x54] sm:$0xf0]  ;;  %v246_v14 = vld [vmem:[%s393_s1 + $0x54] sm:$0xf]  ;;  %v216_v15 = vld [vmem:[%s393_s1 + $0x58] sm:$0xf0] }
   0x5   :  { %130 = vmatpush.bf16.msra.mxu1 %v235_v7  ;;  %v215_v16 = vor.u32 %v247_v13, %v214_v12  ;;  %v219_v17 = vor.u32 %v246_v14, %v216_v15  ;;  %v206_v18 = vld [vmem:[%s393_s1 + $0x40] sm:$0xf]  ;;  %v245_v19 = vld [vmem:[%s393_s1 + $0x44] sm:$0xf0]  ;;  %v244_v20 = vld [vmem:[%s393_s1 + $0x44] sm:$0xf] }
   0x6   :  { %v208_v21 = vld [vmem:[%s393_s1 + $0x48] sm:$0xf0]  ;;  %v207_v22 = vor.u32 %v245_v19, %v206_v18  ;;  %v198_v24 = vld [vmem:[%s393_s1 + $0x30] sm:$0xf]  ;;  %v243_v25 = vld [vmem:[%s393_s1 + $0x34] sm:$0xf0] }
   0x7   :  { %v211_v23 = vor.u32 %v244_v20, %v208_v21  ;;  %v242_v26 = vld [vmem:[%s393_s1 + $0x34] sm:$0xf]  ;;  %v200_v27 = vld [vmem:[%s393_s1 + $0x38] sm:$0xf0]  ;;  %v199_v28 = vor.u32 %v243_v25, %v198_v24  ;;  %v190_v30 = vld [vmem:[%s393_s1 + $0x20] sm:$0xf] }
   0x8   :  { %118 = vmatpush.bf16.msra.mxu0 %v223_v10  ;;  %v203_v29 = vor.u32 %v242_v26, %v200_v27  ;;  %v241_v31 = vld [vmem:[%s393_s1 + $0x24] sm:$0xf0]  ;;  %v240_v32 = vld [vmem:[%s393_s1 + $0x24] sm:$0xf]  ;;  %v192_v33 = vld [vmem:[%s393_s1 + $0x28] sm:$0xf0] }
   0x9   :  { %131 = vmatpush.bf16.msra.mxu1 %v227_v11  ;;  %v191_v34 = vor.u32 %v241_v31, %v190_v30  ;;  %v195_v35 = vor.u32 %v240_v32, %v192_v33  ;;  %v182_v36 = vld [vmem:[%s393_s1 + $0x10] sm:$0xf]  ;;  %v239_v37 = vld [vmem:[%s393_s1 + $0x14] sm:$0xf0]  ;;  %v238_v38 = vld [vmem:[%s393_s1 + $0x14] sm:$0xf] }
   0xa   :  { %v184_v39 = vld [vmem:[%s393_s1 + $0x18] sm:$0xf0]  ;;  %v183_v40 = vor.u32 %v239_v37, %v182_v36  ;;  %v174_v42 = vld [vmem:[%s393_s1] sm:$0xf]  ;;  %v237_v43 = vld [vmem:[%s393_s1 + $0x4] sm:$0xf0] }
   0xb   :  { %v187_v41 = vor.u32 %v238_v38, %v184_v39  ;;  %v236_v44 = vld [vmem:[%s393_s1 + $0x4] sm:$0xf]  ;;  %v176_v45 = vld [vmem:[%s393_s1 + $0x8] sm:$0xf0]  ;;  %v175_v46 = vor.u32 %v237_v43, %v174_v42  ;;  %v20_v48 = vld [vmem:[%s394_s0] sm:$0xf] }
   0xc   :  { %119 = vmatpush.bf16.msra.mxu0 %v215_v16  ;;  %v179_v47 = vor.u32 %v236_v44, %v176_v45  ;;  %v143_v49 = vld [vmem:[%s395_s2] sm:$0x3] }
   0xd   :  { %132 = vmatpush.bf16.msra.mxu1 %v219_v17  ;;  %v144_v50 = vld [vmem:[%s396_s3] sm:$0x3]  ;;  %v147_v51 = vperm.slane %v143_v49, 0  ;;  %v148_v53 = vperm.slane %v143_v49, 1 }
   0xe   :  { %v145_v52 = vld [vmem:[%s397_s4] sm:$0xff]  ;;  %v154_v54 = vperm.slane %v144_v50, 0  ;;  %v155_v56 = vperm.slane %v144_v50, 1 }
   0xf   :  { %v160_v58 = vunpack.c.l.bf16 %v145_v52  ;;  %v161_v61 = vunpack.c.h.bf16 %v145_v52 }
  0x10   :  { %120 = vmatpush.bf16.msra.mxu0 %v207_v22 }
  0x11   :  { %133 = vmatpush.bf16.msra.mxu1 %v211_v23 }
  0x14   :  { %121 = vmatpush.bf16.msra.mxu0 %v199_v28 }
  0x15   :  { %134 = vmatpush.bf16.msra.mxu1 %v203_v29 }
  0x18   :  { %122 = vmatpush.bf16.msra.mxu0 %v191_v34 }
  0x19   :  { %135 = vmatpush.bf16.msra.mxu1 %v195_v35 }
  0x1c   :  { %123 = vmatpush.bf16.msra.mxu0 %v183_v40 }
  0x1d   :  { %136 = vmatpush.bf16.msra.mxu1 %v187_v41 }
  0x20   :  { %124 = vmatpush.bf16.msra.mxu0 %v175_v46 }
  0x21   :  { %137 = vmatpush.bf16.msra.mxu1 %v179_v47 }
  0x23   :  { %125 = vmatmul.bf16.vlgmr.msra.gmra.mxu0 %v20_v48 }
  0x24   :  { %138 = vmatmul.bf16.vlgmr.msra.gmra.mxu1 %v20_v48 }
  0xa0   :  { %v126_v55 = vpop.f32.mrf.mxu0 }
  0xa1   :  { %v151_v57 = vmul.f32 %v147_v51, %v126_v55  ;;  %v139_v59 = vpop.f32.mrf.mxu1 }
  0xa2   :  { %v152_v60 = vmul.f32 %v148_v53, %v139_v59 }
  0xa3   :  { %v158_v62 = vadd.f32 %v154_v54, %v151_v57 }
  0xa4   :  { %v159_v63 = vadd.f32 %v155_v56, %v152_v60 }
  0xa5   :  { %v162_v0 = vadd.f32 %v160_v58, %v158_v62 }
  0xa6   :  { %v163_v1 = vadd.f32 %v161_v61, %v159_v63 }
  0xa7   :  { %v164_v2 = vmax.f32 %v162_v0, 0.0 }
  0xa8   :  { %v165_v3 = vmax.f32 %v163_v1, 0.0  ;;  %v128_v4 = vpop.f32.mrf.mxu0 }
  0xa9   :  { %v141_v5 = vpop.f32.mrf.mxu1 }
  0xaa   :  { %v166_v6 = vpack.c.bf16 %v165_v3, %v164_v2 }
  0xac   :  { %167 = vst [vmem:[%s398_s5] sm:$0xff] %v166_v6 }

// kernel: forward.106
= control target key start
LH: loop header
LB: loop body
LE: loop exit
PB: predicated region body
PF: predicated region fallthrough
CT: control target
= control target key end

     0   :  { %s363_s1 = inlined_call_operand.vmem [shape: bf16[256,128], index: 1, kind: input, shape index: {}]   ;;  %s364_s0 = inlined_call_operand.vmem [shape: bf16[8,256], index: 0, kind: input, shape index: {}]   ;;  %s365_s2 = inlined_call_operand.vmem [shape: f32[1,128], index: 2, kind: input, shape index: {}]   ;;  %s366_s3 = inlined_call_operand.vmem [shape: f32[1,128], index: 3, kind: input, shape index: {}]   ;;  %s367_s4 = inlined_call_operand.vmem [shape: bf16[8,128], index: 4, kind: output, shape index: {}]  }
   0x1   :  { %v267_v0 = vld [vmem:[%s363_s1 + $0x38] sm:$0xff]  ;;  %v266_v2 = vld [vmem:[%s363_s1 + $0x30] sm:$0xff]  ;;  %v265_v4 = vld [vmem:[%s363_s1 + $0x28] sm:$0xff] }
   0x2   :  { %v275_v1 = vld [vmem:[%s363_s1 + $0x78] sm:$0xff]  ;;  %153 = vmatpush.bf16.msra.mxu0 %v267_v0  ;;  %v274_v3 = vld [vmem:[%s363_s1 + $0x70] sm:$0xff]  ;;  %v273_v5 = vld [vmem:[%s363_s1 + $0x68] sm:$0xff] }
   0x3   :  { %166 = vmatpush.bf16.msra.mxu1 %v275_v1  ;;  %v264_v6 = vld [vmem:[%s363_s1 + $0x20] sm:$0xff]  ;;  %v263_v8 = vld [vmem:[%s363_s1 + $0x18] sm:$0xff]  ;;  %v262_v10 = vld [vmem:[%s363_s1 + $0x10] sm:$0xff] }
   0x4   :  { %v272_v7 = vld [vmem:[%s363_s1 + $0x60] sm:$0xff]  ;;  %v271_v9 = vld [vmem:[%s363_s1 + $0x58] sm:$0xff]  ;;  %v270_v11 = vld [vmem:[%s363_s1 + $0x50] sm:$0xff] }
   0x5   :  { %v261_v12 = vld [vmem:[%s363_s1 + $0x8] sm:$0xff]  ;;  %v17_v14 = vld [vmem:[%s364_s0] sm:$0xff] }
   0x6   :  { %154 = vmatpush.bf16.msra.mxu0 %v266_v2  ;;  %v269_v13 = vld [vmem:[%s363_s1 + $0x48] sm:$0xff]  ;;  %v51_v15 = vunpack.c.l.b16 %v17_v14  ;;  %v52_v16 = vunpack.c.h.b16 %v17_v14  ;;  %v260_v17 = vld [vmem:[%s363_s1] sm:$0xff] }
   0x7   :  { %167 = vmatpush.bf16.msra.mxu1 %v274_v3  ;;  %v268_v18 = vld [vmem:[%s363_s1 + $0x40] sm:$0xff] }
   0x8   :  { %v53_v19 = vpack.c.b16 %v51_v15, %v51_v15  ;;  %v54_v20 = vpack.c.b16 %v52_v16, %v52_v16  ;;  %v276_v21 = vld [vmem:[%s365_s2] ss:$0 sm:$0xff] }
   0x9   :  { %v277_v25 = vld [vmem:[%s366_s3] ss:$0 sm:$0xff] }
   0xa   :  { %155 = vmatpush.bf16.msra.mxu0 %v265_v4 }
   0xb   :  { %168 = vmatpush.bf16.msra.mxu1 %v273_v5 }
   0xe   :  { %156 = vmatpush.bf16.msra.mxu0 %v264_v6 }
   0xf   :  { %169 = vmatpush.bf16.msra.mxu1 %v272_v7 }
  0x12   :  { %157 = vmatpush.bf16.msra.mxu0 %v263_v8 }
  0x13   :  { %170 = vmatpush.bf16.msra.mxu1 %v271_v9 }
  0x16   :  { %158 = vmatpush.bf16.msra.mxu0 %v262_v10 }
  0x17   :  { %171 = vmatpush.bf16.msra.mxu1 %v270_v11 }
  0x1a   :  { %159 = vmatpush.bf16.msra.mxu0 %v261_v12 }
  0x1b   :  { %172 = vmatpush.bf16.msra.mxu1 %v269_v13 }
  0x1e   :  { %160 = vmatpush.bf16.msra.mxu0 %v260_v17 }
  0x1f   :  { %173 = vmatpush.bf16.msra.mxu1 %v268_v18 }
  0x21   :  { %161 = vmatmul.bf16.vlgmr.msra.gmra.mxu0 %v53_v19 }
  0x22   :  { %174 = vmatmul.bf16.vlgmr.msra.gmra.mxu1 %v54_v20 }
  0x9e   :  { %v162_v22 = vpop.f32.mrf.mxu0 }
  0x9f   :  { %v175_v23 = vpop.f32.mrf.mxu1 }
  0xa0   :  { %v176_v24 = vadd.f32 %v175_v23, %v162_v22 }
  0xa2   :  { %v184_v26 = vmul.f32 %v276_v21, %v176_v24 }
  0xa4   :  { %v188_v27 = vadd.f32 %v277_v25, %v184_v26 }
  0xa6   :  { %v189_v28 = vmax.f32 %v188_v27, 0.0  ;;  %v164_v29 = vpop.f32.mrf.mxu0 }
  0xa7   :  { %v177_v30 = vpop.f32.mrf.mxu1 }
  0xa8   :  { %v190_v31 = vpack.c.bf16 %v189_v28, %v189_v28 }
  0xaa   :  { %191 = vst [vmem:[%s367_s4] sm:$0xf] %v190_v31 }

// kernel: forward.109
= control target key start
LH: loop header
LB: loop body
LE: loop exit
PB: predicated region body
PF: predicated region fallthrough
CT: control target
= control target key end

     0   :  { %s305_s0 = inlined_call_operand.vmem [shape: bf16[2,1,256], index: 0, kind: input, shape index: {}]   ;;  %s306_s1 = inlined_call_operand.vmem [shape: f32[256,128], index: 1, kind: input, shape index: {}]   ;;  %s307_s2 = inlined_call_operand.vmem [shape: f32[1,128], index: 2, kind: input, shape index: {}]   ;;  %s308_s3 = inlined_call_operand.hbm [shape: f32[2,128], index: 3, kind: output, shape index: {}]  }
   0x1   :  { %v36_v0 = vld [vmem:[%s306_s1 + $0x78] sm:$0xff]  ;;  %v35_v1 = vld [vmem:[%s306_s1 + $0x70] sm:$0xff]  ;;  %v34_v4 = vld [vmem:[%s306_s1 + $0x68] sm:$0xff] }
   0x2   :  { %v52_v2 = vld [vmem:[%s306_s1 + $0xf8] sm:$0xff]  ;;  %68 = vmatpush.msra.mxu0 %v36_v0  ;;  %v51_v3 = vld [vmem:[%s306_s1 + $0xf0] sm:$0xff]  ;;  %v50_v5 = vld [vmem:[%s306_s1 + $0xe8] sm:$0xff] }
   0x3   :  { %88 = vmatpush.msra.mxu1 %v52_v2  ;;  %v33_v6 = vld [vmem:[%s306_s1 + $0x60] sm:$0xff]  ;;  %v32_v8 = vld [vmem:[%s306_s1 + $0x58] sm:$0xff]  ;;  %v31_v10 = vld [vmem:[%s306_s1 + $0x50] sm:$0xff] }
   0x4   :  { %69 = vmatpush.msra.mxu0 %v35_v1  ;;  %v49_v7 = vld [vmem:[%s306_s1 + $0xe0] sm:$0xff]  ;;  %v48_v9 = vld [vmem:[%s306_s1 + $0xd8] sm:$0xff]  ;;  %v47_v11 = vld [vmem:[%s306_s1 + $0xd0] sm:$0xff] }
   0x5   :  { %89 = vmatpush.msra.mxu1 %v51_v3  ;;  %v30_v12 = vld [vmem:[%s306_s1 + $0x48] sm:$0xff]  ;;  %v29_v14 = vld [vmem:[%s306_s1 + $0x40] sm:$0xff] }
   0x6   :  { %70 = vmatpush.msra.mxu0 %v34_v4  ;;  %v46_v13 = vld [vmem:[%s306_s1 + $0xc8] sm:$0xff]  ;;  %v45_v15 = vld [vmem:[%s306_s1 + $0xc0] sm:$0xff] }
   0x7   :  { %90 = vmatpush.msra.mxu1 %v50_v5 }
   0x8   :  { %71 = vmatpush.msra.mxu0 %v33_v6 }
   0x9   :  { %91 = vmatpush.msra.mxu1 %v49_v7 }
   0xa   :  { %72 = vmatpush.msra.mxu0 %v32_v8 }
   0xb   :  { %92 = vmatpush.msra.mxu1 %v48_v9 }
   0xc   :  { %73 = vmatpush.msra.mxu0 %v31_v10 }
   0xd   :  { %93 = vmatpush.msra.mxu1 %v47_v11 }
   0xe   :  { %8 = vsyncpa [#allocation3], 0  ;;  %74 = vmatpush.msra.mxu0 %v30_v12  ;;  %v28_v16 = vld [vmem:[%s306_s1 + $0x38] sm:$0xff]  ;;  %v27_v18 = vld [vmem:[%s306_s1 + $0x30] sm:$0xff]  ;;  %vm63_vm0 = vcmask 1041409   ;;  %s135_s29 = sshll.u32 %s308_s3, 4  ;;  %s136_s29 = int_to_ptr.hbm [resolvable:$true] %s135_s29 }
   0xf   :  { %94 = vmatpush.msra.mxu1 %v46_v13  ;;  %v44_v17 = vld [vmem:[%s306_s1 + $0xb8] sm:$0xff]  ;;  %v43_v19 = vld [vmem:[%s306_s1 + $0xb0] sm:$0xff]  ;;  %v26_v20 = vld [vmem:[%s306_s1 + $0x28] sm:$0xff] }
  0x10   :  { %75 = vmatpush.msra.mxu0 %v29_v14  ;;  %v42_v21 = vld [vmem:[%s306_s1 + $0xa8] sm:$0xff]  ;;  %v15_v22 = vld [vmem:[%s305_s0] sm:$0x3]  ;;  %v16_v23 = vld [vmem:[%s305_s0 + $0x2] sm:$0x3] }
  0x11   :  { %95 = vmatpush.msra.mxu1 %v45_v15  ;;  %v25_v24 = vld [vmem:[%s306_s1 + $0x20] sm:$0xff]  ;;  %v17_v26 = vunpack.c.l.bf16 %v15_v22  ;;  %v18_v27 = vunpack.c.l.bf16 %v16_v23  ;;  %v24_v28 = vld [vmem:[%s306_s1 + $0x18] sm:$0xff]  ;;  %v23_v30 = vld [vmem:[%s306_s1 + $0x10] sm:$0xff] }
  0x12   :  { %76 = vmatpush.msra.mxu0 %v28_v16  ;;  %v41_v25 = vld [vmem:[%s306_s1 + $0xa0] sm:$0xff]  ;;  %v40_v29 = vld [vmem:[%s306_s1 + $0x98] sm:$0xff]  ;;  %v39_v31 = vld [vmem:[%s306_s1 + $0x90] sm:$0xff] }
  0x13   :  { %96 = vmatpush.msra.mxu1 %v44_v17  ;;  %v59_v32 = vperm.slane %v17_v26, 0  ;;  %v61_v33 = vperm.slane %v18_v27, 0  ;;  %v60_v34 = vperm.slane %v17_v26, 2  ;;  %v62_v35 = vperm.slane %v18_v27, 2  ;;  %v22_v36 = vld [vmem:[%s306_s1 + $0x8] sm:$0xff]  ;;  %v21_v38 = vld [vmem:[%s306_s1] sm:$0xff] }
  0x14   :  { %77 = vmatpush.msra.mxu0 %v27_v18  ;;  %v38_v37 = vld [vmem:[%s306_s1 + $0x88] sm:$0xff]  ;;  %v37_v39 = vld [vmem:[%s306_s1 + $0x80] sm:$0xff]  ;;  %s176_s1 = smov [#allocation2]  }
  0x15   :  { %97 = vmatpush.msra.mxu1 %v43_v19  ;;  %v64_v40 = vsel %vm63_vm0, %v61_v33, %v59_v32  ;;  %v65_v41 = vsel %vm63_vm0, %v62_v35, %v60_v34  ;;  %v145_v42 = vld [vmem:[%s307_s2] ss:$0 sm:$0xff]  ;;  %s133_s27 = sshll.u32 %s176_s1, 4  ;;  %s134_s27 = int_to_ptr.vmem [resolvable:$true] %s133_s27 }
  0x16   :  { %78 = vmatpush.msra.mxu0 %v26_v20 }
  0x17   :  { %98 = vmatpush.msra.mxu1 %v42_v21 }
  0x18   :  { %79 = vmatpush.msra.mxu0 %v25_v24 }
  0x19   :  { %99 = vmatpush.msra.mxu1 %v41_v25 }
  0x1a   :  { %80 = vmatpush.msra.mxu0 %v24_v28 }
  0x1b   :  { %100 = vmatpush.msra.mxu1 %v40_v29 }
  0x1c   :  { %81 = vmatpush.msra.mxu0 %v23_v30 }
  0x1d   :  { %101 = vmatpush.msra.mxu1 %v39_v31 }
  0x1e   :  { %82 = vmatpush.msra.mxu0 %v22_v36 }
  0x1f   :  { %102 = vmatpush.msra.mxu1 %v38_v37 }
  0x20   :  { %83 = vmatpush.msra.mxu0 %v21_v38 }
  0x21   :  { %103 = vmatpush.msra.mxu1 %v37_v39  ;;  %84 = vmatmul.f32.vlgmr.msra.gmra.mxu0 %v64_v40 }
  0x22   :  { %104 = vmatmul.f32.vlgmr.msra.gmra.mxu1 %v65_v41 }
  0x9e   :  { %v85_v43 = vpop.f32.mrf.mxu0 }
  0x9f   :  { %v105_v44 = vpop.f32.mrf.mxu1  ;;  %v86_v45 = vadd.f32 %v145_v42, %v85_v43 }
  0xa1   :  { %v106_v46 = vadd.f32 %v105_v44, %v86_v45 }
  0xa3   :  { %v108_v47 = vsub.f32 0.0, %v106_v46 }
  0xa5   :  { %v109_v48 = vmul.f32 1.442695, %v108_v47 }
  0xa7   :  { %146 = vpow2.f32 %v109_v48 }
  0xad   :  { %v147_v49 = vpop.eup %146 }
  0xae   :  { %v111_v50 = vadd.f32 1.0, %v147_v49 }
  0xb0   :  { %148 = vrcp.f32 %v111_v50  ;;  %v123_v54 = vand.u32 2147483648, %v111_v50  ;;  %v121_v56 = vand.u32 2147483647, %v111_v50  ;;  %vm117_vm2 = vweird.f32 %v111_v50 }
  0xb2   :  { %v124_v58 = vor.u32 1.1754944e-38, %v123_v54  ;;  %vm122_vm4 = vcmp.eq.f32.partialorder %v121_v56, 8.507059e+37 }
  0xb6   :  { %v149_v51 = vpop.eup %148 }
  0xb7   :  { %v113_v52 = vmul.f32 %v149_v51, %v111_v50  ;;  %vm118_vm1 = vweird.f32 %v149_v51 }
  0xb8   :  { %vm119_vm3 = vmor %vm117_vm2, %vm118_vm1 }
  0xb9   :  { %v114_v53 = vsub.f32 1.0, %v113_v52 }
  0xbb   :  { %v115_v55 = vmul.f32 %v149_v51, %v114_v53 }
  0xbd   :  { %v116_v57 = vadd.f32 %v149_v51, %v115_v55 }
  0xbf   :  { %v120_v59 = vsel %vm119_vm3, %v149_v51, %v116_v57 }
  0xc0   :  { %v125_v60 = vsel %vm122_vm4, %v124_v58, %v120_v59 }
  0xc1   :  { %127 = vst [vmem:[#allocation2] sm:$0x3] %v125_v60 }
  0xc2   :  { %138 = dma.vmem_to_hbm [thread:$0]  %s134_s27, 32, %s136_s29, [#allocation3]  }
  0xc3   :  { %174 = dma.done.wait [#allocation3], 32  }
  0xc4   :  { %175 = vsyncadd [#allocation3], 4294967264 }
  0xc5   :  { %143 = vsyncpa [#allocation3], 1 }

// kernel: forward.104
= control target key start
LH: loop header
LB: loop body
LE: loop exit
PB: predicated region body
PF: predicated region fallthrough
CT: control target
= control target key end

     0   :  { %s1391_s1 = inlined_call_operand.vmem [shape: bf16[1152,128], index: 1, kind: input, shape index: {}]   ;;  %s1392_s0 = inlined_call_operand.vmem [shape: bf16[8,1152], index: 0, kind: input, shape index: {}]   ;;  %s1393_s2 = inlined_call_operand.vmem [shape: f32[1,128], index: 2, kind: input, shape index: {}]   ;;  %s1394_s3 = inlined_call_operand.vmem [shape: f32[1,128], index: 3, kind: input, shape index: {}]   ;;  %s1395_s4 = inlined_call_operand.vmem [shape: bf16[8,128], index: 4, kind: output, shape index: {}]  }
   0x1   :  { %v1059_v0 = vld [vmem:[%s1391_s1 + $0x38] sm:$0xff]  ;;  %v1058_v4 = vld [vmem:[%s1391_s1 + $0x30] sm:$0xff]  ;;  %v1057_v8 = vld [vmem:[%s1391_s1 + $0x28] sm:$0xff] }
   0x2   :  { %v1075_v1 = vld [vmem:[%s1391_s1 + $0xb8] sm:$0xff]  ;;  %630 = vmatpush.bf16.msra.mxu0 %v1059_v0  ;;  %v1074_v5 = vld [vmem:[%s1391_s1 + $0xb0] sm:$0xff]  ;;  %v1073_v9 = vld [vmem:[%s1391_s1 + $0xa8] sm:$0xff] }
   0x3   :  { %v1083_v2 = vld [vmem:[%s1391_s1 + $0xf8] sm:$0xff]  ;;  %656 = vmatpush.bf16.msra.mxu2 %v1075_v1  ;;  %v1082_v6 = vld [vmem:[%s1391_s1 + $0xf0] sm:$0xff]  ;;  %v1081_v10 = vld [vmem:[%s1391_s1 + $0xe8] sm:$0xff] }
   0x4   :  { %v1067_v3 = vld [vmem:[%s1391_s1 + $0x78] sm:$0xff]  ;;  %669 = vmatpush.bf16.msra.mxu3 %v1083_v2  ;;  %v1066_v7 = vld [vmem:[%s1391_s1 + $0x70] sm:$0xff]  ;;  %v1065_v11 = vld [vmem:[%s1391_s1 + $0x68] sm:$0xff] }
   0x5   :  { %643 = vmatpush.bf16.msra.mxu1 %v1067_v3  ;;  %v1056_v12 = vld [vmem:[%s1391_s1 + $0x20] sm:$0xff]  ;;  %v1055_v16 = vld [vmem:[%s1391_s1 + $0x18] sm:$0xff]  ;;  %v1054_v20 = vld [vmem:[%s1391_s1 + $0x10] sm:$0xff] }
   0x6   :  { %631 = vmatpush.bf16.msra.mxu0 %v1058_v4  ;;  %v1072_v13 = vld [vmem:[%s1391_s1 + $0xa0] sm:$0xff]  ;;  %v1071_v17 = vld [vmem:[%s1391_s1 + $0x98] sm:$0xff]  ;;  %v1070_v21 = vld [vmem:[%s1391_s1 + $0x90] sm:$0xff] }
   0x7   :  { %657 = vmatpush.bf16.msra.mxu2 %v1074_v5  ;;  %v1080_v14 = vld [vmem:[%s1391_s1 + $0xe0] sm:$0xff]  ;;  %v1079_v18 = vld [vmem:[%s1391_s1 + $0xd8] sm:$0xff]  ;;  %v1078_v22 = vld [vmem:[%s1391_s1 + $0xd0] sm:$0xff] }
   0x8   :  { %670 = vmatpush.bf16.msra.mxu3 %v1082_v6  ;;  %v1064_v15 = vld [vmem:[%s1391_s1 + $0x60] sm:$0xff]  ;;  %v1063_v19 = vld [vmem:[%s1391_s1 + $0x58] sm:$0xff]  ;;  %v1062_v23 = vld [vmem:[%s1391_s1 + $0x50] sm:$0xff] }
   0x9   :  { %644 = vmatpush.bf16.msra.mxu1 %v1066_v7  ;;  %v1053_v24 = vld [vmem:[%s1391_s1 + $0x8] sm:$0xff]  ;;  %v17_v29 = vld [vmem:[%s1392_s0] sm:$0xff]  ;;  %v1091_v34 = vld [vmem:[%s1391_s1 + $0x138] sm:$0xff] }
   0xa   :  { %632 = vmatpush.bf16.msra.mxu0 %v1057_v8  ;;  %v1069_v25 = vld [vmem:[%s1391_s1 + $0x88] sm:$0xff]  ;;  %v1052_v30 = vld [vmem:[%s1391_s1] sm:$0xff]  ;;  %v171_v33 = vunpack.c.l.b16 %v17_v29  ;;  %v1107_v35 = vld [vmem:[%s1391_s1 + $0x1b8] sm:$0xff]  ;;  %v172_v39 = vunpack.c.h.b16 %v17_v29 }
   0xb   :  { %658 = vmatpush.bf16.msra.mxu2 %v1073_v9  ;;  %v1077_v26 = vld [vmem:[%s1391_s1 + $0xc8] sm:$0xff]  ;;  %v1068_v31 = vld [vmem:[%s1391_s1 + $0x80] sm:$0xff]  ;;  %v1115_v40 = vld [vmem:[%s1391_s1 + $0x1f8] sm:$0xff] }
   0xc   :  { %671 = vmatpush.bf16.msra.mxu3 %v1081_v10  ;;  %v1061_v27 = vld [vmem:[%s1391_s1 + $0x48] sm:$0xff]  ;;  %v1076_v36 = vld [vmem:[%s1391_s1 + $0xc0] sm:$0xff]  ;;  %v1099_v41 = vld [vmem:[%s1391_s1 + $0x178] sm:$0xff]  ;;  %v180_v43 = vpack.c.b16 %v171_v33, %v171_v33  ;;  %v181_v47 = vpack.c.b16 %v172_v39, %v172_v39 }
   0xd   :  { %645 = vmatpush.bf16.msra.mxu1 %v1065_v11  ;;  %v18_v28 = vld [vmem:[%s1392_s0 + $0x8] sm:$0xff]  ;;  %v1060_v37 = vld [vmem:[%s1391_s1 + $0x40] sm:$0xff]  ;;  %v1090_v44 = vld [vmem:[%s1391_s1 + $0x130] sm:$0xff] }
   0xe   :  { %633 = vmatpush.bf16.msra.mxu0 %v1056_v12  ;;  %v173_v32 = vunpack.c.l.b16 %v18_v28  ;;  %v174_v38 = vunpack.c.h.b16 %v18_v28  ;;  %v1106_v45 = vld [vmem:[%s1391_s1 + $0x1b0] sm:$0xff]  ;;  %v1089_v50 = vld [vmem:[%s1391_s1 + $0x128] sm:$0xff]  ;;  %v1088_v54 = vld [vmem:[%s1391_s1 + $0x120] sm:$0xff] }
   0xf   :  { %659 = vmatpush.bf16.msra.mxu2 %v1072_v13  ;;  %v1114_v48 = vld [vmem:[%s1391_s1 + $0x1f0] sm:$0xff]  ;;  %v1105_v51 = vld [vmem:[%s1391_s1 + $0x1a8] sm:$0xff]  ;;  %v1104_v55 = vld [vmem:[%s1391_s1 + $0x1a0] sm:$0xff] }
  0x10   :  { %672 = vmatpush.bf16.msra.mxu3 %v1080_v14  ;;  %v182_v42 = vpack.c.b16 %v173_v32, %v173_v32  ;;  %v183_v46 = vpack.c.b16 %v174_v38, %v174_v38  ;;  %v1098_v49 = vld [vmem:[%s1391_s1 + $0x170] sm:$0xff]  ;;  %v1113_v52 = vld [vmem:[%s1391_s1 + $0x1e8] sm:$0xff]  ;;  %v1112_v56 = vld [vmem:[%s1391_s1 + $0x1e0] sm:$0xff] }
  0x11   :  { %646 = vmatpush.bf16.msra.mxu1 %v1064_v15  ;;  %v1097_v53 = vld [vmem:[%s1391_s1 + $0x168] sm:$0xff]  ;;  %v1096_v57 = vld [vmem:[%s1391_s1 + $0x160] sm:$0xff]  ;;  %v1087_v58 = vld [vmem:[%s1391_s1 + $0x118] sm:$0xff] }
  0x12   :  { %634 = vmatpush.bf16.msra.mxu0 %v1055_v16  ;;  %v1103_v59 = vld [vmem:[%s1391_s1 + $0x198] sm:$0xff]  ;;  %v1086_v62 = vld [vmem:[%s1391_s1 + $0x110] sm:$0xff]  ;;  %v1085_v2 = vld [vmem:[%s1391_s1 + $0x108] sm:$0xff] }
  0x13   :  { %660 = vmatpush.bf16.msra.mxu2 %v1071_v17  ;;  %v1111_v60 = vld [vmem:[%s1391_s1 + $0x1d8] sm:$0xff]  ;;  %v1102_v63 = vld [vmem:[%s1391_s1 + $0x190] sm:$0xff]  ;;  %v1101_v3 = vld [vmem:[%s1391_s1 + $0x188] sm:$0xff] }
  0x14   :  { %673 = vmatpush.bf16.msra.mxu3 %v1079_v18  ;;  %v1095_v61 = vld [vmem:[%s1391_s1 + $0x158] sm:$0xff]  ;;  %v1110_v0 = vld [vmem:[%s1391_s1 + $0x1d0] sm:$0xff]  ;;  %v1109_v6 = vld [vmem:[%s1391_s1 + $0x1c8] sm:$0xff] }
  0x15   :  { %647 = vmatpush.bf16.msra.mxu1 %v1063_v19  ;;  %v1094_v1 = vld [vmem:[%s1391_s1 + $0x150] sm:$0xff]  ;;  %v20_v4 = vld [vmem:[%s1392_s0 + $0x18] sm:$0xff]  ;;  %v1093_v7 = vld [vmem:[%s1391_s1 + $0x148] sm:$0xff] }
  0x16   :  { %635 = vmatpush.bf16.msra.mxu0 %v1054_v20  ;;  %v19_v5 = vld [vmem:[%s1392_s0 + $0x10] sm:$0xff]  ;;  %v177_v8 = vunpack.c.l.b16 %v20_v4  ;;  %v1084_v10 = vld [vmem:[%s1391_s1 + $0x100] sm:$0xff]  ;;  %v1123_v12 = vld [vmem:[%s1391_s1 + $0x238] sm:$0xff]  ;;  %v178_v13 = vunpack.c.h.b16 %v20_v4 }
  0x17   :  { %661 = vmatpush.bf16.msra.mxu2 %v1070_v21  ;;  %v175_v9 = vunpack.c.l.b16 %v19_v5  ;;  %v1100_v11 = vld [vmem:[%s1391_s1 + $0x180] sm:$0xff]  ;;  %v176_v16 = vunpack.c.h.b16 %v19_v5  ;;  %v1122_v19 = vld [vmem:[%s1391_s1 + $0x230] sm:$0xff] }
  0x18   :  { %674 = vmatpush.bf16.msra.mxu3 %v1078_v22  ;;  %v1108_v14 = vld [vmem:[%s1391_s1 + $0x1c0] sm:$0xff]  ;;  %v186_v17 = vpack.c.b16 %v177_v8, %v177_v8  ;;  %v187_v20 = vpack.c.b16 %v178_v13, %v178_v13  ;;  %v1121_v22 = vld [vmem:[%s1391_s1 + $0x228] sm:$0xff] }
  0x19   :  { %648 = vmatpush.bf16.msra.mxu1 %v1062_v23  ;;  %v1092_v15 = vld [vmem:[%s1391_s1 + $0x140] sm:$0xff]  ;;  %v184_v18 = vpack.c.b16 %v175_v9, %v175_v9  ;;  %v185_v21 = vpack.c.b16 %v176_v16, %v176_v16 }
  0x1a   :  { %636 = vmatpush.bf16.msra.mxu0 %v1053_v24  ;;  %v1120_v23 = vld [vmem:[%s1391_s1 + $0x220] sm:$0xff]  ;;  %v1119_v24 = vld [vmem:[%s1391_s1 + $0x218] sm:$0xff] }
  0x1b   :  { %662 = vmatpush.bf16.msra.mxu2 %v1069_v25  ;;  %v1118_v25 = vld [vmem:[%s1391_s1 + $0x210] sm:$0xff]  ;;  %v1116_v29 = vld [vmem:[%s1391_s1 + $0x200] sm:$0xff] }
  0x1c   :  { %675 = vmatpush.bf16.msra.mxu3 %v1077_v26  ;;  %v1117_v26 = vld [vmem:[%s1391_s1 + $0x208] sm:$0xff] }
  0x1d   :  { %649 = vmatpush.bf16.msra.mxu1 %v1061_v27  ;;  %v21_v27 = vld [vmem:[%s1392_s0 + $0x20] sm:$0xf] }
  0x1e   :  { %637 = vmatpush.bf16.msra.mxu0 %v1052_v30  ;;  %v179_v28 = vunpack.c.l.b16 %v21_v27 }
  0x1f   :  { %663 = vmatpush.bf16.msra.mxu2 %v1068_v31 }
  0x20   :  { %676 = vmatpush.bf16.msra.mxu3 %v1076_v36  ;;  %v188_v30 = vpack.c.b16 %v179_v28, %v179_v28 }
  0x21   :  { %650 = vmatpush.bf16.msra.mxu1 %v1060_v37  ;;  %638 = vmatmul.bf16.vlgmr.msra.gmra.mxu0 %v180_v43 }
  0x22   :  { %682 = vmatpush.bf16.msrb.mxu0 %v1091_v34  ;;  %664 = vmatmul.bf16.vlgmr.msra.gmra.mxu2 %v182_v42 }
  0x23   :  { %708 = vmatpush.bf16.msrb.mxu2 %v1107_v35  ;;  %677 = vmatmul.bf16.vlgmr.msra.gmra.mxu3 %v183_v46 }
  0x24   :  { %721 = vmatpush.bf16.msrb.mxu3 %v1115_v40  ;;  %651 = vmatmul.bf16.vlgmr.msra.gmra.mxu1 %v181_v47 }
  0x25   :  { %695 = vmatpush.bf16.msrb.mxu1 %v1099_v41 }
  0x26   :  { %683 = vmatpush.bf16.msrb.mxu0 %v1090_v44 }
  0x27   :  { %709 = vmatpush.bf16.msrb.mxu2 %v1106_v45 }
  0x28   :  { %722 = vmatpush.bf16.msrb.mxu3 %v1114_v48 }
  0x29   :  { %696 = vmatpush.bf16.msrb.mxu1 %v1098_v49 }
  0x2a   :  { %684 = vmatpush.bf16.msrb.mxu0 %v1089_v50 }
  0x2b   :  { %710 = vmatpush.bf16.msrb.mxu2 %v1105_v51 }
  0x2c   :  { %723 = vmatpush.bf16.msrb.mxu3 %v1113_v52 }
  0x2d   :  { %697 = vmatpush.bf16.msrb.mxu1 %v1097_v53 }
  0x2e   :  { %685 = vmatpush.bf16.msrb.mxu0 %v1088_v54  ;;  %v1124_v54 = vld [vmem:[%s1393_s2] ss:$0 sm:$0xff] }
  0x2f   :  { %711 = vmatpush.bf16.msrb.mxu2 %v1104_v55 }
  0x30   :  { %724 = vmatpush.bf16.msrb.mxu3 %v1112_v56 }
  0x31   :  { %698 = vmatpush.bf16.msrb.mxu1 %v1096_v57  ;;  %v1125_v57 = vld [vmem:[%s1394_s3] ss:$0 sm:$0xff] }
  0x32   :  { %686 = vmatpush.bf16.msrb.mxu0 %v1087_v58 }
  0x33   :  { %712 = vmatpush.bf16.msrb.mxu2 %v1103_v59 }
  0x34   :  { %725 = vmatpush.bf16.msrb.mxu3 %v1111_v60 }
  0x35   :  { %699 = vmatpush.bf16.msrb.mxu1 %v1095_v61 }
  0x36   :  { %687 = vmatpush.bf16.msrb.mxu0 %v1086_v62 }
  0x37   :  { %713 = vmatpush.bf16.msrb.mxu2 %v1102_v63 }
  0x38   :  { %726 = vmatpush.bf16.msrb.mxu3 %v1110_v0 }
  0x39   :  { %700 = vmatpush.bf16.msrb.mxu1 %v1094_v1 }
  0x3a   :  { %688 = vmatpush.bf16.msrb.mxu0 %v1085_v2 }
  0x3b   :  { %714 = vmatpush.bf16.msrb.mxu2 %v1101_v3 }
  0x3c   :  { %727 = vmatpush.bf16.msrb.mxu3 %v1109_v6 }
  0x3d   :  { %701 = vmatpush.bf16.msrb.mxu1 %v1093_v7 }
  0x3e   :  { %689 = vmatpush.bf16.msrb.mxu0 %v1084_v10 }
  0x3f   :  { %715 = vmatpush.bf16.msrb.mxu2 %v1100_v11 }
  0x40   :  { %728 = vmatpush.bf16.msrb.mxu3 %v1108_v14 }
  0x41   :  { %702 = vmatpush.bf16.msrb.mxu1 %v1092_v15  ;;  %690 = vmatmul.bf16.vlgmr.msrb.gmra.mxu0 %v184_v18 }
  0x42   :  { %734 = vmatpush.bf16.msra.mxu0 %v1123_v12  ;;  %716 = vmatmul.bf16.vlgmr.msrb.gmra.mxu2 %v186_v17 }
  0x43   :  { %729 = vmatmul.bf16.vlgmr.msrb.gmra.mxu3 %v187_v20 }
  0x44   :  { %703 = vmatmul.bf16.vlgmr.msrb.gmra.mxu1 %v185_v21 }
  0x46   :  { %735 = vmatpush.bf16.msra.mxu0 %v1122_v19 }
  0x4a   :  { %736 = vmatpush.bf16.msra.mxu0 %v1121_v22 }
  0x4e   :  { %737 = vmatpush.bf16.msra.mxu0 %v1120_v23 }
  0x52   :  { %738 = vmatpush.bf16.msra.mxu0 %v1119_v24 }
  0x56   :  { %739 = vmatpush.bf16.msra.mxu0 %v1118_v25 }
  0x5a   :  { %740 = vmatpush.bf16.msra.mxu0 %v1117_v26 }
  0x5e   :  { %741 = vmatpush.bf16.msra.mxu0 %v1116_v29 }
  0x61   :  { %742 = vmatmul.bf16.vlgmr.msra.gmra.mxu0 %v188_v30 }
  0x9e   :  { %v639_v31 = vpop.f32.mrf.mxu0 }
  0xa1   :  { %v652_v32 = vpop.f32.mrf.mxu1 }
  0xa2   :  { %v653_v41 = vadd.f32 %v652_v32, %v639_v31 }
  0xa5   :  { %v665_v33 = vpop.f32.mrf.mxu2 }
  0xa6   :  { %v678_v34 = vpop.f32.mrf.mxu3  ;;  %v641_v35 = vpop.f32.mrf.mxu0  ;;  %v666_v43 = vadd.f32 %v665_v33, %v653_v41 }
  0xa8   :  { %v679_v47 = vadd.f32 %v678_v34, %v666_v43 }
  0xa9   :  { %v654_v36 = vpop.f32.mrf.mxu1 }
  0xad   :  { %v667_v37 = vpop.f32.mrf.mxu2 }
  0xae   :  { %v680_v38 = vpop.f32.mrf.mxu3 }
  0xbe   :  { %v691_v39 = vpop.f32.mrf.mxu0 }
  0xbf   :  { %v692_v49 = vadd.f32 %v691_v39, %v679_v47 }
  0xc1   :  { %v704_v40 = vpop.f32.mrf.mxu1 }
  0xc2   :  { %v705_v51 = vadd.f32 %v704_v40, %v692_v49 }
  0xc5   :  { %v717_v42 = vpop.f32.mrf.mxu2 }
  0xc6   :  { %v730_v44 = vpop.f32.mrf.mxu3  ;;  %v693_v45 = vpop.f32.mrf.mxu0  ;;  %v718_v52 = vadd.f32 %v717_v42, %v705_v51 }
  0xc8   :  { %v731_v53 = vadd.f32 %v730_v44, %v718_v52 }
  0xc9   :  { %v706_v46 = vpop.f32.mrf.mxu1 }
  0xcd   :  { %v719_v48 = vpop.f32.mrf.mxu2 }
  0xce   :  { %v732_v50 = vpop.f32.mrf.mxu3 }
  0xde   :  { %v743_v55 = vpop.f32.mrf.mxu0 }
  0xdf   :  { %v744_v56 = vadd.f32 %v743_v55, %v731_v53 }
  0xe1   :  { %v752_v58 = vmul.f32 %v1124_v54, %v744_v56 }
  0xe3   :  { %v756_v59 = vadd.f32 %v1125_v57, %v752_v58 }
  0xe5   :  { %v757_v60 = vmax.f32 %v756_v59, 0.0 }
  0xe6   :  { %v745_v61 = vpop.f32.mrf.mxu0 }
  0xe7   :  { %v758_v62 = vpack.c.bf16 %v757_v60, %v757_v60 }
  0xe9   :  { %759 = vst [vmem:[%s1395_s4] sm:$0xf] %v758_v62 }

</bundles_post_ra>
